<compile_context>
chip_gen: v5e
topology: v5e:2x2
jax: 0.10.0
libtpu: 0.0.40
codegen_flags: <defaults>
</compile_context>

<pallas_src>
import functools
import math

import jax
import jax.numpy as jnp
from jax import lax
from jax.experimental import pallas as pl
from jax.experimental.pallas import tpu as pltpu

VMEM_SPEC = pl.BlockSpec(memory_space=pltpu.MemorySpace.VMEM)


# ----------------------------- fused Pallas kernel -----------------------------

def _fused_forward_kernel(
    # inputs
    x_ref, pe_ref, attn_bias_ref,
    mlp_w1_ref, mlp_b1_ref, mlp_w2_ref, mlp_b2_ref,
    wq_ref, wk_ref, wv_ref, bq_ref, bk_ref, bv_ref, wo_ref, ob_ref,
    ln1_g_ref, ln1_b_ref,
    ff1_w_ref, ff1_b_ref, ff2_w_ref, ff2_b_ref,
    ln2_g_ref, ln2_b_ref,
    cb_ref, csq_ref, out_w_ref, out_b_ref,
    # output (single lane-dense packed slab)
    out_ref,
    *, B, T, H, L, F, n_enc, n_dec, eps, vq, slab_w):
  N = B * T
  Dh = F // H
  scale = 1.0 / math.sqrt(Dh)

  # hoisted constants (loaded once, reused by every layer)
  attn_bias = attn_bias_ref[...]                                   # (N, N) 0 / -1e30
  pe = jnp.concatenate([pe_ref[...].astype(jnp.float32)] * B, axis=0)  # (N, F)

  def layernorm(y, g, b):
    # fused single-pass statistics: var = E[y^2] - E[y]^2
    mean = jnp.mean(y, axis=-1, keepdims=True)
    msq = jnp.mean(y * y, axis=-1, keepdims=True)
    var = msq - mean * mean
    return (y - mean) * lax.rsqrt(var + eps) * g + b

  def transformer_layer(h, l):
    # --- multi-head self attention (post-LN, matches nn.TransformerEncoderLayer) ---
    # Per-head weight slabs: no lane slicing of activations, no scratch stores; head
    # outputs are accumulated straight into the output projection, all in vregs.
    attn = ob_ref[l]                                               # (1, F) out-proj bias
    for hh in range(H):
      li = l * H + hh
      q = jnp.dot(h, wq_ref[li], preferred_element_type=jnp.float32) + bq_ref[li]
      k = jnp.dot(h, wk_ref[li], preferred_element_type=jnp.float32) + bk_ref[li]
      v = jnp.dot(h, wv_ref[li], preferred_element_type=jnp.float32) + bv_ref[li]
      s = lax.dot_general(q, k, (((1,), (1,)), ((), ())),
                          preferred_element_type=jnp.float32) * scale
      s = s + attn_bias                                            # block-diag batch mask
      m = jnp.max(s, axis=-1, keepdims=True)
      p = jnp.exp(s - m)
      p = p * pl.reciprocal(jnp.sum(p, axis=-1, keepdims=True), approx=True)
      o = jnp.dot(p, v, preferred_element_type=jnp.float32)        # (N, Dh)
      attn = attn + jnp.dot(o, wo_ref[li], preferred_element_type=jnp.float32)
    h = layernorm(h + attn, ln1_g_ref[l], ln1_b_ref[l])
    # --- feed-forward ---
    ff = jnp.maximum(
        jnp.dot(h, ff1_w_ref[l], preferred_element_type=jnp.float32) + ff1_b_ref[l], 0.0)
    ff = jnp.dot(ff, ff2_w_ref[l], preferred_element_type=jnp.float32) + ff2_b_ref[l]
    return layernorm(h + ff, ln2_g_ref[l], ln2_b_ref[l])

  # ------------------------------ encoder ------------------------------
  x = x_ref[...].astype(jnp.float32)
  h = jnp.maximum(
      jnp.dot(x, mlp_w1_ref[...], preferred_element_type=jnp.float32) + mlp_b1_ref[...],
      0.0)
  h = jnp.dot(h, mlp_w2_ref[...], preferred_element_type=jnp.float32) + mlp_b2_ref[...]
  h = h + pe
  for l in range(n_enc):
    h = transformer_layer(h, l)
  z_e = h                                                          # (N, F)

  # ------------------------------ VQ codebook ------------------------------
  cb = cb_ref[...].astype(jnp.float32)                             # (K, F)
  K = cb.shape[0]
  cross = lax.dot_general(z_e, cb, (((1,), (1,)), ((), ())),
                          preferred_element_type=jnp.float32)      # (N, K)
  # argmin_k ||z - c_k||^2 == argmin_k (||c_k||^2 - 2 z.c_k); ||z||^2 is row-constant.
  score = csq_ref[...] - 2.0 * cross
  min_s = jnp.min(score, axis=-1, keepdims=True)
  col = lax.broadcasted_iota(jnp.int32, (N, K), 1)
  # first-match tie breaking (matches torch.argmin)
  idx = jnp.min(jnp.where(score <= min_s, col, K), axis=-1, keepdims=True)  # (N, 1)
  onehot = (col == idx).astype(jnp.float32)
  z_q = jnp.dot(onehot, cb, preferred_element_type=jnp.float32)    # embedding lookup

  # ------------------ rotation trick (efficient_rotation, exact math) ------------------
  e_hat = z_e * lax.rsqrt(jnp.sum(z_e * z_e, axis=-1, keepdims=True))
  q_hat = z_q * lax.rsqrt(jnp.sum(z_q * z_q, axis=-1, keepdims=True))
  s_vec = e_hat + q_hat
  r = s_vec * lax.rsqrt(jnp.sum(s_vec * s_vec, axis=-1, keepdims=True))
  r_e = jnp.sum(r * z_e, axis=-1, keepdims=True)
  q_e = jnp.sum(q_hat * z_e, axis=-1, keepdims=True)
  z_st = z_e - 2.0 * r * r_e + 2.0 * q_hat * q_e                   # e - reflect_r + rotate_q

  # ------------------------------ decoder ------------------------------
  d = (z_st if vq else z_e) + pe
  for l in range(n_enc, n_enc + n_dec):
    d = transformer_layer(d, l)
  logit = jnp.dot(d, out_w_ref[...], preferred_element_type=jnp.float32) + out_b_ref[...]

  # ----------------- lane-dense packed epilogue: one full-width store -----------------
  # [logit | z_q_st | z_q | idx (replicated to fill 128 lanes)]; indices < 2^24 so the
  # float round-trip is exact.
  idx_fill = jnp.broadcast_to(idx.astype(jnp.float32), (N, slab_w - (L + 2 * F)))
  out_ref[...] = jnp.concatenate([logit, z_st, z_q, idx_fill], axis=-1)


# ----------------------------- wrapper -----------------------------

def evolution_dynamics_forward(params, x, num_heads, vq=True):
  B, T, L = x.shape
  F = params["mlp_w1"].shape[1]
  K = params["codebook"].shape[0]
  lyr = params["layers"]
  n_total = lyr["in_w"].shape[0]
  n_enc = n_total // 2
  n_dec = n_total - n_enc
  N = B * T
  H = num_heads
  Dh = F // H
  slab_w = ((L + 2 * F + 1 + 127) // 128) * 128     # lane-dense packed output width

  # --- host-side weight re-layout (one-time, tiny): split MHA weights per head ---
  in_w = lyr["in_w"]                                 # (nT, F, 3F) columns = [Q | K | V]
  in_b = lyr["in_b"]                                 # (nT, 1, 3F)

  def split_w(w):  # (nT, F, F) -> (nT*H, F, Dh)
    return w.reshape(n_total, F, H, Dh).transpose(0, 2, 1, 3).reshape(n_total * H, F, Dh)

  def split_b(b):  # (nT, 1, F) -> (nT*H, 1, Dh)
    return b.reshape(n_total, 1, H, Dh).transpose(0, 2, 1, 3).reshape(n_total * H, 1, Dh)

  wq = split_w(in_w[:, :, 0:F])
  wk = split_w(in_w[:, :, F:2 * F])
  wv = split_w(in_w[:, :, 2 * F:3 * F])
  bq = split_b(in_b[:, :, 0:F])
  bk = split_b(in_b[:, :, F:2 * F])
  bv = split_b(in_b[:, :, 2 * F:3 * F])
  wo = lyr["out_w"].reshape(n_total * H, Dh, F)      # rows = concatenated head outputs

  # codebook squared norms, precomputed (review: avoid in-kernel (K,)->(1,K) relayout)
  c_sq = jnp.sum(params["codebook"] * params["codebook"], axis=-1)[None, :]   # (1, K)

  # block-diagonal additive attention mask over the flattened (B*T) token axis
  bid = jnp.arange(N, dtype=jnp.int32) // T
  attn_bias = jnp.where(bid[:, None] == bid[None, :], 0.0, -1e30).astype(jnp.float32)

  operands = (
      x.reshape(N, L), params["pe"][:T], attn_bias,
      params["mlp_w1"], params["mlp_b1"], params["mlp_w2"], params["mlp_b2"],
      wq, wk, wv, bq, bk, bv, wo, lyr["out_b"],
      lyr["ln1_g"], lyr["ln1_b"],
      lyr["ff1_w"], lyr["ff1_b"], lyr["ff2_w"], lyr["ff2_b"],
      lyr["ln2_g"], lyr["ln2_b"],
      params["codebook"], c_sq, params["out_w"], params["out_b"],
  )

  # advisory cost estimate for XLA scheduling around the single fused call
  flops = 2 * N * L * F + 2 * N * F * F
  per_layer = (2 * N * F * 3 * F                    # QKV projections (per-head, same total)
               + 2 * H * (2 * N * N * Dh)           # scores + p@v (block-masked full N)
               + 2 * N * F * F                      # output projection
               + 2 * 2 * N * F * F)                 # feed-forward
  flops += n_total * per_layer
  flops += 2 * N * F * K + 2 * N * K * F            # VQ cross-distance + one-hot lookup
  flops += 2 * N * F * L
  transcendentals = n_total * H * N * N + 12 * N
  bytes_accessed = sum(int(math.prod(a.shape)) * 4 for a in operands) + N * slab_w * 4
  ce = pl.CostEstimate(flops=int(flops), transcendentals=int(transcendentals),
                       bytes_accessed=int(bytes_accessed))

  kernel = functools.partial(
      _fused_forward_kernel,
      B=B, T=T, H=H, L=L, F=F, n_enc=n_enc, n_dec=n_dec, eps=1e-5, vq=vq,
      slab_w=slab_w)

  slab = pl.pallas_call(
      kernel,
      out_shape=jax.ShapeDtypeStruct((N, slab_w), jnp.float32),
      in_specs=[VMEM_SPEC] * len(operands),
      out_specs=VMEM_SPEC,
      compiler_params=pltpu.CompilerParams(vmem_limit_bytes=32 * 1024 * 1024),
      cost_estimate=ce,
  )(*operands)

  # split the packed slab (plain XLA slices in the wrapper)
  x_logit = slab[:, 0:L].astype(x.dtype).reshape(B, T, L)
  z_q_st = slab[:, L:L + F].astype(x.dtype).reshape(B, T, F)
  z_q = slab[:, L + F:L + 2 * F].astype(x.dtype).reshape(B, T, F)
  indices = slab[:, L + 2 * F].astype(jnp.int32).reshape(B, T)
  return x_logit, z_q_st, z_q, indices


# ----------------------------- deterministic init -----------------------------

def sine_positional_encoding(max_len, d):
  position = jnp.arange(max_len, dtype=jnp.float32)[:, None]
  div_term = jnp.exp(jnp.arange(0, d, 2, dtype=jnp.float32) * (-math.log(10000.0) / d))
  pe = jnp.zeros((max_len, d), jnp.float32)
  pe = pe.at[:, 0::2].set(jnp.sin(position * div_term))
  pe = pe.at[:, 1::2].set(jnp.cos(position * div_term))
  return pe


def init_params(key, L, F, num_heads, num_layers, K, max_len=5000):
  keys = iter(jax.random.split(key, 256))

  def kaiming(out_in):  # nn.init.kaiming_normal_, stored transposed as (in, out)
    out, inn = out_in
    w = jax.random.normal(next(keys), (out, inn), jnp.float32) * math.sqrt(2.0 / inn)
    return w.T

  def xavier(out_in):   # MHA in_proj (xavier_uniform_), stored transposed
    out, inn = out_in
    lim = math.sqrt(6.0 / (inn + out))
    w = jax.random.uniform(next(keys), (out, inn), jnp.float32, -lim, lim)
    return w.T

  n_total = 2 * num_layers  # [0:num_layers] = encoder layers, [num_layers:] = decoder layers
  layers = dict(
      in_w=jnp.stack([xavier((3 * F, F)) for _ in range(n_total)]),
      in_b=jnp.zeros((n_total, 1, 3 * F), jnp.float32),
      out_w=jnp.stack([kaiming((F, F)) for _ in range(n_total)]),
      out_b=jnp.zeros((n_total, 1, F), jnp.float32),
      ln1_g=jnp.ones((n_total, 1, F), jnp.float32),
      ln1_b=jnp.zeros((n_total, 1, F), jnp.float32),
      ff1_w=jnp.stack([kaiming((F, F)) for _ in range(n_total)]),   # dim_feedforward = feature_dim
      ff1_b=jnp.zeros((n_total, 1, F), jnp.float32),
      ff2_w=jnp.stack([kaiming((F, F)) for _ in range(n_total)]),
      ff2_b=jnp.zeros((n_total, 1, F), jnp.float32),
      ln2_g=jnp.ones((n_total, 1, F), jnp.float32),
      ln2_b=jnp.zeros((n_total, 1, F), jnp.float32),
  )

  return dict(
      mlp_w1=kaiming((F, L)), mlp_b1=jnp.zeros((1, F), jnp.float32),
      mlp_w2=kaiming((F, F)), mlp_b2=jnp.zeros((1, F), jnp.float32),
      layers=layers,
      out_w=kaiming((L, F)), out_b=jnp.zeros((1, L), jnp.float32),
      codebook=jax.random.uniform(next(keys), (K, F), jnp.float32, -1.0 / K, 1.0 / K),
      pe=sine_positional_encoding(max_len, F),
  )


if __name__ == "__main__":
  B, T, L = 2, 8, 16
  feature_dim, num_heads, num_layers, codebook_size = 32, 4, 2, 64

  key = jax.random.PRNGKey(0)
  pkey, xkey = jax.random.split(key)
  params = init_params(pkey, L, feature_dim, num_heads, num_layers, codebook_size)
  x = jax.random.normal(xkey, (B, T, L), jnp.float32)

  fwd = jax.jit(functools.partial(evolution_dynamics_forward, num_heads=num_heads))
  x_logit, z_q_st, z_q, indices = fwd(params, x)
  jax.block_until_ready((x_logit, z_q_st, z_q, indices))

  assert x_logit.shape == (B, T, L)
  assert z_q_st.shape == (B, T, feature_dim)
  assert z_q.shape == (B, T, feature_dim)
  assert indices.shape == (B, T)
  assert indices.dtype == jnp.int32
  print("KERNEL_OK")
</pallas_src>

<mosaic_0001>
module attributes {stable_mosaic.version = 11 : i64} {
  func.func @_fused_forward_kernel(%arg0: memref<16x16xf32, #tpu.memory_space<vmem>>, %arg1: memref<8x32xf32, #tpu.memory_space<vmem>>, %arg2: memref<16x16xf32, #tpu.memory_space<vmem>>, %arg3: memref<16x32xf32, #tpu.memory_space<vmem>>, %arg4: memref<1x32xf32, #tpu.memory_space<vmem>>, %arg5: memref<32x32xf32, #tpu.memory_space<vmem>>, %arg6: memref<1x32xf32, #tpu.memory_space<vmem>>, %arg7: memref<16x32x8xf32, #tpu.memory_space<vmem>>, %arg8: memref<16x32x8xf32, #tpu.memory_space<vmem>>, %arg9: memref<16x32x8xf32, #tpu.memory_space<vmem>>, %arg10: memref<16x1x8xf32, #tpu.memory_space<vmem>>, %arg11: memref<16x1x8xf32, #tpu.memory_space<vmem>>, %arg12: memref<16x1x8xf32, #tpu.memory_space<vmem>>, %arg13: memref<16x8x32xf32, #tpu.memory_space<vmem>>, %arg14: memref<4x1x32xf32, #tpu.memory_space<vmem>>, %arg15: memref<4x1x32xf32, #tpu.memory_space<vmem>>, %arg16: memref<4x1x32xf32, #tpu.memory_space<vmem>>, %arg17: memref<4x32x32xf32, #tpu.memory_space<vmem>>, %arg18: memref<4x1x32xf32, #tpu.memory_space<vmem>>, %arg19: memref<4x32x32xf32, #tpu.memory_space<vmem>>, %arg20: memref<4x1x32xf32, #tpu.memory_space<vmem>>, %arg21: memref<4x1x32xf32, #tpu.memory_space<vmem>>, %arg22: memref<4x1x32xf32, #tpu.memory_space<vmem>>, %arg23: memref<64x32xf32, #tpu.memory_space<vmem>>, %arg24: memref<1x64xf32, #tpu.memory_space<vmem>>, %arg25: memref<32x16xf32, #tpu.memory_space<vmem>>, %arg26: memref<1x16xf32, #tpu.memory_space<vmem>>, %arg27: memref<16x128xf32, #tpu.memory_space<vmem>>) attributes {dimension_semantics = [], scalar_prefetch = 0 : i64, scratch_operands = 0 : i64, tpu.core_type = #tpu.core_type<tc>} {
    %c0 = arith.constant 0 : index
    %c0_0 = arith.constant 0 : index
    %0 = vector.load %arg2[%c0, %c0_0] : memref<16x16xf32, #tpu.memory_space<vmem>>, vector<16x16xf32>
    %c0_1 = arith.constant 0 : index
    %c0_2 = arith.constant 0 : index
    %1 = vector.load %arg1[%c0_1, %c0_2] : memref<8x32xf32, #tpu.memory_space<vmem>>, vector<8x32xf32>
    %2 = tpu.concatenate %1, %1 in 0 : vector<8x32xf32>, vector<8x32xf32> -> vector<16x32xf32>
    %c0_3 = arith.constant 0 : index
    %c0_4 = arith.constant 0 : index
    %3 = vector.load %arg0[%c0_3, %c0_4] : memref<16x16xf32, #tpu.memory_space<vmem>>, vector<16x16xf32>
    %c0_5 = arith.constant 0 : index
    %c0_6 = arith.constant 0 : index
    %4 = vector.load %arg3[%c0_5, %c0_6] : memref<16x32xf32, #tpu.memory_space<vmem>>, vector<16x32xf32>
    %cst = arith.constant dense<0.000000e+00> : vector<16x32xf32>
    %5 = tpu.matmul %3, %4, %cst {dimension_numbers = #tpu.dot_dimension_numbers<[1], [0], [0], [1], [0, 0, 1, 1], [], []>} : vector<16x16xf32>, vector<16x32xf32>, vector<16x32xf32> -> vector<16x32xf32>
    %c0_7 = arith.constant 0 : index
    %c0_8 = arith.constant 0 : index
    %6 = vector.load %arg4[%c0_7, %c0_8] : memref<1x32xf32, #tpu.memory_space<vmem>>, vector<1x32xf32>
    %7 = vector.broadcast %6 : vector<1x32xf32> to vector<16x32xf32>
    %8 = arith.addf %5, %7 : vector<16x32xf32>
    %cst_9 = arith.constant 0.000000e+00 : f32
    %9 = vector.broadcast %cst_9 : f32 to vector<16x32xf32>
    %10 = arith.maximumf %8, %9 : vector<16x32xf32>
    %c0_10 = arith.constant 0 : index
    %c0_11 = arith.constant 0 : index
    %11 = vector.load %arg5[%c0_10, %c0_11] : memref<32x32xf32, #tpu.memory_space<vmem>>, vector<32x32xf32>
    %cst_12 = arith.constant dense<0.000000e+00> : vector<16x32xf32>
    %12 = tpu.matmul %10, %11, %cst_12 {dimension_numbers = #tpu.dot_dimension_numbers<[1], [0], [0], [1], [0, 0, 1, 1], [], []>} : vector<16x32xf32>, vector<32x32xf32>, vector<16x32xf32> -> vector<16x32xf32>
    %c0_13 = arith.constant 0 : index
    %c0_14 = arith.constant 0 : index
    %13 = vector.load %arg6[%c0_13, %c0_14] : memref<1x32xf32, #tpu.memory_space<vmem>>, vector<1x32xf32>
    %14 = vector.broadcast %13 : vector<1x32xf32> to vector<16x32xf32>
    %15 = arith.addf %12, %14 : vector<16x32xf32>
    %16 = arith.addf %15, %2 : vector<16x32xf32>
    %c0_15 = arith.constant 0 : index
    %c0_16 = arith.constant 0 : index
    %c0_17 = arith.constant 0 : index
    %17 = vector.load %arg14[%c0_15, %c0_16, %c0_17] : memref<4x1x32xf32, #tpu.memory_space<vmem>>, vector<1x1x32xf32>
    %18 = vector.shape_cast %17 : vector<1x1x32xf32> to vector<1x32xf32>
    %c0_18 = arith.constant 0 : index
    %c0_19 = arith.constant 0 : index
    %c0_20 = arith.constant 0 : index
    %19 = vector.load %arg7[%c0_18, %c0_19, %c0_20] : memref<16x32x8xf32, #tpu.memory_space<vmem>>, vector<1x32x8xf32>
    %20 = vector.shape_cast %19 : vector<1x32x8xf32> to vector<32x8xf32>
    %cst_21 = arith.constant dense<0.000000e+00> : vector<16x8xf32>
    %21 = tpu.matmul %16, %20, %cst_21 {dimension_numbers = #tpu.dot_dimension_numbers<[1], [0], [0], [1], [0, 0, 1, 1], [], []>} : vector<16x32xf32>, vector<32x8xf32>, vector<16x8xf32> -> vector<16x8xf32>
    %c0_22 = arith.constant 0 : index
    %c0_23 = arith.constant 0 : index
    %c0_24 = arith.constant 0 : index
    %22 = vector.load %arg10[%c0_22, %c0_23, %c0_24] : memref<16x1x8xf32, #tpu.memory_space<vmem>>, vector<1x1x8xf32>
    %23 = vector.shape_cast %22 : vector<1x1x8xf32> to vector<1x8xf32>
    %24 = vector.broadcast %23 : vector<1x8xf32> to vector<16x8xf32>
    %25 = arith.addf %21, %24 : vector<16x8xf32>
    %c0_25 = arith.constant 0 : index
    %c0_26 = arith.constant 0 : index
    %c0_27 = arith.constant 0 : index
    %26 = vector.load %arg8[%c0_25, %c0_26, %c0_27] : memref<16x32x8xf32, #tpu.memory_space<vmem>>, vector<1x32x8xf32>
    %27 = vector.shape_cast %26 : vector<1x32x8xf32> to vector<32x8xf32>
    %cst_28 = arith.constant dense<0.000000e+00> : vector<16x8xf32>
    %28 = tpu.matmul %16, %27, %cst_28 {dimension_numbers = #tpu.dot_dimension_numbers<[1], [0], [0], [1], [0, 0, 1, 1], [], []>} : vector<16x32xf32>, vector<32x8xf32>, vector<16x8xf32> -> vector<16x8xf32>
    %c0_29 = arith.constant 0 : index
    %c0_30 = arith.constant 0 : index
    %c0_31 = arith.constant 0 : index
    %29 = vector.load %arg11[%c0_29, %c0_30, %c0_31] : memref<16x1x8xf32, #tpu.memory_space<vmem>>, vector<1x1x8xf32>
    %30 = vector.shape_cast %29 : vector<1x1x8xf32> to vector<1x8xf32>
    %31 = vector.broadcast %30 : vector<1x8xf32> to vector<16x8xf32>
    %32 = arith.addf %28, %31 : vector<16x8xf32>
    %c0_32 = arith.constant 0 : index
    %c0_33 = arith.constant 0 : index
    %c0_34 = arith.constant 0 : index
    %33 = vector.load %arg9[%c0_32, %c0_33, %c0_34] : memref<16x32x8xf32, #tpu.memory_space<vmem>>, vector<1x32x8xf32>
    %34 = vector.shape_cast %33 : vector<1x32x8xf32> to vector<32x8xf32>
    %cst_35 = arith.constant dense<0.000000e+00> : vector<16x8xf32>
    %35 = tpu.matmul %16, %34, %cst_35 {dimension_numbers = #tpu.dot_dimension_numbers<[1], [0], [0], [1], [0, 0, 1, 1], [], []>} : vector<16x32xf32>, vector<32x8xf32>, vector<16x8xf32> -> vector<16x8xf32>
    %c0_36 = arith.constant 0 : index
    %c0_37 = arith.constant 0 : index
    %c0_38 = arith.constant 0 : index
    %36 = vector.load %arg12[%c0_36, %c0_37, %c0_38] : memref<16x1x8xf32, #tpu.memory_space<vmem>>, vector<1x1x8xf32>
    %37 = vector.shape_cast %36 : vector<1x1x8xf32> to vector<1x8xf32>
    %38 = vector.broadcast %37 : vector<1x8xf32> to vector<16x8xf32>
    %39 = arith.addf %35, %38 : vector<16x8xf32>
    %cst_39 = arith.constant dense<0.000000e+00> : vector<16x16xf32>
    %40 = tpu.matmul %25, %32, %cst_39 {dimension_numbers = #tpu.dot_dimension_numbers<[1], [1], [0], [0], [0, 0, 1, 0], [], []>} : vector<16x8xf32>, vector<16x8xf32>, vector<16x16xf32> -> vector<16x16xf32>
    %cst_40 = arith.constant 0.353553385 : f32
    %41 = vector.broadcast %cst_40 : f32 to vector<16x16xf32>
    %42 = arith.mulf %40, %41 : vector<16x16xf32>
    %43 = arith.addf %42, %0 : vector<16x16xf32>
    %cst_41 = arith.constant dense<0xFF800000> : vector<16xf32>
    %44 = vector.multi_reduction <maximumf>, %43, %cst_41 [1] : vector<16x16xf32> to vector<16xf32>
    %45 = vector.shape_cast %44 : vector<16xf32> to vector<16x1xf32>
    %46 = vector.broadcast %45 : vector<16x1xf32> to vector<16x16xf32>
    %47 = arith.subf %43, %46 : vector<16x16xf32>
    %48 = math.exp %47 : vector<16x16xf32>
    %cst_42 = arith.constant dense<0.000000e+00> : vector<16xf32>
    %49 = vector.multi_reduction <add>, %48, %cst_42 [1] : vector<16x16xf32> to vector<16xf32>
    %50 = vector.shape_cast %49 : vector<16xf32> to vector<16x1xf32>
    %51 = tpu.reciprocal %50 {approx = true} : vector<16x1xf32> -> vector<16x1xf32>
    %52 = vector.broadcast %51 : vector<16x1xf32> to vector<16x16xf32>
    %53 = arith.mulf %48, %52 : vector<16x16xf32>
    %cst_43 = arith.constant dense<0.000000e+00> : vector<16x8xf32>
    %54 = tpu.matmul %53, %39, %cst_43 {dimension_numbers = #tpu.dot_dimension_numbers<[1], [0], [0], [1], [0, 0, 1, 1], [], []>} : vector<16x16xf32>, vector<16x8xf32>, vector<16x8xf32> -> vector<16x8xf32>
    %c0_44 = arith.constant 0 : index
    %c0_45 = arith.constant 0 : index
    %c0_46 = arith.constant 0 : index
    %55 = vector.load %arg13[%c0_44, %c0_45, %c0_46] : memref<16x8x32xf32, #tpu.memory_space<vmem>>, vector<1x8x32xf32>
    %56 = vector.shape_cast %55 : vector<1x8x32xf32> to vector<8x32xf32>
    %cst_47 = arith.constant dense<0.000000e+00> : vector<16x32xf32>
    %57 = tpu.matmul %54, %56, %cst_47 {dimension_numbers = #tpu.dot_dimension_numbers<[1], [0], [0], [1], [0, 0, 1, 1], [], []>} : vector<16x8xf32>, vector<8x32xf32>, vector<16x32xf32> -> vector<16x32xf32>
    %58 = vector.broadcast %18 : vector<1x32xf32> to vector<16x32xf32>
    %59 = arith.addf %58, %57 : vector<16x32xf32>
    %c1 = arith.constant 1 : index
    %c0_48 = arith.constant 0 : index
    %c0_49 = arith.constant 0 : index
    %60 = vector.load %arg7[%c1, %c0_48, %c0_49] : memref<16x32x8xf32, #tpu.memory_space<vmem>>, vector<1x32x8xf32>
    %61 = vector.shape_cast %60 : vector<1x32x8xf32> to vector<32x8xf32>
    %cst_50 = arith.constant dense<0.000000e+00> : vector<16x8xf32>
    %62 = tpu.matmul %16, %61, %cst_50 {dimension_numbers = #tpu.dot_dimension_numbers<[1], [0], [0], [1], [0, 0, 1, 1], [], []>} : vector<16x32xf32>, vector<32x8xf32>, vector<16x8xf32> -> vector<16x8xf32>
    %c1_51 = arith.constant 1 : index
    %c0_52 = arith.constant 0 : index
    %c0_53 = arith.constant 0 : index
    %63 = vector.load %arg10[%c1_51, %c0_52, %c0_53] : memref<16x1x8xf32, #tpu.memory_space<vmem>>, vector<1x1x8xf32>
    %64 = vector.shape_cast %63 : vector<1x1x8xf32> to vector<1x8xf32>
    %65 = vector.broadcast %64 : vector<1x8xf32> to vector<16x8xf32>
    %66 = arith.addf %62, %65 : vector<16x8xf32>
    %c1_54 = arith.constant 1 : index
    %c0_55 = arith.constant 0 : index
    %c0_56 = arith.constant 0 : index
    %67 = vector.load %arg8[%c1_54, %c0_55, %c0_56] : memref<16x32x8xf32, #tpu.memory_space<vmem>>, vector<1x32x8xf32>
    %68 = vector.shape_cast %67 : vector<1x32x8xf32> to vector<32x8xf32>
    %cst_57 = arith.constant dense<0.000000e+00> : vector<16x8xf32>
    %69 = tpu.matmul %16, %68, %cst_57 {dimension_numbers = #tpu.dot_dimension_numbers<[1], [0], [0], [1], [0, 0, 1, 1], [], []>} : vector<16x32xf32>, vector<32x8xf32>, vector<16x8xf32> -> vector<16x8xf32>
    %c1_58 = arith.constant 1 : index
    %c0_59 = arith.constant 0 : index
    %c0_60 = arith.constant 0 : index
    %70 = vector.load %arg11[%c1_58, %c0_59, %c0_60] : memref<16x1x8xf32, #tpu.memory_space<vmem>>, vector<1x1x8xf32>
    %71 = vector.shape_cast %70 : vector<1x1x8xf32> to vector<1x8xf32>
    %72 = vector.broadcast %71 : vector<1x8xf32> to vector<16x8xf32>
    %73 = arith.addf %69, %72 : vector<16x8xf32>
    %c1_61 = arith.constant 1 : index
    %c0_62 = arith.constant 0 : index
    %c0_63 = arith.constant 0 : index
    %74 = vector.load %arg9[%c1_61, %c0_62, %c0_63] : memref<16x32x8xf32, #tpu.memory_space<vmem>>, vector<1x32x8xf32>
    %75 = vector.shape_cast %74 : vector<1x32x8xf32> to vector<32x8xf32>
    %cst_64 = arith.constant dense<0.000000e+00> : vector<16x8xf32>
    %76 = tpu.matmul %16, %75, %cst_64 {dimension_numbers = #tpu.dot_dimension_numbers<[1], [0], [0], [1], [0, 0, 1, 1], [], []>} : vector<16x32xf32>, vector<32x8xf32>, vector<16x8xf32> -> vector<16x8xf32>
    %c1_65 = arith.constant 1 : index
    %c0_66 = arith.constant 0 : index
    %c0_67 = arith.constant 0 : index
    %77 = vector.load %arg12[%c1_65, %c0_66, %c0_67] : memref<16x1x8xf32, #tpu.memory_space<vmem>>, vector<1x1x8xf32>
    %78 = vector.shape_cast %77 : vector<1x1x8xf32> to vector<1x8xf32>
    %79 = vector.broadcast %78 : vector<1x8xf32> to vector<16x8xf32>
    %80 = arith.addf %76, %79 : vector<16x8xf32>
    %cst_68 = arith.constant dense<0.000000e+00> : vector<16x16xf32>
    %81 = tpu.matmul %66, %73, %cst_68 {dimension_numbers = #tpu.dot_dimension_numbers<[1], [1], [0], [0], [0, 0, 1, 0], [], []>} : vector<16x8xf32>, vector<16x8xf32>, vector<16x16xf32> -> vector<16x16xf32>
    %cst_69 = arith.constant 0.353553385 : f32
    %82 = vector.broadcast %cst_69 : f32 to vector<16x16xf32>
    %83 = arith.mulf %81, %82 : vector<16x16xf32>
    %84 = arith.addf %83, %0 : vector<16x16xf32>
    %cst_70 = arith.constant dense<0xFF800000> : vector<16xf32>
    %85 = vector.multi_reduction <maximumf>, %84, %cst_70 [1] : vector<16x16xf32> to vector<16xf32>
    %86 = vector.shape_cast %85 : vector<16xf32> to vector<16x1xf32>
    %87 = vector.broadcast %86 : vector<16x1xf32> to vector<16x16xf32>
    %88 = arith.subf %84, %87 : vector<16x16xf32>
    %89 = math.exp %88 : vector<16x16xf32>
    %cst_71 = arith.constant dense<0.000000e+00> : vector<16xf32>
    %90 = vector.multi_reduction <add>, %89, %cst_71 [1] : vector<16x16xf32> to vector<16xf32>
    %91 = vector.shape_cast %90 : vector<16xf32> to vector<16x1xf32>
    %92 = tpu.reciprocal %91 {approx = true} : vector<16x1xf32> -> vector<16x1xf32>
    %93 = vector.broadcast %92 : vector<16x1xf32> to vector<16x16xf32>
    %94 = arith.mulf %89, %93 : vector<16x16xf32>
    %cst_72 = arith.constant dense<0.000000e+00> : vector<16x8xf32>
    %95 = tpu.matmul %94, %80, %cst_72 {dimension_numbers = #tpu.dot_dimension_numbers<[1], [0], [0], [1], [0, 0, 1, 1], [], []>} : vector<16x16xf32>, vector<16x8xf32>, vector<16x8xf32> -> vector<16x8xf32>
    %c1_73 = arith.constant 1 : index
    %c0_74 = arith.constant 0 : index
    %c0_75 = arith.constant 0 : index
    %96 = vector.load %arg13[%c1_73, %c0_74, %c0_75] : memref<16x8x32xf32, #tpu.memory_space<vmem>>, vector<1x8x32xf32>
    %97 = vector.shape_cast %96 : vector<1x8x32xf32> to vector<8x32xf32>
    %cst_76 = arith.constant dense<0.000000e+00> : vector<16x32xf32>
    %98 = tpu.matmul %95, %97, %cst_76 {dimension_numbers = #tpu.dot_dimension_numbers<[1], [0], [0], [1], [0, 0, 1, 1], [], []>} : vector<16x8xf32>, vector<8x32xf32>, vector<16x32xf32> -> vector<16x32xf32>
    %99 = arith.addf %59, %98 : vector<16x32xf32>
    %c2 = arith.constant 2 : index
    %c0_77 = arith.constant 0 : index
    %c0_78 = arith.constant 0 : index
    %100 = vector.load %arg7[%c2, %c0_77, %c0_78] : memref<16x32x8xf32, #tpu.memory_space<vmem>>, vector<1x32x8xf32>
    %101 = vector.shape_cast %100 : vector<1x32x8xf32> to vector<32x8xf32>
    %cst_79 = arith.constant dense<0.000000e+00> : vector<16x8xf32>
    %102 = tpu.matmul %16, %101, %cst_79 {dimension_numbers = #tpu.dot_dimension_numbers<[1], [0], [0], [1], [0, 0, 1, 1], [], []>} : vector<16x32xf32>, vector<32x8xf32>, vector<16x8xf32> -> vector<16x8xf32>
    %c2_80 = arith.constant 2 : index
    %c0_81 = arith.constant 0 : index
    %c0_82 = arith.constant 0 : index
    %103 = vector.load %arg10[%c2_80, %c0_81, %c0_82] : memref<16x1x8xf32, #tpu.memory_space<vmem>>, vector<1x1x8xf32>
    %104 = vector.shape_cast %103 : vector<1x1x8xf32> to vector<1x8xf32>
    %105 = vector.broadcast %104 : vector<1x8xf32> to vector<16x8xf32>
    %106 = arith.addf %102, %105 : vector<16x8xf32>
    %c2_83 = arith.constant 2 : index
    %c0_84 = arith.constant 0 : index
    %c0_85 = arith.constant 0 : index
    %107 = vector.load %arg8[%c2_83, %c0_84, %c0_85] : memref<16x32x8xf32, #tpu.memory_space<vmem>>, vector<1x32x8xf32>
    %108 = vector.shape_cast %107 : vector<1x32x8xf32> to vector<32x8xf32>
    %cst_86 = arith.constant dense<0.000000e+00> : vector<16x8xf32>
    %109 = tpu.matmul %16, %108, %cst_86 {dimension_numbers = #tpu.dot_dimension_numbers<[1], [0], [0], [1], [0, 0, 1, 1], [], []>} : vector<16x32xf32>, vector<32x8xf32>, vector<16x8xf32> -> vector<16x8xf32>
    %c2_87 = arith.constant 2 : index
    %c0_88 = arith.constant 0 : index
    %c0_89 = arith.constant 0 : index
    %110 = vector.load %arg11[%c2_87, %c0_88, %c0_89] : memref<16x1x8xf32, #tpu.memory_space<vmem>>, vector<1x1x8xf32>
    %111 = vector.shape_cast %110 : vector<1x1x8xf32> to vector<1x8xf32>
    %112 = vector.broadcast %111 : vector<1x8xf32> to vector<16x8xf32>
    %113 = arith.addf %109, %112 : vector<16x8xf32>
    %c2_90 = arith.constant 2 : index
    %c0_91 = arith.constant 0 : index
    %c0_92 = arith.constant 0 : index
    %114 = vector.load %arg9[%c2_90, %c0_91, %c0_92] : memref<16x32x8xf32, #tpu.memory_space<vmem>>, vector<1x32x8xf32>
    %115 = vector.shape_cast %114 : vector<1x32x8xf32> to vector<32x8xf32>
    %cst_93 = arith.constant dense<0.000000e+00> : vector<16x8xf32>
    %116 = tpu.matmul %16, %115, %cst_93 {dimension_numbers = #tpu.dot_dimension_numbers<[1], [0], [0], [1], [0, 0, 1, 1], [], []>} : vector<16x32xf32>, vector<32x8xf32>, vector<16x8xf32> -> vector<16x8xf32>
    %c2_94 = arith.constant 2 : index
    %c0_95 = arith.constant 0 : index
    %c0_96 = arith.constant 0 : index
    %117 = vector.load %arg12[%c2_94, %c0_95, %c0_96] : memref<16x1x8xf32, #tpu.memory_space<vmem>>, vector<1x1x8xf32>
    %118 = vector.shape_cast %117 : vector<1x1x8xf32> to vector<1x8xf32>
    %119 = vector.broadcast %118 : vector<1x8xf32> to vector<16x8xf32>
    %120 = arith.addf %116, %119 : vector<16x8xf32>
    %cst_97 = arith.constant dense<0.000000e+00> : vector<16x16xf32>
    %121 = tpu.matmul %106, %113, %cst_97 {dimension_numbers = #tpu.dot_dimension_numbers<[1], [1], [0], [0], [0, 0, 1, 0], [], []>} : vector<16x8xf32>, vector<16x8xf32>, vector<16x16xf32> -> vector<16x16xf32>
    %cst_98 = arith.constant 0.353553385 : f32
    %122 = vector.broadcast %cst_98 : f32 to vector<16x16xf32>
    %123 = arith.mulf %121, %122 : vector<16x16xf32>
    %124 = arith.addf %123, %0 : vector<16x16xf32>
    %cst_99 = arith.constant dense<0xFF800000> : vector<16xf32>
    %125 = vector.multi_reduction <maximumf>, %124, %cst_99 [1] : vector<16x16xf32> to vector<16xf32>
    %126 = vector.shape_cast %125 : vector<16xf32> to vector<16x1xf32>
    %127 = vector.broadcast %126 : vector<16x1xf32> to vector<16x16xf32>
    %128 = arith.subf %124, %127 : vector<16x16xf32>
    %129 = math.exp %128 : vector<16x16xf32>
    %cst_100 = arith.constant dense<0.000000e+00> : vector<16xf32>
    %130 = vector.multi_reduction <add>, %129, %cst_100 [1] : vector<16x16xf32> to vector<16xf32>
    %131 = vector.shape_cast %130 : vector<16xf32> to vector<16x1xf32>
    %132 = tpu.reciprocal %131 {approx = true} : vector<16x1xf32> -> vector<16x1xf32>
    %133 = vector.broadcast %132 : vector<16x1xf32> to vector<16x16xf32>
    %134 = arith.mulf %129, %133 : vector<16x16xf32>
    %cst_101 = arith.constant dense<0.000000e+00> : vector<16x8xf32>
    %135 = tpu.matmul %134, %120, %cst_101 {dimension_numbers = #tpu.dot_dimension_numbers<[1], [0], [0], [1], [0, 0, 1, 1], [], []>} : vector<16x16xf32>, vector<16x8xf32>, vector<16x8xf32> -> vector<16x8xf32>
    %c2_102 = arith.constant 2 : index
    %c0_103 = arith.constant 0 : index
    %c0_104 = arith.constant 0 : index
    %136 = vector.load %arg13[%c2_102, %c0_103, %c0_104] : memref<16x8x32xf32, #tpu.memory_space<vmem>>, vector<1x8x32xf32>
    %137 = vector.shape_cast %136 : vector<1x8x32xf32> to vector<8x32xf32>
    %cst_105 = arith.constant dense<0.000000e+00> : vector<16x32xf32>
    %138 = tpu.matmul %135, %137, %cst_105 {dimension_numbers = #tpu.dot_dimension_numbers<[1], [0], [0], [1], [0, 0, 1, 1], [], []>} : vector<16x8xf32>, vector<8x32xf32>, vector<16x32xf32> -> vector<16x32xf32>
    %139 = arith.addf %99, %138 : vector<16x32xf32>
    %c3 = arith.constant 3 : index
    %c0_106 = arith.constant 0 : index
    %c0_107 = arith.constant 0 : index
    %140 = vector.load %arg7[%c3, %c0_106, %c0_107] : memref<16x32x8xf32, #tpu.memory_space<vmem>>, vector<1x32x8xf32>
    %141 = vector.shape_cast %140 : vector<1x32x8xf32> to vector<32x8xf32>
    %cst_108 = arith.constant dense<0.000000e+00> : vector<16x8xf32>
    %142 = tpu.matmul %16, %141, %cst_108 {dimension_numbers = #tpu.dot_dimension_numbers<[1], [0], [0], [1], [0, 0, 1, 1], [], []>} : vector<16x32xf32>, vector<32x8xf32>, vector<16x8xf32> -> vector<16x8xf32>
    %c3_109 = arith.constant 3 : index
    %c0_110 = arith.constant 0 : index
    %c0_111 = arith.constant 0 : index
    %143 = vector.load %arg10[%c3_109, %c0_110, %c0_111] : memref<16x1x8xf32, #tpu.memory_space<vmem>>, vector<1x1x8xf32>
    %144 = vector.shape_cast %143 : vector<1x1x8xf32> to vector<1x8xf32>
    %145 = vector.broadcast %144 : vector<1x8xf32> to vector<16x8xf32>
    %146 = arith.addf %142, %145 : vector<16x8xf32>
    %c3_112 = arith.constant 3 : index
    %c0_113 = arith.constant 0 : index
    %c0_114 = arith.constant 0 : index
    %147 = vector.load %arg8[%c3_112, %c0_113, %c0_114] : memref<16x32x8xf32, #tpu.memory_space<vmem>>, vector<1x32x8xf32>
    %148 = vector.shape_cast %147 : vector<1x32x8xf32> to vector<32x8xf32>
    %cst_115 = arith.constant dense<0.000000e+00> : vector<16x8xf32>
    %149 = tpu.matmul %16, %148, %cst_115 {dimension_numbers = #tpu.dot_dimension_numbers<[1], [0], [0], [1], [0, 0, 1, 1], [], []>} : vector<16x32xf32>, vector<32x8xf32>, vector<16x8xf32> -> vector<16x8xf32>
    %c3_116 = arith.constant 3 : index
    %c0_117 = arith.constant 0 : index
    %c0_118 = arith.constant 0 : index
    %150 = vector.load %arg11[%c3_116, %c0_117, %c0_118] : memref<16x1x8xf32, #tpu.memory_space<vmem>>, vector<1x1x8xf32>
    %151 = vector.shape_cast %150 : vector<1x1x8xf32> to vector<1x8xf32>
    %152 = vector.broadcast %151 : vector<1x8xf32> to vector<16x8xf32>
    %153 = arith.addf %149, %152 : vector<16x8xf32>
    %c3_119 = arith.constant 3 : index
    %c0_120 = arith.constant 0 : index
    %c0_121 = arith.constant 0 : index
    %154 = vector.load %arg9[%c3_119, %c0_120, %c0_121] : memref<16x32x8xf32, #tpu.memory_space<vmem>>, vector<1x32x8xf32>
    %155 = vector.shape_cast %154 : vector<1x32x8xf32> to vector<32x8xf32>
    %cst_122 = arith.constant dense<0.000000e+00> : vector<16x8xf32>
    %156 = tpu.matmul %16, %155, %cst_122 {dimension_numbers = #tpu.dot_dimension_numbers<[1], [0], [0], [1], [0, 0, 1, 1], [], []>} : vector<16x32xf32>, vector<32x8xf32>, vector<16x8xf32> -> vector<16x8xf32>
    %c3_123 = arith.constant 3 : index
    %c0_124 = arith.constant 0 : index
    %c0_125 = arith.constant 0 : index
    %157 = vector.load %arg12[%c3_123, %c0_124, %c0_125] : memref<16x1x8xf32, #tpu.memory_space<vmem>>, vector<1x1x8xf32>
    %158 = vector.shape_cast %157 : vector<1x1x8xf32> to vector<1x8xf32>
    %159 = vector.broadcast %158 : vector<1x8xf32> to vector<16x8xf32>
    %160 = arith.addf %156, %159 : vector<16x8xf32>
    %cst_126 = arith.constant dense<0.000000e+00> : vector<16x16xf32>
    %161 = tpu.matmul %146, %153, %cst_126 {dimension_numbers = #tpu.dot_dimension_numbers<[1], [1], [0], [0], [0, 0, 1, 0], [], []>} : vector<16x8xf32>, vector<16x8xf32>, vector<16x16xf32> -> vector<16x16xf32>
    %cst_127 = arith.constant 0.353553385 : f32
    %162 = vector.broadcast %cst_127 : f32 to vector<16x16xf32>
    %163 = arith.mulf %161, %162 : vector<16x16xf32>
    %164 = arith.addf %163, %0 : vector<16x16xf32>
    %cst_128 = arith.constant dense<0xFF800000> : vector<16xf32>
    %165 = vector.multi_reduction <maximumf>, %164, %cst_128 [1] : vector<16x16xf32> to vector<16xf32>
    %166 = vector.shape_cast %165 : vector<16xf32> to vector<16x1xf32>
    %167 = vector.broadcast %166 : vector<16x1xf32> to vector<16x16xf32>
    %168 = arith.subf %164, %167 : vector<16x16xf32>
    %169 = math.exp %168 : vector<16x16xf32>
    %cst_129 = arith.constant dense<0.000000e+00> : vector<16xf32>
    %170 = vector.multi_reduction <add>, %169, %cst_129 [1] : vector<16x16xf32> to vector<16xf32>
    %171 = vector.shape_cast %170 : vector<16xf32> to vector<16x1xf32>
    %172 = tpu.reciprocal %171 {approx = true} : vector<16x1xf32> -> vector<16x1xf32>
    %173 = vector.broadcast %172 : vector<16x1xf32> to vector<16x16xf32>
    %174 = arith.mulf %169, %173 : vector<16x16xf32>
    %cst_130 = arith.constant dense<0.000000e+00> : vector<16x8xf32>
    %175 = tpu.matmul %174, %160, %cst_130 {dimension_numbers = #tpu.dot_dimension_numbers<[1], [0], [0], [1], [0, 0, 1, 1], [], []>} : vector<16x16xf32>, vector<16x8xf32>, vector<16x8xf32> -> vector<16x8xf32>
    %c3_131 = arith.constant 3 : index
    %c0_132 = arith.constant 0 : index
    %c0_133 = arith.constant 0 : index
    %176 = vector.load %arg13[%c3_131, %c0_132, %c0_133] : memref<16x8x32xf32, #tpu.memory_space<vmem>>, vector<1x8x32xf32>
    %177 = vector.shape_cast %176 : vector<1x8x32xf32> to vector<8x32xf32>
    %cst_134 = arith.constant dense<0.000000e+00> : vector<16x32xf32>
    %178 = tpu.matmul %175, %177, %cst_134 {dimension_numbers = #tpu.dot_dimension_numbers<[1], [0], [0], [1], [0, 0, 1, 1], [], []>} : vector<16x8xf32>, vector<8x32xf32>, vector<16x32xf32> -> vector<16x32xf32>
    %179 = arith.addf %139, %178 : vector<16x32xf32>
    %180 = arith.addf %16, %179 : vector<16x32xf32>
    %c0_135 = arith.constant 0 : index
    %c0_136 = arith.constant 0 : index
    %c0_137 = arith.constant 0 : index
    %181 = vector.load %arg15[%c0_135, %c0_136, %c0_137] : memref<4x1x32xf32, #tpu.memory_space<vmem>>, vector<1x1x32xf32>
    %182 = vector.shape_cast %181 : vector<1x1x32xf32> to vector<1x32xf32>
    %c0_138 = arith.constant 0 : index
    %c0_139 = arith.constant 0 : index
    %c0_140 = arith.constant 0 : index
    %183 = vector.load %arg16[%c0_138, %c0_139, %c0_140] : memref<4x1x32xf32, #tpu.memory_space<vmem>>, vector<1x1x32xf32>
    %184 = vector.shape_cast %183 : vector<1x1x32xf32> to vector<1x32xf32>
    %cst_141 = arith.constant dense<0.000000e+00> : vector<16xf32>
    %185 = vector.multi_reduction <add>, %180, %cst_141 [1] : vector<16x32xf32> to vector<16xf32>
    %186 = vector.shape_cast %185 : vector<16xf32> to vector<16x1xf32>
    %cst_142 = arith.constant 3.200000e+01 : f32
    %187 = vector.broadcast %cst_142 : f32 to vector<16x1xf32>
    %188 = arith.divf %186, %187 : vector<16x1xf32>
    %189 = arith.mulf %180, %180 : vector<16x32xf32>
    %cst_143 = arith.constant dense<0.000000e+00> : vector<16xf32>
    %190 = vector.multi_reduction <add>, %189, %cst_143 [1] : vector<16x32xf32> to vector<16xf32>
    %191 = vector.shape_cast %190 : vector<16xf32> to vector<16x1xf32>
    %cst_144 = arith.constant 3.200000e+01 : f32
    %192 = vector.broadcast %cst_144 : f32 to vector<16x1xf32>
    %193 = arith.divf %191, %192 : vector<16x1xf32>
    %194 = arith.mulf %188, %188 : vector<16x1xf32>
    %195 = arith.subf %193, %194 : vector<16x1xf32>
    %196 = vector.broadcast %188 : vector<16x1xf32> to vector<16x32xf32>
    %197 = arith.subf %180, %196 : vector<16x32xf32>
    %cst_145 = arith.constant 9.99999974E-6 : f32
    %198 = vector.broadcast %cst_145 : f32 to vector<16x1xf32>
    %199 = arith.addf %195, %198 : vector<16x1xf32>
    %200 = math.rsqrt %199 : vector<16x1xf32>
    %201 = vector.broadcast %200 : vector<16x1xf32> to vector<16x32xf32>
    %202 = arith.mulf %197, %201 : vector<16x32xf32>
    %203 = vector.broadcast %182 : vector<1x32xf32> to vector<16x32xf32>
    %204 = arith.mulf %202, %203 : vector<16x32xf32>
    %205 = vector.broadcast %184 : vector<1x32xf32> to vector<16x32xf32>
    %206 = arith.addf %204, %205 : vector<16x32xf32>
    %c0_146 = arith.constant 0 : index
    %c0_147 = arith.constant 0 : index
    %c0_148 = arith.constant 0 : index
    %207 = vector.load %arg17[%c0_146, %c0_147, %c0_148] : memref<4x32x32xf32, #tpu.memory_space<vmem>>, vector<1x32x32xf32>
    %208 = vector.shape_cast %207 : vector<1x32x32xf32> to vector<32x32xf32>
    %cst_149 = arith.constant dense<0.000000e+00> : vector<16x32xf32>
    %209 = tpu.matmul %206, %208, %cst_149 {dimension_numbers = #tpu.dot_dimension_numbers<[1], [0], [0], [1], [0, 0, 1, 1], [], []>} : vector<16x32xf32>, vector<32x32xf32>, vector<16x32xf32> -> vector<16x32xf32>
    %c0_150 = arith.constant 0 : index
    %c0_151 = arith.constant 0 : index
    %c0_152 = arith.constant 0 : index
    %210 = vector.load %arg18[%c0_150, %c0_151, %c0_152] : memref<4x1x32xf32, #tpu.memory_space<vmem>>, vector<1x1x32xf32>
    %211 = vector.shape_cast %210 : vector<1x1x32xf32> to vector<1x32xf32>
    %212 = vector.broadcast %211 : vector<1x32xf32> to vector<16x32xf32>
    %213 = arith.addf %209, %212 : vector<16x32xf32>
    %cst_153 = arith.constant 0.000000e+00 : f32
    %214 = vector.broadcast %cst_153 : f32 to vector<16x32xf32>
    %215 = arith.maximumf %213, %214 : vector<16x32xf32>
    %c0_154 = arith.constant 0 : index
    %c0_155 = arith.constant 0 : index
    %c0_156 = arith.constant 0 : index
    %216 = vector.load %arg19[%c0_154, %c0_155, %c0_156] : memref<4x32x32xf32, #tpu.memory_space<vmem>>, vector<1x32x32xf32>
    %217 = vector.shape_cast %216 : vector<1x32x32xf32> to vector<32x32xf32>
    %cst_157 = arith.constant dense<0.000000e+00> : vector<16x32xf32>
    %218 = tpu.matmul %215, %217, %cst_157 {dimension_numbers = #tpu.dot_dimension_numbers<[1], [0], [0], [1], [0, 0, 1, 1], [], []>} : vector<16x32xf32>, vector<32x32xf32>, vector<16x32xf32> -> vector<16x32xf32>
    %c0_158 = arith.constant 0 : index
    %c0_159 = arith.constant 0 : index
    %c0_160 = arith.constant 0 : index
    %219 = vector.load %arg20[%c0_158, %c0_159, %c0_160] : memref<4x1x32xf32, #tpu.memory_space<vmem>>, vector<1x1x32xf32>
    %220 = vector.shape_cast %219 : vector<1x1x32xf32> to vector<1x32xf32>
    %221 = vector.broadcast %220 : vector<1x32xf32> to vector<16x32xf32>
    %222 = arith.addf %218, %221 : vector<16x32xf32>
    %223 = arith.addf %206, %222 : vector<16x32xf32>
    %c0_161 = arith.constant 0 : index
    %c0_162 = arith.constant 0 : index
    %c0_163 = arith.constant 0 : index
    %224 = vector.load %arg21[%c0_161, %c0_162, %c0_163] : memref<4x1x32xf32, #tpu.memory_space<vmem>>, vector<1x1x32xf32>
    %225 = vector.shape_cast %224 : vector<1x1x32xf32> to vector<1x32xf32>
    %c0_164 = arith.constant 0 : index
    %c0_165 = arith.constant 0 : index
    %c0_166 = arith.constant 0 : index
    %226 = vector.load %arg22[%c0_164, %c0_165, %c0_166] : memref<4x1x32xf32, #tpu.memory_space<vmem>>, vector<1x1x32xf32>
    %227 = vector.shape_cast %226 : vector<1x1x32xf32> to vector<1x32xf32>
    %cst_167 = arith.constant dense<0.000000e+00> : vector<16xf32>
    %228 = vector.multi_reduction <add>, %223, %cst_167 [1] : vector<16x32xf32> to vector<16xf32>
    %229 = vector.shape_cast %228 : vector<16xf32> to vector<16x1xf32>
    %cst_168 = arith.constant 3.200000e+01 : f32
    %230 = vector.broadcast %cst_168 : f32 to vector<16x1xf32>
    %231 = arith.divf %229, %230 : vector<16x1xf32>
    %232 = arith.mulf %223, %223 : vector<16x32xf32>
    %cst_169 = arith.constant dense<0.000000e+00> : vector<16xf32>
    %233 = vector.multi_reduction <add>, %232, %cst_169 [1] : vector<16x32xf32> to vector<16xf32>
    %234 = vector.shape_cast %233 : vector<16xf32> to vector<16x1xf32>
    %cst_170 = arith.constant 3.200000e+01 : f32
    %235 = vector.broadcast %cst_170 : f32 to vector<16x1xf32>
    %236 = arith.divf %234, %235 : vector<16x1xf32>
    %237 = arith.mulf %231, %231 : vector<16x1xf32>
    %238 = arith.subf %236, %237 : vector<16x1xf32>
    %239 = vector.broadcast %231 : vector<16x1xf32> to vector<16x32xf32>
    %240 = arith.subf %223, %239 : vector<16x32xf32>
    %cst_171 = arith.constant 9.99999974E-6 : f32
    %241 = vector.broadcast %cst_171 : f32 to vector<16x1xf32>
    %242 = arith.addf %238, %241 : vector<16x1xf32>
    %243 = math.rsqrt %242 : vector<16x1xf32>
    %244 = vector.broadcast %243 : vector<16x1xf32> to vector<16x32xf32>
    %245 = arith.mulf %240, %244 : vector<16x32xf32>
    %246 = vector.broadcast %225 : vector<1x32xf32> to vector<16x32xf32>
    %247 = arith.mulf %245, %246 : vector<16x32xf32>
    %248 = vector.broadcast %227 : vector<1x32xf32> to vector<16x32xf32>
    %249 = arith.addf %247, %248 : vector<16x32xf32>
    %c1_172 = arith.constant 1 : index
    %c0_173 = arith.constant 0 : index
    %c0_174 = arith.constant 0 : index
    %250 = vector.load %arg14[%c1_172, %c0_173, %c0_174] : memref<4x1x32xf32, #tpu.memory_space<vmem>>, vector<1x1x32xf32>
    %251 = vector.shape_cast %250 : vector<1x1x32xf32> to vector<1x32xf32>
    %c4 = arith.constant 4 : index
    %c0_175 = arith.constant 0 : index
    %c0_176 = arith.constant 0 : index
    %252 = vector.load %arg7[%c4, %c0_175, %c0_176] : memref<16x32x8xf32, #tpu.memory_space<vmem>>, vector<1x32x8xf32>
    %253 = vector.shape_cast %252 : vector<1x32x8xf32> to vector<32x8xf32>
    %cst_177 = arith.constant dense<0.000000e+00> : vector<16x8xf32>
    %254 = tpu.matmul %249, %253, %cst_177 {dimension_numbers = #tpu.dot_dimension_numbers<[1], [0], [0], [1], [0, 0, 1, 1], [], []>} : vector<16x32xf32>, vector<32x8xf32>, vector<16x8xf32> -> vector<16x8xf32>
    %c4_178 = arith.constant 4 : index
    %c0_179 = arith.constant 0 : index
    %c0_180 = arith.constant 0 : index
    %255 = vector.load %arg10[%c4_178, %c0_179, %c0_180] : memref<16x1x8xf32, #tpu.memory_space<vmem>>, vector<1x1x8xf32>
    %256 = vector.shape_cast %255 : vector<1x1x8xf32> to vector<1x8xf32>
    %257 = vector.broadcast %256 : vector<1x8xf32> to vector<16x8xf32>
    %258 = arith.addf %254, %257 : vector<16x8xf32>
    %c4_181 = arith.constant 4 : index
    %c0_182 = arith.constant 0 : index
    %c0_183 = arith.constant 0 : index
    %259 = vector.load %arg8[%c4_181, %c0_182, %c0_183] : memref<16x32x8xf32, #tpu.memory_space<vmem>>, vector<1x32x8xf32>
    %260 = vector.shape_cast %259 : vector<1x32x8xf32> to vector<32x8xf32>
    %cst_184 = arith.constant dense<0.000000e+00> : vector<16x8xf32>
    %261 = tpu.matmul %249, %260, %cst_184 {dimension_numbers = #tpu.dot_dimension_numbers<[1], [0], [0], [1], [0, 0, 1, 1], [], []>} : vector<16x32xf32>, vector<32x8xf32>, vector<16x8xf32> -> vector<16x8xf32>
    %c4_185 = arith.constant 4 : index
    %c0_186 = arith.constant 0 : index
    %c0_187 = arith.constant 0 : index
    %262 = vector.load %arg11[%c4_185, %c0_186, %c0_187] : memref<16x1x8xf32, #tpu.memory_space<vmem>>, vector<1x1x8xf32>
    %263 = vector.shape_cast %262 : vector<1x1x8xf32> to vector<1x8xf32>
    %264 = vector.broadcast %263 : vector<1x8xf32> to vector<16x8xf32>
    %265 = arith.addf %261, %264 : vector<16x8xf32>
    %c4_188 = arith.constant 4 : index
    %c0_189 = arith.constant 0 : index
    %c0_190 = arith.constant 0 : index
    %266 = vector.load %arg9[%c4_188, %c0_189, %c0_190] : memref<16x32x8xf32, #tpu.memory_space<vmem>>, vector<1x32x8xf32>
    %267 = vector.shape_cast %266 : vector<1x32x8xf32> to vector<32x8xf32>
    %cst_191 = arith.constant dense<0.000000e+00> : vector<16x8xf32>
    %268 = tpu.matmul %249, %267, %cst_191 {dimension_numbers = #tpu.dot_dimension_numbers<[1], [0], [0], [1], [0, 0, 1, 1], [], []>} : vector<16x32xf32>, vector<32x8xf32>, vector<16x8xf32> -> vector<16x8xf32>
    %c4_192 = arith.constant 4 : index
    %c0_193 = arith.constant 0 : index
    %c0_194 = arith.constant 0 : index
    %269 = vector.load %arg12[%c4_192, %c0_193, %c0_194] : memref<16x1x8xf32, #tpu.memory_space<vmem>>, vector<1x1x8xf32>
    %270 = vector.shape_cast %269 : vector<1x1x8xf32> to vector<1x8xf32>
    %271 = vector.broadcast %270 : vector<1x8xf32> to vector<16x8xf32>
    %272 = arith.addf %268, %271 : vector<16x8xf32>
    %cst_195 = arith.constant dense<0.000000e+00> : vector<16x16xf32>
    %273 = tpu.matmul %258, %265, %cst_195 {dimension_numbers = #tpu.dot_dimension_numbers<[1], [1], [0], [0], [0, 0, 1, 0], [], []>} : vector<16x8xf32>, vector<16x8xf32>, vector<16x16xf32> -> vector<16x16xf32>
    %cst_196 = arith.constant 0.353553385 : f32
    %274 = vector.broadcast %cst_196 : f32 to vector<16x16xf32>
    %275 = arith.mulf %273, %274 : vector<16x16xf32>
    %276 = arith.addf %275, %0 : vector<16x16xf32>
    %cst_197 = arith.constant dense<0xFF800000> : vector<16xf32>
    %277 = vector.multi_reduction <maximumf>, %276, %cst_197 [1] : vector<16x16xf32> to vector<16xf32>
    %278 = vector.shape_cast %277 : vector<16xf32> to vector<16x1xf32>
    %279 = vector.broadcast %278 : vector<16x1xf32> to vector<16x16xf32>
    %280 = arith.subf %276, %279 : vector<16x16xf32>
    %281 = math.exp %280 : vector<16x16xf32>
    %cst_198 = arith.constant dense<0.000000e+00> : vector<16xf32>
    %282 = vector.multi_reduction <add>, %281, %cst_198 [1] : vector<16x16xf32> to vector<16xf32>
    %283 = vector.shape_cast %282 : vector<16xf32> to vector<16x1xf32>
    %284 = tpu.reciprocal %283 {approx = true} : vector<16x1xf32> -> vector<16x1xf32>
    %285 = vector.broadcast %284 : vector<16x1xf32> to vector<16x16xf32>
    %286 = arith.mulf %281, %285 : vector<16x16xf32>
    %cst_199 = arith.constant dense<0.000000e+00> : vector<16x8xf32>
    %287 = tpu.matmul %286, %272, %cst_199 {dimension_numbers = #tpu.dot_dimension_numbers<[1], [0], [0], [1], [0, 0, 1, 1], [], []>} : vector<16x16xf32>, vector<16x8xf32>, vector<16x8xf32> -> vector<16x8xf32>
    %c4_200 = arith.constant 4 : index
    %c0_201 = arith.constant 0 : index
    %c0_202 = arith.constant 0 : index
    %288 = vector.load %arg13[%c4_200, %c0_201, %c0_202] : memref<16x8x32xf32, #tpu.memory_space<vmem>>, vector<1x8x32xf32>
    %289 = vector.shape_cast %288 : vector<1x8x32xf32> to vector<8x32xf32>
    %cst_203 = arith.constant dense<0.000000e+00> : vector<16x32xf32>
    %290 = tpu.matmul %287, %289, %cst_203 {dimension_numbers = #tpu.dot_dimension_numbers<[1], [0], [0], [1], [0, 0, 1, 1], [], []>} : vector<16x8xf32>, vector<8x32xf32>, vector<16x32xf32> -> vector<16x32xf32>
    %291 = vector.broadcast %251 : vector<1x32xf32> to vector<16x32xf32>
    %292 = arith.addf %291, %290 : vector<16x32xf32>
    %c5 = arith.constant 5 : index
    %c0_204 = arith.constant 0 : index
    %c0_205 = arith.constant 0 : index
    %293 = vector.load %arg7[%c5, %c0_204, %c0_205] : memref<16x32x8xf32, #tpu.memory_space<vmem>>, vector<1x32x8xf32>
    %294 = vector.shape_cast %293 : vector<1x32x8xf32> to vector<32x8xf32>
    %cst_206 = arith.constant dense<0.000000e+00> : vector<16x8xf32>
    %295 = tpu.matmul %249, %294, %cst_206 {dimension_numbers = #tpu.dot_dimension_numbers<[1], [0], [0], [1], [0, 0, 1, 1], [], []>} : vector<16x32xf32>, vector<32x8xf32>, vector<16x8xf32> -> vector<16x8xf32>
    %c5_207 = arith.constant 5 : index
    %c0_208 = arith.constant 0 : index
    %c0_209 = arith.constant 0 : index
    %296 = vector.load %arg10[%c5_207, %c0_208, %c0_209] : memref<16x1x8xf32, #tpu.memory_space<vmem>>, vector<1x1x8xf32>
    %297 = vector.shape_cast %296 : vector<1x1x8xf32> to vector<1x8xf32>
    %298 = vector.broadcast %297 : vector<1x8xf32> to vector<16x8xf32>
    %299 = arith.addf %295, %298 : vector<16x8xf32>
    %c5_210 = arith.constant 5 : index
    %c0_211 = arith.constant 0 : index
    %c0_212 = arith.constant 0 : index
    %300 = vector.load %arg8[%c5_210, %c0_211, %c0_212] : memref<16x32x8xf32, #tpu.memory_space<vmem>>, vector<1x32x8xf32>
    %301 = vector.shape_cast %300 : vector<1x32x8xf32> to vector<32x8xf32>
    %cst_213 = arith.constant dense<0.000000e+00> : vector<16x8xf32>
    %302 = tpu.matmul %249, %301, %cst_213 {dimension_numbers = #tpu.dot_dimension_numbers<[1], [0], [0], [1], [0, 0, 1, 1], [], []>} : vector<16x32xf32>, vector<32x8xf32>, vector<16x8xf32> -> vector<16x8xf32>
    %c5_214 = arith.constant 5 : index
    %c0_215 = arith.constant 0 : index
    %c0_216 = arith.constant 0 : index
    %303 = vector.load %arg11[%c5_214, %c0_215, %c0_216] : memref<16x1x8xf32, #tpu.memory_space<vmem>>, vector<1x1x8xf32>
    %304 = vector.shape_cast %303 : vector<1x1x8xf32> to vector<1x8xf32>
    %305 = vector.broadcast %304 : vector<1x8xf32> to vector<16x8xf32>
    %306 = arith.addf %302, %305 : vector<16x8xf32>
    %c5_217 = arith.constant 5 : index
    %c0_218 = arith.constant 0 : index
    %c0_219 = arith.constant 0 : index
    %307 = vector.load %arg9[%c5_217, %c0_218, %c0_219] : memref<16x32x8xf32, #tpu.memory_space<vmem>>, vector<1x32x8xf32>
    %308 = vector.shape_cast %307 : vector<1x32x8xf32> to vector<32x8xf32>
    %cst_220 = arith.constant dense<0.000000e+00> : vector<16x8xf32>
    %309 = tpu.matmul %249, %308, %cst_220 {dimension_numbers = #tpu.dot_dimension_numbers<[1], [0], [0], [1], [0, 0, 1, 1], [], []>} : vector<16x32xf32>, vector<32x8xf32>, vector<16x8xf32> -> vector<16x8xf32>
    %c5_221 = arith.constant 5 : index
    %c0_222 = arith.constant 0 : index
    %c0_223 = arith.constant 0 : index
    %310 = vector.load %arg12[%c5_221, %c0_222, %c0_223] : memref<16x1x8xf32, #tpu.memory_space<vmem>>, vector<1x1x8xf32>
    %311 = vector.shape_cast %310 : vector<1x1x8xf32> to vector<1x8xf32>
    %312 = vector.broadcast %311 : vector<1x8xf32> to vector<16x8xf32>
    %313 = arith.addf %309, %312 : vector<16x8xf32>
    %cst_224 = arith.constant dense<0.000000e+00> : vector<16x16xf32>
    %314 = tpu.matmul %299, %306, %cst_224 {dimension_numbers = #tpu.dot_dimension_numbers<[1], [1], [0], [0], [0, 0, 1, 0], [], []>} : vector<16x8xf32>, vector<16x8xf32>, vector<16x16xf32> -> vector<16x16xf32>
    %cst_225 = arith.constant 0.353553385 : f32
    %315 = vector.broadcast %cst_225 : f32 to vector<16x16xf32>
    %316 = arith.mulf %314, %315 : vector<16x16xf32>
    %317 = arith.addf %316, %0 : vector<16x16xf32>
    %cst_226 = arith.constant dense<0xFF800000> : vector<16xf32>
    %318 = vector.multi_reduction <maximumf>, %317, %cst_226 [1] : vector<16x16xf32> to vector<16xf32>
    %319 = vector.shape_cast %318 : vector<16xf32> to vector<16x1xf32>
    %320 = vector.broadcast %319 : vector<16x1xf32> to vector<16x16xf32>
    %321 = arith.subf %317, %320 : vector<16x16xf32>
    %322 = math.exp %321 : vector<16x16xf32>
    %cst_227 = arith.constant dense<0.000000e+00> : vector<16xf32>
    %323 = vector.multi_reduction <add>, %322, %cst_227 [1] : vector<16x16xf32> to vector<16xf32>
    %324 = vector.shape_cast %323 : vector<16xf32> to vector<16x1xf32>
    %325 = tpu.reciprocal %324 {approx = true} : vector<16x1xf32> -> vector<16x1xf32>
    %326 = vector.broadcast %325 : vector<16x1xf32> to vector<16x16xf32>
    %327 = arith.mulf %322, %326 : vector<16x16xf32>
    %cst_228 = arith.constant dense<0.000000e+00> : vector<16x8xf32>
    %328 = tpu.matmul %327, %313, %cst_228 {dimension_numbers = #tpu.dot_dimension_numbers<[1], [0], [0], [1], [0, 0, 1, 1], [], []>} : vector<16x16xf32>, vector<16x8xf32>, vector<16x8xf32> -> vector<16x8xf32>
    %c5_229 = arith.constant 5 : index
    %c0_230 = arith.constant 0 : index
    %c0_231 = arith.constant 0 : index
    %329 = vector.load %arg13[%c5_229, %c0_230, %c0_231] : memref<16x8x32xf32, #tpu.memory_space<vmem>>, vector<1x8x32xf32>
    %330 = vector.shape_cast %329 : vector<1x8x32xf32> to vector<8x32xf32>
    %cst_232 = arith.constant dense<0.000000e+00> : vector<16x32xf32>
    %331 = tpu.matmul %328, %330, %cst_232 {dimension_numbers = #tpu.dot_dimension_numbers<[1], [0], [0], [1], [0, 0, 1, 1], [], []>} : vector<16x8xf32>, vector<8x32xf32>, vector<16x32xf32> -> vector<16x32xf32>
    %332 = arith.addf %292, %331 : vector<16x32xf32>
    %c6 = arith.constant 6 : index
    %c0_233 = arith.constant 0 : index
    %c0_234 = arith.constant 0 : index
    %333 = vector.load %arg7[%c6, %c0_233, %c0_234] : memref<16x32x8xf32, #tpu.memory_space<vmem>>, vector<1x32x8xf32>
    %334 = vector.shape_cast %333 : vector<1x32x8xf32> to vector<32x8xf32>
    %cst_235 = arith.constant dense<0.000000e+00> : vector<16x8xf32>
    %335 = tpu.matmul %249, %334, %cst_235 {dimension_numbers = #tpu.dot_dimension_numbers<[1], [0], [0], [1], [0, 0, 1, 1], [], []>} : vector<16x32xf32>, vector<32x8xf32>, vector<16x8xf32> -> vector<16x8xf32>
    %c6_236 = arith.constant 6 : index
    %c0_237 = arith.constant 0 : index
    %c0_238 = arith.constant 0 : index
    %336 = vector.load %arg10[%c6_236, %c0_237, %c0_238] : memref<16x1x8xf32, #tpu.memory_space<vmem>>, vector<1x1x8xf32>
    %337 = vector.shape_cast %336 : vector<1x1x8xf32> to vector<1x8xf32>
    %338 = vector.broadcast %337 : vector<1x8xf32> to vector<16x8xf32>
    %339 = arith.addf %335, %338 : vector<16x8xf32>
    %c6_239 = arith.constant 6 : index
    %c0_240 = arith.constant 0 : index
    %c0_241 = arith.constant 0 : index
    %340 = vector.load %arg8[%c6_239, %c0_240, %c0_241] : memref<16x32x8xf32, #tpu.memory_space<vmem>>, vector<1x32x8xf32>
    %341 = vector.shape_cast %340 : vector<1x32x8xf32> to vector<32x8xf32>
    %cst_242 = arith.constant dense<0.000000e+00> : vector<16x8xf32>
    %342 = tpu.matmul %249, %341, %cst_242 {dimension_numbers = #tpu.dot_dimension_numbers<[1], [0], [0], [1], [0, 0, 1, 1], [], []>} : vector<16x32xf32>, vector<32x8xf32>, vector<16x8xf32> -> vector<16x8xf32>
    %c6_243 = arith.constant 6 : index
    %c0_244 = arith.constant 0 : index
    %c0_245 = arith.constant 0 : index
    %343 = vector.load %arg11[%c6_243, %c0_244, %c0_245] : memref<16x1x8xf32, #tpu.memory_space<vmem>>, vector<1x1x8xf32>
    %344 = vector.shape_cast %343 : vector<1x1x8xf32> to vector<1x8xf32>
    %345 = vector.broadcast %344 : vector<1x8xf32> to vector<16x8xf32>
    %346 = arith.addf %342, %345 : vector<16x8xf32>
    %c6_246 = arith.constant 6 : index
    %c0_247 = arith.constant 0 : index
    %c0_248 = arith.constant 0 : index
    %347 = vector.load %arg9[%c6_246, %c0_247, %c0_248] : memref<16x32x8xf32, #tpu.memory_space<vmem>>, vector<1x32x8xf32>
    %348 = vector.shape_cast %347 : vector<1x32x8xf32> to vector<32x8xf32>
    %cst_249 = arith.constant dense<0.000000e+00> : vector<16x8xf32>
    %349 = tpu.matmul %249, %348, %cst_249 {dimension_numbers = #tpu.dot_dimension_numbers<[1], [0], [0], [1], [0, 0, 1, 1], [], []>} : vector<16x32xf32>, vector<32x8xf32>, vector<16x8xf32> -> vector<16x8xf32>
    %c6_250 = arith.constant 6 : index
    %c0_251 = arith.constant 0 : index
    %c0_252 = arith.constant 0 : index
    %350 = vector.load %arg12[%c6_250, %c0_251, %c0_252] : memref<16x1x8xf32, #tpu.memory_space<vmem>>, vector<1x1x8xf32>
    %351 = vector.shape_cast %350 : vector<1x1x8xf32> to vector<1x8xf32>
    %352 = vector.broadcast %351 : vector<1x8xf32> to vector<16x8xf32>
    %353 = arith.addf %349, %352 : vector<16x8xf32>
    %cst_253 = arith.constant dense<0.000000e+00> : vector<16x16xf32>
    %354 = tpu.matmul %339, %346, %cst_253 {dimension_numbers = #tpu.dot_dimension_numbers<[1], [1], [0], [0], [0, 0, 1, 0], [], []>} : vector<16x8xf32>, vector<16x8xf32>, vector<16x16xf32> -> vector<16x16xf32>
    %cst_254 = arith.constant 0.353553385 : f32
    %355 = vector.broadcast %cst_254 : f32 to vector<16x16xf32>
    %356 = arith.mulf %354, %355 : vector<16x16xf32>
    %357 = arith.addf %356, %0 : vector<16x16xf32>
    %cst_255 = arith.constant dense<0xFF800000> : vector<16xf32>
    %358 = vector.multi_reduction <maximumf>, %357, %cst_255 [1] : vector<16x16xf32> to vector<16xf32>
    %359 = vector.shape_cast %358 : vector<16xf32> to vector<16x1xf32>
    %360 = vector.broadcast %359 : vector<16x1xf32> to vector<16x16xf32>
    %361 = arith.subf %357, %360 : vector<16x16xf32>
    %362 = math.exp %361 : vector<16x16xf32>
    %cst_256 = arith.constant dense<0.000000e+00> : vector<16xf32>
    %363 = vector.multi_reduction <add>, %362, %cst_256 [1] : vector<16x16xf32> to vector<16xf32>
    %364 = vector.shape_cast %363 : vector<16xf32> to vector<16x1xf32>
    %365 = tpu.reciprocal %364 {approx = true} : vector<16x1xf32> -> vector<16x1xf32>
    %366 = vector.broadcast %365 : vector<16x1xf32> to vector<16x16xf32>
    %367 = arith.mulf %362, %366 : vector<16x16xf32>
    %cst_257 = arith.constant dense<0.000000e+00> : vector<16x8xf32>
    %368 = tpu.matmul %367, %353, %cst_257 {dimension_numbers = #tpu.dot_dimension_numbers<[1], [0], [0], [1], [0, 0, 1, 1], [], []>} : vector<16x16xf32>, vector<16x8xf32>, vector<16x8xf32> -> vector<16x8xf32>
    %c6_258 = arith.constant 6 : index
    %c0_259 = arith.constant 0 : index
    %c0_260 = arith.constant 0 : index
    %369 = vector.load %arg13[%c6_258, %c0_259, %c0_260] : memref<16x8x32xf32, #tpu.memory_space<vmem>>, vector<1x8x32xf32>
    %370 = vector.shape_cast %369 : vector<1x8x32xf32> to vector<8x32xf32>
    %cst_261 = arith.constant dense<0.000000e+00> : vector<16x32xf32>
    %371 = tpu.matmul %368, %370, %cst_261 {dimension_numbers = #tpu.dot_dimension_numbers<[1], [0], [0], [1], [0, 0, 1, 1], [], []>} : vector<16x8xf32>, vector<8x32xf32>, vector<16x32xf32> -> vector<16x32xf32>
    %372 = arith.addf %332, %371 : vector<16x32xf32>
    %c7 = arith.constant 7 : index
    %c0_262 = arith.constant 0 : index
    %c0_263 = arith.constant 0 : index
    %373 = vector.load %arg7[%c7, %c0_262, %c0_263] : memref<16x32x8xf32, #tpu.memory_space<vmem>>, vector<1x32x8xf32>
    %374 = vector.shape_cast %373 : vector<1x32x8xf32> to vector<32x8xf32>
    %cst_264 = arith.constant dense<0.000000e+00> : vector<16x8xf32>
    %375 = tpu.matmul %249, %374, %cst_264 {dimension_numbers = #tpu.dot_dimension_numbers<[1], [0], [0], [1], [0, 0, 1, 1], [], []>} : vector<16x32xf32>, vector<32x8xf32>, vector<16x8xf32> -> vector<16x8xf32>
    %c7_265 = arith.constant 7 : index
    %c0_266 = arith.constant 0 : index
    %c0_267 = arith.constant 0 : index
    %376 = vector.load %arg10[%c7_265, %c0_266, %c0_267] : memref<16x1x8xf32, #tpu.memory_space<vmem>>, vector<1x1x8xf32>
    %377 = vector.shape_cast %376 : vector<1x1x8xf32> to vector<1x8xf32>
    %378 = vector.broadcast %377 : vector<1x8xf32> to vector<16x8xf32>
    %379 = arith.addf %375, %378 : vector<16x8xf32>
    %c7_268 = arith.constant 7 : index
    %c0_269 = arith.constant 0 : index
    %c0_270 = arith.constant 0 : index
    %380 = vector.load %arg8[%c7_268, %c0_269, %c0_270] : memref<16x32x8xf32, #tpu.memory_space<vmem>>, vector<1x32x8xf32>
    %381 = vector.shape_cast %380 : vector<1x32x8xf32> to vector<32x8xf32>
    %cst_271 = arith.constant dense<0.000000e+00> : vector<16x8xf32>
    %382 = tpu.matmul %249, %381, %cst_271 {dimension_numbers = #tpu.dot_dimension_numbers<[1], [0], [0], [1], [0, 0, 1, 1], [], []>} : vector<16x32xf32>, vector<32x8xf32>, vector<16x8xf32> -> vector<16x8xf32>
    %c7_272 = arith.constant 7 : index
    %c0_273 = arith.constant 0 : index
    %c0_274 = arith.constant 0 : index
    %383 = vector.load %arg11[%c7_272, %c0_273, %c0_274] : memref<16x1x8xf32, #tpu.memory_space<vmem>>, vector<1x1x8xf32>
    %384 = vector.shape_cast %383 : vector<1x1x8xf32> to vector<1x8xf32>
    %385 = vector.broadcast %384 : vector<1x8xf32> to vector<16x8xf32>
    %386 = arith.addf %382, %385 : vector<16x8xf32>
    %c7_275 = arith.constant 7 : index
    %c0_276 = arith.constant 0 : index
    %c0_277 = arith.constant 0 : index
    %387 = vector.load %arg9[%c7_275, %c0_276, %c0_277] : memref<16x32x8xf32, #tpu.memory_space<vmem>>, vector<1x32x8xf32>
    %388 = vector.shape_cast %387 : vector<1x32x8xf32> to vector<32x8xf32>
    %cst_278 = arith.constant dense<0.000000e+00> : vector<16x8xf32>
    %389 = tpu.matmul %249, %388, %cst_278 {dimension_numbers = #tpu.dot_dimension_numbers<[1], [0], [0], [1], [0, 0, 1, 1], [], []>} : vector<16x32xf32>, vector<32x8xf32>, vector<16x8xf32> -> vector<16x8xf32>
    %c7_279 = arith.constant 7 : index
    %c0_280 = arith.constant 0 : index
    %c0_281 = arith.constant 0 : index
    %390 = vector.load %arg12[%c7_279, %c0_280, %c0_281] : memref<16x1x8xf32, #tpu.memory_space<vmem>>, vector<1x1x8xf32>
    %391 = vector.shape_cast %390 : vector<1x1x8xf32> to vector<1x8xf32>
    %392 = vector.broadcast %391 : vector<1x8xf32> to vector<16x8xf32>
    %393 = arith.addf %389, %392 : vector<16x8xf32>
    %cst_282 = arith.constant dense<0.000000e+00> : vector<16x16xf32>
    %394 = tpu.matmul %379, %386, %cst_282 {dimension_numbers = #tpu.dot_dimension_numbers<[1], [1], [0], [0], [0, 0, 1, 0], [], []>} : vector<16x8xf32>, vector<16x8xf32>, vector<16x16xf32> -> vector<16x16xf32>
    %cst_283 = arith.constant 0.353553385 : f32
    %395 = vector.broadcast %cst_283 : f32 to vector<16x16xf32>
    %396 = arith.mulf %394, %395 : vector<16x16xf32>
    %397 = arith.addf %396, %0 : vector<16x16xf32>
    %cst_284 = arith.constant dense<0xFF800000> : vector<16xf32>
    %398 = vector.multi_reduction <maximumf>, %397, %cst_284 [1] : vector<16x16xf32> to vector<16xf32>
    %399 = vector.shape_cast %398 : vector<16xf32> to vector<16x1xf32>
    %400 = vector.broadcast %399 : vector<16x1xf32> to vector<16x16xf32>
    %401 = arith.subf %397, %400 : vector<16x16xf32>
    %402 = math.exp %401 : vector<16x16xf32>
    %cst_285 = arith.constant dense<0.000000e+00> : vector<16xf32>
    %403 = vector.multi_reduction <add>, %402, %cst_285 [1] : vector<16x16xf32> to vector<16xf32>
    %404 = vector.shape_cast %403 : vector<16xf32> to vector<16x1xf32>
    %405 = tpu.reciprocal %404 {approx = true} : vector<16x1xf32> -> vector<16x1xf32>
    %406 = vector.broadcast %405 : vector<16x1xf32> to vector<16x16xf32>
    %407 = arith.mulf %402, %406 : vector<16x16xf32>
    %cst_286 = arith.constant dense<0.000000e+00> : vector<16x8xf32>
    %408 = tpu.matmul %407, %393, %cst_286 {dimension_numbers = #tpu.dot_dimension_numbers<[1], [0], [0], [1], [0, 0, 1, 1], [], []>} : vector<16x16xf32>, vector<16x8xf32>, vector<16x8xf32> -> vector<16x8xf32>
    %c7_287 = arith.constant 7 : index
    %c0_288 = arith.constant 0 : index
    %c0_289 = arith.constant 0 : index
    %409 = vector.load %arg13[%c7_287, %c0_288, %c0_289] : memref<16x8x32xf32, #tpu.memory_space<vmem>>, vector<1x8x32xf32>
    %410 = vector.shape_cast %409 : vector<1x8x32xf32> to vector<8x32xf32>
    %cst_290 = arith.constant dense<0.000000e+00> : vector<16x32xf32>
    %411 = tpu.matmul %408, %410, %cst_290 {dimension_numbers = #tpu.dot_dimension_numbers<[1], [0], [0], [1], [0, 0, 1, 1], [], []>} : vector<16x8xf32>, vector<8x32xf32>, vector<16x32xf32> -> vector<16x32xf32>
    %412 = arith.addf %372, %411 : vector<16x32xf32>
    %413 = arith.addf %249, %412 : vector<16x32xf32>
    %c1_291 = arith.constant 1 : index
    %c0_292 = arith.constant 0 : index
    %c0_293 = arith.constant 0 : index
    %414 = vector.load %arg15[%c1_291, %c0_292, %c0_293] : memref<4x1x32xf32, #tpu.memory_space<vmem>>, vector<1x1x32xf32>
    %415 = vector.shape_cast %414 : vector<1x1x32xf32> to vector<1x32xf32>
    %c1_294 = arith.constant 1 : index
    %c0_295 = arith.constant 0 : index
    %c0_296 = arith.constant 0 : index
    %416 = vector.load %arg16[%c1_294, %c0_295, %c0_296] : memref<4x1x32xf32, #tpu.memory_space<vmem>>, vector<1x1x32xf32>
    %417 = vector.shape_cast %416 : vector<1x1x32xf32> to vector<1x32xf32>
    %cst_297 = arith.constant dense<0.000000e+00> : vector<16xf32>
    %418 = vector.multi_reduction <add>, %413, %cst_297 [1] : vector<16x32xf32> to vector<16xf32>
    %419 = vector.shape_cast %418 : vector<16xf32> to vector<16x1xf32>
    %cst_298 = arith.constant 3.200000e+01 : f32
    %420 = vector.broadcast %cst_298 : f32 to vector<16x1xf32>
    %421 = arith.divf %419, %420 : vector<16x1xf32>
    %422 = arith.mulf %413, %413 : vector<16x32xf32>
    %cst_299 = arith.constant dense<0.000000e+00> : vector<16xf32>
    %423 = vector.multi_reduction <add>, %422, %cst_299 [1] : vector<16x32xf32> to vector<16xf32>
    %424 = vector.shape_cast %423 : vector<16xf32> to vector<16x1xf32>
    %cst_300 = arith.constant 3.200000e+01 : f32
    %425 = vector.broadcast %cst_300 : f32 to vector<16x1xf32>
    %426 = arith.divf %424, %425 : vector<16x1xf32>
    %427 = arith.mulf %421, %421 : vector<16x1xf32>
    %428 = arith.subf %426, %427 : vector<16x1xf32>
    %429 = vector.broadcast %421 : vector<16x1xf32> to vector<16x32xf32>
    %430 = arith.subf %413, %429 : vector<16x32xf32>
    %cst_301 = arith.constant 9.99999974E-6 : f32
    %431 = vector.broadcast %cst_301 : f32 to vector<16x1xf32>
    %432 = arith.addf %428, %431 : vector<16x1xf32>
    %433 = math.rsqrt %432 : vector<16x1xf32>
    %434 = vector.broadcast %433 : vector<16x1xf32> to vector<16x32xf32>
    %435 = arith.mulf %430, %434 : vector<16x32xf32>
    %436 = vector.broadcast %415 : vector<1x32xf32> to vector<16x32xf32>
    %437 = arith.mulf %435, %436 : vector<16x32xf32>
    %438 = vector.broadcast %417 : vector<1x32xf32> to vector<16x32xf32>
    %439 = arith.addf %437, %438 : vector<16x32xf32>
    %c1_302 = arith.constant 1 : index
    %c0_303 = arith.constant 0 : index
    %c0_304 = arith.constant 0 : index
    %440 = vector.load %arg17[%c1_302, %c0_303, %c0_304] : memref<4x32x32xf32, #tpu.memory_space<vmem>>, vector<1x32x32xf32>
    %441 = vector.shape_cast %440 : vector<1x32x32xf32> to vector<32x32xf32>
    %cst_305 = arith.constant dense<0.000000e+00> : vector<16x32xf32>
    %442 = tpu.matmul %439, %441, %cst_305 {dimension_numbers = #tpu.dot_dimension_numbers<[1], [0], [0], [1], [0, 0, 1, 1], [], []>} : vector<16x32xf32>, vector<32x32xf32>, vector<16x32xf32> -> vector<16x32xf32>
    %c1_306 = arith.constant 1 : index
    %c0_307 = arith.constant 0 : index
    %c0_308 = arith.constant 0 : index
    %443 = vector.load %arg18[%c1_306, %c0_307, %c0_308] : memref<4x1x32xf32, #tpu.memory_space<vmem>>, vector<1x1x32xf32>
    %444 = vector.shape_cast %443 : vector<1x1x32xf32> to vector<1x32xf32>
    %445 = vector.broadcast %444 : vector<1x32xf32> to vector<16x32xf32>
    %446 = arith.addf %442, %445 : vector<16x32xf32>
    %cst_309 = arith.constant 0.000000e+00 : f32
    %447 = vector.broadcast %cst_309 : f32 to vector<16x32xf32>
    %448 = arith.maximumf %446, %447 : vector<16x32xf32>
    %c1_310 = arith.constant 1 : index
    %c0_311 = arith.constant 0 : index
    %c0_312 = arith.constant 0 : index
    %449 = vector.load %arg19[%c1_310, %c0_311, %c0_312] : memref<4x32x32xf32, #tpu.memory_space<vmem>>, vector<1x32x32xf32>
    %450 = vector.shape_cast %449 : vector<1x32x32xf32> to vector<32x32xf32>
    %cst_313 = arith.constant dense<0.000000e+00> : vector<16x32xf32>
    %451 = tpu.matmul %448, %450, %cst_313 {dimension_numbers = #tpu.dot_dimension_numbers<[1], [0], [0], [1], [0, 0, 1, 1], [], []>} : vector<16x32xf32>, vector<32x32xf32>, vector<16x32xf32> -> vector<16x32xf32>
    %c1_314 = arith.constant 1 : index
    %c0_315 = arith.constant 0 : index
    %c0_316 = arith.constant 0 : index
    %452 = vector.load %arg20[%c1_314, %c0_315, %c0_316] : memref<4x1x32xf32, #tpu.memory_space<vmem>>, vector<1x1x32xf32>
    %453 = vector.shape_cast %452 : vector<1x1x32xf32> to vector<1x32xf32>
    %454 = vector.broadcast %453 : vector<1x32xf32> to vector<16x32xf32>
    %455 = arith.addf %451, %454 : vector<16x32xf32>
    %456 = arith.addf %439, %455 : vector<16x32xf32>
    %c1_317 = arith.constant 1 : index
    %c0_318 = arith.constant 0 : index
    %c0_319 = arith.constant 0 : index
    %457 = vector.load %arg21[%c1_317, %c0_318, %c0_319] : memref<4x1x32xf32, #tpu.memory_space<vmem>>, vector<1x1x32xf32>
    %458 = vector.shape_cast %457 : vector<1x1x32xf32> to vector<1x32xf32>
    %c1_320 = arith.constant 1 : index
    %c0_321 = arith.constant 0 : index
    %c0_322 = arith.constant 0 : index
    %459 = vector.load %arg22[%c1_320, %c0_321, %c0_322] : memref<4x1x32xf32, #tpu.memory_space<vmem>>, vector<1x1x32xf32>
    %460 = vector.shape_cast %459 : vector<1x1x32xf32> to vector<1x32xf32>
    %cst_323 = arith.constant dense<0.000000e+00> : vector<16xf32>
    %461 = vector.multi_reduction <add>, %456, %cst_323 [1] : vector<16x32xf32> to vector<16xf32>
    %462 = vector.shape_cast %461 : vector<16xf32> to vector<16x1xf32>
    %cst_324 = arith.constant 3.200000e+01 : f32
    %463 = vector.broadcast %cst_324 : f32 to vector<16x1xf32>
    %464 = arith.divf %462, %463 : vector<16x1xf32>
    %465 = arith.mulf %456, %456 : vector<16x32xf32>
    %cst_325 = arith.constant dense<0.000000e+00> : vector<16xf32>
    %466 = vector.multi_reduction <add>, %465, %cst_325 [1] : vector<16x32xf32> to vector<16xf32>
    %467 = vector.shape_cast %466 : vector<16xf32> to vector<16x1xf32>
    %cst_326 = arith.constant 3.200000e+01 : f32
    %468 = vector.broadcast %cst_326 : f32 to vector<16x1xf32>
    %469 = arith.divf %467, %468 : vector<16x1xf32>
    %470 = arith.mulf %464, %464 : vector<16x1xf32>
    %471 = arith.subf %469, %470 : vector<16x1xf32>
    %472 = vector.broadcast %464 : vector<16x1xf32> to vector<16x32xf32>
    %473 = arith.subf %456, %472 : vector<16x32xf32>
    %cst_327 = arith.constant 9.99999974E-6 : f32
    %474 = vector.broadcast %cst_327 : f32 to vector<16x1xf32>
    %475 = arith.addf %471, %474 : vector<16x1xf32>
    %476 = math.rsqrt %475 : vector<16x1xf32>
    %477 = vector.broadcast %476 : vector<16x1xf32> to vector<16x32xf32>
    %478 = arith.mulf %473, %477 : vector<16x32xf32>
    %479 = vector.broadcast %458 : vector<1x32xf32> to vector<16x32xf32>
    %480 = arith.mulf %478, %479 : vector<16x32xf32>
    %481 = vector.broadcast %460 : vector<1x32xf32> to vector<16x32xf32>
    %482 = arith.addf %480, %481 : vector<16x32xf32>
    %c0_328 = arith.constant 0 : index
    %c0_329 = arith.constant 0 : index
    %483 = vector.load %arg23[%c0_328, %c0_329] : memref<64x32xf32, #tpu.memory_space<vmem>>, vector<64x32xf32>
    %cst_330 = arith.constant dense<0.000000e+00> : vector<16x64xf32>
    %484 = tpu.matmul %482, %483, %cst_330 {dimension_numbers = #tpu.dot_dimension_numbers<[1], [1], [0], [0], [0, 0, 1, 0], [], []>} : vector<16x32xf32>, vector<64x32xf32>, vector<16x64xf32> -> vector<16x64xf32>
    %c0_331 = arith.constant 0 : index
    %c0_332 = arith.constant 0 : index
    %485 = vector.load %arg24[%c0_331, %c0_332] : memref<1x64xf32, #tpu.memory_space<vmem>>, vector<1x64xf32>
    %cst_333 = arith.constant 2.000000e+00 : f32
    %486 = vector.broadcast %cst_333 : f32 to vector<16x64xf32>
    %487 = arith.mulf %486, %484 : vector<16x64xf32>
    %488 = vector.broadcast %485 : vector<1x64xf32> to vector<16x64xf32>
    %489 = arith.subf %488, %487 : vector<16x64xf32>
    %cst_334 = arith.constant dense<0x7F800000> : vector<16xf32>
    %490 = vector.multi_reduction <minimumf>, %489, %cst_334 [1] : vector<16x64xf32> to vector<16xf32>
    %491 = vector.shape_cast %490 : vector<16xf32> to vector<16x1xf32>
    %492 = tpu.iota {dimensions = array<i32: 1>} : vector<16x64xi32>
    %493 = vector.broadcast %491 : vector<16x1xf32> to vector<16x64xf32>
    %494 = arith.cmpf ole, %489, %493 : vector<16x64xf32>
    %c64_i32 = arith.constant 64 : i32
    %495 = vector.broadcast %c64_i32 : i32 to vector<16x64xi32>
    %496 = arith.select %494, %492, %495 : vector<16x64xi1>, vector<16x64xi32>
    %cst_335 = arith.constant dense<2147483647> : vector<16xi32>
    %497 = vector.multi_reduction <minsi>, %496, %cst_335 [1] : vector<16x64xi32> to vector<16xi32>
    %498 = vector.shape_cast %497 : vector<16xi32> to vector<16x1xi32>
    %499 = vector.broadcast %498 : vector<16x1xi32> to vector<16x64xi32>
    %500 = arith.cmpi eq, %492, %499 : vector<16x64xi32>
    %501 = arith.extui %500 : vector<16x64xi1> to vector<16x64xi32>
    %502 = arith.sitofp %501 : vector<16x64xi32> to vector<16x64xf32>
    %cst_336 = arith.constant dense<0.000000e+00> : vector<16x32xf32>
    %503 = tpu.matmul %502, %483, %cst_336 {dimension_numbers = #tpu.dot_dimension_numbers<[1], [0], [0], [1], [0, 0, 1, 1], [], []>} : vector<16x64xf32>, vector<64x32xf32>, vector<16x32xf32> -> vector<16x32xf32>
    %504 = arith.mulf %482, %482 : vector<16x32xf32>
    %cst_337 = arith.constant dense<0.000000e+00> : vector<16xf32>
    %505 = vector.multi_reduction <add>, %504, %cst_337 [1] : vector<16x32xf32> to vector<16xf32>
    %506 = vector.shape_cast %505 : vector<16xf32> to vector<16x1xf32>
    %507 = math.rsqrt %506 : vector<16x1xf32>
    %508 = vector.broadcast %507 : vector<16x1xf32> to vector<16x32xf32>
    %509 = arith.mulf %482, %508 : vector<16x32xf32>
    %510 = arith.mulf %503, %503 : vector<16x32xf32>
    %cst_338 = arith.constant dense<0.000000e+00> : vector<16xf32>
    %511 = vector.multi_reduction <add>, %510, %cst_338 [1] : vector<16x32xf32> to vector<16xf32>
    %512 = vector.shape_cast %511 : vector<16xf32> to vector<16x1xf32>
    %513 = math.rsqrt %512 : vector<16x1xf32>
    %514 = vector.broadcast %513 : vector<16x1xf32> to vector<16x32xf32>
    %515 = arith.mulf %503, %514 : vector<16x32xf32>
    %516 = arith.addf %509, %515 : vector<16x32xf32>
    %517 = arith.mulf %516, %516 : vector<16x32xf32>
    %cst_339 = arith.constant dense<0.000000e+00> : vector<16xf32>
    %518 = vector.multi_reduction <add>, %517, %cst_339 [1] : vector<16x32xf32> to vector<16xf32>
    %519 = vector.shape_cast %518 : vector<16xf32> to vector<16x1xf32>
    %520 = math.rsqrt %519 : vector<16x1xf32>
    %521 = vector.broadcast %520 : vector<16x1xf32> to vector<16x32xf32>
    %522 = arith.mulf %516, %521 : vector<16x32xf32>
    %523 = arith.mulf %522, %482 : vector<16x32xf32>
    %cst_340 = arith.constant dense<0.000000e+00> : vector<16xf32>
    %524 = vector.multi_reduction <add>, %523, %cst_340 [1] : vector<16x32xf32> to vector<16xf32>
    %525 = vector.shape_cast %524 : vector<16xf32> to vector<16x1xf32>
    %526 = arith.mulf %515, %482 : vector<16x32xf32>
    %cst_341 = arith.constant dense<0.000000e+00> : vector<16xf32>
    %527 = vector.multi_reduction <add>, %526, %cst_341 [1] : vector<16x32xf32> to vector<16xf32>
    %528 = vector.shape_cast %527 : vector<16xf32> to vector<16x1xf32>
    %cst_342 = arith.constant 2.000000e+00 : f32
    %529 = vector.broadcast %cst_342 : f32 to vector<16x32xf32>
    %530 = arith.mulf %529, %522 : vector<16x32xf32>
    %531 = vector.broadcast %525 : vector<16x1xf32> to vector<16x32xf32>
    %532 = arith.mulf %530, %531 : vector<16x32xf32>
    %533 = arith.subf %482, %532 : vector<16x32xf32>
    %cst_343 = arith.constant 2.000000e+00 : f32
    %534 = vector.broadcast %cst_343 : f32 to vector<16x32xf32>
    %535 = arith.mulf %534, %515 : vector<16x32xf32>
    %536 = vector.broadcast %528 : vector<16x1xf32> to vector<16x32xf32>
    %537 = arith.mulf %535, %536 : vector<16x32xf32>
    %538 = arith.addf %533, %537 : vector<16x32xf32>
    %539 = arith.addf %538, %2 : vector<16x32xf32>
    %c2_344 = arith.constant 2 : index
    %c0_345 = arith.constant 0 : index
    %c0_346 = arith.constant 0 : index
    %540 = vector.load %arg14[%c2_344, %c0_345, %c0_346] : memref<4x1x32xf32, #tpu.memory_space<vmem>>, vector<1x1x32xf32>
    %541 = vector.shape_cast %540 : vector<1x1x32xf32> to vector<1x32xf32>
    %c8 = arith.constant 8 : index
    %c0_347 = arith.constant 0 : index
    %c0_348 = arith.constant 0 : index
    %542 = vector.load %arg7[%c8, %c0_347, %c0_348] : memref<16x32x8xf32, #tpu.memory_space<vmem>>, vector<1x32x8xf32>
    %543 = vector.shape_cast %542 : vector<1x32x8xf32> to vector<32x8xf32>
    %cst_349 = arith.constant dense<0.000000e+00> : vector<16x8xf32>
    %544 = tpu.matmul %539, %543, %cst_349 {dimension_numbers = #tpu.dot_dimension_numbers<[1], [0], [0], [1], [0, 0, 1, 1], [], []>} : vector<16x32xf32>, vector<32x8xf32>, vector<16x8xf32> -> vector<16x8xf32>
    %c8_350 = arith.constant 8 : index
    %c0_351 = arith.constant 0 : index
    %c0_352 = arith.constant 0 : index
    %545 = vector.load %arg10[%c8_350, %c0_351, %c0_352] : memref<16x1x8xf32, #tpu.memory_space<vmem>>, vector<1x1x8xf32>
    %546 = vector.shape_cast %545 : vector<1x1x8xf32> to vector<1x8xf32>
    %547 = vector.broadcast %546 : vector<1x8xf32> to vector<16x8xf32>
    %548 = arith.addf %544, %547 : vector<16x8xf32>
    %c8_353 = arith.constant 8 : index
    %c0_354 = arith.constant 0 : index
    %c0_355 = arith.constant 0 : index
    %549 = vector.load %arg8[%c8_353, %c0_354, %c0_355] : memref<16x32x8xf32, #tpu.memory_space<vmem>>, vector<1x32x8xf32>
    %550 = vector.shape_cast %549 : vector<1x32x8xf32> to vector<32x8xf32>
    %cst_356 = arith.constant dense<0.000000e+00> : vector<16x8xf32>
    %551 = tpu.matmul %539, %550, %cst_356 {dimension_numbers = #tpu.dot_dimension_numbers<[1], [0], [0], [1], [0, 0, 1, 1], [], []>} : vector<16x32xf32>, vector<32x8xf32>, vector<16x8xf32> -> vector<16x8xf32>
    %c8_357 = arith.constant 8 : index
    %c0_358 = arith.constant 0 : index
    %c0_359 = arith.constant 0 : index
    %552 = vector.load %arg11[%c8_357, %c0_358, %c0_359] : memref<16x1x8xf32, #tpu.memory_space<vmem>>, vector<1x1x8xf32>
    %553 = vector.shape_cast %552 : vector<1x1x8xf32> to vector<1x8xf32>
    %554 = vector.broadcast %553 : vector<1x8xf32> to vector<16x8xf32>
    %555 = arith.addf %551, %554 : vector<16x8xf32>
    %c8_360 = arith.constant 8 : index
    %c0_361 = arith.constant 0 : index
    %c0_362 = arith.constant 0 : index
    %556 = vector.load %arg9[%c8_360, %c0_361, %c0_362] : memref<16x32x8xf32, #tpu.memory_space<vmem>>, vector<1x32x8xf32>
    %557 = vector.shape_cast %556 : vector<1x32x8xf32> to vector<32x8xf32>
    %cst_363 = arith.constant dense<0.000000e+00> : vector<16x8xf32>
    %558 = tpu.matmul %539, %557, %cst_363 {dimension_numbers = #tpu.dot_dimension_numbers<[1], [0], [0], [1], [0, 0, 1, 1], [], []>} : vector<16x32xf32>, vector<32x8xf32>, vector<16x8xf32> -> vector<16x8xf32>
    %c8_364 = arith.constant 8 : index
    %c0_365 = arith.constant 0 : index
    %c0_366 = arith.constant 0 : index
    %559 = vector.load %arg12[%c8_364, %c0_365, %c0_366] : memref<16x1x8xf32, #tpu.memory_space<vmem>>, vector<1x1x8xf32>
    %560 = vector.shape_cast %559 : vector<1x1x8xf32> to vector<1x8xf32>
    %561 = vector.broadcast %560 : vector<1x8xf32> to vector<16x8xf32>
    %562 = arith.addf %558, %561 : vector<16x8xf32>
    %cst_367 = arith.constant dense<0.000000e+00> : vector<16x16xf32>
    %563 = tpu.matmul %548, %555, %cst_367 {dimension_numbers = #tpu.dot_dimension_numbers<[1], [1], [0], [0], [0, 0, 1, 0], [], []>} : vector<16x8xf32>, vector<16x8xf32>, vector<16x16xf32> -> vector<16x16xf32>
    %cst_368 = arith.constant 0.353553385 : f32
    %564 = vector.broadcast %cst_368 : f32 to vector<16x16xf32>
    %565 = arith.mulf %563, %564 : vector<16x16xf32>
    %566 = arith.addf %565, %0 : vector<16x16xf32>
    %cst_369 = arith.constant dense<0xFF800000> : vector<16xf32>
    %567 = vector.multi_reduction <maximumf>, %566, %cst_369 [1] : vector<16x16xf32> to vector<16xf32>
    %568 = vector.shape_cast %567 : vector<16xf32> to vector<16x1xf32>
    %569 = vector.broadcast %568 : vector<16x1xf32> to vector<16x16xf32>
    %570 = arith.subf %566, %569 : vector<16x16xf32>
    %571 = math.exp %570 : vector<16x16xf32>
    %cst_370 = arith.constant dense<0.000000e+00> : vector<16xf32>
    %572 = vector.multi_reduction <add>, %571, %cst_370 [1] : vector<16x16xf32> to vector<16xf32>
    %573 = vector.shape_cast %572 : vector<16xf32> to vector<16x1xf32>
    %574 = tpu.reciprocal %573 {approx = true} : vector<16x1xf32> -> vector<16x1xf32>
    %575 = vector.broadcast %574 : vector<16x1xf32> to vector<16x16xf32>
    %576 = arith.mulf %571, %575 : vector<16x16xf32>
    %cst_371 = arith.constant dense<0.000000e+00> : vector<16x8xf32>
    %577 = tpu.matmul %576, %562, %cst_371 {dimension_numbers = #tpu.dot_dimension_numbers<[1], [0], [0], [1], [0, 0, 1, 1], [], []>} : vector<16x16xf32>, vector<16x8xf32>, vector<16x8xf32> -> vector<16x8xf32>
    %c8_372 = arith.constant 8 : index
    %c0_373 = arith.constant 0 : index
    %c0_374 = arith.constant 0 : index
    %578 = vector.load %arg13[%c8_372, %c0_373, %c0_374] : memref<16x8x32xf32, #tpu.memory_space<vmem>>, vector<1x8x32xf32>
    %579 = vector.shape_cast %578 : vector<1x8x32xf32> to vector<8x32xf32>
    %cst_375 = arith.constant dense<0.000000e+00> : vector<16x32xf32>
    %580 = tpu.matmul %577, %579, %cst_375 {dimension_numbers = #tpu.dot_dimension_numbers<[1], [0], [0], [1], [0, 0, 1, 1], [], []>} : vector<16x8xf32>, vector<8x32xf32>, vector<16x32xf32> -> vector<16x32xf32>
    %581 = vector.broadcast %541 : vector<1x32xf32> to vector<16x32xf32>
    %582 = arith.addf %581, %580 : vector<16x32xf32>
    %c9 = arith.constant 9 : index
    %c0_376 = arith.constant 0 : index
    %c0_377 = arith.constant 0 : index
    %583 = vector.load %arg7[%c9, %c0_376, %c0_377] : memref<16x32x8xf32, #tpu.memory_space<vmem>>, vector<1x32x8xf32>
    %584 = vector.shape_cast %583 : vector<1x32x8xf32> to vector<32x8xf32>
    %cst_378 = arith.constant dense<0.000000e+00> : vector<16x8xf32>
    %585 = tpu.matmul %539, %584, %cst_378 {dimension_numbers = #tpu.dot_dimension_numbers<[1], [0], [0], [1], [0, 0, 1, 1], [], []>} : vector<16x32xf32>, vector<32x8xf32>, vector<16x8xf32> -> vector<16x8xf32>
    %c9_379 = arith.constant 9 : index
    %c0_380 = arith.constant 0 : index
    %c0_381 = arith.constant 0 : index
    %586 = vector.load %arg10[%c9_379, %c0_380, %c0_381] : memref<16x1x8xf32, #tpu.memory_space<vmem>>, vector<1x1x8xf32>
    %587 = vector.shape_cast %586 : vector<1x1x8xf32> to vector<1x8xf32>
    %588 = vector.broadcast %587 : vector<1x8xf32> to vector<16x8xf32>
    %589 = arith.addf %585, %588 : vector<16x8xf32>
    %c9_382 = arith.constant 9 : index
    %c0_383 = arith.constant 0 : index
    %c0_384 = arith.constant 0 : index
    %590 = vector.load %arg8[%c9_382, %c0_383, %c0_384] : memref<16x32x8xf32, #tpu.memory_space<vmem>>, vector<1x32x8xf32>
    %591 = vector.shape_cast %590 : vector<1x32x8xf32> to vector<32x8xf32>
    %cst_385 = arith.constant dense<0.000000e+00> : vector<16x8xf32>
    %592 = tpu.matmul %539, %591, %cst_385 {dimension_numbers = #tpu.dot_dimension_numbers<[1], [0], [0], [1], [0, 0, 1, 1], [], []>} : vector<16x32xf32>, vector<32x8xf32>, vector<16x8xf32> -> vector<16x8xf32>
    %c9_386 = arith.constant 9 : index
    %c0_387 = arith.constant 0 : index
    %c0_388 = arith.constant 0 : index
    %593 = vector.load %arg11[%c9_386, %c0_387, %c0_388] : memref<16x1x8xf32, #tpu.memory_space<vmem>>, vector<1x1x8xf32>
    %594 = vector.shape_cast %593 : vector<1x1x8xf32> to vector<1x8xf32>
    %595 = vector.broadcast %594 : vector<1x8xf32> to vector<16x8xf32>
    %596 = arith.addf %592, %595 : vector<16x8xf32>
    %c9_389 = arith.constant 9 : index
    %c0_390 = arith.constant 0 : index
    %c0_391 = arith.constant 0 : index
    %597 = vector.load %arg9[%c9_389, %c0_390, %c0_391] : memref<16x32x8xf32, #tpu.memory_space<vmem>>, vector<1x32x8xf32>
    %598 = vector.shape_cast %597 : vector<1x32x8xf32> to vector<32x8xf32>
    %cst_392 = arith.constant dense<0.000000e+00> : vector<16x8xf32>
    %599 = tpu.matmul %539, %598, %cst_392 {dimension_numbers = #tpu.dot_dimension_numbers<[1], [0], [0], [1], [0, 0, 1, 1], [], []>} : vector<16x32xf32>, vector<32x8xf32>, vector<16x8xf32> -> vector<16x8xf32>
    %c9_393 = arith.constant 9 : index
    %c0_394 = arith.constant 0 : index
    %c0_395 = arith.constant 0 : index
    %600 = vector.load %arg12[%c9_393, %c0_394, %c0_395] : memref<16x1x8xf32, #tpu.memory_space<vmem>>, vector<1x1x8xf32>
    %601 = vector.shape_cast %600 : vector<1x1x8xf32> to vector<1x8xf32>
    %602 = vector.broadcast %601 : vector<1x8xf32> to vector<16x8xf32>
    %603 = arith.addf %599, %602 : vector<16x8xf32>
    %cst_396 = arith.constant dense<0.000000e+00> : vector<16x16xf32>
    %604 = tpu.matmul %589, %596, %cst_396 {dimension_numbers = #tpu.dot_dimension_numbers<[1], [1], [0], [0], [0, 0, 1, 0], [], []>} : vector<16x8xf32>, vector<16x8xf32>, vector<16x16xf32> -> vector<16x16xf32>
    %cst_397 = arith.constant 0.353553385 : f32
    %605 = vector.broadcast %cst_397 : f32 to vector<16x16xf32>
    %606 = arith.mulf %604, %605 : vector<16x16xf32>
    %607 = arith.addf %606, %0 : vector<16x16xf32>
    %cst_398 = arith.constant dense<0xFF800000> : vector<16xf32>
    %608 = vector.multi_reduction <maximumf>, %607, %cst_398 [1] : vector<16x16xf32> to vector<16xf32>
    %609 = vector.shape_cast %608 : vector<16xf32> to vector<16x1xf32>
    %610 = vector.broadcast %609 : vector<16x1xf32> to vector<16x16xf32>
    %611 = arith.subf %607, %610 : vector<16x16xf32>
    %612 = math.exp %611 : vector<16x16xf32>
    %cst_399 = arith.constant dense<0.000000e+00> : vector<16xf32>
    %613 = vector.multi_reduction <add>, %612, %cst_399 [1] : vector<16x16xf32> to vector<16xf32>
    %614 = vector.shape_cast %613 : vector<16xf32> to vector<16x1xf32>
    %615 = tpu.reciprocal %614 {approx = true} : vector<16x1xf32> -> vector<16x1xf32>
    %616 = vector.broadcast %615 : vector<16x1xf32> to vector<16x16xf32>
    %617 = arith.mulf %612, %616 : vector<16x16xf32>
    %cst_400 = arith.constant dense<0.000000e+00> : vector<16x8xf32>
    %618 = tpu.matmul %617, %603, %cst_400 {dimension_numbers = #tpu.dot_dimension_numbers<[1], [0], [0], [1], [0, 0, 1, 1], [], []>} : vector<16x16xf32>, vector<16x8xf32>, vector<16x8xf32> -> vector<16x8xf32>
    %c9_401 = arith.constant 9 : index
    %c0_402 = arith.constant 0 : index
    %c0_403 = arith.constant 0 : index
    %619 = vector.load %arg13[%c9_401, %c0_402, %c0_403] : memref<16x8x32xf32, #tpu.memory_space<vmem>>, vector<1x8x32xf32>
    %620 = vector.shape_cast %619 : vector<1x8x32xf32> to vector<8x32xf32>
    %cst_404 = arith.constant dense<0.000000e+00> : vector<16x32xf32>
    %621 = tpu.matmul %618, %620, %cst_404 {dimension_numbers = #tpu.dot_dimension_numbers<[1], [0], [0], [1], [0, 0, 1, 1], [], []>} : vector<16x8xf32>, vector<8x32xf32>, vector<16x32xf32> -> vector<16x32xf32>
    %622 = arith.addf %582, %621 : vector<16x32xf32>
    %c10 = arith.constant 10 : index
    %c0_405 = arith.constant 0 : index
    %c0_406 = arith.constant 0 : index
    %623 = vector.load %arg7[%c10, %c0_405, %c0_406] : memref<16x32x8xf32, #tpu.memory_space<vmem>>, vector<1x32x8xf32>
    %624 = vector.shape_cast %623 : vector<1x32x8xf32> to vector<32x8xf32>
    %cst_407 = arith.constant dense<0.000000e+00> : vector<16x8xf32>
    %625 = tpu.matmul %539, %624, %cst_407 {dimension_numbers = #tpu.dot_dimension_numbers<[1], [0], [0], [1], [0, 0, 1, 1], [], []>} : vector<16x32xf32>, vector<32x8xf32>, vector<16x8xf32> -> vector<16x8xf32>
    %c10_408 = arith.constant 10 : index
    %c0_409 = arith.constant 0 : index
    %c0_410 = arith.constant 0 : index
    %626 = vector.load %arg10[%c10_408, %c0_409, %c0_410] : memref<16x1x8xf32, #tpu.memory_space<vmem>>, vector<1x1x8xf32>
    %627 = vector.shape_cast %626 : vector<1x1x8xf32> to vector<1x8xf32>
    %628 = vector.broadcast %627 : vector<1x8xf32> to vector<16x8xf32>
    %629 = arith.addf %625, %628 : vector<16x8xf32>
    %c10_411 = arith.constant 10 : index
    %c0_412 = arith.constant 0 : index
    %c0_413 = arith.constant 0 : index
    %630 = vector.load %arg8[%c10_411, %c0_412, %c0_413] : memref<16x32x8xf32, #tpu.memory_space<vmem>>, vector<1x32x8xf32>
    %631 = vector.shape_cast %630 : vector<1x32x8xf32> to vector<32x8xf32>
    %cst_414 = arith.constant dense<0.000000e+00> : vector<16x8xf32>
    %632 = tpu.matmul %539, %631, %cst_414 {dimension_numbers = #tpu.dot_dimension_numbers<[1], [0], [0], [1], [0, 0, 1, 1], [], []>} : vector<16x32xf32>, vector<32x8xf32>, vector<16x8xf32> -> vector<16x8xf32>
    %c10_415 = arith.constant 10 : index
    %c0_416 = arith.constant 0 : index
    %c0_417 = arith.constant 0 : index
    %633 = vector.load %arg11[%c10_415, %c0_416, %c0_417] : memref<16x1x8xf32, #tpu.memory_space<vmem>>, vector<1x1x8xf32>
    %634 = vector.shape_cast %633 : vector<1x1x8xf32> to vector<1x8xf32>
    %635 = vector.broadcast %634 : vector<1x8xf32> to vector<16x8xf32>
    %636 = arith.addf %632, %635 : vector<16x8xf32>
    %c10_418 = arith.constant 10 : index
    %c0_419 = arith.constant 0 : index
    %c0_420 = arith.constant 0 : index
    %637 = vector.load %arg9[%c10_418, %c0_419, %c0_420] : memref<16x32x8xf32, #tpu.memory_space<vmem>>, vector<1x32x8xf32>
    %638 = vector.shape_cast %637 : vector<1x32x8xf32> to vector<32x8xf32>
    %cst_421 = arith.constant dense<0.000000e+00> : vector<16x8xf32>
    %639 = tpu.matmul %539, %638, %cst_421 {dimension_numbers = #tpu.dot_dimension_numbers<[1], [0], [0], [1], [0, 0, 1, 1], [], []>} : vector<16x32xf32>, vector<32x8xf32>, vector<16x8xf32> -> vector<16x8xf32>
    %c10_422 = arith.constant 10 : index
    %c0_423 = arith.constant 0 : index
    %c0_424 = arith.constant 0 : index
    %640 = vector.load %arg12[%c10_422, %c0_423, %c0_424] : memref<16x1x8xf32, #tpu.memory_space<vmem>>, vector<1x1x8xf32>
    %641 = vector.shape_cast %640 : vector<1x1x8xf32> to vector<1x8xf32>
    %642 = vector.broadcast %641 : vector<1x8xf32> to vector<16x8xf32>
    %643 = arith.addf %639, %642 : vector<16x8xf32>
    %cst_425 = arith.constant dense<0.000000e+00> : vector<16x16xf32>
    %644 = tpu.matmul %629, %636, %cst_425 {dimension_numbers = #tpu.dot_dimension_numbers<[1], [1], [0], [0], [0, 0, 1, 0], [], []>} : vector<16x8xf32>, vector<16x8xf32>, vector<16x16xf32> -> vector<16x16xf32>
    %cst_426 = arith.constant 0.353553385 : f32
    %645 = vector.broadcast %cst_426 : f32 to vector<16x16xf32>
    %646 = arith.mulf %644, %645 : vector<16x16xf32>
    %647 = arith.addf %646, %0 : vector<16x16xf32>
    %cst_427 = arith.constant dense<0xFF800000> : vector<16xf32>
    %648 = vector.multi_reduction <maximumf>, %647, %cst_427 [1] : vector<16x16xf32> to vector<16xf32>
    %649 = vector.shape_cast %648 : vector<16xf32> to vector<16x1xf32>
    %650 = vector.broadcast %649 : vector<16x1xf32> to vector<16x16xf32>
    %651 = arith.subf %647, %650 : vector<16x16xf32>
    %652 = math.exp %651 : vector<16x16xf32>
    %cst_428 = arith.constant dense<0.000000e+00> : vector<16xf32>
    %653 = vector.multi_reduction <add>, %652, %cst_428 [1] : vector<16x16xf32> to vector<16xf32>
    %654 = vector.shape_cast %653 : vector<16xf32> to vector<16x1xf32>
    %655 = tpu.reciprocal %654 {approx = true} : vector<16x1xf32> -> vector<16x1xf32>
    %656 = vector.broadcast %655 : vector<16x1xf32> to vector<16x16xf32>
    %657 = arith.mulf %652, %656 : vector<16x16xf32>
    %cst_429 = arith.constant dense<0.000000e+00> : vector<16x8xf32>
    %658 = tpu.matmul %657, %643, %cst_429 {dimension_numbers = #tpu.dot_dimension_numbers<[1], [0], [0], [1], [0, 0, 1, 1], [], []>} : vector<16x16xf32>, vector<16x8xf32>, vector<16x8xf32> -> vector<16x8xf32>
    %c10_430 = arith.constant 10 : index
    %c0_431 = arith.constant 0 : index
    %c0_432 = arith.constant 0 : index
    %659 = vector.load %arg13[%c10_430, %c0_431, %c0_432] : memref<16x8x32xf32, #tpu.memory_space<vmem>>, vector<1x8x32xf32>
    %660 = vector.shape_cast %659 : vector<1x8x32xf32> to vector<8x32xf32>
    %cst_433 = arith.constant dense<0.000000e+00> : vector<16x32xf32>
    %661 = tpu.matmul %658, %660, %cst_433 {dimension_numbers = #tpu.dot_dimension_numbers<[1], [0], [0], [1], [0, 0, 1, 1], [], []>} : vector<16x8xf32>, vector<8x32xf32>, vector<16x32xf32> -> vector<16x32xf32>
    %662 = arith.addf %622, %661 : vector<16x32xf32>
    %c11 = arith.constant 11 : index
    %c0_434 = arith.constant 0 : index
    %c0_435 = arith.constant 0 : index
    %663 = vector.load %arg7[%c11, %c0_434, %c0_435] : memref<16x32x8xf32, #tpu.memory_space<vmem>>, vector<1x32x8xf32>
    %664 = vector.shape_cast %663 : vector<1x32x8xf32> to vector<32x8xf32>
    %cst_436 = arith.constant dense<0.000000e+00> : vector<16x8xf32>
    %665 = tpu.matmul %539, %664, %cst_436 {dimension_numbers = #tpu.dot_dimension_numbers<[1], [0], [0], [1], [0, 0, 1, 1], [], []>} : vector<16x32xf32>, vector<32x8xf32>, vector<16x8xf32> -> vector<16x8xf32>
    %c11_437 = arith.constant 11 : index
    %c0_438 = arith.constant 0 : index
    %c0_439 = arith.constant 0 : index
    %666 = vector.load %arg10[%c11_437, %c0_438, %c0_439] : memref<16x1x8xf32, #tpu.memory_space<vmem>>, vector<1x1x8xf32>
    %667 = vector.shape_cast %666 : vector<1x1x8xf32> to vector<1x8xf32>
    %668 = vector.broadcast %667 : vector<1x8xf32> to vector<16x8xf32>
    %669 = arith.addf %665, %668 : vector<16x8xf32>
    %c11_440 = arith.constant 11 : index
    %c0_441 = arith.constant 0 : index
    %c0_442 = arith.constant 0 : index
    %670 = vector.load %arg8[%c11_440, %c0_441, %c0_442] : memref<16x32x8xf32, #tpu.memory_space<vmem>>, vector<1x32x8xf32>
    %671 = vector.shape_cast %670 : vector<1x32x8xf32> to vector<32x8xf32>
    %cst_443 = arith.constant dense<0.000000e+00> : vector<16x8xf32>
    %672 = tpu.matmul %539, %671, %cst_443 {dimension_numbers = #tpu.dot_dimension_numbers<[1], [0], [0], [1], [0, 0, 1, 1], [], []>} : vector<16x32xf32>, vector<32x8xf32>, vector<16x8xf32> -> vector<16x8xf32>
    %c11_444 = arith.constant 11 : index
    %c0_445 = arith.constant 0 : index
    %c0_446 = arith.constant 0 : index
    %673 = vector.load %arg11[%c11_444, %c0_445, %c0_446] : memref<16x1x8xf32, #tpu.memory_space<vmem>>, vector<1x1x8xf32>
    %674 = vector.shape_cast %673 : vector<1x1x8xf32> to vector<1x8xf32>
    %675 = vector.broadcast %674 : vector<1x8xf32> to vector<16x8xf32>
    %676 = arith.addf %672, %675 : vector<16x8xf32>
    %c11_447 = arith.constant 11 : index
    %c0_448 = arith.constant 0 : index
    %c0_449 = arith.constant 0 : index
    %677 = vector.load %arg9[%c11_447, %c0_448, %c0_449] : memref<16x32x8xf32, #tpu.memory_space<vmem>>, vector<1x32x8xf32>
    %678 = vector.shape_cast %677 : vector<1x32x8xf32> to vector<32x8xf32>
    %cst_450 = arith.constant dense<0.000000e+00> : vector<16x8xf32>
    %679 = tpu.matmul %539, %678, %cst_450 {dimension_numbers = #tpu.dot_dimension_numbers<[1], [0], [0], [1], [0, 0, 1, 1], [], []>} : vector<16x32xf32>, vector<32x8xf32>, vector<16x8xf32> -> vector<16x8xf32>
    %c11_451 = arith.constant 11 : index
    %c0_452 = arith.constant 0 : index
    %c0_453 = arith.constant 0 : index
    %680 = vector.load %arg12[%c11_451, %c0_452, %c0_453] : memref<16x1x8xf32, #tpu.memory_space<vmem>>, vector<1x1x8xf32>
    %681 = vector.shape_cast %680 : vector<1x1x8xf32> to vector<1x8xf32>
    %682 = vector.broadcast %681 : vector<1x8xf32> to vector<16x8xf32>
    %683 = arith.addf %679, %682 : vector<16x8xf32>
    %cst_454 = arith.constant dense<0.000000e+00> : vector<16x16xf32>
    %684 = tpu.matmul %669, %676, %cst_454 {dimension_numbers = #tpu.dot_dimension_numbers<[1], [1], [0], [0], [0, 0, 1, 0], [], []>} : vector<16x8xf32>, vector<16x8xf32>, vector<16x16xf32> -> vector<16x16xf32>
    %cst_455 = arith.constant 0.353553385 : f32
    %685 = vector.broadcast %cst_455 : f32 to vector<16x16xf32>
    %686 = arith.mulf %684, %685 : vector<16x16xf32>
    %687 = arith.addf %686, %0 : vector<16x16xf32>
    %cst_456 = arith.constant dense<0xFF800000> : vector<16xf32>
    %688 = vector.multi_reduction <maximumf>, %687, %cst_456 [1] : vector<16x16xf32> to vector<16xf32>
    %689 = vector.shape_cast %688 : vector<16xf32> to vector<16x1xf32>
    %690 = vector.broadcast %689 : vector<16x1xf32> to vector<16x16xf32>
    %691 = arith.subf %687, %690 : vector<16x16xf32>
    %692 = math.exp %691 : vector<16x16xf32>
    %cst_457 = arith.constant dense<0.000000e+00> : vector<16xf32>
    %693 = vector.multi_reduction <add>, %692, %cst_457 [1] : vector<16x16xf32> to vector<16xf32>
    %694 = vector.shape_cast %693 : vector<16xf32> to vector<16x1xf32>
    %695 = tpu.reciprocal %694 {approx = true} : vector<16x1xf32> -> vector<16x1xf32>
    %696 = vector.broadcast %695 : vector<16x1xf32> to vector<16x16xf32>
    %697 = arith.mulf %692, %696 : vector<16x16xf32>
    %cst_458 = arith.constant dense<0.000000e+00> : vector<16x8xf32>
    %698 = tpu.matmul %697, %683, %cst_458 {dimension_numbers = #tpu.dot_dimension_numbers<[1], [0], [0], [1], [0, 0, 1, 1], [], []>} : vector<16x16xf32>, vector<16x8xf32>, vector<16x8xf32> -> vector<16x8xf32>
    %c11_459 = arith.constant 11 : index
    %c0_460 = arith.constant 0 : index
    %c0_461 = arith.constant 0 : index
    %699 = vector.load %arg13[%c11_459, %c0_460, %c0_461] : memref<16x8x32xf32, #tpu.memory_space<vmem>>, vector<1x8x32xf32>
    %700 = vector.shape_cast %699 : vector<1x8x32xf32> to vector<8x32xf32>
    %cst_462 = arith.constant dense<0.000000e+00> : vector<16x32xf32>
    %701 = tpu.matmul %698, %700, %cst_462 {dimension_numbers = #tpu.dot_dimension_numbers<[1], [0], [0], [1], [0, 0, 1, 1], [], []>} : vector<16x8xf32>, vector<8x32xf32>, vector<16x32xf32> -> vector<16x32xf32>
    %702 = arith.addf %662, %701 : vector<16x32xf32>
    %703 = arith.addf %539, %702 : vector<16x32xf32>
    %c2_463 = arith.constant 2 : index
    %c0_464 = arith.constant 0 : index
    %c0_465 = arith.constant 0 : index
    %704 = vector.load %arg15[%c2_463, %c0_464, %c0_465] : memref<4x1x32xf32, #tpu.memory_space<vmem>>, vector<1x1x32xf32>
    %705 = vector.shape_cast %704 : vector<1x1x32xf32> to vector<1x32xf32>
    %c2_466 = arith.constant 2 : index
    %c0_467 = arith.constant 0 : index
    %c0_468 = arith.constant 0 : index
    %706 = vector.load %arg16[%c2_466, %c0_467, %c0_468] : memref<4x1x32xf32, #tpu.memory_space<vmem>>, vector<1x1x32xf32>
    %707 = vector.shape_cast %706 : vector<1x1x32xf32> to vector<1x32xf32>
    %cst_469 = arith.constant dense<0.000000e+00> : vector<16xf32>
    %708 = vector.multi_reduction <add>, %703, %cst_469 [1] : vector<16x32xf32> to vector<16xf32>
    %709 = vector.shape_cast %708 : vector<16xf32> to vector<16x1xf32>
    %cst_470 = arith.constant 3.200000e+01 : f32
    %710 = vector.broadcast %cst_470 : f32 to vector<16x1xf32>
    %711 = arith.divf %709, %710 : vector<16x1xf32>
    %712 = arith.mulf %703, %703 : vector<16x32xf32>
    %cst_471 = arith.constant dense<0.000000e+00> : vector<16xf32>
    %713 = vector.multi_reduction <add>, %712, %cst_471 [1] : vector<16x32xf32> to vector<16xf32>
    %714 = vector.shape_cast %713 : vector<16xf32> to vector<16x1xf32>
    %cst_472 = arith.constant 3.200000e+01 : f32
    %715 = vector.broadcast %cst_472 : f32 to vector<16x1xf32>
    %716 = arith.divf %714, %715 : vector<16x1xf32>
    %717 = arith.mulf %711, %711 : vector<16x1xf32>
    %718 = arith.subf %716, %717 : vector<16x1xf32>
    %719 = vector.broadcast %711 : vector<16x1xf32> to vector<16x32xf32>
    %720 = arith.subf %703, %719 : vector<16x32xf32>
    %cst_473 = arith.constant 9.99999974E-6 : f32
    %721 = vector.broadcast %cst_473 : f32 to vector<16x1xf32>
    %722 = arith.addf %718, %721 : vector<16x1xf32>
    %723 = math.rsqrt %722 : vector<16x1xf32>
    %724 = vector.broadcast %723 : vector<16x1xf32> to vector<16x32xf32>
    %725 = arith.mulf %720, %724 : vector<16x32xf32>
    %726 = vector.broadcast %705 : vector<1x32xf32> to vector<16x32xf32>
    %727 = arith.mulf %725, %726 : vector<16x32xf32>
    %728 = vector.broadcast %707 : vector<1x32xf32> to vector<16x32xf32>
    %729 = arith.addf %727, %728 : vector<16x32xf32>
    %c2_474 = arith.constant 2 : index
    %c0_475 = arith.constant 0 : index
    %c0_476 = arith.constant 0 : index
    %730 = vector.load %arg17[%c2_474, %c0_475, %c0_476] : memref<4x32x32xf32, #tpu.memory_space<vmem>>, vector<1x32x32xf32>
    %731 = vector.shape_cast %730 : vector<1x32x32xf32> to vector<32x32xf32>
    %cst_477 = arith.constant dense<0.000000e+00> : vector<16x32xf32>
    %732 = tpu.matmul %729, %731, %cst_477 {dimension_numbers = #tpu.dot_dimension_numbers<[1], [0], [0], [1], [0, 0, 1, 1], [], []>} : vector<16x32xf32>, vector<32x32xf32>, vector<16x32xf32> -> vector<16x32xf32>
    %c2_478 = arith.constant 2 : index
    %c0_479 = arith.constant 0 : index
    %c0_480 = arith.constant 0 : index
    %733 = vector.load %arg18[%c2_478, %c0_479, %c0_480] : memref<4x1x32xf32, #tpu.memory_space<vmem>>, vector<1x1x32xf32>
    %734 = vector.shape_cast %733 : vector<1x1x32xf32> to vector<1x32xf32>
    %735 = vector.broadcast %734 : vector<1x32xf32> to vector<16x32xf32>
    %736 = arith.addf %732, %735 : vector<16x32xf32>
    %cst_481 = arith.constant 0.000000e+00 : f32
    %737 = vector.broadcast %cst_481 : f32 to vector<16x32xf32>
    %738 = arith.maximumf %736, %737 : vector<16x32xf32>
    %c2_482 = arith.constant 2 : index
    %c0_483 = arith.constant 0 : index
    %c0_484 = arith.constant 0 : index
    %739 = vector.load %arg19[%c2_482, %c0_483, %c0_484] : memref<4x32x32xf32, #tpu.memory_space<vmem>>, vector<1x32x32xf32>
    %740 = vector.shape_cast %739 : vector<1x32x32xf32> to vector<32x32xf32>
    %cst_485 = arith.constant dense<0.000000e+00> : vector<16x32xf32>
    %741 = tpu.matmul %738, %740, %cst_485 {dimension_numbers = #tpu.dot_dimension_numbers<[1], [0], [0], [1], [0, 0, 1, 1], [], []>} : vector<16x32xf32>, vector<32x32xf32>, vector<16x32xf32> -> vector<16x32xf32>
    %c2_486 = arith.constant 2 : index
    %c0_487 = arith.constant 0 : index
    %c0_488 = arith.constant 0 : index
    %742 = vector.load %arg20[%c2_486, %c0_487, %c0_488] : memref<4x1x32xf32, #tpu.memory_space<vmem>>, vector<1x1x32xf32>
    %743 = vector.shape_cast %742 : vector<1x1x32xf32> to vector<1x32xf32>
    %744 = vector.broadcast %743 : vector<1x32xf32> to vector<16x32xf32>
    %745 = arith.addf %741, %744 : vector<16x32xf32>
    %746 = arith.addf %729, %745 : vector<16x32xf32>
    %c2_489 = arith.constant 2 : index
    %c0_490 = arith.constant 0 : index
    %c0_491 = arith.constant 0 : index
    %747 = vector.load %arg21[%c2_489, %c0_490, %c0_491] : memref<4x1x32xf32, #tpu.memory_space<vmem>>, vector<1x1x32xf32>
    %748 = vector.shape_cast %747 : vector<1x1x32xf32> to vector<1x32xf32>
    %c2_492 = arith.constant 2 : index
    %c0_493 = arith.constant 0 : index
    %c0_494 = arith.constant 0 : index
    %749 = vector.load %arg22[%c2_492, %c0_493, %c0_494] : memref<4x1x32xf32, #tpu.memory_space<vmem>>, vector<1x1x32xf32>
    %750 = vector.shape_cast %749 : vector<1x1x32xf32> to vector<1x32xf32>
    %cst_495 = arith.constant dense<0.000000e+00> : vector<16xf32>
    %751 = vector.multi_reduction <add>, %746, %cst_495 [1] : vector<16x32xf32> to vector<16xf32>
    %752 = vector.shape_cast %751 : vector<16xf32> to vector<16x1xf32>
    %cst_496 = arith.constant 3.200000e+01 : f32
    %753 = vector.broadcast %cst_496 : f32 to vector<16x1xf32>
    %754 = arith.divf %752, %753 : vector<16x1xf32>
    %755 = arith.mulf %746, %746 : vector<16x32xf32>
    %cst_497 = arith.constant dense<0.000000e+00> : vector<16xf32>
    %756 = vector.multi_reduction <add>, %755, %cst_497 [1] : vector<16x32xf32> to vector<16xf32>
    %757 = vector.shape_cast %756 : vector<16xf32> to vector<16x1xf32>
    %cst_498 = arith.constant 3.200000e+01 : f32
    %758 = vector.broadcast %cst_498 : f32 to vector<16x1xf32>
    %759 = arith.divf %757, %758 : vector<16x1xf32>
    %760 = arith.mulf %754, %754 : vector<16x1xf32>
    %761 = arith.subf %759, %760 : vector<16x1xf32>
    %762 = vector.broadcast %754 : vector<16x1xf32> to vector<16x32xf32>
    %763 = arith.subf %746, %762 : vector<16x32xf32>
    %cst_499 = arith.constant 9.99999974E-6 : f32
    %764 = vector.broadcast %cst_499 : f32 to vector<16x1xf32>
    %765 = arith.addf %761, %764 : vector<16x1xf32>
    %766 = math.rsqrt %765 : vector<16x1xf32>
    %767 = vector.broadcast %766 : vector<16x1xf32> to vector<16x32xf32>
    %768 = arith.mulf %763, %767 : vector<16x32xf32>
    %769 = vector.broadcast %748 : vector<1x32xf32> to vector<16x32xf32>
    %770 = arith.mulf %768, %769 : vector<16x32xf32>
    %771 = vector.broadcast %750 : vector<1x32xf32> to vector<16x32xf32>
    %772 = arith.addf %770, %771 : vector<16x32xf32>
    %c3_500 = arith.constant 3 : index
    %c0_501 = arith.constant 0 : index
    %c0_502 = arith.constant 0 : index
    %773 = vector.load %arg14[%c3_500, %c0_501, %c0_502] : memref<4x1x32xf32, #tpu.memory_space<vmem>>, vector<1x1x32xf32>
    %774 = vector.shape_cast %773 : vector<1x1x32xf32> to vector<1x32xf32>
    %c12 = arith.constant 12 : index
    %c0_503 = arith.constant 0 : index
    %c0_504 = arith.constant 0 : index
    %775 = vector.load %arg7[%c12, %c0_503, %c0_504] : memref<16x32x8xf32, #tpu.memory_space<vmem>>, vector<1x32x8xf32>
    %776 = vector.shape_cast %775 : vector<1x32x8xf32> to vector<32x8xf32>
    %cst_505 = arith.constant dense<0.000000e+00> : vector<16x8xf32>
    %777 = tpu.matmul %772, %776, %cst_505 {dimension_numbers = #tpu.dot_dimension_numbers<[1], [0], [0], [1], [0, 0, 1, 1], [], []>} : vector<16x32xf32>, vector<32x8xf32>, vector<16x8xf32> -> vector<16x8xf32>
    %c12_506 = arith.constant 12 : index
    %c0_507 = arith.constant 0 : index
    %c0_508 = arith.constant 0 : index
    %778 = vector.load %arg10[%c12_506, %c0_507, %c0_508] : memref<16x1x8xf32, #tpu.memory_space<vmem>>, vector<1x1x8xf32>
    %779 = vector.shape_cast %778 : vector<1x1x8xf32> to vector<1x8xf32>
    %780 = vector.broadcast %779 : vector<1x8xf32> to vector<16x8xf32>
    %781 = arith.addf %777, %780 : vector<16x8xf32>
    %c12_509 = arith.constant 12 : index
    %c0_510 = arith.constant 0 : index
    %c0_511 = arith.constant 0 : index
    %782 = vector.load %arg8[%c12_509, %c0_510, %c0_511] : memref<16x32x8xf32, #tpu.memory_space<vmem>>, vector<1x32x8xf32>
    %783 = vector.shape_cast %782 : vector<1x32x8xf32> to vector<32x8xf32>
    %cst_512 = arith.constant dense<0.000000e+00> : vector<16x8xf32>
    %784 = tpu.matmul %772, %783, %cst_512 {dimension_numbers = #tpu.dot_dimension_numbers<[1], [0], [0], [1], [0, 0, 1, 1], [], []>} : vector<16x32xf32>, vector<32x8xf32>, vector<16x8xf32> -> vector<16x8xf32>
    %c12_513 = arith.constant 12 : index
    %c0_514 = arith.constant 0 : index
    %c0_515 = arith.constant 0 : index
    %785 = vector.load %arg11[%c12_513, %c0_514, %c0_515] : memref<16x1x8xf32, #tpu.memory_space<vmem>>, vector<1x1x8xf32>
    %786 = vector.shape_cast %785 : vector<1x1x8xf32> to vector<1x8xf32>
    %787 = vector.broadcast %786 : vector<1x8xf32> to vector<16x8xf32>
    %788 = arith.addf %784, %787 : vector<16x8xf32>
    %c12_516 = arith.constant 12 : index
    %c0_517 = arith.constant 0 : index
    %c0_518 = arith.constant 0 : index
    %789 = vector.load %arg9[%c12_516, %c0_517, %c0_518] : memref<16x32x8xf32, #tpu.memory_space<vmem>>, vector<1x32x8xf32>
    %790 = vector.shape_cast %789 : vector<1x32x8xf32> to vector<32x8xf32>
    %cst_519 = arith.constant dense<0.000000e+00> : vector<16x8xf32>
    %791 = tpu.matmul %772, %790, %cst_519 {dimension_numbers = #tpu.dot_dimension_numbers<[1], [0], [0], [1], [0, 0, 1, 1], [], []>} : vector<16x32xf32>, vector<32x8xf32>, vector<16x8xf32> -> vector<16x8xf32>
    %c12_520 = arith.constant 12 : index
    %c0_521 = arith.constant 0 : index
    %c0_522 = arith.constant 0 : index
    %792 = vector.load %arg12[%c12_520, %c0_521, %c0_522] : memref<16x1x8xf32, #tpu.memory_space<vmem>>, vector<1x1x8xf32>
    %793 = vector.shape_cast %792 : vector<1x1x8xf32> to vector<1x8xf32>
    %794 = vector.broadcast %793 : vector<1x8xf32> to vector<16x8xf32>
    %795 = arith.addf %791, %794 : vector<16x8xf32>
    %cst_523 = arith.constant dense<0.000000e+00> : vector<16x16xf32>
    %796 = tpu.matmul %781, %788, %cst_523 {dimension_numbers = #tpu.dot_dimension_numbers<[1], [1], [0], [0], [0, 0, 1, 0], [], []>} : vector<16x8xf32>, vector<16x8xf32>, vector<16x16xf32> -> vector<16x16xf32>
    %cst_524 = arith.constant 0.353553385 : f32
    %797 = vector.broadcast %cst_524 : f32 to vector<16x16xf32>
    %798 = arith.mulf %796, %797 : vector<16x16xf32>
    %799 = arith.addf %798, %0 : vector<16x16xf32>
    %cst_525 = arith.constant dense<0xFF800000> : vector<16xf32>
    %800 = vector.multi_reduction <maximumf>, %799, %cst_525 [1] : vector<16x16xf32> to vector<16xf32>
    %801 = vector.shape_cast %800 : vector<16xf32> to vector<16x1xf32>
    %802 = vector.broadcast %801 : vector<16x1xf32> to vector<16x16xf32>
    %803 = arith.subf %799, %802 : vector<16x16xf32>
    %804 = math.exp %803 : vector<16x16xf32>
    %cst_526 = arith.constant dense<0.000000e+00> : vector<16xf32>
    %805 = vector.multi_reduction <add>, %804, %cst_526 [1] : vector<16x16xf32> to vector<16xf32>
    %806 = vector.shape_cast %805 : vector<16xf32> to vector<16x1xf32>
    %807 = tpu.reciprocal %806 {approx = true} : vector<16x1xf32> -> vector<16x1xf32>
    %808 = vector.broadcast %807 : vector<16x1xf32> to vector<16x16xf32>
    %809 = arith.mulf %804, %808 : vector<16x16xf32>
    %cst_527 = arith.constant dense<0.000000e+00> : vector<16x8xf32>
    %810 = tpu.matmul %809, %795, %cst_527 {dimension_numbers = #tpu.dot_dimension_numbers<[1], [0], [0], [1], [0, 0, 1, 1], [], []>} : vector<16x16xf32>, vector<16x8xf32>, vector<16x8xf32> -> vector<16x8xf32>
    %c12_528 = arith.constant 12 : index
    %c0_529 = arith.constant 0 : index
    %c0_530 = arith.constant 0 : index
    %811 = vector.load %arg13[%c12_528, %c0_529, %c0_530] : memref<16x8x32xf32, #tpu.memory_space<vmem>>, vector<1x8x32xf32>
    %812 = vector.shape_cast %811 : vector<1x8x32xf32> to vector<8x32xf32>
    %cst_531 = arith.constant dense<0.000000e+00> : vector<16x32xf32>
    %813 = tpu.matmul %810, %812, %cst_531 {dimension_numbers = #tpu.dot_dimension_numbers<[1], [0], [0], [1], [0, 0, 1, 1], [], []>} : vector<16x8xf32>, vector<8x32xf32>, vector<16x32xf32> -> vector<16x32xf32>
    %814 = vector.broadcast %774 : vector<1x32xf32> to vector<16x32xf32>
    %815 = arith.addf %814, %813 : vector<16x32xf32>
    %c13 = arith.constant 13 : index
    %c0_532 = arith.constant 0 : index
    %c0_533 = arith.constant 0 : index
    %816 = vector.load %arg7[%c13, %c0_532, %c0_533] : memref<16x32x8xf32, #tpu.memory_space<vmem>>, vector<1x32x8xf32>
    %817 = vector.shape_cast %816 : vector<1x32x8xf32> to vector<32x8xf32>
    %cst_534 = arith.constant dense<0.000000e+00> : vector<16x8xf32>
    %818 = tpu.matmul %772, %817, %cst_534 {dimension_numbers = #tpu.dot_dimension_numbers<[1], [0], [0], [1], [0, 0, 1, 1], [], []>} : vector<16x32xf32>, vector<32x8xf32>, vector<16x8xf32> -> vector<16x8xf32>
    %c13_535 = arith.constant 13 : index
    %c0_536 = arith.constant 0 : index
    %c0_537 = arith.constant 0 : index
    %819 = vector.load %arg10[%c13_535, %c0_536, %c0_537] : memref<16x1x8xf32, #tpu.memory_space<vmem>>, vector<1x1x8xf32>
    %820 = vector.shape_cast %819 : vector<1x1x8xf32> to vector<1x8xf32>
    %821 = vector.broadcast %820 : vector<1x8xf32> to vector<16x8xf32>
    %822 = arith.addf %818, %821 : vector<16x8xf32>
    %c13_538 = arith.constant 13 : index
    %c0_539 = arith.constant 0 : index
    %c0_540 = arith.constant 0 : index
    %823 = vector.load %arg8[%c13_538, %c0_539, %c0_540] : memref<16x32x8xf32, #tpu.memory_space<vmem>>, vector<1x32x8xf32>
    %824 = vector.shape_cast %823 : vector<1x32x8xf32> to vector<32x8xf32>
    %cst_541 = arith.constant dense<0.000000e+00> : vector<16x8xf32>
    %825 = tpu.matmul %772, %824, %cst_541 {dimension_numbers = #tpu.dot_dimension_numbers<[1], [0], [0], [1], [0, 0, 1, 1], [], []>} : vector<16x32xf32>, vector<32x8xf32>, vector<16x8xf32> -> vector<16x8xf32>
    %c13_542 = arith.constant 13 : index
    %c0_543 = arith.constant 0 : index
    %c0_544 = arith.constant 0 : index
    %826 = vector.load %arg11[%c13_542, %c0_543, %c0_544] : memref<16x1x8xf32, #tpu.memory_space<vmem>>, vector<1x1x8xf32>
    %827 = vector.shape_cast %826 : vector<1x1x8xf32> to vector<1x8xf32>
    %828 = vector.broadcast %827 : vector<1x8xf32> to vector<16x8xf32>
    %829 = arith.addf %825, %828 : vector<16x8xf32>
    %c13_545 = arith.constant 13 : index
    %c0_546 = arith.constant 0 : index
    %c0_547 = arith.constant 0 : index
    %830 = vector.load %arg9[%c13_545, %c0_546, %c0_547] : memref<16x32x8xf32, #tpu.memory_space<vmem>>, vector<1x32x8xf32>
    %831 = vector.shape_cast %830 : vector<1x32x8xf32> to vector<32x8xf32>
    %cst_548 = arith.constant dense<0.000000e+00> : vector<16x8xf32>
    %832 = tpu.matmul %772, %831, %cst_548 {dimension_numbers = #tpu.dot_dimension_numbers<[1], [0], [0], [1], [0, 0, 1, 1], [], []>} : vector<16x32xf32>, vector<32x8xf32>, vector<16x8xf32> -> vector<16x8xf32>
    %c13_549 = arith.constant 13 : index
    %c0_550 = arith.constant 0 : index
    %c0_551 = arith.constant 0 : index
    %833 = vector.load %arg12[%c13_549, %c0_550, %c0_551] : memref<16x1x8xf32, #tpu.memory_space<vmem>>, vector<1x1x8xf32>
    %834 = vector.shape_cast %833 : vector<1x1x8xf32> to vector<1x8xf32>
    %835 = vector.broadcast %834 : vector<1x8xf32> to vector<16x8xf32>
    %836 = arith.addf %832, %835 : vector<16x8xf32>
    %cst_552 = arith.constant dense<0.000000e+00> : vector<16x16xf32>
    %837 = tpu.matmul %822, %829, %cst_552 {dimension_numbers = #tpu.dot_dimension_numbers<[1], [1], [0], [0], [0, 0, 1, 0], [], []>} : vector<16x8xf32>, vector<16x8xf32>, vector<16x16xf32> -> vector<16x16xf32>
    %cst_553 = arith.constant 0.353553385 : f32
    %838 = vector.broadcast %cst_553 : f32 to vector<16x16xf32>
    %839 = arith.mulf %837, %838 : vector<16x16xf32>
    %840 = arith.addf %839, %0 : vector<16x16xf32>
    %cst_554 = arith.constant dense<0xFF800000> : vector<16xf32>
    %841 = vector.multi_reduction <maximumf>, %840, %cst_554 [1] : vector<16x16xf32> to vector<16xf32>
    %842 = vector.shape_cast %841 : vector<16xf32> to vector<16x1xf32>
    %843 = vector.broadcast %842 : vector<16x1xf32> to vector<16x16xf32>
    %844 = arith.subf %840, %843 : vector<16x16xf32>
    %845 = math.exp %844 : vector<16x16xf32>
    %cst_555 = arith.constant dense<0.000000e+00> : vector<16xf32>
    %846 = vector.multi_reduction <add>, %845, %cst_555 [1] : vector<16x16xf32> to vector<16xf32>
    %847 = vector.shape_cast %846 : vector<16xf32> to vector<16x1xf32>
    %848 = tpu.reciprocal %847 {approx = true} : vector<16x1xf32> -> vector<16x1xf32>
    %849 = vector.broadcast %848 : vector<16x1xf32> to vector<16x16xf32>
    %850 = arith.mulf %845, %849 : vector<16x16xf32>
    %cst_556 = arith.constant dense<0.000000e+00> : vector<16x8xf32>
    %851 = tpu.matmul %850, %836, %cst_556 {dimension_numbers = #tpu.dot_dimension_numbers<[1], [0], [0], [1], [0, 0, 1, 1], [], []>} : vector<16x16xf32>, vector<16x8xf32>, vector<16x8xf32> -> vector<16x8xf32>
    %c13_557 = arith.constant 13 : index
    %c0_558 = arith.constant 0 : index
    %c0_559 = arith.constant 0 : index
    %852 = vector.load %arg13[%c13_557, %c0_558, %c0_559] : memref<16x8x32xf32, #tpu.memory_space<vmem>>, vector<1x8x32xf32>
    %853 = vector.shape_cast %852 : vector<1x8x32xf32> to vector<8x32xf32>
    %cst_560 = arith.constant dense<0.000000e+00> : vector<16x32xf32>
    %854 = tpu.matmul %851, %853, %cst_560 {dimension_numbers = #tpu.dot_dimension_numbers<[1], [0], [0], [1], [0, 0, 1, 1], [], []>} : vector<16x8xf32>, vector<8x32xf32>, vector<16x32xf32> -> vector<16x32xf32>
    %855 = arith.addf %815, %854 : vector<16x32xf32>
    %c14 = arith.constant 14 : index
    %c0_561 = arith.constant 0 : index
    %c0_562 = arith.constant 0 : index
    %856 = vector.load %arg7[%c14, %c0_561, %c0_562] : memref<16x32x8xf32, #tpu.memory_space<vmem>>, vector<1x32x8xf32>
    %857 = vector.shape_cast %856 : vector<1x32x8xf32> to vector<32x8xf32>
    %cst_563 = arith.constant dense<0.000000e+00> : vector<16x8xf32>
    %858 = tpu.matmul %772, %857, %cst_563 {dimension_numbers = #tpu.dot_dimension_numbers<[1], [0], [0], [1], [0, 0, 1, 1], [], []>} : vector<16x32xf32>, vector<32x8xf32>, vector<16x8xf32> -> vector<16x8xf32>
    %c14_564 = arith.constant 14 : index
    %c0_565 = arith.constant 0 : index
    %c0_566 = arith.constant 0 : index
    %859 = vector.load %arg10[%c14_564, %c0_565, %c0_566] : memref<16x1x8xf32, #tpu.memory_space<vmem>>, vector<1x1x8xf32>
    %860 = vector.shape_cast %859 : vector<1x1x8xf32> to vector<1x8xf32>
    %861 = vector.broadcast %860 : vector<1x8xf32> to vector<16x8xf32>
    %862 = arith.addf %858, %861 : vector<16x8xf32>
    %c14_567 = arith.constant 14 : index
    %c0_568 = arith.constant 0 : index
    %c0_569 = arith.constant 0 : index
    %863 = vector.load %arg8[%c14_567, %c0_568, %c0_569] : memref<16x32x8xf32, #tpu.memory_space<vmem>>, vector<1x32x8xf32>
    %864 = vector.shape_cast %863 : vector<1x32x8xf32> to vector<32x8xf32>
    %cst_570 = arith.constant dense<0.000000e+00> : vector<16x8xf32>
    %865 = tpu.matmul %772, %864, %cst_570 {dimension_numbers = #tpu.dot_dimension_numbers<[1], [0], [0], [1], [0, 0, 1, 1], [], []>} : vector<16x32xf32>, vector<32x8xf32>, vector<16x8xf32> -> vector<16x8xf32>
    %c14_571 = arith.constant 14 : index
    %c0_572 = arith.constant 0 : index
    %c0_573 = arith.constant 0 : index
    %866 = vector.load %arg11[%c14_571, %c0_572, %c0_573] : memref<16x1x8xf32, #tpu.memory_space<vmem>>, vector<1x1x8xf32>
    %867 = vector.shape_cast %866 : vector<1x1x8xf32> to vector<1x8xf32>
    %868 = vector.broadcast %867 : vector<1x8xf32> to vector<16x8xf32>
    %869 = arith.addf %865, %868 : vector<16x8xf32>
    %c14_574 = arith.constant 14 : index
    %c0_575 = arith.constant 0 : index
    %c0_576 = arith.constant 0 : index
    %870 = vector.load %arg9[%c14_574, %c0_575, %c0_576] : memref<16x32x8xf32, #tpu.memory_space<vmem>>, vector<1x32x8xf32>
    %871 = vector.shape_cast %870 : vector<1x32x8xf32> to vector<32x8xf32>
    %cst_577 = arith.constant dense<0.000000e+00> : vector<16x8xf32>
    %872 = tpu.matmul %772, %871, %cst_577 {dimension_numbers = #tpu.dot_dimension_numbers<[1], [0], [0], [1], [0, 0, 1, 1], [], []>} : vector<16x32xf32>, vector<32x8xf32>, vector<16x8xf32> -> vector<16x8xf32>
    %c14_578 = arith.constant 14 : index
    %c0_579 = arith.constant 0 : index
    %c0_580 = arith.constant 0 : index
    %873 = vector.load %arg12[%c14_578, %c0_579, %c0_580] : memref<16x1x8xf32, #tpu.memory_space<vmem>>, vector<1x1x8xf32>
    %874 = vector.shape_cast %873 : vector<1x1x8xf32> to vector<1x8xf32>
    %875 = vector.broadcast %874 : vector<1x8xf32> to vector<16x8xf32>
    %876 = arith.addf %872, %875 : vector<16x8xf32>
    %cst_581 = arith.constant dense<0.000000e+00> : vector<16x16xf32>
    %877 = tpu.matmul %862, %869, %cst_581 {dimension_numbers = #tpu.dot_dimension_numbers<[1], [1], [0], [0], [0, 0, 1, 0], [], []>} : vector<16x8xf32>, vector<16x8xf32>, vector<16x16xf32> -> vector<16x16xf32>
    %cst_582 = arith.constant 0.353553385 : f32
    %878 = vector.broadcast %cst_582 : f32 to vector<16x16xf32>
    %879 = arith.mulf %877, %878 : vector<16x16xf32>
    %880 = arith.addf %879, %0 : vector<16x16xf32>
    %cst_583 = arith.constant dense<0xFF800000> : vector<16xf32>
    %881 = vector.multi_reduction <maximumf>, %880, %cst_583 [1] : vector<16x16xf32> to vector<16xf32>
    %882 = vector.shape_cast %881 : vector<16xf32> to vector<16x1xf32>
    %883 = vector.broadcast %882 : vector<16x1xf32> to vector<16x16xf32>
    %884 = arith.subf %880, %883 : vector<16x16xf32>
    %885 = math.exp %884 : vector<16x16xf32>
    %cst_584 = arith.constant dense<0.000000e+00> : vector<16xf32>
    %886 = vector.multi_reduction <add>, %885, %cst_584 [1] : vector<16x16xf32> to vector<16xf32>
    %887 = vector.shape_cast %886 : vector<16xf32> to vector<16x1xf32>
    %888 = tpu.reciprocal %887 {approx = true} : vector<16x1xf32> -> vector<16x1xf32>
    %889 = vector.broadcast %888 : vector<16x1xf32> to vector<16x16xf32>
    %890 = arith.mulf %885, %889 : vector<16x16xf32>
    %cst_585 = arith.constant dense<0.000000e+00> : vector<16x8xf32>
    %891 = tpu.matmul %890, %876, %cst_585 {dimension_numbers = #tpu.dot_dimension_numbers<[1], [0], [0], [1], [0, 0, 1, 1], [], []>} : vector<16x16xf32>, vector<16x8xf32>, vector<16x8xf32> -> vector<16x8xf32>
    %c14_586 = arith.constant 14 : index
    %c0_587 = arith.constant 0 : index
    %c0_588 = arith.constant 0 : index
    %892 = vector.load %arg13[%c14_586, %c0_587, %c0_588] : memref<16x8x32xf32, #tpu.memory_space<vmem>>, vector<1x8x32xf32>
    %893 = vector.shape_cast %892 : vector<1x8x32xf32> to vector<8x32xf32>
    %cst_589 = arith.constant dense<0.000000e+00> : vector<16x32xf32>
    %894 = tpu.matmul %891, %893, %cst_589 {dimension_numbers = #tpu.dot_dimension_numbers<[1], [0], [0], [1], [0, 0, 1, 1], [], []>} : vector<16x8xf32>, vector<8x32xf32>, vector<16x32xf32> -> vector<16x32xf32>
    %895 = arith.addf %855, %894 : vector<16x32xf32>
    %c15 = arith.constant 15 : index
    %c0_590 = arith.constant 0 : index
    %c0_591 = arith.constant 0 : index
    %896 = vector.load %arg7[%c15, %c0_590, %c0_591] : memref<16x32x8xf32, #tpu.memory_space<vmem>>, vector<1x32x8xf32>
    %897 = vector.shape_cast %896 : vector<1x32x8xf32> to vector<32x8xf32>
    %cst_592 = arith.constant dense<0.000000e+00> : vector<16x8xf32>
    %898 = tpu.matmul %772, %897, %cst_592 {dimension_numbers = #tpu.dot_dimension_numbers<[1], [0], [0], [1], [0, 0, 1, 1], [], []>} : vector<16x32xf32>, vector<32x8xf32>, vector<16x8xf32> -> vector<16x8xf32>
    %c15_593 = arith.constant 15 : index
    %c0_594 = arith.constant 0 : index
    %c0_595 = arith.constant 0 : index
    %899 = vector.load %arg10[%c15_593, %c0_594, %c0_595] : memref<16x1x8xf32, #tpu.memory_space<vmem>>, vector<1x1x8xf32>
    %900 = vector.shape_cast %899 : vector<1x1x8xf32> to vector<1x8xf32>
    %901 = vector.broadcast %900 : vector<1x8xf32> to vector<16x8xf32>
    %902 = arith.addf %898, %901 : vector<16x8xf32>
    %c15_596 = arith.constant 15 : index
    %c0_597 = arith.constant 0 : index
    %c0_598 = arith.constant 0 : index
    %903 = vector.load %arg8[%c15_596, %c0_597, %c0_598] : memref<16x32x8xf32, #tpu.memory_space<vmem>>, vector<1x32x8xf32>
    %904 = vector.shape_cast %903 : vector<1x32x8xf32> to vector<32x8xf32>
    %cst_599 = arith.constant dense<0.000000e+00> : vector<16x8xf32>
    %905 = tpu.matmul %772, %904, %cst_599 {dimension_numbers = #tpu.dot_dimension_numbers<[1], [0], [0], [1], [0, 0, 1, 1], [], []>} : vector<16x32xf32>, vector<32x8xf32>, vector<16x8xf32> -> vector<16x8xf32>
    %c15_600 = arith.constant 15 : index
    %c0_601 = arith.constant 0 : index
    %c0_602 = arith.constant 0 : index
    %906 = vector.load %arg11[%c15_600, %c0_601, %c0_602] : memref<16x1x8xf32, #tpu.memory_space<vmem>>, vector<1x1x8xf32>
    %907 = vector.shape_cast %906 : vector<1x1x8xf32> to vector<1x8xf32>
    %908 = vector.broadcast %907 : vector<1x8xf32> to vector<16x8xf32>
    %909 = arith.addf %905, %908 : vector<16x8xf32>
    %c15_603 = arith.constant 15 : index
    %c0_604 = arith.constant 0 : index
    %c0_605 = arith.constant 0 : index
    %910 = vector.load %arg9[%c15_603, %c0_604, %c0_605] : memref<16x32x8xf32, #tpu.memory_space<vmem>>, vector<1x32x8xf32>
    %911 = vector.shape_cast %910 : vector<1x32x8xf32> to vector<32x8xf32>
    %cst_606 = arith.constant dense<0.000000e+00> : vector<16x8xf32>
    %912 = tpu.matmul %772, %911, %cst_606 {dimension_numbers = #tpu.dot_dimension_numbers<[1], [0], [0], [1], [0, 0, 1, 1], [], []>} : vector<16x32xf32>, vector<32x8xf32>, vector<16x8xf32> -> vector<16x8xf32>
    %c15_607 = arith.constant 15 : index
    %c0_608 = arith.constant 0 : index
    %c0_609 = arith.constant 0 : index
    %913 = vector.load %arg12[%c15_607, %c0_608, %c0_609] : memref<16x1x8xf32, #tpu.memory_space<vmem>>, vector<1x1x8xf32>
    %914 = vector.shape_cast %913 : vector<1x1x8xf32> to vector<1x8xf32>
    %915 = vector.broadcast %914 : vector<1x8xf32> to vector<16x8xf32>
    %916 = arith.addf %912, %915 : vector<16x8xf32>
    %cst_610 = arith.constant dense<0.000000e+00> : vector<16x16xf32>
    %917 = tpu.matmul %902, %909, %cst_610 {dimension_numbers = #tpu.dot_dimension_numbers<[1], [1], [0], [0], [0, 0, 1, 0], [], []>} : vector<16x8xf32>, vector<16x8xf32>, vector<16x16xf32> -> vector<16x16xf32>
    %cst_611 = arith.constant 0.353553385 : f32
    %918 = vector.broadcast %cst_611 : f32 to vector<16x16xf32>
    %919 = arith.mulf %917, %918 : vector<16x16xf32>
    %920 = arith.addf %919, %0 : vector<16x16xf32>
    %cst_612 = arith.constant dense<0xFF800000> : vector<16xf32>
    %921 = vector.multi_reduction <maximumf>, %920, %cst_612 [1] : vector<16x16xf32> to vector<16xf32>
    %922 = vector.shape_cast %921 : vector<16xf32> to vector<16x1xf32>
    %923 = vector.broadcast %922 : vector<16x1xf32> to vector<16x16xf32>
    %924 = arith.subf %920, %923 : vector<16x16xf32>
    %925 = math.exp %924 : vector<16x16xf32>
    %cst_613 = arith.constant dense<0.000000e+00> : vector<16xf32>
    %926 = vector.multi_reduction <add>, %925, %cst_613 [1] : vector<16x16xf32> to vector<16xf32>
    %927 = vector.shape_cast %926 : vector<16xf32> to vector<16x1xf32>
    %928 = tpu.reciprocal %927 {approx = true} : vector<16x1xf32> -> vector<16x1xf32>
    %929 = vector.broadcast %928 : vector<16x1xf32> to vector<16x16xf32>
    %930 = arith.mulf %925, %929 : vector<16x16xf32>
    %cst_614 = arith.constant dense<0.000000e+00> : vector<16x8xf32>
    %931 = tpu.matmul %930, %916, %cst_614 {dimension_numbers = #tpu.dot_dimension_numbers<[1], [0], [0], [1], [0, 0, 1, 1], [], []>} : vector<16x16xf32>, vector<16x8xf32>, vector<16x8xf32> -> vector<16x8xf32>
    %c15_615 = arith.constant 15 : index
    %c0_616 = arith.constant 0 : index
    %c0_617 = arith.constant 0 : index
    %932 = vector.load %arg13[%c15_615, %c0_616, %c0_617] : memref<16x8x32xf32, #tpu.memory_space<vmem>>, vector<1x8x32xf32>
    %933 = vector.shape_cast %932 : vector<1x8x32xf32> to vector<8x32xf32>
    %cst_618 = arith.constant dense<0.000000e+00> : vector<16x32xf32>
    %934 = tpu.matmul %931, %933, %cst_618 {dimension_numbers = #tpu.dot_dimension_numbers<[1], [0], [0], [1], [0, 0, 1, 1], [], []>} : vector<16x8xf32>, vector<8x32xf32>, vector<16x32xf32> -> vector<16x32xf32>
    %935 = arith.addf %895, %934 : vector<16x32xf32>
    %936 = arith.addf %772, %935 : vector<16x32xf32>
    %c3_619 = arith.constant 3 : index
    %c0_620 = arith.constant 0 : index
    %c0_621 = arith.constant 0 : index
    %937 = vector.load %arg15[%c3_619, %c0_620, %c0_621] : memref<4x1x32xf32, #tpu.memory_space<vmem>>, vector<1x1x32xf32>
    %938 = vector.shape_cast %937 : vector<1x1x32xf32> to vector<1x32xf32>
    %c3_622 = arith.constant 3 : index
    %c0_623 = arith.constant 0 : index
    %c0_624 = arith.constant 0 : index
    %939 = vector.load %arg16[%c3_622, %c0_623, %c0_624] : memref<4x1x32xf32, #tpu.memory_space<vmem>>, vector<1x1x32xf32>
    %940 = vector.shape_cast %939 : vector<1x1x32xf32> to vector<1x32xf32>
    %cst_625 = arith.constant dense<0.000000e+00> : vector<16xf32>
    %941 = vector.multi_reduction <add>, %936, %cst_625 [1] : vector<16x32xf32> to vector<16xf32>
    %942 = vector.shape_cast %941 : vector<16xf32> to vector<16x1xf32>
    %cst_626 = arith.constant 3.200000e+01 : f32
    %943 = vector.broadcast %cst_626 : f32 to vector<16x1xf32>
    %944 = arith.divf %942, %943 : vector<16x1xf32>
    %945 = arith.mulf %936, %936 : vector<16x32xf32>
    %cst_627 = arith.constant dense<0.000000e+00> : vector<16xf32>
    %946 = vector.multi_reduction <add>, %945, %cst_627 [1] : vector<16x32xf32> to vector<16xf32>
    %947 = vector.shape_cast %946 : vector<16xf32> to vector<16x1xf32>
    %cst_628 = arith.constant 3.200000e+01 : f32
    %948 = vector.broadcast %cst_628 : f32 to vector<16x1xf32>
    %949 = arith.divf %947, %948 : vector<16x1xf32>
    %950 = arith.mulf %944, %944 : vector<16x1xf32>
    %951 = arith.subf %949, %950 : vector<16x1xf32>
    %952 = vector.broadcast %944 : vector<16x1xf32> to vector<16x32xf32>
    %953 = arith.subf %936, %952 : vector<16x32xf32>
    %cst_629 = arith.constant 9.99999974E-6 : f32
    %954 = vector.broadcast %cst_629 : f32 to vector<16x1xf32>
    %955 = arith.addf %951, %954 : vector<16x1xf32>
    %956 = math.rsqrt %955 : vector<16x1xf32>
    %957 = vector.broadcast %956 : vector<16x1xf32> to vector<16x32xf32>
    %958 = arith.mulf %953, %957 : vector<16x32xf32>
    %959 = vector.broadcast %938 : vector<1x32xf32> to vector<16x32xf32>
    %960 = arith.mulf %958, %959 : vector<16x32xf32>
    %961 = vector.broadcast %940 : vector<1x32xf32> to vector<16x32xf32>
    %962 = arith.addf %960, %961 : vector<16x32xf32>
    %c3_630 = arith.constant 3 : index
    %c0_631 = arith.constant 0 : index
    %c0_632 = arith.constant 0 : index
    %963 = vector.load %arg17[%c3_630, %c0_631, %c0_632] : memref<4x32x32xf32, #tpu.memory_space<vmem>>, vector<1x32x32xf32>
    %964 = vector.shape_cast %963 : vector<1x32x32xf32> to vector<32x32xf32>
    %cst_633 = arith.constant dense<0.000000e+00> : vector<16x32xf32>
    %965 = tpu.matmul %962, %964, %cst_633 {dimension_numbers = #tpu.dot_dimension_numbers<[1], [0], [0], [1], [0, 0, 1, 1], [], []>} : vector<16x32xf32>, vector<32x32xf32>, vector<16x32xf32> -> vector<16x32xf32>
    %c3_634 = arith.constant 3 : index
    %c0_635 = arith.constant 0 : index
    %c0_636 = arith.constant 0 : index
    %966 = vector.load %arg18[%c3_634, %c0_635, %c0_636] : memref<4x1x32xf32, #tpu.memory_space<vmem>>, vector<1x1x32xf32>
    %967 = vector.shape_cast %966 : vector<1x1x32xf32> to vector<1x32xf32>
    %968 = vector.broadcast %967 : vector<1x32xf32> to vector<16x32xf32>
    %969 = arith.addf %965, %968 : vector<16x32xf32>
    %cst_637 = arith.constant 0.000000e+00 : f32
    %970 = vector.broadcast %cst_637 : f32 to vector<16x32xf32>
    %971 = arith.maximumf %969, %970 : vector<16x32xf32>
    %c3_638 = arith.constant 3 : index
    %c0_639 = arith.constant 0 : index
    %c0_640 = arith.constant 0 : index
    %972 = vector.load %arg19[%c3_638, %c0_639, %c0_640] : memref<4x32x32xf32, #tpu.memory_space<vmem>>, vector<1x32x32xf32>
    %973 = vector.shape_cast %972 : vector<1x32x32xf32> to vector<32x32xf32>
    %cst_641 = arith.constant dense<0.000000e+00> : vector<16x32xf32>
    %974 = tpu.matmul %971, %973, %cst_641 {dimension_numbers = #tpu.dot_dimension_numbers<[1], [0], [0], [1], [0, 0, 1, 1], [], []>} : vector<16x32xf32>, vector<32x32xf32>, vector<16x32xf32> -> vector<16x32xf32>
    %c3_642 = arith.constant 3 : index
    %c0_643 = arith.constant 0 : index
    %c0_644 = arith.constant 0 : index
    %975 = vector.load %arg20[%c3_642, %c0_643, %c0_644] : memref<4x1x32xf32, #tpu.memory_space<vmem>>, vector<1x1x32xf32>
    %976 = vector.shape_cast %975 : vector<1x1x32xf32> to vector<1x32xf32>
    %977 = vector.broadcast %976 : vector<1x32xf32> to vector<16x32xf32>
    %978 = arith.addf %974, %977 : vector<16x32xf32>
    %979 = arith.addf %962, %978 : vector<16x32xf32>
    %c3_645 = arith.constant 3 : index
    %c0_646 = arith.constant 0 : index
    %c0_647 = arith.constant 0 : index
    %980 = vector.load %arg21[%c3_645, %c0_646, %c0_647] : memref<4x1x32xf32, #tpu.memory_space<vmem>>, vector<1x1x32xf32>
    %981 = vector.shape_cast %980 : vector<1x1x32xf32> to vector<1x32xf32>
    %c3_648 = arith.constant 3 : index
    %c0_649 = arith.constant 0 : index
    %c0_650 = arith.constant 0 : index
    %982 = vector.load %arg22[%c3_648, %c0_649, %c0_650] : memref<4x1x32xf32, #tpu.memory_space<vmem>>, vector<1x1x32xf32>
    %983 = vector.shape_cast %982 : vector<1x1x32xf32> to vector<1x32xf32>
    %cst_651 = arith.constant dense<0.000000e+00> : vector<16xf32>
    %984 = vector.multi_reduction <add>, %979, %cst_651 [1] : vector<16x32xf32> to vector<16xf32>
    %985 = vector.shape_cast %984 : vector<16xf32> to vector<16x1xf32>
    %cst_652 = arith.constant 3.200000e+01 : f32
    %986 = vector.broadcast %cst_652 : f32 to vector<16x1xf32>
    %987 = arith.divf %985, %986 : vector<16x1xf32>
    %988 = arith.mulf %979, %979 : vector<16x32xf32>
    %cst_653 = arith.constant dense<0.000000e+00> : vector<16xf32>
    %989 = vector.multi_reduction <add>, %988, %cst_653 [1] : vector<16x32xf32> to vector<16xf32>
    %990 = vector.shape_cast %989 : vector<16xf32> to vector<16x1xf32>
    %cst_654 = arith.constant 3.200000e+01 : f32
    %991 = vector.broadcast %cst_654 : f32 to vector<16x1xf32>
    %992 = arith.divf %990, %991 : vector<16x1xf32>
    %993 = arith.mulf %987, %987 : vector<16x1xf32>
    %994 = arith.subf %992, %993 : vector<16x1xf32>
    %995 = vector.broadcast %987 : vector<16x1xf32> to vector<16x32xf32>
    %996 = arith.subf %979, %995 : vector<16x32xf32>
    %cst_655 = arith.constant 9.99999974E-6 : f32
    %997 = vector.broadcast %cst_655 : f32 to vector<16x1xf32>
    %998 = arith.addf %994, %997 : vector<16x1xf32>
    %999 = math.rsqrt %998 : vector<16x1xf32>
    %1000 = vector.broadcast %999 : vector<16x1xf32> to vector<16x32xf32>
    %1001 = arith.mulf %996, %1000 : vector<16x32xf32>
    %1002 = vector.broadcast %981 : vector<1x32xf32> to vector<16x32xf32>
    %1003 = arith.mulf %1001, %1002 : vector<16x32xf32>
    %1004 = vector.broadcast %983 : vector<1x32xf32> to vector<16x32xf32>
    %1005 = arith.addf %1003, %1004 : vector<16x32xf32>
    %c0_656 = arith.constant 0 : index
    %c0_657 = arith.constant 0 : index
    %1006 = vector.load %arg25[%c0_656, %c0_657] : memref<32x16xf32, #tpu.memory_space<vmem>>, vector<32x16xf32>
    %cst_658 = arith.constant dense<0.000000e+00> : vector<16x16xf32>
    %1007 = tpu.matmul %1005, %1006, %cst_658 {dimension_numbers = #tpu.dot_dimension_numbers<[1], [0], [0], [1], [0, 0, 1, 1], [], []>} : vector<16x32xf32>, vector<32x16xf32>, vector<16x16xf32> -> vector<16x16xf32>
    %c0_659 = arith.constant 0 : index
    %c0_660 = arith.constant 0 : index
    %1008 = vector.load %arg26[%c0_659, %c0_660] : memref<1x16xf32, #tpu.memory_space<vmem>>, vector<1x16xf32>
    %1009 = vector.broadcast %1008 : vector<1x16xf32> to vector<16x16xf32>
    %1010 = arith.addf %1007, %1009 : vector<16x16xf32>
    %1011 = arith.sitofp %498 : vector<16x1xi32> to vector<16x1xf32>
    %1012 = vector.shape_cast %1011 : vector<16x1xf32> to vector<16x1xf32>
    %1013 = vector.broadcast %1012 : vector<16x1xf32> to vector<16x48xf32>
    %1014 = tpu.concatenate %1010, %538, %503, %1013 in 1 : vector<16x16xf32>, vector<16x32xf32>, vector<16x32xf32>, vector<16x48xf32> -> vector<16x128xf32>
    %c0_661 = arith.constant 0 : index
    %c0_662 = arith.constant 0 : index
    %1015 = vector.load %arg27[%c0_661, %c0_662] : memref<16x128xf32, #tpu.memory_space<vmem>>, vector<16x128xf32>
    tpu.vector_store %arg27[%c0_661, %c0_662], %1014 {strides = array<i32>} : memref<16x128xf32, #tpu.memory_space<vmem>>, vector<16x128xf32>,
    return
  }
}

</mosaic_0001>

<bundles_post_ra>
// kernel: evolution_dynamics_forward.1
= control target key start
LH: loop header
LB: loop body
LE: loop exit
PB: predicated region body
PF: predicated region fallthrough
CT: control target
= control target key end

     0   :  { %vm97_vm0 = vcmask 130048   ;;  %vm137_vm1 = vcmask 261120   ;;  %vm269_vm2 = vcmask 64512   ;;  %s7679_s3 = inlined_call_operand.vmem [shape: f32[16,32], index: 3, kind: input, shape index: {}]   ;;  %s7680_s0 = inlined_call_operand.vmem [shape: f32[16,16], index: 0, kind: input, shape index: {}]   ;;  %s7681_s5 = inlined_call_operand.vmem [shape: f32[32,32], index: 5, kind: input, shape index: {}]   ;;  %s7682_s4 = inlined_call_operand.vmem [shape: f32[1,32], index: 4, kind: input, shape index: {}]   ;;  %s7683_s6 = inlined_call_operand.vmem [shape: f32[1,32], index: 6, kind: input, shape index: {}]   ;;  %s7684_s7 = inlined_call_operand.vmem [shape: f32[16,32,8], index: 7, kind: input, shape index: {}]   ;;  %s7685_s8 = inlined_call_operand.vmem [shape: f32[16,32,8], index: 8, kind: input, shape index: {}]   ;;  %s7686_s9 = inlined_call_operand.vmem [shape: f32[16,32,8], index: 9, kind: input, shape index: {}]   ;;  %s7687_s12 = inlined_call_operand.vmem [shape: f32[16,1,8], index: 12, kind: input, shape index: {}]   ;;  %s7688_s1 = inlined_call_operand.vmem [shape: f32[8,32], index: 1, kind: input, shape index: {}]   ;;  %s7689_s10 = inlined_call_operand.vmem [shape: f32[16,1,8], index: 10, kind: input, shape index: {}]   ;;  %s7690_s11 = inlined_call_operand.vmem [shape: f32[16,1,8], index: 11, kind: input, shape index: {}]   ;;  %s7691_s13 = inlined_call_operand.vmem [shape: f32[16,8,32], index: 13, kind: input, shape index: {}]   ;;  %s7692_s2 = inlined_call_operand.vmem [shape: f32[16,16], index: 2, kind: input, shape index: {}]   ;;  %s7693_s14 = inlined_call_operand.vmem [shape: f32[4,1,32], index: 14, kind: input, shape index: {}]   ;;  %s7694_s15 = inlined_call_operand.vmem [shape: f32[4,1,32], index: 15, kind: input, shape index: {}]   ;;  %s7695_s16 = inlined_call_operand.vmem [shape: f32[4,1,32], index: 16, kind: input, shape index: {}]   ;;  %s7696_s18 = inlined_call_operand.vmem [shape: f32[4,1,32], index: 18, kind: input, shape index: {}]   ;;  %s7697_s17 = inlined_call_operand.vmem [shape: f32[4,32,32], index: 17, kind: input, shape index: {}]   ;;  %s7698_s19 = inlined_call_operand.vmem [shape: f32[4,32,32], index: 19, kind: input, shape index: {}]   ;;  %s7699_s20 = inlined_call_operand.vmem [shape: f32[4,1,32], index: 20, kind: input, shape index: {}]   ;;  %s7700_s21 = inlined_call_operand.vmem [shape: f32[4,1,32], index: 21, kind: input, shape index: {}]   ;;  %s7701_s22 = inlined_call_operand.vmem [shape: f32[4,1,32], index: 22, kind: input, shape index: {}]   ;;  %s7702_s23 = inlined_call_operand.vmem [shape: f32[64,32], index: 23, kind: input, shape index: {}]   ;;  %s7703_s24 = inlined_call_operand.vmem [shape: f32[1,64], index: 24, kind: input, shape index: {}]   ;;  %s7704_s26 = inlined_call_operand.vmem [shape: f32[1,16], index: 26, kind: input, shape index: {}]   ;;  %s7705_s25 = inlined_call_operand.vmem [shape: f32[32,16], index: 25, kind: input, shape index: {}]   ;;  %s7706_s27 = inlined_call_operand.vmem [shape: f32[16,128], index: 27, kind: output, shape index: {}]  }
   0x1   :  { %7718 = sst [smem:[#allocation2_spill]] %s7679_s3  ;;  %v360_v58 = vld [vmem:[%s7691_s13] sm:$0xff] }
   0x2   :  { %7719 = sst [smem:[#allocation3_spill]] %s7680_s0  ;;  %v6027_v60 = vld [vmem:[%s7692_s2] sm:$0xff] }
   0x3   :  { %7720 = sst [smem:[#allocation4_spill]] %s7681_s5 }
   0x4   :  { %7721 = sst [smem:[#allocation5_spill]] %s7682_s4 }
   0x5   :  { %7722 = sst [smem:[#allocation6_spill]] %s7683_s6 }
   0x6   :  { %7723 = sst [smem:[#allocation7_spill]] %s7684_s7 }
   0x7   :  { %7724 = sst [smem:[#allocation8_spill]] %s7685_s8 }
   0x8   :  { %7725 = sst [smem:[#allocation9_spill]] %s7686_s9 }
   0x9   :  { %7726 = sst [smem:[#allocation10_spill]] %s7687_s12 }
   0xa   :  { %7727 = sst [smem:[#allocation11_spill]] %s7688_s1 }
   0xb   :  { %7728 = sst [smem:[#allocation12_spill]] %s7689_s10 }
   0xc   :  { %7729 = sst [smem:[#allocation13_spill]] %s7690_s11 }
   0xd   :  { %7730 = sst [smem:[#allocation14_spill]] %s7704_s26 }
   0xe   :  { %7731 = sst [smem:[#allocation15_spill]] %s7706_s27 }
   0xf   :  { %s7732_s12 = sld [smem:[#allocation2_spill]] }
  0x10   :  { %s7733_s0 = sld [smem:[#allocation3_spill]] }
  0x11   :  { %s7734_s11 = sld [smem:[#allocation4_spill]] }
  0x12   :  { %s7735_s28 = sld [smem:[#allocation7_spill]] }
  0x13   :  { %s7736_s29 = sld [smem:[#allocation8_spill]] }
  0x14   :  { %s7737_s4 = sld [smem:[#allocation9_spill]] }
  0x15   :  { %v92_v0 = vld [vmem:[%s7732_s12 + $0x8] sm:$0xff]  ;;  %v91_v1 = vld [vmem:[%s7732_s12] sm:$0xff]  ;;  %s7739_s7 = sld [smem:[#allocation6_spill]] }
  0x16   :  { %v90_v2 = vld [vmem:[%s7733_s0 + $0x8] sm:$0xff]  ;;  %5472 = vmatpush.msra.mxu3 %v92_v0  ;;  %118 = vmatpush.msra.mxu0 %v92_v0  ;;  %v89_v3 = vld [vmem:[%s7733_s0] sm:$0xff]  ;;  %s7740_s3 = sld [smem:[#allocation11_spill]] }
  0x17   :  { %v132_v4 = vld [vmem:[%s7734_s11 + $0x18] sm:$0xff]  ;;  %v131_v5 = vld [vmem:[%s7734_s11 + $0x10] sm:$0xff]  ;;  %v130_v6 = vld [vmem:[%s7734_s11 + $0x8] sm:$0xff]  ;;  %s7741_s9 = sld [smem:[#allocation10_spill]] }
  0x18   :  { %156 = vmatpush.msra.mxu1 %v132_v4  ;;  %5474 = vmatpush.msra.mxu2 %v132_v4  ;;  %v129_v7 = vld [vmem:[%s7734_s11] sm:$0xff]  ;;  %v173_v8 = vld [vmem:[%s7735_s28 + $0x18] sm:$0xff]  ;;  %s7738_s11 = sld [smem:[#allocation5_spill]]  ;;  %v172_v18 = vld [vmem:[%s7735_s28 + $0x10] sm:$0xff] }
  0x19   :  { %5473 = vmatpush.msra.mxu3 %v91_v1  ;;  %119 = vmatpush.msra.mxu0 %v91_v1  ;;  %v210_v9 = vld [vmem:[%s7736_s29 + $0x18] sm:$0xff]  ;;  %v209_v19 = vld [vmem:[%s7736_s29 + $0x10] sm:$0xff]  ;;  %v171_v21 = vld [vmem:[%s7735_s28 + $0x8] sm:$0xff]  ;;  %s7742_s12 = sld [smem:[#allocation13_spill]] }
  0x1a   :  { %4928 = vmatmul.msk.f32.vlgmr.msra.gmra.mxu3 %vm97_vm0, %v90_v2  ;;  %4927 = vmatmul.msk.f32.vlgmr.msra.gmra.mxu0 %vm97_vm0, %v89_v3  ;;  %v241_v10 = vld [vmem:[%s7737_s4 + $0x18] sm:$0xff]  ;;  %v240_v20 = vld [vmem:[%s7737_s4 + $0x10] sm:$0xff]  ;;  %v208_v22 = vld [vmem:[%s7736_s29 + $0x8] sm:$0xff] }
  0x1b   :  { %157 = vmatpush.msra.mxu1 %v131_v5  ;;  %5475 = vmatpush.msra.mxu2 %v131_v5  ;;  %v239_v23 = vld [vmem:[%s7737_s4 + $0x8] sm:$0xff]  ;;  %v170_v24 = vld [vmem:[%s7735_s28] sm:$0xff]  ;;  %v4948_v27 = vld [vmem:[%s7735_s28 + $0x38] sm:$0xff] }
  0x1c   :  { %227 = vmatpush.msrb.mxu3 %v210_v9  ;;  %258 = vmatpush.msrb.mxu0 %v241_v10  ;;  %v207_v25 = vld [vmem:[%s7736_s29] sm:$0xff]  ;;  %v4947_v28 = vld [vmem:[%s7735_s28 + $0x30] sm:$0xff]  ;;  %v4946_v29 = vld [vmem:[%s7735_s28 + $0x28] sm:$0xff] }
  0x1d   :  { %158 = vmatpush.msra.mxu1 %v130_v6  ;;  %5476 = vmatpush.msra.mxu2 %v130_v6  ;;  %v238_v26 = vld [vmem:[%s7737_s4] sm:$0xff]  ;;  %v4955_v51 = vld [vmem:[%s7736_s29 + $0x38] sm:$0xff]  ;;  %v4954_v53 = vld [vmem:[%s7736_s29 + $0x30] sm:$0xff] }
  0x1e   :  { %v5482_v11 = vld [vmem:[%s7738_s11] ss:$0 sm:$0xff]  ;;  %228 = vmatpush.msrb.mxu3 %v209_v19  ;;  %259 = vmatpush.msrb.mxu0 %v240_v20  ;;  %v4953_v54 = vld [vmem:[%s7736_s29 + $0x28] sm:$0xff]  ;;  %v4962_v20 = vld [vmem:[%s7737_s4 + $0x38] sm:$0xff] }
  0x1f   :  { %159 = vmatpush.msra.mxu1 %v129_v7  ;;  %5477 = vmatpush.msra.mxu2 %v129_v7  ;;  %v4945_v30 = vld [vmem:[%s7735_s28 + $0x20] sm:$0xff]  ;;  %v6034_v1 = vld [vmem:[%s7692_s2 + $0x8] sm:$0xff] }
  0x20   :  { %229 = vmatpush.msrb.mxu3 %v208_v22  ;;  %260 = vmatpush.msrb.mxu0 %v239_v23  ;;  %v5483_v31 = vld [vmem:[%s7739_s7] ss:$0 sm:$0xff]  ;;  %s7743_s7 = sld [smem:[#allocation12_spill]]  ;;  %v5488_v6 = vld [vmem:[%s7742_s12 + $0x1] ss:$0 sm:$0xff]  ;;  %v4960_v22 = vld [vmem:[%s7737_s4 + $0x28] sm:$0xff] }
  0x21   :  { %196 = vmatpush.msrb.mxu2 %v173_v8  ;;  %v88_v32 = vld [vmem:[%s7740_s3] sm:$0xff] }
  0x22   :  { %230 = vmatpush.msrb.mxu3 %v207_v25  ;;  %261 = vmatpush.msrb.mxu0 %v238_v26  ;;  %v5484_v41 = vld [vmem:[%s7741_s9] ss:$0 sm:$0xff] }
  0x23   :  { %197 = vmatpush.msrb.mxu2 %v172_v18  ;;  %v5486_v45 = vld [vmem:[%s7742_s12] ss:$0 sm:$0xff] }
  0x24   :  { %417 = vmatpush.msra.mxu0 %v4948_v27  ;;  %v4952_v55 = vld [vmem:[%s7736_s29 + $0x20] sm:$0xff]  ;;  %382 = vmatpush.msra.mxu3 %v360_v58 }
  0x25   :  { %198 = vmatpush.msrb.mxu2 %v171_v21  ;;  %v4961_v21 = vld [vmem:[%s7737_s4 + $0x30] sm:$0xff]  ;;  %v4959_v23 = vld [vmem:[%s7737_s4 + $0x20] sm:$0xff] }
  0x26   :  { %418 = vmatpush.msra.mxu0 %v4947_v28  ;;  %v5485_v49 = vld [vmem:[%s7743_s7] ss:$0 sm:$0xff]  ;;  %v4978_v28 = vld [vmem:[%s7735_s28 + $0x58] sm:$0xff] }
  0x27   :  { %199 = vmatpush.msrb.mxu2 %v170_v24 }
  0x28   :  { %419 = vmatpush.msra.mxu0 %v4946_v29  ;;  %v4977_v29 = vld [vmem:[%s7735_s28 + $0x50] sm:$0xff] }
  0x2a   :  { %420 = vmatpush.msra.mxu0 %v4945_v30  ;;  %v4976_v30 = vld [vmem:[%s7735_s28 + $0x48] sm:$0xff] }
  0x97   :  { %v121_v12 = vpop.f32.mrf.mxu0 }
  0x98   :  { %v122_v13 = vadd.f32 %v5482_v11, %v121_v12 }
  0x9a   :  { %v127_v14 = vmax.f32 %v122_v13, 0.0 }
  0x9c   :  { %4929 = vmatmul.msk.f32.vlgmr.msra.gmra.mxu1 %vm137_vm1, %v127_v14 }
  0x9d   :  { %v124_v15 = vpop.f32.mrf.mxu3 }
  0x9e   :  { %v125_v16 = vadd.f32 %v5482_v11, %v124_v15 }
  0xa0   :  { %v128_v17 = vmax.f32 %v125_v16, 0.0 }
  0xa2   :  { %4930 = vmatmul.msk.f32.vlgmr.msra.gmra.mxu2 %vm137_vm1, %v128_v17 }
 0x119   :  { %v161_v33 = vpop.f32.mrf.mxu1 }
 0x11a   :  { %v162_v34 = vadd.f32 %v5483_v31, %v161_v33 }
 0x11c   :  { %v5972_v35 = vadd.f32 %v162_v34, %v88_v32  ;;  %v4985_v34 = vld [vmem:[%s7736_s29 + $0x58] sm:$0xff] }
 0x11e   :  { %4931 = vmatmul.msk.f32.vlgmr.msrb.gmra.mxu2 %vm137_vm1, %v5972_v35  ;;  %4933 = vmatmul.msk.f32.vlgmr.msrb.gmra.mxu3 %vm137_vm1, %v5972_v35 }
 0x11f   :  { %4935 = vmatmul.msk.f32.vlgmr.msrb.gmra.mxu0 %vm137_vm1, %v5972_v35 }
 0x125   :  { %v164_v36 = vpop.f32.mrf.mxu2 }
 0x126   :  { %v165_v37 = vadd.f32 %v5483_v31, %v164_v36  ;;  %v4975_v31 = vld [vmem:[%s7735_s28 + $0x40] sm:$0xff] }
 0x128   :  { %v5980_v38 = vadd.f32 %v165_v37, %v88_v32  ;;  %v4984_v37 = vld [vmem:[%s7736_s29 + $0x50] sm:$0xff] }
 0x12a   :  { %4932 = vmatmul.msk.f32.gmra.mxu2 %vm137_vm1, %v5980_v38  ;;  %4934 = vmatmul.msk.f32.gmra.mxu3 %vm137_vm1, %v5980_v38 }
 0x12b   :  { %4936 = vmatmul.msk.f32.gmra.mxu0 %vm137_vm1, %v5980_v38 }
 0x133   :  { %4950 = vmatmul.msk.f32.vlgmr.msra.gmra.mxu0 %vm137_vm1, %v5972_v35 }
 0x13b   :  { %4951 = vmatmul.msk.f32.gmra.mxu0 %vm137_vm1, %v5980_v38 }
 0x19c   :  { %v263_v39 = vpop.f32.mrf.mxu0 }
 0x19d   :  { %v264_v44 = vadd.f32 %v5484_v41, %v263_v39  ;;  %v4983_v39 = vld [vmem:[%s7736_s29 + $0x48] sm:$0xff] }
 0x1a1   :  { %v232_v40 = vpop.f32.mrf.mxu3  ;;  %v201_v48 = vpop.f32.mrf.mxu2 }
 0x1a2   :  { %v233_v50 = vadd.f32 %v5486_v45, %v232_v40  ;;  %v202_v52 = vadd.f32 %v5485_v49, %v201_v48  ;;  %v4982_v40 = vld [vmem:[%s7736_s29 + $0x40] sm:$0xff] }
 0x1a3   :  { %v5489_v48 = vld [vmem:[%s7741_s9 + $0x1] ss:$0 sm:$0xff] }
 0x1a8   :  { %v266_v42 = vpop.f32.mrf.mxu0 }
 0x1a9   :  { %v267_v43 = vadd.f32 %v5484_v41, %v266_v42 }
 0x1ab   :  { %351 = vmatpush.msra.mxu2 %v267_v43  ;;  %v5487_v43 = vld [vmem:[%s7743_s7 + $0x1] ss:$0 sm:$0xff] }
 0x1ad   :  { %352 = vmatpush.msra.mxu2 %v264_v44  ;;  %v235_v46 = vpop.f32.mrf.mxu3  ;;  %v204_v56 = vpop.f32.mrf.mxu2 }
 0x1ae   :  { %v236_v47 = vadd.f32 %v5486_v45, %v235_v46  ;;  %v205_v57 = vadd.f32 %v5485_v49, %v204_v56 }
 0x1af   :  { %483 = vmatpush.msrb.mxu2 %v4962_v20 }
 0x1b0   :  { %4937 = vmatpush.xpose.msk.msrb.mxu1 %vm269_vm2, %v236_v47  ;;  %v422_v42 = vpop.f32.mrf.mxu0 }
 0x1b1   :  { %484 = vmatpush.msrb.mxu2 %v4961_v21  ;;  %v423_v44 = vadd.f32 %v5487_v43, %v422_v42 }
 0x1b3   :  { %485 = vmatpush.msrb.mxu2 %v4960_v22 }
 0x1b4   :  { %4938 = vmatpush.xpose.msk.msrb.mxu1 %vm269_vm2, %v233_v50 }
 0x1b5   :  { %486 = vmatpush.msrb.mxu2 %v4959_v23 }
 0x1b7   :  { %4939 = vmatmul.msk.f32.vlgmr.msrb.gmra.mxu1 %vm269_vm2, %v202_v52 }
 0x1b8   :  { %450 = vmatpush.msra.mxu1 %v4955_v51  ;;  %v425_v46 = vpop.f32.mrf.mxu0 }
 0x1b9   :  { %v426_v47 = vadd.f32 %v5487_v43, %v425_v46 }
 0x1ba   :  { %451 = vmatpush.msra.mxu1 %v4954_v53 }
 0x1bc   :  { %452 = vmatpush.msra.mxu1 %v4953_v54  ;;  %v4972_v54 = vld [vmem:[%s7691_s13 + $0x8] sm:$0xff] }
 0x1be   :  { %453 = vmatpush.msra.mxu1 %v4952_v55 }
 0x1bf   :  { %4940 = vmatmul.msk.f32.gmra.mxu1 %vm269_vm2, %v205_v57 }
 0x1c0   :  { %607 = vmatpush.msrb.mxu1 %v4972_v54 }
 0x1c7   :  { %4957 = vmatmul.msk.f32.vlgmr.msra.gmra.mxu1 %vm137_vm1, %v5972_v35 }
 0x1cf   :  { %4958 = vmatmul.msk.f32.gmra.mxu1 %vm137_vm1, %v5980_v38 }
 0x234   :  { %v299_v59 = vpop.f32.mrf.mxu1 }
 0x235   :  { %v305_v61 = vmul.f32 0.35355338, %v299_v59 }
 0x237   :  { %v307_v62 = vadd.f32 %v305_v61, %v6027_v60 }
 0x239   :  { %v309_v63 = vsel %vm97_vm0, %v307_v62, -inf }
 0x23a   :  { %310 = vmax.xlane.f32.xlu0 %v309_v63 }
 0x23c   :  { %v302_v0 = vpop.f32.mrf.mxu1 }
 0x23d   :  { %v306_v2 = vmul.f32 0.35355338, %v302_v0 }
 0x23f   :  { %v308_v3 = vadd.f32 %v306_v2, %v6034_v1  ;;  %v5492_v2 = vld [vmem:[%s7742_s12 + $0x2] ss:$0 sm:$0xff] }
 0x241   :  { %v312_v4 = vsel %vm97_vm0, %v308_v3, -inf }
 0x242   :  { %313 = vmax.xlane.f32.xlu0 %v312_v4 }
 0x244   :  { %v455_v5 = vpop.f32.mrf.mxu1 }
 0x245   :  { %v456_v9 = vadd.f32 %v5488_v6, %v455_v5 }
 0x24c   :  { %v458_v7 = vpop.f32.mrf.mxu1 }
 0x24d   :  { %v459_v8 = vadd.f32 %v5488_v6, %v458_v7 }
 0x24f   :  { %4966 = vmatpush.xpose.msk.msrb.mxu3 %vm269_vm2, %v459_v8 }
 0x253   :  { %4967 = vmatpush.xpose.msk.msrb.mxu3 %vm269_vm2, %v456_v9 }
 0x2ad   :  { %v311_v10 = vpop.xlane.xlu0 %310 }
 0x2ae   :  { %v315_v11 = vsub.f32 %v307_v62, %v311_v10 }
 0x2b0   :  { %v317_v12 = vmul.f32 1.442695, %v315_v11 }
 0x2b2   :  { %5562 = vpow2.f32 %v317_v12 }
 0x2b5   :  { %v314_v13 = vpop.xlane.xlu0 %313 }
 0x2b6   :  { %v316_v14 = vsub.f32 %v308_v3, %v314_v13 }
 0x2b8   :  { %v5563_v15 = vpop.eup %5562  ;;  %v319_v16 = vmul.f32 1.442695, %v316_v14 }
 0x2b9   :  { %v321_v17 = vsel %vm97_vm0, %v5563_v15, 0.0 }
 0x2ba   :  { %5564 = vpow2.f32 %v319_v16  ;;  %322 = vadd.xlane.f32.xlu1 %v321_v17  ;;  %v4992_v16 = vld [vmem:[%s7737_s4 + $0x58] sm:$0xff]  ;;  %v4991_v17 = vld [vmem:[%s7737_s4 + $0x50] sm:$0xff] }
 0x2c0   :  { %v5565_v18 = vpop.eup %5564 }
 0x2c1   :  { %v324_v19 = vsel %vm97_vm0, %v5565_v18, 0.0 }
 0x2c2   :  { %325 = vadd.xlane.f32.xlu1 %v324_v19  ;;  %v4989_v19 = vld [vmem:[%s7737_s4 + $0x40] sm:$0xff] }
 0x32d   :  { %v323_v24 = vpop.xlane.xlu1 %322 }
 0x32e   :  { %5566 = vrcp.f32 %v323_v24  ;;  %v5008_v24 = vld [vmem:[%s7735_s28 + $0x78] sm:$0xff] }
 0x334   :  { %v5567_v25 = vpop.eup %5566 }
 0x335   :  { %v329_v26 = vmul.f32 %v5567_v25, %v5563_v15  ;;  %v326_v27 = vpop.xlane.xlu1 %325  ;;  %v5007_v25 = vld [vmem:[%s7735_s28 + $0x70] sm:$0xff] }
 0x336   :  { %5568 = vrcp.f32 %v326_v27  ;;  %v5005_v27 = vld [vmem:[%s7735_s28 + $0x60] sm:$0xff] }
 0x337   :  { %4941 = vmatmul.msk.f32.vlgmr.msra.gmra.mxu2 %vm97_vm0, %v329_v26  ;;  %v5006_v26 = vld [vmem:[%s7735_s28 + $0x68] sm:$0xff] }
 0x338   :  { %639 = vmatpush.msra.mxu2 %v4978_v28 }
 0x33a   :  { %640 = vmatpush.msra.mxu2 %v4977_v29 }
 0x33c   :  { %v5569_v32 = vpop.eup %5568  ;;  %641 = vmatpush.msra.mxu2 %v4976_v30  ;;  %v5015_v30 = vld [vmem:[%s7736_s29 + $0x78] sm:$0xff] }
 0x33d   :  { %v330_v33 = vmul.f32 %v5569_v32, %v5565_v18  ;;  %v4990_v18 = vld [vmem:[%s7737_s4 + $0x48] sm:$0xff]  ;;  %v5014_v32 = vld [vmem:[%s7736_s29 + $0x70] sm:$0xff] }
 0x33e   :  { %642 = vmatpush.msra.mxu2 %v4975_v31 }
 0x33f   :  { %4942 = vmatmul.msk.f32.gmra.mxu2 %vm97_vm0, %v330_v33  ;;  %v5013_v33 = vld [vmem:[%s7736_s29 + $0x68] sm:$0xff] }
 0x347   :  { %4964 = vmatmul.msk.f32.vlgmr.msrb.gmra.mxu2 %vm137_vm1, %v5972_v35 }
 0x34f   :  { %4965 = vmatmul.msk.f32.gmra.mxu2 %vm137_vm1, %v5980_v38 }
 0x357   :  { %4980 = vmatmul.msk.f32.vlgmr.msra.gmra.mxu2 %vm137_vm1, %v5972_v35 }
 0x35f   :  { %4981 = vmatmul.msk.f32.gmra.mxu2 %vm137_vm1, %v5980_v38 }
 0x3ba   :  { %v354_v36 = vpop.f32.mrf.mxu2 }
 0x3bb   :  { %4943 = vmatmul.msk.f32.vlgmr.msra.gmra.mxu3 %vm269_vm2, %v354_v36 }
 0x3bc   :  { %672 = vmatpush.msra.mxu3 %v4985_v34  ;;  %v5012_v34 = vld [vmem:[%s7736_s29 + $0x60] sm:$0xff] }
 0x3be   :  { %673 = vmatpush.msra.mxu3 %v4984_v37 }
 0x3c0   :  { %674 = vmatpush.msra.mxu3 %v4983_v39  ;;  %v5490_v39 = vld [vmem:[%s7743_s7 + $0x2] ss:$0 sm:$0xff] }
 0x3c2   :  { %v357_v41 = vpop.f32.mrf.mxu2  ;;  %675 = vmatpush.msra.mxu3 %v4982_v40 }
 0x3c3   :  { %4944 = vmatmul.msk.f32.gmra.mxu3 %vm269_vm2, %v357_v41 }
 0x3ca   :  { %v488_v45 = vpop.f32.mrf.mxu2 }
 0x3cb   :  { %4968 = vmatmul.msk.f32.vlgmr.msrb.gmra.mxu3 %vm269_vm2, %v423_v44  ;;  %v489_v51 = vadd.f32 %v5489_v48, %v488_v45  ;;  %v5493_v44 = vld [vmem:[%s7741_s9 + $0x2] ss:$0 sm:$0xff] }
 0x3d2   :  { %v491_v49 = vpop.f32.mrf.mxu2 }
 0x3d3   :  { %v492_v50 = vadd.f32 %v5489_v48, %v491_v49  ;;  %4969 = vmatmul.msk.f32.gmra.mxu3 %vm269_vm2, %v426_v47 }
 0x3d5   :  { %575 = vmatpush.msrb.mxu0 %v492_v50  ;;  %v5002_v50 = vld [vmem:[%s7691_s13 + $0x10] sm:$0xff] }
 0x3d6   :  { %829 = vmatpush.msrb.mxu3 %v5002_v50 }
 0x3d7   :  { %576 = vmatpush.msrb.mxu0 %v489_v51 }
 0x3d9   :  { %705 = vmatpush.msra.mxu0 %v4992_v16  ;;  %v5020_v16 = vld [vmem:[%s7737_s4 + $0x68] sm:$0xff] }
 0x3da   :  { %v644_v37 = vpop.f32.mrf.mxu2 }
 0x3db   :  { %4987 = vmatmul.msk.f32.vlgmr.msra.gmra.mxu3 %vm137_vm1, %v5972_v35  ;;  %706 = vmatpush.msra.mxu0 %v4991_v17  ;;  %v645_v40 = vadd.f32 %v5490_v39, %v644_v37  ;;  %v5019_v17 = vld [vmem:[%s7737_s4 + $0x60] sm:$0xff] }
 0x3dd   :  { %707 = vmatpush.msra.mxu0 %v4990_v18 }
 0x3df   :  { %708 = vmatpush.msra.mxu0 %v4989_v19 }
 0x3e2   :  { %v647_v42 = vpop.f32.mrf.mxu2 }
 0x3e3   :  { %4988 = vmatmul.msk.f32.gmra.mxu3 %vm137_vm1, %v5980_v38  ;;  %v648_v43 = vadd.f32 %v5490_v39, %v647_v42 }
 0x43e   :  { %v6105_v52 = vpop.f32.mrf.mxu3 }
 0x446   :  { %v6107_v53 = vpop.f32.mrf.mxu3 }
 0x44e   :  { %v523_v55 = vpop.f32.mrf.mxu3 }
 0x44f   :  { %v529_v56 = vmul.f32 0.35355338, %v523_v55 }
 0x451   :  { %v531_v57 = vadd.f32 %v529_v56, %v6027_v60 }
 0x453   :  { %v533_v58 = vsel %vm97_vm0, %v531_v57, -inf }
 0x454   :  { %534 = vmax.xlane.f32.xlu2 %v533_v58 }
 0x456   :  { %v526_v59 = vpop.f32.mrf.mxu3 }
 0x457   :  { %v530_v61 = vmul.f32 0.35355338, %v526_v59 }
 0x459   :  { %v532_v62 = vadd.f32 %v530_v61, %v6034_v1 }
 0x45b   :  { %v536_v63 = vsel %vm97_vm0, %v532_v62, -inf }
 0x45c   :  { %537 = vmax.xlane.f32.xlu2 %v536_v63  ;;  %v5495_v63 = vld [vmem:[%s7742_s12 + $0x3] ss:$0 sm:$0xff] }
 0x45e   :  { %v677_v0 = vpop.f32.mrf.mxu3 }
 0x45f   :  { %v678_v5 = vadd.f32 %v5492_v2, %v677_v0 }
 0x466   :  { %v680_v3 = vpop.f32.mrf.mxu3 }
 0x467   :  { %v681_v4 = vadd.f32 %v5492_v2, %v680_v3 }
 0x469   :  { %4996 = vmatpush.xpose.msk.msra.mxu1 %vm269_vm2, %v681_v4 }
 0x46d   :  { %4997 = vmatpush.xpose.msk.msra.mxu1 %vm269_vm2, %v678_v5 }
 0x4c7   :  { %v535_v6 = vpop.xlane.xlu2 %534 }
 0x4c8   :  { %v539_v7 = vsub.f32 %v531_v57, %v535_v6 }
 0x4ca   :  { %v541_v8 = vmul.f32 1.442695, %v539_v7 }
 0x4cc   :  { %5570 = vpow2.f32 %v541_v8 }
 0x4cf   :  { %v538_v9 = vpop.xlane.xlu2 %537 }
 0x4d0   :  { %v540_v10 = vsub.f32 %v532_v62, %v538_v9 }
 0x4d2   :  { %v5571_v11 = vpop.eup %5570  ;;  %v543_v12 = vmul.f32 1.442695, %v540_v10 }
 0x4d3   :  { %v545_v13 = vsel %vm97_vm0, %v5571_v11, 0.0 }
 0x4d4   :  { %5572 = vpow2.f32 %v543_v12  ;;  %546 = vadd.xlane.f32.xlu0 %v545_v13 }
 0x4da   :  { %v5573_v14 = vpop.eup %5572 }
 0x4db   :  { %v548_v15 = vsel %vm97_vm0, %v5573_v14, 0.0 }
 0x4dc   :  { %549 = vadd.xlane.f32.xlu1 %v548_v15  ;;  %v5021_v15 = vld [vmem:[%s7737_s4 + $0x70] sm:$0xff] }
 0x547   :  { %v547_v20 = vpop.xlane.xlu0 %546 }
 0x548   :  { %5574 = vrcp.f32 %v547_v20 }
 0x54e   :  { %v5575_v21 = vpop.eup %5574 }
 0x54f   :  { %v553_v22 = vmul.f32 %v5575_v21, %v5571_v11  ;;  %v550_v23 = vpop.xlane.xlu1 %549 }
 0x550   :  { %5576 = vrcp.f32 %v550_v23 }
 0x551   :  { %4970 = vmatmul.msk.f32.vlgmr.msrb.gmra.mxu0 %vm97_vm0, %v553_v22 }
 0x552   :  { %861 = vmatpush.msrb.mxu0 %v5008_v24 }
 0x554   :  { %862 = vmatpush.msrb.mxu0 %v5007_v25 }
 0x556   :  { %v5577_v28 = vpop.eup %5576  ;;  %863 = vmatpush.msrb.mxu0 %v5006_v26 }
 0x557   :  { %v554_v29 = vmul.f32 %v5577_v28, %v5573_v14  ;;  %v5022_v14 = vld [vmem:[%s7737_s4 + $0x78] sm:$0xff] }
 0x558   :  { %864 = vmatpush.msrb.mxu0 %v5005_v27  ;;  %v5494_v27 = vld [vmem:[%s7743_s7 + $0x3] ss:$0 sm:$0xff] }
 0x559   :  { %4971 = vmatmul.msk.f32.gmra.mxu0 %vm97_vm0, %v554_v29 }
 0x561   :  { %4994 = vmatmul.msk.f32.vlgmr.msra.gmra.mxu0 %vm137_vm1, %v5972_v35 }
 0x569   :  { %4995 = vmatmul.msk.f32.gmra.mxu0 %vm137_vm1, %v5980_v38 }
 0x571   :  { %5010 = vmatmul.msk.f32.vlgmr.msrb.gmra.mxu0 %vm137_vm1, %v5972_v35 }
 0x579   :  { %5011 = vmatmul.msk.f32.gmra.mxu0 %vm137_vm1, %v5980_v38 }
 0x5ce   :  { %v578_v31 = vpop.f32.mrf.mxu0 }
 0x5cf   :  { %4973 = vmatmul.msk.f32.vlgmr.msrb.gmra.mxu1 %vm269_vm2, %v578_v31 }
 0x5d0   :  { %894 = vmatpush.msrb.mxu1 %v5015_v30 }
 0x5d2   :  { %895 = vmatpush.msrb.mxu1 %v5014_v32  ;;  %v5496_v32 = vld [vmem:[%s7741_s9 + $0x3] ss:$0 sm:$0xff] }
 0x5d4   :  { %896 = vmatpush.msrb.mxu1 %v5013_v33 }
 0x5d6   :  { %v581_v36 = vpop.f32.mrf.mxu0  ;;  %897 = vmatpush.msrb.mxu1 %v5012_v34 }
 0x5d7   :  { %4974 = vmatmul.msk.f32.gmra.mxu1 %vm269_vm2, %v581_v36 }
 0x5de   :  { %v710_v41 = vpop.f32.mrf.mxu0 }
 0x5df   :  { %4998 = vmatmul.msk.f32.vlgmr.msra.gmra.mxu1 %vm269_vm2, %v645_v40  ;;  %v711_v47 = vadd.f32 %v5493_v44, %v710_v41 }
 0x5e6   :  { %v713_v45 = vpop.f32.mrf.mxu0 }
 0x5e7   :  { %v714_v46 = vadd.f32 %v5493_v44, %v713_v45  ;;  %4999 = vmatmul.msk.f32.gmra.mxu1 %vm269_vm2, %v648_v43 }
 0x5e9   :  { %797 = vmatpush.msrb.mxu2 %v714_v46 }
 0x5eb   :  { %798 = vmatpush.msrb.mxu2 %v711_v47 }
 0x5ed   :  { %927 = vmatpush.msra.mxu2 %v5022_v14 }
 0x5ee   :  { %v866_v26 = vpop.f32.mrf.mxu0 }
 0x5ef   :  { %5017 = vmatmul.msk.f32.vlgmr.msrb.gmra.mxu1 %vm137_vm1, %v5972_v35  ;;  %928 = vmatpush.msra.mxu2 %v5021_v15  ;;  %v867_v28 = vadd.f32 %v5494_v27, %v866_v26 }
 0x5f1   :  { %929 = vmatpush.msra.mxu2 %v5020_v16 }
 0x5f3   :  { %930 = vmatpush.msra.mxu2 %v5019_v17 }
 0x5f6   :  { %v869_v30 = vpop.f32.mrf.mxu0 }
 0x5f7   :  { %5018 = vmatmul.msk.f32.gmra.mxu1 %vm137_vm1, %v5980_v38  ;;  %v870_v31 = vadd.f32 %v5494_v27, %v869_v30  ;;  %v1132_v27 = vld [vmem:[%s7697_s17 + $0x10] sm:$0xff] }
 0x64c   :  { %v6183_v48 = vpop.f32.mrf.mxu1 }
 0x654   :  { %v6185_v49 = vpop.f32.mrf.mxu1 }
 0x65c   :  { %v745_v51 = vpop.f32.mrf.mxu1 }
 0x65d   :  { %v751_v54 = vmul.f32 0.35355338, %v745_v51 }
 0x65f   :  { %v753_v55 = vadd.f32 %v751_v54, %v6027_v60 }
 0x661   :  { %v755_v56 = vsel %vm97_vm0, %v753_v55, -inf }
 0x662   :  { %756 = vmax.xlane.f32.xlu2 %v755_v56 }
 0x664   :  { %v748_v57 = vpop.f32.mrf.mxu1 }
 0x665   :  { %v752_v58 = vmul.f32 0.35355338, %v748_v57 }
 0x667   :  { %v754_v59 = vadd.f32 %v752_v58, %v6034_v1 }
 0x669   :  { %v758_v61 = vsel %vm97_vm0, %v754_v59, -inf }
 0x66a   :  { %759 = vmax.xlane.f32.xlu0 %v758_v61 }
 0x66c   :  { %v899_v62 = vpop.f32.mrf.mxu1 }
 0x66d   :  { %v900_v3 = vadd.f32 %v5495_v63, %v899_v62 }
 0x674   :  { %v902_v0 = vpop.f32.mrf.mxu1 }
 0x675   :  { %v903_v2 = vadd.f32 %v5495_v63, %v902_v0 }
 0x677   :  { %5026 = vmatpush.xpose.msk.msra.mxu3 %vm269_vm2, %v903_v2 }
 0x67b   :  { %5027 = vmatpush.xpose.msk.msra.mxu3 %vm269_vm2, %v900_v3 }
 0x6d5   :  { %v757_v4 = vpop.xlane.xlu2 %756 }
 0x6d6   :  { %v761_v5 = vsub.f32 %v753_v55, %v757_v4 }
 0x6d8   :  { %v763_v6 = vmul.f32 1.442695, %v761_v5 }
 0x6da   :  { %5578 = vpow2.f32 %v763_v6 }
 0x6dd   :  { %v760_v7 = vpop.xlane.xlu0 %759 }
 0x6de   :  { %v762_v8 = vsub.f32 %v754_v59, %v760_v7  ;;  %v5491_v7 = vld [vmem:[%s7693_s14] ss:$0 sm:$0xff] }
 0x6e0   :  { %v5579_v9 = vpop.eup %5578  ;;  %v765_v10 = vmul.f32 1.442695, %v762_v8  ;;  %v393_v8 = vadd.f32 %v5491_v7, %v6105_v52 }
 0x6e1   :  { %v767_v11 = vsel %vm97_vm0, %v5579_v9, 0.0 }
 0x6e2   :  { %5580 = vpow2.f32 %v765_v10  ;;  %768 = vadd.xlane.f32.xlu1 %v767_v11 }
 0x6e8   :  { %v5581_v12 = vpop.eup %5580 }
 0x6e9   :  { %v770_v13 = vsel %vm97_vm0, %v5581_v12, 0.0 }
 0x6ea   :  { %771 = vadd.xlane.f32.xlu2 %v770_v13  ;;  %v394_v13 = vadd.f32 %v5491_v7, %v6107_v53 }
 0x6ec   :  { %v616_v15 = vadd.f32 %v6185_v49, %v394_v13  ;;  %v1170_v13 = vld [vmem:[%s7698_s19 + $0x8] sm:$0xff] }
 0x755   :  { %v769_v18 = vpop.xlane.xlu1 %768 }
 0x756   :  { %5582 = vrcp.f32 %v769_v18 }
 0x75c   :  { %v5583_v19 = vpop.eup %5582 }
 0x75d   :  { %v775_v20 = vmul.f32 %v5583_v19, %v5579_v9  ;;  %v772_v21 = vpop.xlane.xlu2 %771  ;;  %v615_v9 = vadd.f32 %v6183_v48, %v393_v8 }
 0x75e   :  { %5584 = vrcp.f32 %v772_v21  ;;  %v5743_v21 = vmov 32.0  }
 0x75f   :  { %5000 = vmatmul.msk.f32.vlgmr.msrb.gmra.mxu2 %vm97_vm0, %v775_v20 }
 0x764   :  { %v5585_v22 = vpop.eup %5584 }
 0x765   :  { %v776_v23 = vmul.f32 %v5585_v22, %v5581_v12 }
 0x767   :  { %5001 = vmatmul.msk.f32.gmra.mxu2 %vm97_vm0, %v776_v23 }
 0x76f   :  { %5024 = vmatmul.msk.f32.vlgmr.msra.gmra.mxu2 %vm137_vm1, %v5972_v35 }
 0x777   :  { %5025 = vmatmul.msk.f32.gmra.mxu2 %vm137_vm1, %v5980_v38 }
 0x7e2   :  { %v800_v24 = vpop.f32.mrf.mxu2 }
 0x7e3   :  { %5003 = vmatmul.msk.f32.vlgmr.msrb.gmra.mxu3 %vm269_vm2, %v800_v24 }
 0x7ea   :  { %v803_v25 = vpop.f32.mrf.mxu2 }
 0x7eb   :  { %5004 = vmatmul.msk.f32.gmra.mxu3 %vm269_vm2, %v803_v25 }
 0x7f2   :  { %v932_v29 = vpop.f32.mrf.mxu2 }
 0x7f3   :  { %5028 = vmatmul.msk.f32.vlgmr.msra.gmra.mxu3 %vm269_vm2, %v867_v28  ;;  %v933_v36 = vadd.f32 %v5496_v32, %v932_v29  ;;  %v1131_v29 = vld [vmem:[%s7697_s17 + $0x8] sm:$0xff] }
 0x7fa   :  { %v935_v33 = vpop.f32.mrf.mxu2 }
 0x7fb   :  { %v936_v34 = vadd.f32 %v5496_v32, %v935_v33  ;;  %5029 = vmatmul.msk.f32.gmra.mxu3 %vm269_vm2, %v870_v31  ;;  %v1130_v31 = vld [vmem:[%s7697_s17] sm:$0xff] }
 0x7fd   :  { %1019 = vmatpush.msra.mxu0 %v936_v34 }
 0x7ff   :  { %1020 = vmatpush.msra.mxu0 %v933_v36 }
 0x866   :  { %v831_v37 = vpop.f32.mrf.mxu3 }
 0x867   :  { %v837_v10 = vadd.f32 %v831_v37, %v615_v9 }
 0x86e   :  { %v834_v39 = vpop.f32.mrf.mxu3 }
 0x86f   :  { %v838_v52 = vadd.f32 %v834_v39, %v616_v15  ;;  %v5499_v15 = vld [vmem:[%s7696_s18] ss:$0 sm:$0xff] }
 0x876   :  { %v967_v40 = vpop.f32.mrf.mxu3 }
 0x877   :  { %v973_v41 = vmul.f32 0.35355338, %v967_v40 }
 0x879   :  { %v975_v42 = vadd.f32 %v973_v41, %v6027_v60 }
 0x87b   :  { %v977_v43 = vsel %vm97_vm0, %v975_v42, -inf }
 0x87c   :  { %978 = vmax.xlane.f32.xlu0 %v977_v43 }
 0x87e   :  { %v970_v44 = vpop.f32.mrf.mxu3 }
 0x87f   :  { %v974_v45 = vmul.f32 0.35355338, %v970_v44 }
 0x881   :  { %v976_v46 = vadd.f32 %v974_v45, %v6034_v1  ;;  %v5032_v1 = vld [vmem:[%s7691_s13 + $0x18] sm:$0xff] }
 0x882   :  { %1051 = vmatpush.msra.mxu1 %v5032_v1 }
 0x883   :  { %v980_v47 = vsel %vm97_vm0, %v976_v46, -inf }
 0x884   :  { %981 = vmax.xlane.f32.xlu1 %v980_v47 }
 0x8ef   :  { %v979_v50 = vpop.xlane.xlu0 %978 }
 0x8f0   :  { %v983_v51 = vsub.f32 %v975_v42, %v979_v50  ;;  %v1172_v42 = vld [vmem:[%s7698_s19 + $0x18] sm:$0xff] }
 0x8f1   :  { %1195 = vmatpush.msrb.mxu3 %v1172_v42  ;;  %v5040_v42 = vld [vmem:[%s7735_s28 + $0x80] sm:$0xff] }
 0x8f2   :  { %v985_v54 = vmul.f32 1.442695, %v983_v51 }
 0x8f4   :  { %5586 = vpow2.f32 %v985_v54 }
 0x8f7   :  { %v982_v55 = vpop.xlane.xlu1 %981 }
 0x8f8   :  { %v984_v56 = vsub.f32 %v976_v46, %v982_v55 }
 0x8fa   :  { %v5587_v57 = vpop.eup %5586  ;;  %v987_v58 = vmul.f32 1.442695, %v984_v56 }
 0x8fb   :  { %v989_v60 = vsel %vm97_vm0, %v5587_v57, 0.0 }
 0x8fc   :  { %5588 = vpow2.f32 %v987_v58  ;;  %990 = vadd.xlane.f32.xlu2 %v989_v60 }
 0x902   :  { %v5589_v59 = vpop.eup %5588 }
 0x903   :  { %v992_v61 = vsel %vm97_vm0, %v5589_v59, 0.0 }
 0x904   :  { %993 = vadd.xlane.f32.xlu0 %v992_v61  ;;  %v5497_v61 = vld [vmem:[%s7694_s15] ss:$0 sm:$0xff] }
 0x96f   :  { %v991_v62 = vpop.xlane.xlu2 %990 }
 0x970   :  { %5590 = vrcp.f32 %v991_v62 }
 0x976   :  { %v5591_v63 = vpop.eup %5590 }
 0x977   :  { %v997_v0 = vmul.f32 %v5591_v63, %v5587_v57  ;;  %v994_v2 = vpop.xlane.xlu0 %993 }
 0x978   :  { %5592 = vrcp.f32 %v994_v2 }
 0x979   :  { %5030 = vmatmul.msk.f32.vlgmr.msra.gmra.mxu0 %vm97_vm0, %v997_v0  ;;  %5594 = vrcp.f32 %v5743_v21  ;;  %v5498_v0 = vld [vmem:[%s7695_s16] ss:$0 sm:$0xff] }
 0x97e   :  { %v5593_v3 = vpop.eup %5592 }
 0x97f   :  { %v998_v4 = vmul.f32 %v5593_v3, %v5589_v59  ;;  %v5595_v22 = vpop.eup %5594 }
 0x980   :  { %v1072_v23 = vmul.f32 32.0, %v5595_v22  ;;  %vm1076_vm3 = vweird.f32 %v5595_v22 }
 0x981   :  { %5031 = vmatmul.msk.f32.gmra.mxu0 %vm97_vm0, %v998_v4 }
 0x982   :  { %v1073_v24 = vsub.f32 1.0, %v1072_v23 }
 0x984   :  { %v1074_v25 = vmul.f32 %v5595_v22, %v1073_v24 }
 0x986   :  { %v1075_v26 = vadd.f32 %v5595_v22, %v1074_v25 }
 0x988   :  { %v6271_v28 = vsel %vm1076_vm3, %v5595_v22, %v1075_v26 }
 0x9f6   :  { %v1022_v5 = vpop.f32.mrf.mxu0 }
 0x9f7   :  { %5033 = vmatmul.msk.f32.vlgmr.msra.gmra.mxu1 %vm269_vm2, %v1022_v5 }
 0x9fe   :  { %v1025_v6 = vpop.f32.mrf.mxu0 }
 0x9ff   :  { %5034 = vmatmul.msk.f32.gmra.mxu1 %vm269_vm2, %v1025_v6 }
 0xa74   :  { %v1053_v11 = vpop.f32.mrf.mxu1 }
 0xa75   :  { %v1059_v12 = vadd.f32 %v1053_v11, %v837_v10 }
 0xa77   :  { %v6249_v14 = vadd.f32 %v1059_v12, %v5972_v35  ;;  %v1171_v12 = vld [vmem:[%s7698_s19 + $0x10] sm:$0xff] }
 0xa78   :  { %1196 = vmatpush.msrb.mxu3 %v1171_v12 }
 0xa79   :  { %v1065_v16 = vsel %vm137_vm1, %v6249_v14, 0.0  ;;  %v1080_v17 = vmul.f32 %v6249_v14, %v6249_v14 }
 0xa7a   :  { %1066 = vadd.xlane.f32.xlu1 %v1065_v16  ;;  %1197 = vmatpush.msrb.mxu3 %v1170_v13 }
 0xa7b   :  { %v1082_v48 = vsel %vm137_vm1, %v1080_v17, 0.0 }
 0xa7c   :  { %1083 = vadd.xlane.f32.xlu2 %v1082_v48  ;;  %v1056_v18 = vpop.f32.mrf.mxu1 }
 0xa7d   :  { %v1060_v19 = vadd.f32 %v1056_v18, %v838_v52 }
 0xa7f   :  { %v6258_v53 = vadd.f32 %v1060_v19, %v5980_v38  ;;  %v1133_v38 = vld [vmem:[%s7697_s17 + $0x18] sm:$0xff] }
 0xa80   :  { %1156 = vmatpush.msrb.mxu2 %v1133_v38 }
 0xa81   :  { %v1068_v35 = vsel %vm137_vm1, %v6258_v53, 0.0  ;;  %v1081_v49 = vmul.f32 %v6258_v53, %v6258_v53 }
 0xa82   :  { %1069 = vadd.xlane.f32.xlu0 %v1068_v35  ;;  %1157 = vmatpush.msrb.mxu2 %v1132_v27 }
 0xa83   :  { %v1085_v20 = vsel %vm137_vm1, %v1081_v49, 0.0 }
 0xa84   :  { %1086 = vadd.xlane.f32.xlu1 %v1085_v20  ;;  %1158 = vmatpush.msrb.mxu2 %v1131_v29 }
 0xa86   :  { %1159 = vmatpush.msrb.mxu2 %v1130_v31  ;;  %v5050_v31 = vld [vmem:[%s7736_s29 + $0x98] sm:$0xff] }
 0xa87   :  { %1331 = vmatpush.msrb.mxu1 %v5050_v31 }
 0xaed   :  { %v1067_v30 = vpop.xlane.xlu1 %1066 }
 0xaee   :  { %v1078_v32 = vmul.f32 %v6271_v28, %v1067_v30  ;;  %v5043_v30 = vld [vmem:[%s7735_s28 + $0x98] sm:$0xff] }
 0xaef   :  { %v1084_v33 = vpop.xlane.xlu2 %1083  ;;  %1298 = vmatpush.msrb.mxu0 %v5043_v30  ;;  %v5505_v30 = vld [vmem:[%s7741_s9 + $0x4] ss:$0 sm:$0xff] }
 0xaf0   :  { %v1090_v34 = vmul.f32 %v1078_v32, %v1078_v32  ;;  %v1088_v36 = vmul.f32 %v1084_v33, %v6271_v28  ;;  %v1094_v59 = vsub.f32 %v6249_v14, %v1078_v32  ;;  %v1169_v14 = vld [vmem:[%s7698_s19] sm:$0xff]  ;;  %v5057_v32 = vld [vmem:[%s7737_s4 + $0x98] sm:$0xff]  ;;  %v5042_v33 = vld [vmem:[%s7735_s28 + $0x90] sm:$0xff] }
 0xaf1   :  { %1198 = vmatpush.msrb.mxu3 %v1169_v14  ;;  %1364 = vmatpush.msra.mxu2 %v5057_v32  ;;  %v5502_v14 = vld [vmem:[%s7701_s22] ss:$0 sm:$0xff] }
 0xaf2   :  { %v1092_v37 = vsub.f32 %v1088_v36, %v1090_v34  ;;  %v5049_v34 = vld [vmem:[%s7736_s29 + $0x90] sm:$0xff]  ;;  %1299 = vmatpush.msrb.mxu0 %v5042_v33 }
 0xaf3   :  { %v5056_v36 = vld [vmem:[%s7737_s4 + $0x90] sm:$0xff]  ;;  %1332 = vmatpush.msrb.mxu1 %v5049_v34 }
 0xaf4   :  { %v1096_v39 = vadd.f32 1e-05, %v1092_v37  ;;  %1365 = vmatpush.msra.mxu2 %v5056_v36  ;;  %v5041_v37 = vld [vmem:[%s7735_s28 + $0x88] sm:$0xff]  ;;  %v5079_v34 = vld [vmem:[%s7736_s29 + $0xb0] sm:$0xff] }
 0xaf5   :  { %v1070_v40 = vpop.xlane.xlu0 %1069  ;;  %1300 = vmatpush.msrb.mxu0 %v5041_v37  ;;  %v5078_v37 = vld [vmem:[%s7736_s29 + $0xa8] sm:$0xff] }
 0xaf6   :  { %5596 = vrsqrt.f32 %v1096_v39  ;;  %v1079_v41 = vmul.f32 %v6271_v28, %v1070_v40  ;;  %vm1104_vm5 = vweird.f32 %v1096_v39  ;;  %v5055_v40 = vld [vmem:[%s7737_s4 + $0x88] sm:$0xff] }
 0xaf7   :  { %v1087_v43 = vpop.xlane.xlu1 %1086  ;;  %1366 = vmatpush.msra.mxu2 %v5055_v40  ;;  %1301 = vmatpush.msrb.mxu0 %v5040_v42  ;;  %v5067_v42 = vld [vmem:[%s7691_s13 + $0x20] sm:$0xff] }
 0xaf8   :  { %v1091_v44 = vmul.f32 %v1079_v41, %v1079_v41  ;;  %v1089_v45 = vmul.f32 %v1087_v43, %v6271_v28  ;;  %v1095_v7 = vsub.f32 %v6258_v53, %v1079_v41  ;;  %v5500_v53 = vld [vmem:[%s7699_s20] ss:$0 sm:$0xff] }
 0xaf9   :  { %v5047_v43 = vld [vmem:[%s7736_s29 + $0x80] sm:$0xff] }
 0xafa   :  { %v1093_v46 = vsub.f32 %v1089_v45, %v1091_v44  ;;  %v5054_v44 = vld [vmem:[%s7737_s4 + $0x80] sm:$0xff] }
 0xafb   :  { %1367 = vmatpush.msra.mxu2 %v5054_v44 }
 0xafc   :  { %v5597_v47 = vpop.eup %5596  ;;  %v1097_v50 = vadd.f32 1e-05, %v1093_v46 }
 0xafd   :  { %v1099_v51 = vmul.f32 %v5597_v47, %v1096_v39  ;;  %vm1105_vm4 = vweird.f32 %v5597_v47  ;;  %v5048_v39 = vld [vmem:[%s7736_s29 + $0x88] sm:$0xff] }
 0xafe   :  { %5598 = vrsqrt.f32 %v1097_v50  ;;  %vm1106_vm6 = vmor %vm1104_vm5, %vm1105_vm4  ;;  %vm1114_vm8 = vweird.f32 %v1097_v50  ;;  %1333 = vmatpush.msrb.mxu1 %v5048_v39  ;;  %v5077_v39 = vld [vmem:[%s7736_s29 + $0xa0] sm:$0xff] }
 0xaff   :  { %v1100_v54 = vmul.f32 %v5597_v47, %v1099_v51 }
 0xb00   :  { %1334 = vmatpush.msrb.mxu1 %v5047_v43 }
 0xb01   :  { %v1101_v55 = vmul.f32 0.5, %v1100_v54 }
 0xb02   :  { %1488 = vmatpush.msra.mxu1 %v5067_v42 }
 0xb03   :  { %v1102_v56 = vsub.f32 1.5, %v1101_v55 }
 0xb04   :  { %v5599_v57 = vpop.eup %5598 }
 0xb05   :  { %v1103_v58 = vmul.f32 %v5597_v47, %v1102_v56  ;;  %v1109_v60 = vmul.f32 %v5599_v57, %v1097_v50  ;;  %vm1115_vm7 = vweird.f32 %v5599_v57 }
 0xb06   :  { %vm1116_vm9 = vmor %vm1114_vm8, %vm1115_vm7 }
 0xb07   :  { %v1107_v1 = vsel %vm1106_vm6, %v5597_v47, %v1103_v58  ;;  %v1110_v62 = vmul.f32 %v5599_v57, %v1109_v60  ;;  %v5073_v58 = vld [vmem:[%s7735_s28 + $0xb8] sm:$0xff]  ;;  %v5072_v60 = vld [vmem:[%s7735_s28 + $0xb0] sm:$0xff] }
 0xb08   :  { %v1118_v63 = vmul.f32 %v1107_v1, %v1094_v59  ;;  %v5071_v1 = vld [vmem:[%s7735_s28 + $0xa8] sm:$0xff] }
 0xb09   :  { %v1111_v2 = vmul.f32 0.5, %v1110_v62 }
 0xb0a   :  { %v1123_v3 = vmul.f32 %v5497_v61, %v1118_v63  ;;  %v5070_v63 = vld [vmem:[%s7735_s28 + $0xa0] sm:$0xff] }
 0xb0b   :  { %v1112_v4 = vsub.f32 1.5, %v1111_v2 }
 0xb0c   :  { %v1128_v5 = vadd.f32 %v5498_v0, %v1123_v3 }
 0xb0d   :  { %v1113_v6 = vmul.f32 %v5599_v57, %v1112_v4 }
 0xb0e   :  { %5035 = vmatmul.msk.f32.vlgmr.msrb.gmra.mxu2 %vm137_vm1, %v1128_v5 }
 0xb0f   :  { %v1117_v8 = vsel %vm1116_vm9, %v5599_v57, %v1113_v6  ;;  %1523 = vmatpush.msrb.mxu2 %v5073_v58  ;;  %v5507_v58 = vld [vmem:[%s7742_s12 + $0x5] ss:$0 sm:$0xff] }
 0xb10   :  { %v1119_v9 = vmul.f32 %v1117_v8, %v1095_v7 }
 0xb11   :  { %1524 = vmatpush.msrb.mxu2 %v5072_v60 }
 0xb12   :  { %v1124_v10 = vmul.f32 %v5497_v61, %v1119_v9 }
 0xb13   :  { %1525 = vmatpush.msrb.mxu2 %v5071_v1 }
 0xb14   :  { %v1129_v11 = vadd.f32 %v5498_v0, %v1124_v10 }
 0xb15   :  { %1526 = vmatpush.msrb.mxu2 %v5070_v63 }
 0xb16   :  { %5036 = vmatmul.msk.f32.gmra.mxu2 %vm137_vm1, %v1129_v11 }
 0xb91   :  { %v1161_v16 = vpop.f32.mrf.mxu2 }
 0xb92   :  { %v1162_v17 = vadd.f32 %v5499_v15, %v1161_v16 }
 0xb94   :  { %v1167_v52 = vmax.f32 %v1162_v17, 0.0 }
 0xb96   :  { %5037 = vmatmul.msk.f32.vlgmr.msrb.gmra.mxu3 %vm137_vm1, %v1167_v52 }
 0xb99   :  { %v1164_v48 = vpop.f32.mrf.mxu2 }
 0xb9a   :  { %v1165_v18 = vadd.f32 %v5499_v15, %v1164_v48 }
 0xb9c   :  { %v1168_v19 = vmax.f32 %v1165_v18, 0.0 }
 0xb9e   :  { %5038 = vmatmul.msk.f32.gmra.mxu3 %vm137_vm1, %v1168_v19 }
 0xc19   :  { %v1200_v35 = vpop.f32.mrf.mxu3 }
 0xc1a   :  { %v1201_v49 = vadd.f32 %v5500_v53, %v1200_v35 }
 0xc1c   :  { %v6313_v20 = vadd.f32 %v1201_v49, %v1128_v5 }
 0xc1e   :  { %v1210_v21 = vsel %vm137_vm1, %v6313_v20, 0.0  ;;  %v1218_v22 = vmul.f32 %v6313_v20, %v6313_v20 }
 0xc1f   :  { %1211 = vadd.xlane.f32.xlu2 %v1210_v21 }
 0xc20   :  { %v1220_v23 = vsel %vm137_vm1, %v1218_v22, 0.0  ;;  %v5504_v22 = vld [vmem:[%s7742_s12 + $0x4] ss:$0 sm:$0xff] }
 0xc21   :  { %1221 = vadd.xlane.f32.xlu0 %v1220_v23  ;;  %v1203_v24 = vpop.f32.mrf.mxu3 }
 0xc22   :  { %v1204_v25 = vadd.f32 %v5500_v53, %v1203_v24 }
 0xc24   :  { %v6320_v26 = vadd.f32 %v1204_v25, %v1129_v11  ;;  %v5501_v11 = vld [vmem:[%s7700_s21] ss:$0 sm:$0xff] }
 0xc26   :  { %v1213_v38 = vsel %vm137_vm1, %v6320_v26, 0.0  ;;  %v1219_v27 = vmul.f32 %v6320_v26, %v6320_v26 }
 0xc27   :  { %1214 = vadd.xlane.f32.xlu1 %v1213_v38  ;;  %v5503_v38 = vld [vmem:[%s7743_s7 + $0x4] ss:$0 sm:$0xff] }
 0xc28   :  { %v1223_v29 = vsel %vm137_vm1, %v1219_v27, 0.0 }
 0xc29   :  { %1224 = vadd.xlane.f32.xlu2 %v1223_v29  ;;  %v5080_v29 = vld [vmem:[%s7736_s29 + $0xb8] sm:$0xff] }
 0xc92   :  { %v1212_v41 = vpop.xlane.xlu2 %1211 }
 0xc93   :  { %v1216_v45 = vmul.f32 %v1212_v41, %v6271_v28 }
 0xc94   :  { %v1222_v46 = vpop.xlane.xlu0 %1221 }
 0xc95   :  { %v1228_v47 = vmul.f32 %v1216_v45, %v1216_v45  ;;  %v1226_v50 = vmul.f32 %v1222_v46, %v6271_v28  ;;  %v1232_v10 = vsub.f32 %v6313_v20, %v1216_v45  ;;  %v6442_v45 = vld [vmem:[%s7692_s2] sm:$0xff] }
 0xc97   :  { %v1230_v51 = vsub.f32 %v1226_v50, %v1228_v47 }
 0xc99   :  { %v1234_v54 = vadd.f32 1e-05, %v1230_v51 }
 0xc9a   :  { %v1215_v55 = vpop.xlane.xlu1 %1214 }
 0xc9b   :  { %5600 = vrsqrt.f32 %v1234_v54  ;;  %v1217_v56 = vmul.f32 %v1215_v55, %v6271_v28  ;;  %vm1242_vm11 = vweird.f32 %v1234_v54 }
 0xc9c   :  { %v1225_v57 = vpop.xlane.xlu2 %1224 }
 0xc9d   :  { %v1229_v59 = vmul.f32 %v1217_v56, %v1217_v56  ;;  %v1227_v61 = vmul.f32 %v1225_v57, %v6271_v28  ;;  %v1233_v19 = vsub.f32 %v6320_v26, %v1217_v56 }
 0xc9f   :  { %v1231_v62 = vsub.f32 %v1227_v61, %v1229_v59 }
 0xca1   :  { %v5601_v0 = vpop.eup %5600  ;;  %v1235_v2 = vadd.f32 1e-05, %v1231_v62 }
 0xca2   :  { %v1237_v3 = vmul.f32 %v5601_v0, %v1234_v54  ;;  %vm1243_vm10 = vweird.f32 %v5601_v0  ;;  %v6449_v54 = vld [vmem:[%s7692_s2 + $0x8] sm:$0xff] }
 0xca3   :  { %5602 = vrsqrt.f32 %v1235_v2  ;;  %vm1244_vm12 = vmor %vm1242_vm11, %vm1243_vm10  ;;  %vm1252_vm14 = vweird.f32 %v1235_v2 }
 0xca4   :  { %v1238_v4 = vmul.f32 %v5601_v0, %v1237_v3 }
 0xca6   :  { %v1239_v5 = vmul.f32 0.5, %v1238_v4 }
 0xca8   :  { %v1240_v6 = vsub.f32 1.5, %v1239_v5 }
 0xca9   :  { %v5603_v7 = vpop.eup %5602 }
 0xcaa   :  { %v1241_v8 = vmul.f32 %v5601_v0, %v1240_v6  ;;  %v1247_v9 = vmul.f32 %v5603_v7, %v1235_v2  ;;  %vm1253_vm13 = vweird.f32 %v5603_v7 }
 0xcab   :  { %vm1254_vm15 = vmor %vm1252_vm14, %vm1253_vm13 }
 0xcac   :  { %v1245_v12 = vsel %vm1244_vm12, %v5601_v0, %v1241_v8  ;;  %v1248_v13 = vmul.f32 %v5603_v7, %v1247_v9  ;;  %v5087_v8 = vld [vmem:[%s7737_s4 + $0xb8] sm:$0xff]  ;;  %v5086_v9 = vld [vmem:[%s7737_s4 + $0xb0] sm:$0xff] }
 0xcad   :  { %v1256_v15 = vmul.f32 %v1245_v12, %v1232_v10  ;;  %v5085_v10 = vld [vmem:[%s7737_s4 + $0xa8] sm:$0xff] }
 0xcae   :  { %v1249_v16 = vmul.f32 0.5, %v1248_v13 }
 0xcaf   :  { %v1261_v17 = vmul.f32 %v5501_v11, %v1256_v15 }
 0xcb0   :  { %v1250_v52 = vsub.f32 1.5, %v1249_v16  ;;  %v5103_v16 = vld [vmem:[%s7735_s28 + $0xd8] sm:$0xff] }
 0xcb1   :  { %v6386_v48 = vadd.f32 %v5502_v14, %v1261_v17  ;;  %v5102_v17 = vld [vmem:[%s7735_s28 + $0xd0] sm:$0xff] }
 0xcb2   :  { %v1251_v18 = vmul.f32 %v5603_v7, %v1250_v52  ;;  %v5101_v52 = vld [vmem:[%s7735_s28 + $0xc8] sm:$0xff] }
 0xcb3   :  { %5045 = vmatmul.msk.f32.vlgmr.msrb.gmra.mxu0 %vm137_vm1, %v6386_v48  ;;  %5052 = vmatmul.msk.f32.vlgmr.msrb.gmra.mxu1 %vm137_vm1, %v6386_v48 }
 0xcb4   :  { %v1255_v53 = vsel %vm1254_vm15, %v5603_v7, %v1251_v18  ;;  %5059 = vmatmul.msk.f32.vlgmr.msra.gmra.mxu2 %vm137_vm1, %v6386_v48  ;;  %v5100_v18 = vld [vmem:[%s7735_s28 + $0xc0] sm:$0xff]  ;;  %vm2444_vm15 = vcmask 523264  }
 0xcb5   :  { %v1257_v35 = vmul.f32 %v1255_v53, %v1233_v19 }
 0xcb7   :  { %v1262_v49 = vmul.f32 %v5501_v11, %v1257_v35  ;;  %v5084_v11 = vld [vmem:[%s7737_s4 + $0xa0] sm:$0xff]  ;;  %v5110_v35 = vld [vmem:[%s7736_s29 + $0xd8] sm:$0xff] }
 0xcb9   :  { %v6395_v20 = vadd.f32 %v5502_v14, %v1262_v49 }
 0xcbb   :  { %5046 = vmatmul.msk.f32.gmra.mxu0 %vm137_vm1, %v6395_v20  ;;  %5053 = vmatmul.msk.f32.gmra.mxu1 %vm137_vm1, %v6395_v20 }
 0xcbc   :  { %5060 = vmatmul.msk.f32.gmra.mxu2 %vm137_vm1, %v6395_v20 }
 0xcc4   :  { %5075 = vmatmul.msk.f32.vlgmr.msrb.gmra.mxu2 %vm137_vm1, %v6386_v48 }
 0xccc   :  { %5076 = vmatmul.msk.f32.gmra.mxu2 %vm137_vm1, %v6395_v20 }
 0xd30   :  { %v1336_v21 = vpop.f32.mrf.mxu1  ;;  %v1303_v26 = vpop.f32.mrf.mxu0 }
 0xd31   :  { %v1337_v27 = vadd.f32 %v5504_v22, %v1336_v21  ;;  %v1304_v32 = vadd.f32 %v5503_v38, %v1303_v26  ;;  %v5109_v21 = vld [vmem:[%s7736_s29 + $0xd0] sm:$0xff]  ;;  %v5506_v26 = vld [vmem:[%s7743_s7 + $0x5] ss:$0 sm:$0xff] }
 0xd37   :  { %v1369_v23 = vpop.f32.mrf.mxu2 }
 0xd38   :  { %v1339_v24 = vpop.f32.mrf.mxu1  ;;  %v1370_v36 = vadd.f32 %v5505_v30, %v1369_v23  ;;  %v1306_v40 = vpop.f32.mrf.mxu0  ;;  %v5107_v23 = vld [vmem:[%s7736_s29 + $0xc0] sm:$0xff] }
 0xd39   :  { %v1340_v25 = vadd.f32 %v5504_v22, %v1339_v24  ;;  %v1307_v41 = vadd.f32 %v5503_v38, %v1306_v40  ;;  %v5108_v22 = vld [vmem:[%s7736_s29 + $0xc8] sm:$0xff] }
 0xd3b   :  { %5061 = vmatpush.xpose.msk.msra.mxu3 %vm269_vm2, %v1340_v25 }
 0xd3f   :  { %v1372_v31 = vpop.f32.mrf.mxu2  ;;  %5062 = vmatpush.xpose.msk.msra.mxu3 %vm269_vm2, %v1337_v27 }
 0xd40   :  { %v1373_v33 = vadd.f32 %v5505_v30, %v1372_v31  ;;  %v5508_v31 = vld [vmem:[%s7741_s9 + $0x5] ss:$0 sm:$0xff] }
 0xd42   :  { %1456 = vmatpush.msra.mxu0 %v1373_v33  ;;  %5063 = vmatmul.msk.f32.vlgmr.msra.gmra.mxu3 %vm269_vm2, %v1304_v32 }
 0xd43   :  { %1556 = vmatpush.msrb.mxu3 %v5080_v29 }
 0xd44   :  { %1457 = vmatpush.msra.mxu0 %v1370_v36 }
 0xd45   :  { %1557 = vmatpush.msrb.mxu3 %v5079_v34 }
 0xd46   :  { %1589 = vmatpush.msrb.mxu0 %v5087_v8  ;;  %v5114_v8 = vld [vmem:[%s7737_s4 + $0xc0] sm:$0xff] }
 0xd47   :  { %1558 = vmatpush.msrb.mxu3 %v5078_v37  ;;  %v1528_v25 = vpop.f32.mrf.mxu2 }
 0xd48   :  { %1590 = vmatpush.msrb.mxu0 %v5086_v9  ;;  %v1529_v38 = vadd.f32 %v5506_v26, %v1528_v25 }
 0xd49   :  { %1559 = vmatpush.msrb.mxu3 %v5077_v39  ;;  %v5097_v39 = vld [vmem:[%s7691_s13 + $0x28] sm:$0xff] }
 0xd4a   :  { %5064 = vmatmul.msk.f32.gmra.mxu3 %vm269_vm2, %v1307_v41  ;;  %1591 = vmatpush.msrb.mxu0 %v5085_v10 }
 0xd4b   :  { %1713 = vmatpush.msra.mxu3 %v5097_v39 }
 0xd4c   :  { %1592 = vmatpush.msrb.mxu0 %v5084_v11 }
 0xd4f   :  { %v1531_v29 = vpop.f32.mrf.mxu2 }
 0xd50   :  { %v1532_v30 = vadd.f32 %v5506_v26, %v1531_v29 }
 0xd52   :  { %5082 = vmatmul.msk.f32.vlgmr.msrb.gmra.mxu3 %vm137_vm1, %v6386_v48 }
 0xd5a   :  { %5083 = vmatmul.msk.f32.gmra.mxu3 %vm137_vm1, %v6395_v20 }
 0xdc5   :  { %v1404_v43 = vpop.f32.mrf.mxu3 }
 0xdc6   :  { %v1410_v44 = vmul.f32 0.35355338, %v1404_v43 }
 0xdc8   :  { %v1412_v46 = vadd.f32 %v6442_v45, %v1410_v44 }
 0xdca   :  { %v1414_v47 = vsel %vm97_vm0, %v1412_v46, -inf }
 0xdcb   :  { %1415 = vmax.xlane.f32.xlu0 %v1414_v47 }
 0xdcd   :  { %v1407_v50 = vpop.f32.mrf.mxu3 }
 0xdce   :  { %v1411_v51 = vmul.f32 0.35355338, %v1407_v50 }
 0xdd0   :  { %v1413_v55 = vadd.f32 %v6449_v54, %v1411_v51 }
 0xdd2   :  { %v1417_v56 = vsel %vm97_vm0, %v1413_v55, -inf }
 0xdd3   :  { %1418 = vmax.xlane.f32.xlu1 %v1417_v56 }
 0xdd5   :  { %v1561_v57 = vpop.f32.mrf.mxu3 }
 0xdd6   :  { %v1562_v61 = vadd.f32 %v5507_v58, %v1561_v57 }
 0xddd   :  { %v1564_v60 = vpop.f32.mrf.mxu3 }
 0xdde   :  { %v1565_v59 = vadd.f32 %v5507_v58, %v1564_v60 }
 0xde0   :  { %5091 = vmatpush.xpose.msk.msrb.mxu1 %vm269_vm2, %v1565_v59 }
 0xde4   :  { %5092 = vmatpush.xpose.msk.msrb.mxu1 %vm269_vm2, %v1562_v61 }
 0xe3e   :  { %v1416_v1 = vpop.xlane.xlu0 %1415 }
 0xe3f   :  { %v1420_v62 = vsub.f32 %v1412_v46, %v1416_v1 }
 0xe41   :  { %v1422_v63 = vmul.f32 1.442695, %v1420_v62 }
 0xe43   :  { %5604 = vpow2.f32 %v1422_v63 }
 0xe46   :  { %v1419_v0 = vpop.xlane.xlu1 %1418 }
 0xe47   :  { %v1421_v2 = vsub.f32 %v1413_v55, %v1419_v0  ;;  %v5511_v55 = vld [vmem:[%s7742_s12 + $0x6] ss:$0 sm:$0xff] }
 0xe49   :  { %v5605_v3 = vpop.eup %5604  ;;  %v1424_v4 = vmul.f32 1.442695, %v1421_v2 }
 0xe4a   :  { %v1426_v5 = vsel %vm97_vm0, %v5605_v3, 0.0 }
 0xe4b   :  { %5606 = vpow2.f32 %v1424_v4  ;;  %1427 = vadd.xlane.f32.xlu2 %v1426_v5  ;;  %v5117_v5 = vld [vmem:[%s7737_s4 + $0xd8] sm:$0xff] }
 0xe51   :  { %v5607_v6 = vpop.eup %5606 }
 0xe52   :  { %v1429_v7 = vsel %vm97_vm0, %v5607_v6, 0.0 }
 0xe53   :  { %1430 = vadd.xlane.f32.xlu0 %v1429_v7  ;;  %v5115_v7 = vld [vmem:[%s7737_s4 + $0xc8] sm:$0xff] }
 0xebe   :  { %v1428_v12 = vpop.xlane.xlu2 %1427 }
 0xebf   :  { %5608 = vrcp.f32 %v1428_v12 }
 0xec5   :  { %v5609_v13 = vpop.eup %5608 }
 0xec6   :  { %v1434_v14 = vmul.f32 %v5609_v13, %v5605_v3  ;;  %v1431_v15 = vpop.xlane.xlu0 %1430  ;;  %v5133_v13 = vld [vmem:[%s7735_s28 + $0xf8] sm:$0xff] }
 0xec7   :  { %5610 = vrcp.f32 %v1431_v15  ;;  %v5131_v15 = vld [vmem:[%s7735_s28 + $0xe8] sm:$0xff] }
 0xec8   :  { %5065 = vmatmul.msk.f32.vlgmr.msra.gmra.mxu0 %vm97_vm0, %v1434_v14  ;;  %v5132_v14 = vld [vmem:[%s7735_s28 + $0xf0] sm:$0xff] }
 0xec9   :  { %1745 = vmatpush.msra.mxu0 %v5103_v16  ;;  %v5130_v16 = vld [vmem:[%s7735_s28 + $0xe0] sm:$0xff] }
 0xecb   :  { %1746 = vmatpush.msra.mxu0 %v5102_v17 }
 0xecd   :  { %v5611_v19 = vpop.eup %5610  ;;  %1747 = vmatpush.msra.mxu0 %v5101_v52 }
 0xece   :  { %v1435_v53 = vmul.f32 %v5611_v19, %v5607_v6  ;;  %v5116_v6 = vld [vmem:[%s7737_s4 + $0xd0] sm:$0xff] }
 0xecf   :  { %1748 = vmatpush.msra.mxu0 %v5100_v18  ;;  %v5140_v18 = vld [vmem:[%s7736_s29 + $0xf8] sm:$0xff] }
 0xed0   :  { %5066 = vmatmul.msk.f32.gmra.mxu0 %vm97_vm0, %v1435_v53  ;;  %v5139_v53 = vld [vmem:[%s7736_s29 + $0xf0] sm:$0xff] }
 0xed8   :  { %5089 = vmatmul.msk.f32.vlgmr.msrb.gmra.mxu0 %vm137_vm1, %v6386_v48 }
 0xee0   :  { %5090 = vmatmul.msk.f32.gmra.mxu0 %vm137_vm1, %v6395_v20 }
 0xee8   :  { %5105 = vmatmul.msk.f32.vlgmr.msra.gmra.mxu0 %vm137_vm1, %v6386_v48 }
 0xef0   :  { %5106 = vmatmul.msk.f32.gmra.mxu0 %vm137_vm1, %v6395_v20 }
 0xf45   :  { %v1459_v49 = vpop.f32.mrf.mxu0 }
 0xf46   :  { %5068 = vmatmul.msk.f32.vlgmr.msra.gmra.mxu1 %vm269_vm2, %v1459_v49  ;;  %v5137_v49 = vld [vmem:[%s7736_s29 + $0xe0] sm:$0xff] }
 0xf47   :  { %1778 = vmatpush.msra.mxu1 %v5110_v35  ;;  %v5138_v35 = vld [vmem:[%s7736_s29 + $0xe8] sm:$0xff] }
 0xf49   :  { %1779 = vmatpush.msra.mxu1 %v5109_v21 }
 0xf4b   :  { %1780 = vmatpush.msra.mxu1 %v5108_v22 }
 0xf4d   :  { %v1462_v24 = vpop.f32.mrf.mxu0  ;;  %1781 = vmatpush.msra.mxu1 %v5107_v23  ;;  %v5509_v23 = vld [vmem:[%s7743_s7 + $0x6] ss:$0 sm:$0xff] }
 0xf4e   :  { %5069 = vmatmul.msk.f32.gmra.mxu1 %vm269_vm2, %v1462_v24 }
 0xf55   :  { %v1594_v27 = vpop.f32.mrf.mxu0 }
 0xf56   :  { %5093 = vmatmul.msk.f32.vlgmr.msrb.gmra.mxu1 %vm269_vm2, %v1529_v38  ;;  %v1595_v34 = vadd.f32 %v5508_v31, %v1594_v27  ;;  %v5512_v27 = vld [vmem:[%s7741_s9 + $0x6] ss:$0 sm:$0xff] }
 0xf5d   :  { %v1597_v32 = vpop.f32.mrf.mxu0 }
 0xf5e   :  { %v1598_v33 = vadd.f32 %v5508_v31, %v1597_v32  ;;  %5094 = vmatmul.msk.f32.gmra.mxu1 %vm269_vm2, %v1532_v30 }
 0xf60   :  { %1681 = vmatpush.msra.mxu2 %v1598_v33 }
 0xf62   :  { %1682 = vmatpush.msra.mxu2 %v1595_v34  ;;  %v5127_v34 = vld [vmem:[%s7691_s13 + $0x30] sm:$0xff] }
 0xf63   :  { %1935 = vmatpush.msrb.mxu1 %v5127_v34 }
 0xf64   :  { %1811 = vmatpush.msrb.mxu2 %v5117_v5  ;;  %v5146_v5 = vld [vmem:[%s7737_s4 + $0xf0] sm:$0xff] }
 0xf65   :  { %v1750_v22 = vpop.f32.mrf.mxu0 }
 0xf66   :  { %5112 = vmatmul.msk.f32.vlgmr.msra.gmra.mxu1 %vm137_vm1, %v6386_v48  ;;  %1812 = vmatpush.msrb.mxu2 %v5116_v6  ;;  %v1751_v24 = vadd.f32 %v5509_v23, %v1750_v22  ;;  %v5145_v6 = vld [vmem:[%s7737_s4 + $0xe8] sm:$0xff] }
 0xf68   :  { %1813 = vmatpush.msrb.mxu2 %v5115_v7  ;;  %v5144_v7 = vld [vmem:[%s7737_s4 + $0xe0] sm:$0xff] }
 0xf6a   :  { %1814 = vmatpush.msrb.mxu2 %v5114_v8 }
 0xf6d   :  { %v1753_v26 = vpop.f32.mrf.mxu0 }
 0xf6e   :  { %5113 = vmatmul.msk.f32.gmra.mxu1 %vm137_vm1, %v6395_v20  ;;  %v1754_v38 = vadd.f32 %v5509_v23, %v1753_v26 }
 0xfc3   :  { %v6520_v36 = vpop.f32.mrf.mxu1 }
 0xfcb   :  { %v6522_v37 = vpop.f32.mrf.mxu1 }
 0xfd3   :  { %v1629_v40 = vpop.f32.mrf.mxu1 }
 0xfd4   :  { %v1635_v41 = vmul.f32 0.35355338, %v1629_v40 }
 0xfd6   :  { %v1637_v42 = vadd.f32 %v6442_v45, %v1635_v41 }
 0xfd8   :  { %v1639_v43 = vsel %vm97_vm0, %v1637_v42, -inf }
 0xfd9   :  { %1640 = vmax.xlane.f32.xlu1 %v1639_v43 }
 0xfdb   :  { %v1632_v44 = vpop.f32.mrf.mxu1 }
 0xfdc   :  { %v1636_v46 = vmul.f32 0.35355338, %v1632_v44 }
 0xfde   :  { %v1638_v47 = vadd.f32 %v6449_v54, %v1636_v46 }
 0xfe0   :  { %v1642_v50 = vsel %vm97_vm0, %v1638_v47, -inf }
 0xfe1   :  { %1643 = vmax.xlane.f32.xlu2 %v1642_v50 }
 0xfe3   :  { %v1783_v51 = vpop.f32.mrf.mxu1 }
 0xfe4   :  { %v1784_v58 = vadd.f32 %v5511_v55, %v1783_v51  ;;  %v5514_v51 = vld [vmem:[%s7742_s12 + $0x7] ss:$0 sm:$0xff] }
 0xfeb   :  { %v1786_v56 = vpop.f32.mrf.mxu1 }
 0xfec   :  { %v1787_v57 = vadd.f32 %v5511_v55, %v1786_v56 }
 0xfee   :  { %5121 = vmatpush.xpose.msk.msrb.mxu3 %vm269_vm2, %v1787_v57 }
 0xff2   :  { %5122 = vmatpush.xpose.msk.msrb.mxu3 %vm269_vm2, %v1784_v58 }
0x104c   :  { %v1641_v60 = vpop.xlane.xlu1 %1640 }
0x104d   :  { %v1645_v59 = vsub.f32 %v1637_v42, %v1641_v60 }
0x104f   :  { %v1647_v61 = vmul.f32 1.442695, %v1645_v59 }
0x1051   :  { %5612 = vpow2.f32 %v1647_v61 }
0x1054   :  { %v1644_v1 = vpop.xlane.xlu2 %1643 }
0x1055   :  { %v1646_v62 = vsub.f32 %v1638_v47, %v1644_v1 }
0x1057   :  { %v5613_v63 = vpop.eup %5612  ;;  %v1649_v0 = vmul.f32 1.442695, %v1646_v62 }
0x1058   :  { %v1651_v2 = vsel %vm97_vm0, %v5613_v63, 0.0 }
0x1059   :  { %5614 = vpow2.f32 %v1649_v0  ;;  %1652 = vadd.xlane.f32.xlu0 %v1651_v2 }
0x105f   :  { %v5615_v3 = vpop.eup %5614 }
0x1060   :  { %v1654_v4 = vsel %vm97_vm0, %v5615_v3, 0.0 }
0x1061   :  { %1655 = vadd.xlane.f32.xlu1 %v1654_v4  ;;  %v5147_v4 = vld [vmem:[%s7737_s4 + $0xf8] sm:$0xff] }
0x10cc   :  { %v1653_v9 = vpop.xlane.xlu0 %1652 }
0x10cd   :  { %5616 = vrcp.f32 %v1653_v9 }
0x10d3   :  { %v5617_v10 = vpop.eup %5616 }
0x10d4   :  { %v1659_v11 = vmul.f32 %v5617_v10, %v5613_v63  ;;  %v1656_v12 = vpop.xlane.xlu1 %1655 }
0x10d5   :  { %5618 = vrcp.f32 %v1656_v12 }
0x10d6   :  { %5095 = vmatmul.msk.f32.vlgmr.msra.gmra.mxu2 %vm97_vm0, %v1659_v11 }
0x10d7   :  { %1967 = vmatpush.msra.mxu2 %v5133_v13 }
0x10d9   :  { %1968 = vmatpush.msra.mxu2 %v5132_v14 }
0x10db   :  { %v5619_v17 = vpop.eup %5618  ;;  %1969 = vmatpush.msra.mxu2 %v5131_v15 }
0x10dc   :  { %v1660_v52 = vmul.f32 %v5619_v17, %v5615_v3  ;;  %v5513_v17 = vld [vmem:[%s7743_s7 + $0x7] ss:$0 sm:$0xff] }
0x10dd   :  { %1970 = vmatpush.msra.mxu2 %v5130_v16 }
0x10de   :  { %5096 = vmatmul.msk.f32.gmra.mxu2 %vm97_vm0, %v1660_v52 }
0x10e6   :  { %5119 = vmatmul.msk.f32.vlgmr.msrb.gmra.mxu2 %vm137_vm1, %v6386_v48 }
0x10ee   :  { %5120 = vmatmul.msk.f32.gmra.mxu2 %vm137_vm1, %v6395_v20 }
0x10f6   :  { %5135 = vmatmul.msk.f32.vlgmr.msra.gmra.mxu2 %vm137_vm1, %v6386_v48 }
0x10fe   :  { %5136 = vmatmul.msk.f32.gmra.mxu2 %vm137_vm1, %v6395_v20 }
0x1159   :  { %v1684_v19 = vpop.f32.mrf.mxu2 }
0x115a   :  { %5098 = vmatmul.msk.f32.vlgmr.msra.gmra.mxu3 %vm269_vm2, %v1684_v19 }
0x115b   :  { %2000 = vmatpush.msra.mxu3 %v5140_v18 }
0x115d   :  { %2001 = vmatpush.msra.mxu3 %v5139_v53 }
0x115f   :  { %2002 = vmatpush.msra.mxu3 %v5138_v35  ;;  %v5515_v35 = vld [vmem:[%s7741_s9 + $0x7] ss:$0 sm:$0xff] }
0x1161   :  { %v1687_v21 = vpop.f32.mrf.mxu2  ;;  %2003 = vmatpush.msra.mxu3 %v5137_v49 }
0x1162   :  { %5099 = vmatmul.msk.f32.gmra.mxu3 %vm269_vm2, %v1687_v21 }
0x1169   :  { %v1816_v25 = vpop.f32.mrf.mxu2 }
0x116a   :  { %5123 = vmatmul.msk.f32.vlgmr.msrb.gmra.mxu3 %vm269_vm2, %v1751_v24  ;;  %v1817_v31 = vadd.f32 %v5512_v27, %v1816_v25 }
0x1171   :  { %v1819_v29 = vpop.f32.mrf.mxu2 }
0x1172   :  { %v1820_v30 = vadd.f32 %v5512_v27, %v1819_v29  ;;  %5124 = vmatmul.msk.f32.gmra.mxu3 %vm269_vm2, %v1754_v38 }
0x1174   :  { %1903 = vmatpush.msrb.mxu0 %v1820_v30 }
0x1176   :  { %1904 = vmatpush.msrb.mxu0 %v1817_v31 }
0x1178   :  { %2033 = vmatpush.msra.mxu0 %v5147_v4 }
0x1179   :  { %v1972_v16 = vpop.f32.mrf.mxu2 }
0x117a   :  { %5142 = vmatmul.msk.f32.vlgmr.msra.gmra.mxu3 %vm137_vm1, %v6386_v48  ;;  %2034 = vmatpush.msra.mxu0 %v5146_v5  ;;  %v1973_v52 = vadd.f32 %v5513_v17, %v1972_v16 }
0x117c   :  { %2035 = vmatpush.msra.mxu0 %v5145_v6 }
0x117e   :  { %2036 = vmatpush.msra.mxu0 %v5144_v7 }
0x1181   :  { %v1975_v19 = vpop.f32.mrf.mxu2 }
0x1182   :  { %5143 = vmatmul.msk.f32.gmra.mxu3 %vm137_vm1, %v6395_v20  ;;  %v1976_v53 = vadd.f32 %v5513_v17, %v1975_v19 }
0x11dd   :  { %v6598_v32 = vpop.f32.mrf.mxu3 }
0x11e5   :  { %v6600_v33 = vpop.f32.mrf.mxu3 }
0x11ed   :  { %v1851_v39 = vpop.f32.mrf.mxu3 }
0x11ee   :  { %v1857_v40 = vmul.f32 0.35355338, %v1851_v39 }
0x11f0   :  { %v1859_v41 = vadd.f32 %v6442_v45, %v1857_v40 }
0x11f2   :  { %v1861_v42 = vsel %vm97_vm0, %v1859_v41, -inf }
0x11f3   :  { %1862 = vmax.xlane.f32.xlu2 %v1861_v42 }
0x11f5   :  { %v1854_v43 = vpop.f32.mrf.mxu3 }
0x11f6   :  { %v1858_v44 = vmul.f32 0.35355338, %v1854_v43 }
0x11f8   :  { %v1860_v46 = vadd.f32 %v6449_v54, %v1858_v44 }
0x11fa   :  { %v1864_v47 = vsel %vm97_vm0, %v1860_v46, -inf }
0x11fb   :  { %1865 = vmax.xlane.f32.xlu0 %v1864_v47 }
0x11fd   :  { %v2005_v50 = vpop.f32.mrf.mxu3 }
0x11fe   :  { %v2006_v57 = vadd.f32 %v5514_v51, %v2005_v50 }
0x1205   :  { %v2008_v55 = vpop.f32.mrf.mxu3 }
0x1206   :  { %v2009_v56 = vadd.f32 %v5514_v51, %v2008_v55 }
0x1208   :  { %5151 = vmatpush.xpose.msk.msra.mxu1 %vm269_vm2, %v2009_v56 }
0x120c   :  { %5152 = vmatpush.xpose.msk.msra.mxu1 %vm269_vm2, %v2006_v57 }
0x1266   :  { %v1863_v58 = vpop.xlane.xlu2 %1862 }
0x1267   :  { %v1867_v60 = vsub.f32 %v1859_v41, %v1863_v58 }
0x1269   :  { %v1869_v59 = vmul.f32 1.442695, %v1867_v60 }
0x126b   :  { %5620 = vpow2.f32 %v1869_v59 }
0x126e   :  { %v1866_v61 = vpop.xlane.xlu0 %1865 }
0x126f   :  { %v1868_v1 = vsub.f32 %v1860_v46, %v1866_v61 }
0x1271   :  { %v5621_v62 = vpop.eup %5620  ;;  %v1871_v63 = vmul.f32 1.442695, %v1868_v1  ;;  %v5510_v1 = vld [vmem:[%s7693_s14 + $0x1] ss:$0 sm:$0xff] }
0x1272   :  { %v1873_v0 = vsel %vm97_vm0, %v5621_v62, 0.0  ;;  %v1500_v4 = vadd.f32 %v5510_v1, %v6522_v37  ;;  %v5165_v37 = vld [vmem:[%s7697_s17 + $0x38] sm:$0xff] }
0x1273   :  { %5622 = vpow2.f32 %v1871_v63  ;;  %1874 = vadd.xlane.f32.xlu1 %v1873_v0 }
0x1274   :  { %v1722_v6 = vadd.f32 %v6600_v33, %v1500_v4  ;;  %v5164_v33 = vld [vmem:[%s7697_s17 + $0x30] sm:$0xff] }
0x1279   :  { %v5623_v2 = vpop.eup %5622 }
0x127a   :  { %v1876_v3 = vsel %vm97_vm0, %v5623_v2, 0.0 }
0x127b   :  { %1877 = vadd.xlane.f32.xlu2 %v1876_v3 }
0x12e6   :  { %v1875_v8 = vpop.xlane.xlu1 %1874 }
0x12e7   :  { %5624 = vrcp.f32 %v1875_v8 }
0x12ed   :  { %v5625_v9 = vpop.eup %5624 }
0x12ee   :  { %v1881_v10 = vmul.f32 %v5625_v9, %v5621_v62  ;;  %v1878_v11 = vpop.xlane.xlu2 %1877  ;;  %v1499_v62 = vadd.f32 %v5510_v1, %v6520_v36  ;;  %v5170_v1 = vld [vmem:[%s7698_s19 + $0x28] sm:$0xff] }
0x12ef   :  { %5626 = vrcp.f32 %v1878_v11 }
0x12f0   :  { %5125 = vmatmul.msk.f32.vlgmr.msrb.gmra.mxu0 %vm97_vm0, %v1881_v10  ;;  %v1721_v63 = vadd.f32 %v6598_v32, %v1499_v62  ;;  %v5169_v62 = vld [vmem:[%s7698_s19 + $0x20] sm:$0xff] }
0x12f1   :  { %2259 = vmatpush.msrb.mxu0 %v5165_v37 }
0x12f3   :  { %2260 = vmatpush.msrb.mxu0 %v5164_v33 }
0x12f5   :  { %v5627_v12 = vpop.eup %5626 }
0x12f6   :  { %v1882_v13 = vmul.f32 %v5627_v12, %v5623_v2 }
0x12f8   :  { %5126 = vmatmul.msk.f32.gmra.mxu0 %vm97_vm0, %v1882_v13 }
0x1300   :  { %5149 = vmatmul.msk.f32.vlgmr.msra.gmra.mxu0 %vm137_vm1, %v6386_v48 }
0x1308   :  { %5150 = vmatmul.msk.f32.gmra.mxu0 %vm137_vm1, %v6395_v20 }
0x136d   :  { %v1906_v14 = vpop.f32.mrf.mxu0 }
0x136e   :  { %5128 = vmatmul.msk.f32.vlgmr.msrb.gmra.mxu1 %vm269_vm2, %v1906_v14 }
0x1375   :  { %v1909_v15 = vpop.f32.mrf.mxu0 }
0x1376   :  { %5129 = vmatmul.msk.f32.gmra.mxu1 %vm269_vm2, %v1909_v15  ;;  %v5162_v15 = vld [vmem:[%s7697_s17 + $0x20] sm:$0xff] }
0x137d   :  { %v2038_v18 = vpop.f32.mrf.mxu0 }
0x137e   :  { %5153 = vmatmul.msk.f32.vlgmr.msra.gmra.mxu1 %vm269_vm2, %v1973_v52  ;;  %v2039_v22 = vadd.f32 %v5515_v35, %v2038_v18 }
0x1385   :  { %v2041_v49 = vpop.f32.mrf.mxu0 }
0x1386   :  { %v2042_v21 = vadd.f32 %v5515_v35, %v2041_v49  ;;  %5154 = vmatmul.msk.f32.gmra.mxu1 %vm269_vm2, %v1976_v53 }
0x1388   :  { %2125 = vmatpush.msrb.mxu2 %v2042_v21  ;;  %v5172_v21 = vld [vmem:[%s7698_s19 + $0x38] sm:$0xff] }
0x1389   :  { %2300 = vmatpush.msrb.mxu1 %v5172_v21 }
0x138a   :  { %2126 = vmatpush.msrb.mxu2 %v2039_v22 }
0x13eb   :  { %v1937_v23 = vpop.f32.mrf.mxu1 }
0x13ec   :  { %v1943_v0 = vadd.f32 %v1937_v23, %v1721_v63  ;;  %v5518_v63 = vld [vmem:[%s7696_s18 + $0x1] ss:$0 sm:$0xff] }
0x13f3   :  { %v1940_v24 = vpop.f32.mrf.mxu1 }
0x13f4   :  { %v1944_v9 = vadd.f32 %v1940_v24, %v1722_v6 }
0x13fb   :  { %v2073_v25 = vpop.f32.mrf.mxu1 }
0x13fc   :  { %v2079_v26 = vmul.f32 0.35355338, %v2073_v25 }
0x13fe   :  { %v2081_v38 = vadd.f32 %v6442_v45, %v2079_v26 }
0x1400   :  { %v2083_v27 = vsel %vm97_vm0, %v2081_v38, -inf }
0x1401   :  { %2084 = vmax.xlane.f32.xlu0 %v2083_v27 }
0x1403   :  { %v2076_v29 = vpop.f32.mrf.mxu1 }
0x1404   :  { %v2080_v30 = vmul.f32 0.35355338, %v2076_v29 }
0x1406   :  { %v2082_v31 = vadd.f32 %v6449_v54, %v2080_v30  ;;  %v5157_v54 = vld [vmem:[%s7691_s13 + $0x38] sm:$0xff] }
0x1407   :  { %2157 = vmatpush.msrb.mxu3 %v5157_v54 }
0x1408   :  { %v2086_v34 = vsel %vm97_vm0, %v2082_v31, -inf }
0x1409   :  { %2087 = vmax.xlane.f32.xlu1 %v2086_v34 }
0x1474   :  { %v2085_v39 = vpop.xlane.xlu0 %2084 }
0x1475   :  { %v2089_v40 = vsub.f32 %v2081_v38, %v2085_v39 }
0x1477   :  { %v2091_v41 = vmul.f32 1.442695, %v2089_v40 }
0x1479   :  { %5628 = vpow2.f32 %v2091_v41 }
0x147c   :  { %v2088_v42 = vpop.xlane.xlu1 %2087 }
0x147d   :  { %v2090_v43 = vsub.f32 %v2082_v31, %v2088_v42  ;;  %v5516_v42 = vld [vmem:[%s7694_s15 + $0x1] ss:$0 sm:$0xff] }
0x147f   :  { %v5629_v44 = vpop.eup %5628  ;;  %v2093_v46 = vmul.f32 1.442695, %v2090_v43 }
0x1480   :  { %v2095_v45 = vsel %vm97_vm0, %v5629_v44, 0.0 }
0x1481   :  { %5630 = vpow2.f32 %v2093_v46  ;;  %2096 = vadd.xlane.f32.xlu2 %v2095_v45  ;;  %v5517_v46 = vld [vmem:[%s7695_s16 + $0x1] ss:$0 sm:$0xff] }
0x1487   :  { %v5631_v47 = vpop.eup %5630 }
0x1488   :  { %v2098_v50 = vsel %vm97_vm0, %v5631_v47, 0.0 }
0x1489   :  { %2099 = vadd.xlane.f32.xlu0 %v2098_v50 }
0x14f4   :  { %v2097_v51 = vpop.xlane.xlu2 %2096 }
0x14f5   :  { %5632 = vrcp.f32 %v2097_v51 }
0x14fb   :  { %v5633_v55 = vpop.eup %5632 }
0x14fc   :  { %v2103_v56 = vmul.f32 %v5633_v55, %v5629_v44  ;;  %v2100_v57 = vpop.xlane.xlu0 %2099 }
0x14fd   :  { %5634 = vrcp.f32 %v2100_v57 }
0x14fe   :  { %5155 = vmatmul.msk.f32.vlgmr.msrb.gmra.mxu2 %vm97_vm0, %v2103_v56 }
0x1503   :  { %v5635_v58 = vpop.eup %5634 }
0x1504   :  { %v2104_v60 = vmul.f32 %v5635_v58, %v5631_v47 }
0x1506   :  { %5156 = vmatmul.msk.f32.gmra.mxu2 %vm97_vm0, %v2104_v60 }
0x1581   :  { %v2128_v59 = vpop.f32.mrf.mxu2 }
0x1582   :  { %5158 = vmatmul.msk.f32.vlgmr.msrb.gmra.mxu3 %vm269_vm2, %v2128_v59 }
0x1589   :  { %v2131_v61 = vpop.f32.mrf.mxu2 }
0x158a   :  { %5159 = vmatmul.msk.f32.gmra.mxu3 %vm269_vm2, %v2131_v61  ;;  %v5171_v61 = vld [vmem:[%s7698_s19 + $0x30] sm:$0xff] }
0x158b   :  { %2301 = vmatpush.msrb.mxu1 %v5171_v61 }
0x158d   :  { %2302 = vmatpush.msrb.mxu1 %v5170_v1 }
0x158f   :  { %2303 = vmatpush.msrb.mxu1 %v5169_v62 }
0x1605   :  { %v2159_v2 = vpop.f32.mrf.mxu3 }
0x1606   :  { %v2165_v3 = vadd.f32 %v2159_v2, %v1943_v0 }
0x1608   :  { %v2167_v5 = vadd.f32 %v2165_v3, %v6386_v48 }
0x160a   :  { %v2173_v7 = vsel %vm137_vm1, %v2167_v5, 0.0  ;;  %v2181_v8 = vmul.f32 %v2167_v5, %v2167_v5 }
0x160b   :  { %2174 = vadd.xlane.f32.xlu1 %v2173_v7  ;;  %v5519_v7 = vld [vmem:[%s7699_s20 + $0x1] ss:$0 sm:$0xff] }
0x160c   :  { %v2183_v10 = vsel %vm137_vm1, %v2181_v8, 0.0 }
0x160d   :  { %2184 = vadd.xlane.f32.xlu2 %v2183_v10  ;;  %v2162_v36 = vpop.f32.mrf.mxu3 }
0x160e   :  { %v2166_v11 = vadd.f32 %v2162_v36, %v1944_v9 }
0x1610   :  { %v2168_v32 = vadd.f32 %v2166_v11, %v6395_v20  ;;  %v5163_v20 = vld [vmem:[%s7697_s17 + $0x28] sm:$0xff] }
0x1611   :  { %2261 = vmatpush.msrb.mxu0 %v5163_v20 }
0x1612   :  { %v2176_v12 = vsel %vm137_vm1, %v2168_v32, 0.0  ;;  %v2182_v13 = vmul.f32 %v2168_v32, %v2168_v32 }
0x1613   :  { %2177 = vadd.xlane.f32.xlu0 %v2176_v12  ;;  %2262 = vmatpush.msrb.mxu0 %v5162_v15  ;;  %v2381_v15 = vld [vmem:[%s7702_s23 + $0x30] sm:$0xff] }
0x1614   :  { %v2186_v48 = vsel %vm137_vm1, %v2182_v13, 0.0 }
0x1615   :  { %2187 = vadd.xlane.f32.xlu1 %v2186_v48 }
0x167e   :  { %v2175_v14 = vpop.xlane.xlu1 %2174 }
0x167f   :  { %v2179_v16 = vmul.f32 %v2175_v14, %v6271_v28  ;;  %v2382_v14 = vld [vmem:[%s7702_s23 + $0x38] sm:$0xff] }
0x1680   :  { %v2185_v17 = vpop.xlane.xlu2 %2184  ;;  %5178 = vmatpush.xpose.msk.msra.mxu2 %vm137_vm1, %v2382_v14  ;;  %2507 = vmatpush.msra.mxu3 %v2382_v14 }
0x1681   :  { %v2191_v52 = vmul.f32 %v2179_v16, %v2179_v16  ;;  %v2189_v18 = vmul.f32 %v2185_v17, %v6271_v28  ;;  %v2195_v41 = vsub.f32 %v2167_v5, %v2179_v16  ;;  %v2380_v16 = vld [vmem:[%s7702_s23 + $0x28] sm:$0xff]  ;;  %v2379_v17 = vld [vmem:[%s7702_s23 + $0x20] sm:$0xff] }
0x1682   :  { %2508 = vmatpush.msra.mxu3 %v2381_v15 }
0x1683   :  { %v2193_v19 = vsub.f32 %v2189_v18, %v2191_v52  ;;  %v2378_v52 = vld [vmem:[%s7702_s23 + $0x18] sm:$0xff]  ;;  %v2377_v18 = vld [vmem:[%s7702_s23 + $0x10] sm:$0xff] }
0x1684   :  { %5179 = vmatpush.xpose.msk.msra.mxu2 %vm137_vm1, %v2381_v15  ;;  %2509 = vmatpush.msra.mxu3 %v2380_v16 }
0x1685   :  { %v2197_v53 = vadd.f32 1e-05, %v2193_v19  ;;  %v2376_v19 = vld [vmem:[%s7702_s23 + $0x8] sm:$0xff] }
0x1686   :  { %v2178_v35 = vpop.xlane.xlu0 %2177  ;;  %2510 = vmatpush.msra.mxu3 %v2379_v17 }
0x1687   :  { %5636 = vrsqrt.f32 %v2197_v53  ;;  %v2180_v49 = vmul.f32 %v2178_v35, %v6271_v28  ;;  %vm2205_vm4 = vweird.f32 %v2197_v53 }
0x1688   :  { %v2188_v22 = vpop.xlane.xlu1 %2187  ;;  %5180 = vmatpush.xpose.msk.msra.mxu2 %vm137_vm1, %v2380_v16  ;;  %2511 = vmatpush.msra.mxu3 %v2378_v52 }
0x1689   :  { %v2192_v23 = vmul.f32 %v2180_v49, %v2180_v49  ;;  %v2190_v24 = vmul.f32 %v2188_v22, %v6271_v28  ;;  %v2196_v56 = vsub.f32 %v2168_v32, %v2180_v49 }
0x168a   :  { %2512 = vmatpush.msra.mxu3 %v2377_v18 }
0x168b   :  { %v2194_v25 = vsub.f32 %v2190_v24, %v2192_v23 }
0x168c   :  { %5181 = vmatpush.xpose.msk.msra.mxu2 %vm137_vm1, %v2379_v17  ;;  %2513 = vmatpush.msra.mxu3 %v2376_v19 }
0x168d   :  { %v5637_v26 = vpop.eup %5636  ;;  %v2198_v38 = vadd.f32 1e-05, %v2194_v25 }
0x168e   :  { %v2200_v27 = vmul.f32 %v5637_v26, %v2197_v53  ;;  %vm2206_vm3 = vweird.f32 %v5637_v26  ;;  %v2375_v53 = vld [vmem:[%s7702_s23] sm:$0xff]  ;;  %s7745_s23 = sld [smem:[#allocation15_spill]] }
0x168f   :  { %5638 = vrsqrt.f32 %v2198_v38  ;;  %vm2207_vm5 = vmor %vm2205_vm4, %vm2206_vm3  ;;  %vm2215_vm7 = vweird.f32 %v2198_v38  ;;  %2514 = vmatpush.msra.mxu3 %v2375_v53 }
0x1690   :  { %v2201_v29 = vmul.f32 %v5637_v26, %v2200_v27  ;;  %5182 = vmatpush.xpose.msk.msra.mxu2 %vm137_vm1, %v2378_v52 }
0x1692   :  { %v2202_v30 = vmul.f32 0.5, %v2201_v29 }
0x1694   :  { %v2203_v31 = vsub.f32 1.5, %v2202_v30  ;;  %5183 = vmatpush.xpose.msk.msra.mxu2 %vm137_vm1, %v2377_v18 }
0x1695   :  { %v5639_v34 = vpop.eup %5638 }
0x1696   :  { %v2204_v39 = vmul.f32 %v5637_v26, %v2203_v31  ;;  %v2210_v40 = vmul.f32 %v5639_v34, %v2198_v38  ;;  %vm2216_vm6 = vweird.f32 %v5639_v34 }
0x1697   :  { %vm2217_vm8 = vmor %vm2215_vm7, %vm2216_vm6 }
0x1698   :  { %v2208_v43 = vsel %vm2207_vm5, %v5637_v26, %v2204_v39  ;;  %v2211_v44 = vmul.f32 %v5639_v34, %v2210_v40  ;;  %5184 = vmatpush.xpose.msk.msra.mxu2 %vm137_vm1, %v2376_v19 }
0x1699   :  { %v2219_v45 = vmul.f32 %v2208_v43, %v2195_v41 }
0x169a   :  { %v2212_v47 = vmul.f32 0.5, %v2211_v44 }
0x169b   :  { %v2224_v50 = vmul.f32 %v5516_v42, %v2219_v45 }
0x169c   :  { %v2213_v54 = vsub.f32 1.5, %v2212_v47  ;;  %5185 = vmatpush.xpose.msk.msra.mxu2 %vm137_vm1, %v2375_v53 }
0x169d   :  { %v2229_v51 = vadd.f32 %v5517_v46, %v2224_v50  ;;  %v5520_v50 = vld [vmem:[%s7700_s21 + $0x1] ss:$0 sm:$0xff] }
0x169e   :  { %v2214_v55 = vmul.f32 %v5639_v34, %v2213_v54 }
0x169f   :  { %5167 = vmatmul.msk.f32.vlgmr.msrb.gmra.mxu0 %vm137_vm1, %v2229_v51 }
0x16a0   :  { %v2218_v57 = vsel %vm2217_vm8, %v5639_v34, %v2214_v55  ;;  %v5521_v55 = vld [vmem:[%s7701_s22 + $0x1] ss:$0 sm:$0xff] }
0x16a1   :  { %v2220_v58 = vmul.f32 %v2218_v57, %v2196_v56 }
0x16a3   :  { %v2225_v60 = vmul.f32 %v5516_v42, %v2220_v58 }
0x16a5   :  { %v2230_v59 = vadd.f32 %v5517_v46, %v2225_v60 }
0x16a7   :  { %5168 = vmatmul.msk.f32.gmra.mxu0 %vm137_vm1, %v2230_v59 }
0x171c   :  { %v2264_v0 = vpop.f32.mrf.mxu0 }
0x171d   :  { %v2265_v2 = vadd.f32 %v5518_v63, %v2264_v0 }
0x171f   :  { %v2270_v3 = vmax.f32 %v2265_v2, 0.0 }
0x1721   :  { %5174 = vmatmul.msk.f32.vlgmr.msrb.gmra.mxu1 %vm137_vm1, %v2270_v3  ;;  %v5522_v3 = vld [vmem:[%s7703_s24] ss:$0 sm:$0xff] }
0x1724   :  { %v2267_v4 = vpop.f32.mrf.mxu0 }
0x1725   :  { %v2268_v5 = vadd.f32 %v5518_v63, %v2267_v4 }
0x1727   :  { %v2271_v6 = vmax.f32 %v2268_v5, 0.0 }
0x1729   :  { %5175 = vmatmul.msk.f32.gmra.mxu1 %vm137_vm1, %v2271_v6 }
0x179e   :  { %v2305_v8 = vpop.f32.mrf.mxu1 }
0x179f   :  { %v2306_v9 = vadd.f32 %v5519_v7, %v2305_v8 }
0x17a1   :  { %v6714_v10 = vadd.f32 %v2306_v9, %v2229_v51 }
0x17a3   :  { %v2317_v36 = vsel %vm137_vm1, %v6714_v10, 0.0  ;;  %v2325_v11 = vmul.f32 %v6714_v10, %v6714_v10 }
0x17a4   :  { %2318 = vadd.xlane.f32.xlu2 %v2317_v36 }
0x17a5   :  { %v2327_v32 = vsel %vm137_vm1, %v2325_v11, 0.0  ;;  %v2451_v11 = vlaneseq }
0x17a6   :  { %2328 = vadd.xlane.f32.xlu0 %v2327_v32  ;;  %v2308_v12 = vpop.f32.mrf.mxu1 }
0x17a7   :  { %v2309_v13 = vadd.f32 %v5519_v7, %v2308_v12  ;;  %v2452_v32 = vand.u32 127, %v2451_v11 }
0x17a9   :  { %v6721_v48 = vadd.f32 %v2309_v13, %v2230_v59 }
0x17ab   :  { %v2320_v37 = vsel %vm137_vm1, %v6721_v48, 0.0  ;;  %v2326_v33 = vmul.f32 %v6721_v48, %v6721_v48 }
0x17ac   :  { %2321 = vadd.xlane.f32.xlu1 %v2320_v37 }
0x17ad   :  { %v2330_v20 = vsel %vm137_vm1, %v2326_v33, 0.0 }
0x17ae   :  { %2331 = vadd.xlane.f32.xlu2 %v2330_v20 }
0x1817   :  { %v2319_v35 = vpop.xlane.xlu2 %2318 }
0x1818   :  { %v2323_v49 = vmul.f32 %v2319_v35, %v6271_v28 }
0x1819   :  { %v2329_v21 = vpop.xlane.xlu0 %2328 }
0x181a   :  { %v2335_v22 = vmul.f32 %v2323_v49, %v2323_v49  ;;  %v2333_v23 = vmul.f32 %v2329_v21, %v6271_v28  ;;  %v2339_v47 = vsub.f32 %v6714_v10, %v2323_v49 }
0x181c   :  { %v2337_v24 = vsub.f32 %v2333_v23, %v2335_v22 }
0x181e   :  { %v2341_v25 = vadd.f32 1e-05, %v2337_v24 }
0x181f   :  { %v2322_v26 = vpop.xlane.xlu1 %2321 }
0x1820   :  { %5640 = vrsqrt.f32 %v2341_v25  ;;  %v2324_v38 = vmul.f32 %v2322_v26, %v6271_v28  ;;  %vm2349_vm10 = vweird.f32 %v2341_v25 }
0x1821   :  { %v2332_v27 = vpop.xlane.xlu2 %2331 }
0x1822   :  { %v2336_v29 = vmul.f32 %v2324_v38, %v2324_v38  ;;  %v2334_v30 = vmul.f32 %v2332_v27, %v6271_v28  ;;  %v2340_v1 = vsub.f32 %v6721_v48, %v2324_v38 }
0x1824   :  { %v2338_v31 = vsub.f32 %v2334_v30, %v2336_v29 }
0x1826   :  { %v5641_v34 = vpop.eup %5640  ;;  %v2342_v39 = vadd.f32 1e-05, %v2338_v31 }
0x1827   :  { %v2344_v40 = vmul.f32 %v5641_v34, %v2341_v25  ;;  %vm2350_vm9 = vweird.f32 %v5641_v34 }
0x1828   :  { %5642 = vrsqrt.f32 %v2342_v39  ;;  %vm2351_vm11 = vmor %vm2349_vm10, %vm2350_vm9  ;;  %vm2359_vm13 = vweird.f32 %v2342_v39 }
0x1829   :  { %v2345_v41 = vmul.f32 %v5641_v34, %v2344_v40 }
0x182b   :  { %v2346_v42 = vmul.f32 0.5, %v2345_v41 }
0x182d   :  { %v2347_v43 = vsub.f32 1.5, %v2346_v42 }
0x182e   :  { %v5643_v44 = vpop.eup %5642 }
0x182f   :  { %v2348_v46 = vmul.f32 %v5641_v34, %v2347_v43  ;;  %v2354_v45 = vmul.f32 %v5643_v44, %v2342_v39  ;;  %vm2360_vm12 = vweird.f32 %v5643_v44  ;;  %v5744_v39 = vmov 0.0  }
0x1830   :  { %vm2361_vm14 = vmor %vm2359_vm13, %vm2360_vm12 }
0x1831   :  { %v2352_v54 = vsel %vm2351_vm11, %v5641_v34, %v2348_v46  ;;  %v2355_v51 = vmul.f32 %v5643_v44, %v2354_v45 }
0x1832   :  { %v2363_v56 = vmul.f32 %v2352_v54, %v2339_v47 }
0x1833   :  { %v2356_v57 = vmul.f32 0.5, %v2355_v51 }
0x1834   :  { %v2368_v58 = vmul.f32 %v5520_v50, %v2363_v56 }
0x1835   :  { %v2357_v60 = vsub.f32 1.5, %v2356_v57 }
0x1836   :  { %v6771_v59 = vadd.f32 %v5521_v55, %v2368_v58 }
0x1837   :  { %v2358_v61 = vmul.f32 %v5643_v44, %v2357_v60 }
0x1838   :  { %5186 = vmatmul.msk.f32.vlgmr.msra.gmra.mxu2 %vm137_vm1, %v6771_v59  ;;  %v2522_v52 = vmul.f32 %v6771_v59, %v6771_v59 }
0x1839   :  { %v2362_v62 = vsel %vm2361_vm14, %v5643_v44, %v2358_v61 }
0x183a   :  { %v2364_v63 = vmul.f32 %v2362_v62, %v2340_v1  ;;  %v2524_v18 = vsel %vm137_vm1, %v2522_v52, 0.0 }
0x183c   :  { %v2369_v0 = vmul.f32 %v5520_v50, %v2364_v63 }
0x183e   :  { %v6776_v2 = vadd.f32 %v5521_v55, %v2369_v0 }
0x1840   :  { %5187 = vmatmul.msk.f32.gmra.mxu2 %vm137_vm1, %v6776_v2  ;;  %v2523_v25 = vmul.f32 %v6776_v2, %v6776_v2 }
0x1842   :  { %v2527_v26 = vsel %vm137_vm1, %v2523_v25, 0.0 }
0x18bb   :  { %v2430_v4 = vpop.f32.mrf.mxu2 }
0x18bc   :  { %v2437_v5 = vmul.f32 2.0, %v2430_v4 }
0x18be   :  { %v2442_v6 = vsub.f32 %v5522_v3, %v2437_v5 }
0x18c0   :  { %v2445_v7 = vsel %vm2444_vm15, %v2442_v6, inf }
0x18c1   :  { %2446 = vmin.xlane.f32.xlu0 %v2445_v7 }
0x18c3   :  { %v2433_v8 = vpop.f32.mrf.mxu2 }
0x18c4   :  { %v2438_v9 = vmul.f32 2.0, %v2433_v8 }
0x18c6   :  { %v2443_v10 = vsub.f32 %v5522_v3, %v2438_v9 }
0x18c8   :  { %v2448_v36 = vsel %vm2444_vm15, %v2443_v10, inf }
0x18c9   :  { %2449 = vmin.xlane.f32.xlu1 %v2448_v36 }
0x1934   :  { %v2447_v12 = vpop.xlane.xlu0 %2446 }
0x1935   :  { %vm2453_vm3 = vcmp.le.f32.partialorder %v2442_v6, %v2447_v12 }
0x1936   :  { %v2455_v13 = vsel %vm2453_vm3, %v2452_v32, 64 }
0x1937   :  { %v2457_v48 = vsel %vm2444_vm15, %v2455_v13, 2147483647 }
0x1938   :  { %v2459_v37 = vshra.s32 %v2457_v48, 16  ;;  %v2458_v19 = vand.u32 65535, %v2457_v48 }
0x193a   :  { %v2461_v33 = vcvt.s32.f32 %v2459_v37  ;;  %v2460_v35 = vcvt.s32.f32 %v2458_v19 }
0x193c   :  { %2462 = vmin.xlane.f32.xlu2 %v2461_v33  ;;  %v2450_v20 = vpop.xlane.xlu1 %2449 }
0x193d   :  { %vm2454_vm4 = vcmp.le.f32.partialorder %v2443_v10, %v2450_v20 }
0x193e   :  { %v2456_v14 = vsel %vm2454_vm4, %v2452_v32, 64 }
0x193f   :  { %v2472_v15 = vsel %vm2444_vm15, %v2456_v14, 2147483647 }
0x1940   :  { %v2474_v16 = vshra.s32 %v2472_v15, 16  ;;  %v2473_v21 = vand.u32 65535, %v2472_v15 }
0x1942   :  { %v2476_v17 = vcvt.s32.f32 %v2474_v16  ;;  %v2475_v23 = vcvt.s32.f32 %v2473_v21 }
0x1944   :  { %2477 = vmin.xlane.f32.xlu0 %v2476_v17 }
0x194c   :  { %2525 = vadd.xlane.f32.xlu0 %v2524_v18 }
0x19af   :  { %v2463_v53 = vpop.xlane.xlu2 %2462 }
0x19b0   :  { %vm2464_vm5 = vcmp.eq.f32.partialorder %v2461_v33, %v2463_v53  ;;  %v2469_v38 = vcvt.f32.s32 %v2463_v53 }
0x19b1   :  { %v2465_v49 = vsel %vm2464_vm5, %v2460_v35, inf }
0x19b2   :  { %2466 = vmin.xlane.f32.xlu1 %v2465_v49  ;;  %v2470_v29 = vshll.u32 %v2469_v38, 16 }
0x19b7   :  { %v2478_v22 = vpop.xlane.xlu0 %2477 }
0x19b8   :  { %vm2479_vm6 = vcmp.eq.f32.partialorder %v2476_v17, %v2478_v22  ;;  %v2484_v34 = vcvt.f32.s32 %v2478_v22 }
0x19b9   :  { %v2480_v24 = vsel %vm2479_vm6, %v2475_v23, inf }
0x19ba   :  { %2481 = vmin.xlane.f32.xlu2 %v2480_v24  ;;  %v2485_v42 = vshll.u32 %v2484_v34, 16 }
0x19bf   :  { %v2526_v56 = vpop.xlane.xlu0 %2525 }
0x19c0   :  { %5644 = vrsqrt.f32 %v2526_v56  ;;  %vm2536_vm10 = vweird.f32 %v2526_v56 }
0x19c2   :  { %2528 = vadd.xlane.f32.xlu2 %v2527_v26 }
0x19c6   :  { %v5645_v57 = vpop.eup %5644 }
0x19c7   :  { %v2531_v60 = vmul.f32 %v5645_v57, %v2526_v56  ;;  %vm2537_vm9 = vweird.f32 %v5645_v57 }
0x19c8   :  { %vm2538_vm11 = vmor %vm2536_vm10, %vm2537_vm9 }
0x19c9   :  { %v2532_v61 = vmul.f32 %v5645_v57, %v2531_v60 }
0x19cb   :  { %v2533_v63 = vmul.f32 0.5, %v2532_v61 }
0x19cd   :  { %v2534_v4 = vsub.f32 1.5, %v2533_v63 }
0x19cf   :  { %v2535_v9 = vmul.f32 %v5645_v57, %v2534_v4 }
0x19d1   :  { %v2539_v12 = vsel %vm2538_vm11, %v5645_v57, %v2535_v9  ;;  %v5202_v9 = vld [vmem:[%s7736_s29 + $0x110] sm:$0xff] }
0x19d2   :  { %v2550_v15 = vmul.f32 %v2539_v12, %v6771_v59  ;;  %v5193_v12 = vld [vmem:[%s7735_s28 + $0x100] sm:$0xff] }
0x1a25   :  { %v2467_v27 = vpop.xlane.xlu1 %2466 }
0x1a26   :  { %v2468_v30 = vcvt.f32.s32 %v2467_v27 }
0x1a28   :  { %v6793_v31 = vadd.s32 %v2470_v29, %v2468_v30 }
0x1a2a   :  { %vm2487_vm7 = vcmp.eq.s32.totalorder %v2452_v32, %v6793_v31 }
0x1a2b   :  { %v5188_v40 = vsel %vm2487_vm7, 1.0, %v5744_v39 }
0x1a2c   :  { %5190 = vmatmul.msk.f32.vlgmr.msra.gmra.mxu3 %vm2444_vm15, %v5188_v40 }
0x1a2d   :  { %v2482_v41 = vpop.xlane.xlu2 %2481 }
0x1a2e   :  { %v2483_v43 = vcvt.f32.s32 %v2482_v41 }
0x1a30   :  { %v6797_v44 = vadd.s32 %v2485_v42, %v2483_v43 }
0x1a32   :  { %vm2488_vm8 = vcmp.eq.s32.totalorder %v2452_v32, %v6797_v44 }
0x1a33   :  { %v5189_v46 = vsel %vm2488_vm8, 1.0, %v5744_v39 }
0x1a34   :  { %5191 = vmatmul.msk.f32.gmra.mxu3 %vm2444_vm15, %v5189_v46 }
0x1a35   :  { %v2529_v58 = vpop.xlane.xlu2 %2528 }
0x1a36   :  { %5646 = vrsqrt.f32 %v2529_v58  ;;  %vm2546_vm3 = vweird.f32 %v2529_v58 }
0x1a3c   :  { %v5647_v62 = vpop.eup %5646 }
0x1a3d   :  { %v2541_v0 = vmul.f32 %v5647_v62, %v2529_v58  ;;  %vm2547_vm15 = vweird.f32 %v5647_v62 }
0x1a3e   :  { %vm2548_vm5 = vmor %vm2546_vm3, %vm2547_vm15 }
0x1a3f   :  { %v2542_v5 = vmul.f32 %v5647_v62, %v2541_v0 }
0x1a41   :  { %v2543_v10 = vmul.f32 0.5, %v2542_v5  ;;  %v5196_v5 = vld [vmem:[%s7735_s28 + $0x118] sm:$0xff] }
0x1a42   :  { %2674 = vmatpush.msra.mxu0 %v5196_v5 }
0x1a43   :  { %v2544_v13 = vsub.f32 1.5, %v2543_v10  ;;  %v5209_v10 = vld [vmem:[%s7737_s4 + $0x110] sm:$0xff] }
0x1a45   :  { %v2545_v16 = vmul.f32 %v5647_v62, %v2544_v13  ;;  %v5200_v13 = vld [vmem:[%s7736_s29 + $0x100] sm:$0xff] }
0x1a47   :  { %v2549_v53 = vsel %vm2548_vm5, %v5647_v62, %v2545_v16 }
0x1a48   :  { %v2551_v23 = vmul.f32 %v2549_v53, %v6776_v2 }
0x1aaf   :  { %v6801_v45 = vpop.f32.mrf.mxu3 }
0x1ab0   :  { %v2552_v47 = vmul.f32 %v6801_v45, %v6801_v45 }
0x1ab2   :  { %v2554_v50 = vsel %vm137_vm1, %v2552_v47, 0.0 }
0x1ab3   :  { %2555 = vadd.xlane.f32.xlu1 %v2554_v50 }
0x1ab7   :  { %v6806_v54 = vpop.f32.mrf.mxu3 }
0x1ab8   :  { %v2553_v51 = vmul.f32 %v6806_v54, %v6806_v54 }
0x1aba   :  { %v2557_v55 = vsel %vm137_vm1, %v2553_v51, 0.0 }
0x1abb   :  { %2558 = vadd.xlane.f32.xlu0 %v2557_v55 }
0x1b26   :  { %v2556_v1 = vpop.xlane.xlu1 %2555 }
0x1b27   :  { %5648 = vrsqrt.f32 %v2556_v1  ;;  %vm2566_vm13 = vweird.f32 %v2556_v1 }
0x1b2d   :  { %v5649_v3 = vpop.eup %5648 }
0x1b2e   :  { %v2561_v6 = vmul.f32 %v5649_v3, %v2556_v1  ;;  %v2559_v7 = vpop.xlane.xlu0 %2558  ;;  %vm2567_vm12 = vweird.f32 %v5649_v3 }
0x1b2f   :  { %5650 = vrsqrt.f32 %v2559_v7  ;;  %vm2568_vm14 = vmor %vm2566_vm13, %vm2567_vm12  ;;  %vm2576_vm6 = vweird.f32 %v2559_v7 }
0x1b30   :  { %v2562_v8 = vmul.f32 %v5649_v3, %v2561_v6  ;;  %v5203_v6 = vld [vmem:[%s7736_s29 + $0x118] sm:$0xff] }
0x1b31   :  { %2707 = vmatpush.msra.mxu1 %v5203_v6 }
0x1b32   :  { %v2563_v36 = vmul.f32 0.5, %v2562_v8  ;;  %v5195_v8 = vld [vmem:[%s7735_s28 + $0x110] sm:$0xff] }
0x1b33   :  { %2675 = vmatpush.msra.mxu0 %v5195_v8  ;;  %2708 = vmatpush.msra.mxu1 %v5202_v9  ;;  %v6956_v8 = vld [vmem:[%s7692_s2 + $0x8] sm:$0xff] }
0x1b34   :  { %v2564_v11 = vsub.f32 1.5, %v2563_v36  ;;  %v5194_v36 = vld [vmem:[%s7735_s28 + $0x108] sm:$0xff] }
0x1b35   :  { %v5651_v32 = vpop.eup %5650  ;;  %2676 = vmatpush.msra.mxu0 %v5194_v36 }
0x1b36   :  { %v2565_v48 = vmul.f32 %v5649_v3, %v2564_v11  ;;  %v2571_v37 = vmul.f32 %v5651_v32, %v2559_v7  ;;  %vm2577_vm4 = vweird.f32 %v5651_v32  ;;  %v5210_v7 = vld [vmem:[%s7737_s4 + $0x118] sm:$0xff]  ;;  %v5201_v11 = vld [vmem:[%s7736_s29 + $0x108] sm:$0xff] }
0x1b37   :  { %vm2578_vm7 = vmor %vm2576_vm6, %vm2577_vm4  ;;  %2740 = vmatpush.msrb.mxu3 %v5210_v7  ;;  %2709 = vmatpush.msra.mxu1 %v5201_v11  ;;  %v5527_v11 = vld [vmem:[%s7742_s12 + $0x9] ss:$0 sm:$0xff] }
0x1b38   :  { %v2569_v33 = vsel %vm2568_vm14, %v5649_v3, %v2565_v48  ;;  %v2572_v20 = vmul.f32 %v5651_v32, %v2571_v37  ;;  %v5207_v48 = vld [vmem:[%s7737_s4 + $0x100] sm:$0xff]  ;;  %2677 = vmatpush.msra.mxu0 %v5193_v12  ;;  %v5226_v37 = vld [vmem:[%s7735_s28 + $0x138] sm:$0xff] }
0x1b39   :  { %v6812_v14 = vmul.f32 %v2569_v33, %v6801_v45  ;;  %2741 = vmatpush.msrb.mxu3 %v5209_v10  ;;  %2710 = vmatpush.msra.mxu1 %v5200_v13  ;;  %v5225_v33 = vld [vmem:[%s7735_s28 + $0x130] sm:$0xff] }
0x1b3a   :  { %v2573_v17 = vmul.f32 0.5, %v2572_v20  ;;  %v5224_v20 = vld [vmem:[%s7735_s28 + $0x128] sm:$0xff] }
0x1b3b   :  { %v2582_v52 = vadd.f32 %v6812_v14, %v2550_v15  ;;  %v2622_v24 = vmul.f32 %v6812_v14, %v6771_v59  ;;  %v5223_v15 = vld [vmem:[%s7735_s28 + $0x120] sm:$0xff] }
0x1b3c   :  { %v2574_v18 = vsub.f32 1.5, %v2573_v17 }
0x1b3d   :  { %v2584_v19 = vmul.f32 %v2582_v52, %v2582_v52  ;;  %v2624_v38 = vsel %vm137_vm1, %v2622_v24, 0.0 }
0x1b3e   :  { %v2575_v35 = vmul.f32 %v5651_v32, %v2574_v18  ;;  %v2636_v18 = vmul.f32 2.0, %v6812_v14 }
0x1b3f   :  { %v2586_v49 = vsel %vm137_vm1, %v2584_v19, 0.0 }
0x1b40   :  { %v2579_v21 = vsel %vm2578_vm7, %v5651_v32, %v2575_v35  ;;  %2587 = vadd.xlane.f32.xlu1 %v2586_v49  ;;  %v5208_v32 = vld [vmem:[%s7737_s4 + $0x108] sm:$0xff] }
0x1b41   :  { %v6818_v22 = vmul.f32 %v2579_v21, %v6806_v54  ;;  %2742 = vmatpush.msrb.mxu3 %v5208_v32  ;;  %v5738_v21 = vld [vmem:[%s7740_s3] sm:$0xff] }
0x1b43   :  { %v2583_v25 = vadd.f32 %v6818_v22, %v2551_v23  ;;  %v2623_v62 = vmul.f32 %v6818_v22, %v6776_v2  ;;  %2743 = vmatpush.msrb.mxu3 %v5207_v48 }
0x1b45   :  { %v2585_v26 = vmul.f32 %v2583_v25, %v2583_v25  ;;  %v2627_v3 = vsel %vm137_vm1, %v2623_v62, 0.0  ;;  %2899 = vmatpush.msra.mxu3 %v5226_v37  ;;  %v5220_v62 = vld [vmem:[%s7691_s13 + $0x40] sm:$0xff] }
0x1b46   :  { %2864 = vmatpush.msrb.mxu2 %v5220_v62 }
0x1b47   :  { %v2589_v27 = vsel %vm137_vm1, %v2585_v26, 0.0  ;;  %2900 = vmatpush.msra.mxu3 %v5225_v33 }
0x1b48   :  { %2625 = vadd.xlane.f32.xlu1 %v2624_v38  ;;  %2590 = vadd.xlane.f32.xlu2 %v2589_v27  ;;  %v2637_v27 = vmul.f32 2.0, %v6818_v22  ;;  %v5524_v22 = vld [vmem:[%s7742_s12 + $0x8] ss:$0 sm:$0xff] }
0x1b49   :  { %2901 = vmatpush.msra.mxu3 %v5224_v20 }
0x1b4b   :  { %2902 = vmatpush.msra.mxu3 %v5223_v15 }
0x1bb3   :  { %v2588_v29 = vpop.xlane.xlu1 %2587 }
0x1bb4   :  { %5652 = vrsqrt.f32 %v2588_v29  ;;  %vm2598_vm9 = vweird.f32 %v2588_v29 }
0x1bba   :  { %v5653_v30 = vpop.eup %5652 }
0x1bbb   :  { %v2593_v34 = vmul.f32 %v5653_v30, %v2588_v29  ;;  %v2591_v39 = vpop.xlane.xlu2 %2590  ;;  %vm2599_vm8 = vweird.f32 %v5653_v30  ;;  %v2626_v17 = vpop.xlane.xlu1 %2625 }
0x1bbc   :  { %5654 = vrsqrt.f32 %v2591_v39  ;;  %vm2600_vm10 = vmor %vm2598_vm9, %vm2599_vm8  ;;  %vm2608_vm12 = vweird.f32 %v2591_v39  ;;  %v2638_v53 = vmul.f32 %v2636_v18, %v2626_v17 }
0x1bbd   :  { %v2594_v40 = vmul.f32 %v5653_v30, %v2593_v34 }
0x1bbf   :  { %v2595_v41 = vmul.f32 0.5, %v2594_v40 }
0x1bc1   :  { %v2596_v42 = vsub.f32 1.5, %v2595_v41 }
0x1bc2   :  { %v5655_v43 = vpop.eup %5654 }
0x1bc3   :  { %v2597_v46 = vmul.f32 %v5653_v30, %v2596_v42  ;;  %v2603_v47 = vmul.f32 %v5655_v43, %v2591_v39  ;;  %vm2609_vm11 = vweird.f32 %v5655_v43  ;;  %v5523_v42 = vld [vmem:[%s7743_s7 + $0x8] ss:$0 sm:$0xff] }
0x1bc4   :  { %vm2610_vm13 = vmor %vm2608_vm12, %vm2609_vm11 }
0x1bc5   :  { %v2604_v50 = vmul.f32 %v5655_v43, %v2603_v47  ;;  %v2601_v51 = vsel %vm2600_vm10, %v5653_v30, %v2597_v46  ;;  %v5233_v46 = vld [vmem:[%s7736_s29 + $0x138] sm:$0xff]  ;;  %v5525_v47 = vld [vmem:[%s7741_s9 + $0x8] ss:$0 sm:$0xff] }
0x1bc6   :  { %v2612_v55 = vmul.f32 %v2601_v51, %v2582_v52 }
0x1bc7   :  { %v2605_v56 = vmul.f32 0.5, %v2604_v50 }
0x1bc8   :  { %v2614_v57 = vmul.f32 %v2612_v55, %v6771_v59  ;;  %v2630_v16 = vmul.f32 2.0, %v2612_v55 }
0x1bc9   :  { %v2606_v58 = vsub.f32 1.5, %v2605_v56  ;;  %v5232_v56 = vld [vmem:[%s7736_s29 + $0x130] sm:$0xff] }
0x1bca   :  { %v2616_v60 = vsel %vm137_vm1, %v2614_v57, 0.0 }
0x1bcb   :  { %v2607_v61 = vmul.f32 %v5655_v43, %v2606_v58  ;;  %2617 = vadd.xlane.f32.xlu0 %v2616_v60  ;;  %v5231_v58 = vld [vmem:[%s7736_s29 + $0x128] sm:$0xff]  ;;  %v5230_v60 = vld [vmem:[%s7736_s29 + $0x120] sm:$0xff] }
0x1bcd   :  { %v2611_v1 = vsel %vm2610_vm13, %v5655_v43, %v2607_v61 }
0x1bce   :  { %v2613_v63 = vmul.f32 %v2611_v1, %v2583_v25 }
0x1bd0   :  { %v2615_v0 = vmul.f32 %v2613_v63, %v6776_v2  ;;  %v2631_v24 = vmul.f32 2.0, %v2613_v63 }
0x1bd2   :  { %v2619_v4 = vsel %vm137_vm1, %v2615_v0, 0.0 }
0x1bd3   :  { %2628 = vadd.xlane.f32.xlu0 %v2627_v3  ;;  %2620 = vadd.xlane.f32.xlu2 %v2619_v4  ;;  %v6949_v3 = vld [vmem:[%s7692_s2] sm:$0xff] }
0x1c3e   :  { %v2618_v52 = vpop.xlane.xlu0 %2617 }
0x1c3f   :  { %v2632_v19 = vmul.f32 %v2630_v16, %v2618_v52 }
0x1c41   :  { %v2634_v35 = vsub.f32 %v6771_v59, %v2632_v19 }
0x1c43   :  { %v6883_v49 = vadd.f32 %v2638_v53, %v2634_v35  ;;  %v5240_v53 = vld [vmem:[%s7737_s4 + $0x138] sm:$0xff]  ;;  %v5239_v35 = vld [vmem:[%s7737_s4 + $0x130] sm:$0xff] }
0x1c45   :  { %v6889_v23 = vadd.f32 %v5738_v21, %v6883_v49 }
0x1c46   :  { %v2621_v25 = vpop.xlane.xlu2 %2620  ;;  %v2629_v26 = vpop.xlane.xlu0 %2628 }
0x1c47   :  { %v2633_v38 = vmul.f32 %v2631_v24, %v2621_v25  ;;  %5198 = vmatmul.msk.f32.vlgmr.msra.gmra.mxu0 %vm137_vm1, %v6889_v23  ;;  %5205 = vmatmul.msk.f32.vlgmr.msra.gmra.mxu1 %vm137_vm1, %v6889_v23  ;;  %v2639_v14 = vmul.f32 %v2637_v27, %v2629_v26  ;;  %v5237_v24 = vld [vmem:[%s7737_s4 + $0x120] sm:$0xff] }
0x1c48   :  { %5212 = vmatmul.msk.f32.vlgmr.msrb.gmra.mxu3 %vm137_vm1, %v6889_v23 }
0x1c49   :  { %v2635_v59 = vsub.f32 %v6776_v2, %v2633_v38 }
0x1c4b   :  { %v6899_v29 = vadd.f32 %v2639_v14, %v2635_v59  ;;  %v5256_v59 = vld [vmem:[%s7735_s28 + $0x158] sm:$0xff]  ;;  %v5255_v14 = vld [vmem:[%s7735_s28 + $0x150] sm:$0xff] }
0x1c4d   :  { %v6902_v30 = vadd.f32 %v5738_v21, %v6899_v29  ;;  %v5238_v21 = vld [vmem:[%s7737_s4 + $0x128] sm:$0xff] }
0x1c4f   :  { %5199 = vmatmul.msk.f32.gmra.mxu0 %vm137_vm1, %v6902_v30  ;;  %5206 = vmatmul.msk.f32.gmra.mxu1 %vm137_vm1, %v6902_v30 }
0x1c50   :  { %5213 = vmatmul.msk.f32.gmra.mxu3 %vm137_vm1, %v6902_v30 }
0x1c58   :  { %5228 = vmatmul.msk.f32.vlgmr.msra.gmra.mxu3 %vm137_vm1, %v6889_v23 }
0x1c60   :  { %5229 = vmatmul.msk.f32.gmra.mxu3 %vm137_vm1, %v6902_v30 }
0x1cc4   :  { %v2712_v2 = vpop.f32.mrf.mxu1  ;;  %v2679_v41 = vpop.f32.mrf.mxu0 }
0x1cc5   :  { %v2713_v43 = vadd.f32 %v5524_v22, %v2712_v2  ;;  %v2680_v51 = vadd.f32 %v5523_v42, %v2679_v41  ;;  %v5254_v2 = vld [vmem:[%s7735_s28 + $0x148] sm:$0xff] }
0x1ccb   :  { %v2745_v34 = vpop.f32.mrf.mxu3 }
0x1ccc   :  { %v2715_v39 = vpop.f32.mrf.mxu1  ;;  %v2746_v57 = vadd.f32 %v5525_v47, %v2745_v34  ;;  %v2682_v61 = vpop.f32.mrf.mxu0 }
0x1ccd   :  { %v2716_v40 = vadd.f32 %v5524_v22, %v2715_v39  ;;  %v2683_v1 = vadd.f32 %v5523_v42, %v2682_v61  ;;  %v5253_v22 = vld [vmem:[%s7735_s28 + $0x140] sm:$0xff]  ;;  %v5262_v42 = vld [vmem:[%s7736_s29 + $0x150] sm:$0xff] }
0x1ccf   :  { %5214 = vmatpush.xpose.msk.msrb.mxu0 %vm269_vm2, %v2716_v40  ;;  %v5263_v40 = vld [vmem:[%s7736_s29 + $0x158] sm:$0xff] }
0x1cd3   :  { %v2748_v50 = vpop.f32.mrf.mxu3  ;;  %5215 = vmatpush.xpose.msk.msrb.mxu0 %vm269_vm2, %v2713_v43  ;;  %v5261_v43 = vld [vmem:[%s7736_s29 + $0x148] sm:$0xff] }
0x1cd4   :  { %v2749_v55 = vadd.f32 %v5525_v47, %v2748_v50 }
0x1cd6   :  { %2832 = vmatpush.msrb.mxu1 %v2749_v55  ;;  %5216 = vmatmul.msk.f32.vlgmr.msrb.gmra.mxu0 %vm269_vm2, %v2680_v51  ;;  %v5526_v51 = vld [vmem:[%s7743_s7 + $0x9] ss:$0 sm:$0xff] }
0x1cd7   :  { %2932 = vmatpush.msra.mxu0 %v5233_v46  ;;  %v5260_v46 = vld [vmem:[%s7736_s29 + $0x140] sm:$0xff] }
0x1cd8   :  { %2833 = vmatpush.msrb.mxu1 %v2746_v57 }
0x1cd9   :  { %2933 = vmatpush.msra.mxu0 %v5232_v56 }
0x1cda   :  { %2965 = vmatpush.msra.mxu1 %v5240_v53 }
0x1cdb   :  { %2934 = vmatpush.msra.mxu0 %v5231_v58  ;;  %v2904_v50 = vpop.f32.mrf.mxu3 }
0x1cdc   :  { %2966 = vmatpush.msra.mxu1 %v5239_v35  ;;  %v2905_v55 = vadd.f32 %v5526_v51, %v2904_v50  ;;  %v5291_v50 = vld [vmem:[%s7736_s29 + $0x168] sm:$0xff] }
0x1cdd   :  { %2935 = vmatpush.msra.mxu0 %v5230_v60  ;;  %v5528_v60 = vld [vmem:[%s7741_s9 + $0x9] ss:$0 sm:$0xff] }
0x1cde   :  { %5217 = vmatmul.msk.f32.gmra.mxu0 %vm269_vm2, %v2683_v1  ;;  %2967 = vmatpush.msra.mxu1 %v5238_v21 }
0x1ce0   :  { %2968 = vmatpush.msra.mxu1 %v5237_v24  ;;  %v5270_v24 = vld [vmem:[%s7737_s4 + $0x158] sm:$0xff] }
0x1ce3   :  { %v2907_v57 = vpop.f32.mrf.mxu3 }
0x1ce4   :  { %v2908_v58 = vadd.f32 %v5526_v51, %v2907_v57  ;;  %v5290_v51 = vld [vmem:[%s7736_s29 + $0x160] sm:$0xff]  ;;  %v5529_v57 = vld [vmem:[%s7743_s7 + $0xa] ss:$0 sm:$0xff] }
0x1ce6   :  { %5235 = vmatmul.msk.f32.vlgmr.msra.gmra.mxu0 %vm137_vm1, %v6889_v23 }
0x1cee   :  { %5236 = vmatmul.msk.f32.gmra.mxu0 %vm137_vm1, %v6902_v30 }
0x1d53   :  { %v2780_v63 = vpop.f32.mrf.mxu0 }
0x1d54   :  { %v2786_v0 = vmul.f32 0.35355338, %v2780_v63 }
0x1d56   :  { %v2788_v4 = vadd.f32 %v6949_v3, %v2786_v0 }
0x1d58   :  { %v2790_v5 = vsel %vm97_vm0, %v2788_v4, -inf }
0x1d59   :  { %2791 = vmax.xlane.f32.xlu1 %v2790_v5 }
0x1d5b   :  { %v2783_v6 = vpop.f32.mrf.mxu0 }
0x1d5c   :  { %v2787_v7 = vmul.f32 0.35355338, %v2783_v6 }
0x1d5e   :  { %v2789_v9 = vadd.f32 %v6956_v8, %v2787_v7 }
0x1d60   :  { %v2793_v10 = vsel %vm97_vm0, %v2789_v9, -inf }
0x1d61   :  { %2794 = vmax.xlane.f32.xlu2 %v2793_v10 }
0x1d63   :  { %v2937_v36 = vpop.f32.mrf.mxu0 }
0x1d64   :  { %v2938_v13 = vadd.f32 %v5527_v11, %v2937_v36 }
0x1d6b   :  { %v2940_v32 = vpop.f32.mrf.mxu0 }
0x1d6c   :  { %v2941_v12 = vadd.f32 %v5527_v11, %v2940_v32 }
0x1d6e   :  { %5244 = vmatpush.xpose.msk.msra.mxu2 %vm269_vm2, %v2941_v12 }
0x1d72   :  { %5245 = vmatpush.xpose.msk.msra.mxu2 %vm269_vm2, %v2938_v13  ;;  %v5531_v13 = vld [vmem:[%s7742_s12 + $0xa] ss:$0 sm:$0xff] }
0x1dcc   :  { %v2792_v48 = vpop.xlane.xlu1 %2791 }
0x1dcd   :  { %v2796_v37 = vsub.f32 %v2788_v4, %v2792_v48  ;;  %v5250_v4 = vld [vmem:[%s7691_s13 + $0x48] sm:$0xff] }
0x1dce   :  { %3089 = vmatpush.msrb.mxu0 %v5250_v4 }
0x1dcf   :  { %v2798_v33 = vmul.f32 1.442695, %v2796_v37 }
0x1dd1   :  { %5656 = vpow2.f32 %v2798_v33 }
0x1dd4   :  { %v2795_v20 = vpop.xlane.xlu2 %2794 }
0x1dd5   :  { %v2797_v15 = vsub.f32 %v2789_v9, %v2795_v20 }
0x1dd7   :  { %v5657_v16 = vpop.eup %5656  ;;  %v2800_v17 = vmul.f32 1.442695, %v2797_v15 }
0x1dd8   :  { %v2802_v52 = vsel %vm97_vm0, %v5657_v16, 0.0 }
0x1dd9   :  { %5658 = vpow2.f32 %v2800_v17  ;;  %2803 = vadd.xlane.f32.xlu0 %v2802_v52 }
0x1ddf   :  { %v5659_v18 = vpop.eup %5658 }
0x1de0   :  { %v2805_v19 = vsel %vm97_vm0, %v5659_v18, 0.0 }
0x1de1   :  { %2806 = vadd.xlane.f32.xlu1 %v2805_v19 }
0x1e4c   :  { %v2804_v25 = vpop.xlane.xlu0 %2803 }
0x1e4d   :  { %5660 = vrcp.f32 %v2804_v25  ;;  %v5269_v25 = vld [vmem:[%s7737_s4 + $0x150] sm:$0xff] }
0x1e53   :  { %v5661_v26 = vpop.eup %5660 }
0x1e54   :  { %v2810_v38 = vmul.f32 %v5661_v26, %v5657_v16  ;;  %v2807_v27 = vpop.xlane.xlu1 %2806  ;;  %v5268_v26 = vld [vmem:[%s7737_s4 + $0x148] sm:$0xff] }
0x1e55   :  { %5662 = vrcp.f32 %v2807_v27 }
0x1e56   :  { %5218 = vmatmul.msk.f32.vlgmr.msrb.gmra.mxu1 %vm97_vm0, %v2810_v38  ;;  %v5267_v38 = vld [vmem:[%s7737_s4 + $0x140] sm:$0xff] }
0x1e57   :  { %3121 = vmatpush.msrb.mxu1 %v5256_v59 }
0x1e59   :  { %3122 = vmatpush.msrb.mxu1 %v5255_v14 }
0x1e5b   :  { %v5663_v34 = vpop.eup %5662  ;;  %3123 = vmatpush.msrb.mxu1 %v5254_v2 }
0x1e5c   :  { %v2811_v39 = vmul.f32 %v5663_v34, %v5659_v18  ;;  %v5285_v34 = vld [vmem:[%s7735_s28 + $0x170] sm:$0xff] }
0x1e5d   :  { %3124 = vmatpush.msrb.mxu1 %v5253_v22  ;;  %v5286_v22 = vld [vmem:[%s7735_s28 + $0x178] sm:$0xff] }
0x1e5e   :  { %5219 = vmatmul.msk.f32.gmra.mxu1 %vm97_vm0, %v2811_v39  ;;  %v5284_v39 = vld [vmem:[%s7735_s28 + $0x168] sm:$0xff] }
0x1e66   :  { %5242 = vmatmul.msk.f32.vlgmr.msra.gmra.mxu1 %vm137_vm1, %v6889_v23 }
0x1e6e   :  { %5243 = vmatmul.msk.f32.gmra.mxu1 %vm137_vm1, %v6902_v30 }
0x1e76   :  { %5258 = vmatmul.msk.f32.vlgmr.msrb.gmra.mxu1 %vm137_vm1, %v6889_v23 }
0x1e7e   :  { %5259 = vmatmul.msk.f32.gmra.mxu1 %vm137_vm1, %v6902_v30 }
0x1ed3   :  { %v2835_v41 = vpop.f32.mrf.mxu1 }
0x1ed4   :  { %5221 = vmatmul.msk.f32.vlgmr.msrb.gmra.mxu2 %vm269_vm2, %v2835_v41 }
0x1ed5   :  { %3154 = vmatpush.msrb.mxu2 %v5263_v40  ;;  %v5283_v40 = vld [vmem:[%s7735_s28 + $0x160] sm:$0xff] }
0x1ed7   :  { %3155 = vmatpush.msrb.mxu2 %v5262_v42 }
0x1ed9   :  { %3156 = vmatpush.msrb.mxu2 %v5261_v43  ;;  %v5293_v43 = vld [vmem:[%s7736_s29 + $0x178] sm:$0xff] }
0x1edb   :  { %v2838_v47 = vpop.f32.mrf.mxu1  ;;  %3157 = vmatpush.msrb.mxu2 %v5260_v46 }
0x1edc   :  { %5222 = vmatmul.msk.f32.gmra.mxu2 %vm269_vm2, %v2838_v47  ;;  %v5292_v47 = vld [vmem:[%s7736_s29 + $0x170] sm:$0xff] }
0x1ee3   :  { %v2970_v56 = vpop.f32.mrf.mxu1 }
0x1ee4   :  { %5246 = vmatmul.msk.f32.vlgmr.msra.gmra.mxu2 %vm269_vm2, %v2905_v55  ;;  %v2971_v62 = vadd.f32 %v5528_v60, %v2970_v56 }
0x1eeb   :  { %v2973_v61 = vpop.f32.mrf.mxu1 }
0x1eec   :  { %v2974_v1 = vadd.f32 %v5528_v60, %v2973_v61  ;;  %5247 = vmatmul.msk.f32.gmra.mxu2 %vm269_vm2, %v2908_v58 }
0x1eee   :  { %3057 = vmatpush.msrb.mxu3 %v2974_v1 }
0x1ef0   :  { %3058 = vmatpush.msrb.mxu3 %v2971_v62  ;;  %v5532_v62 = vld [vmem:[%s7741_s9 + $0xa] ss:$0 sm:$0xff] }
0x1ef2   :  { %3187 = vmatpush.msra.mxu3 %v5270_v24 }
0x1ef3   :  { %v3126_v56 = vpop.f32.mrf.mxu1 }
0x1ef4   :  { %5265 = vmatmul.msk.f32.vlgmr.msrb.gmra.mxu2 %vm137_vm1, %v6889_v23  ;;  %3188 = vmatpush.msra.mxu3 %v5269_v25  ;;  %v3127_v58 = vadd.f32 %v5529_v57, %v3126_v56 }
0x1ef6   :  { %3189 = vmatpush.msra.mxu3 %v5268_v26 }
0x1ef8   :  { %3190 = vmatpush.msra.mxu3 %v5267_v38 }
0x1efb   :  { %v3129_v61 = vpop.f32.mrf.mxu1 }
0x1efc   :  { %5266 = vmatmul.msk.f32.gmra.mxu2 %vm137_vm1, %v6902_v30  ;;  %v3130_v1 = vadd.f32 %v5529_v57, %v3129_v61  ;;  %v5533_v57 = vld [vmem:[%s7743_s7 + $0xb] ss:$0 sm:$0xff] }
0x1f57   :  { %v7027_v63 = vpop.f32.mrf.mxu2 }
0x1f5f   :  { %v7029_v0 = vpop.f32.mrf.mxu2 }
0x1f67   :  { %v3005_v5 = vpop.f32.mrf.mxu2 }
0x1f68   :  { %v3011_v6 = vmul.f32 0.35355338, %v3005_v5 }
0x1f6a   :  { %v3013_v7 = vadd.f32 %v6949_v3, %v3011_v6 }
0x1f6c   :  { %v3015_v9 = vsel %vm97_vm0, %v3013_v7, -inf }
0x1f6d   :  { %3016 = vmax.xlane.f32.xlu2 %v3015_v9 }
0x1f6f   :  { %v3008_v10 = vpop.f32.mrf.mxu2 }
0x1f70   :  { %v3012_v36 = vmul.f32 0.35355338, %v3008_v10 }
0x1f72   :  { %v3014_v11 = vadd.f32 %v6956_v8, %v3012_v36 }
0x1f74   :  { %v3018_v32 = vsel %vm97_vm0, %v3014_v11, -inf }
0x1f75   :  { %3019 = vmax.xlane.f32.xlu0 %v3018_v32 }
0x1f77   :  { %v3159_v12 = vpop.f32.mrf.mxu2 }
0x1f78   :  { %v3160_v33 = vadd.f32 %v5531_v13, %v3159_v12 }
0x1f7f   :  { %v3162_v48 = vpop.f32.mrf.mxu2 }
0x1f80   :  { %v3163_v37 = vadd.f32 %v5531_v13, %v3162_v48  ;;  %v5280_v13 = vld [vmem:[%s7691_s13 + $0x50] sm:$0xff] }
0x1f81   :  { %3311 = vmatpush.msra.mxu2 %v5280_v13 }
0x1f82   :  { %5274 = vmatpush.xpose.msk.msra.mxu0 %vm269_vm2, %v3163_v37 }
0x1f86   :  { %5275 = vmatpush.xpose.msk.msra.mxu0 %vm269_vm2, %v3160_v33 }
0x1fe0   :  { %v3017_v20 = vpop.xlane.xlu2 %3016 }
0x1fe1   :  { %v3021_v15 = vsub.f32 %v3013_v7, %v3017_v20  ;;  %v5530_v7 = vld [vmem:[%s7693_s14 + $0x2] ss:$0 sm:$0xff] }
0x1fe2   :  { %v2875_v9 = vadd.f32 %v5530_v7, %v7027_v63 }
0x1fe3   :  { %v3023_v16 = vmul.f32 1.442695, %v3021_v15 }
0x1fe5   :  { %5664 = vpow2.f32 %v3023_v16 }
0x1fe8   :  { %v3020_v17 = vpop.xlane.xlu0 %3019 }
0x1fe9   :  { %v3022_v52 = vsub.f32 %v3014_v11, %v3020_v17  ;;  %v2876_v11 = vadd.f32 %v5530_v7, %v7029_v0 }
0x1feb   :  { %v5665_v18 = vpop.eup %5664  ;;  %v3025_v19 = vmul.f32 1.442695, %v3022_v52  ;;  %v5534_v52 = vld [vmem:[%s7742_s12 + $0xb] ss:$0 sm:$0xff] }
0x1fec   :  { %v3027_v53 = vsel %vm97_vm0, %v5665_v18, 0.0 }
0x1fed   :  { %5666 = vpow2.f32 %v3025_v19  ;;  %3028 = vadd.xlane.f32.xlu1 %v3027_v53 }
0x1ff3   :  { %v5667_v35 = vpop.eup %5666 }
0x1ff4   :  { %v3030_v21 = vsel %vm97_vm0, %v5667_v35, 0.0 }
0x1ff5   :  { %3031 = vadd.xlane.f32.xlu2 %v3030_v21 }
0x2060   :  { %v3029_v27 = vpop.xlane.xlu1 %3028 }
0x2061   :  { %5668 = vrcp.f32 %v3029_v27 }
0x2067   :  { %v5669_v59 = vpop.eup %5668 }
0x2068   :  { %v3035_v14 = vmul.f32 %v5669_v59, %v5665_v18  ;;  %v3032_v2 = vpop.xlane.xlu2 %3031 }
0x2069   :  { %5670 = vrcp.f32 %v3032_v2 }
0x206a   :  { %5248 = vmatmul.msk.f32.vlgmr.msrb.gmra.mxu3 %vm97_vm0, %v3035_v14 }
0x206b   :  { %3343 = vmatpush.msrb.mxu3 %v5286_v22  ;;  %v5300_v22 = vld [vmem:[%s7737_s4 + $0x178] sm:$0xff] }
0x206d   :  { %3344 = vmatpush.msrb.mxu3 %v5285_v34  ;;  %v5299_v34 = vld [vmem:[%s7737_s4 + $0x170] sm:$0xff] }
0x206f   :  { %v5671_v41 = vpop.eup %5670  ;;  %3345 = vmatpush.msrb.mxu3 %v5284_v39  ;;  %v5298_v39 = vld [vmem:[%s7737_s4 + $0x168] sm:$0xff] }
0x2070   :  { %v3036_v42 = vmul.f32 %v5671_v41, %v5667_v35 }
0x2071   :  { %3346 = vmatpush.msrb.mxu3 %v5283_v40  ;;  %v5297_v40 = vld [vmem:[%s7737_s4 + $0x160] sm:$0xff] }
0x2072   :  { %5249 = vmatmul.msk.f32.gmra.mxu3 %vm97_vm0, %v3036_v42 }
0x207a   :  { %5272 = vmatmul.msk.f32.vlgmr.msra.gmra.mxu3 %vm137_vm1, %v6889_v23 }
0x2082   :  { %5273 = vmatmul.msk.f32.gmra.mxu3 %vm137_vm1, %v6902_v30 }
0x208a   :  { %5288 = vmatmul.msk.f32.vlgmr.msrb.gmra.mxu3 %vm137_vm1, %v6889_v23 }
0x2092   :  { %5289 = vmatmul.msk.f32.gmra.mxu3 %vm137_vm1, %v6902_v30 }
0x20ed   :  { %v3060_v46 = vpop.f32.mrf.mxu3 }
0x20ee   :  { %5251 = vmatmul.msk.f32.vlgmr.msrb.gmra.mxu0 %vm269_vm2, %v3060_v46 }
0x20ef   :  { %3376 = vmatpush.msrb.mxu0 %v5293_v43 }
0x20f1   :  { %3377 = vmatpush.msrb.mxu0 %v5292_v47 }
0x20f3   :  { %3378 = vmatpush.msrb.mxu0 %v5291_v50 }
0x20f5   :  { %v3063_v55 = vpop.f32.mrf.mxu3  ;;  %3379 = vmatpush.msrb.mxu0 %v5290_v51 }
0x20f6   :  { %5252 = vmatmul.msk.f32.gmra.mxu0 %vm269_vm2, %v3063_v55 }
0x20fd   :  { %v3192_v60 = vpop.f32.mrf.mxu3 }
0x20fe   :  { %5276 = vmatmul.msk.f32.vlgmr.msra.gmra.mxu0 %vm269_vm2, %v3127_v58  ;;  %v3193_v6 = vadd.f32 %v5532_v62, %v3192_v60 }
0x2105   :  { %v3195_v4 = vpop.f32.mrf.mxu3 }
0x2106   :  { %v3196_v5 = vadd.f32 %v5532_v62, %v3195_v4  ;;  %5277 = vmatmul.msk.f32.gmra.mxu0 %vm269_vm2, %v3130_v1  ;;  %v5535_v62 = vld [vmem:[%s7741_s9 + $0xb] ss:$0 sm:$0xff] }
0x2108   :  { %3279 = vmatpush.msra.mxu1 %v3196_v5 }
0x210a   :  { %3280 = vmatpush.msra.mxu1 %v3193_v6 }
0x210c   :  { %3409 = vmatpush.msrb.mxu1 %v5300_v22 }
0x210d   :  { %v3348_v56 = vpop.f32.mrf.mxu3 }
0x210e   :  { %5295 = vmatmul.msk.f32.vlgmr.msrb.gmra.mxu0 %vm137_vm1, %v6889_v23  ;;  %3410 = vmatpush.msrb.mxu1 %v5299_v34  ;;  %v3349_v58 = vadd.f32 %v5533_v57, %v3348_v56  ;;  %v5315_v56 = vld [vmem:[%s7697_s17 + $0x40] sm:$0xff] }
0x2110   :  { %3411 = vmatpush.msrb.mxu1 %v5298_v39 }
0x2112   :  { %3412 = vmatpush.msrb.mxu1 %v5297_v40 }
0x2115   :  { %v3351_v61 = vpop.f32.mrf.mxu3 }
0x2116   :  { %5296 = vmatmul.msk.f32.gmra.mxu0 %vm137_vm1, %v6902_v30  ;;  %v3352_v1 = vadd.f32 %v5533_v57, %v3351_v61 }
0x216b   :  { %v3091_v10 = vpop.f32.mrf.mxu0 }
0x216c   :  { %v7109_v36 = vadd.f32 %v3091_v10, %v2875_v9 }
0x2173   :  { %v3094_v32 = vpop.f32.mrf.mxu0 }
0x2174   :  { %v7112_v12 = vadd.f32 %v3094_v32, %v2876_v11 }
0x217b   :  { %v3227_v48 = vpop.f32.mrf.mxu0 }
0x217c   :  { %v3233_v37 = vmul.f32 0.35355338, %v3227_v48 }
0x217e   :  { %v3235_v33 = vadd.f32 %v6949_v3, %v3233_v37 }
0x2180   :  { %v3237_v20 = vsel %vm97_vm0, %v3235_v33, -inf }
0x2181   :  { %3238 = vmax.xlane.f32.xlu0 %v3237_v20 }
0x2183   :  { %v3230_v63 = vpop.f32.mrf.mxu0 }
0x2184   :  { %v3234_v15 = vmul.f32 0.35355338, %v3230_v63 }
0x2186   :  { %v3236_v16 = vadd.f32 %v6956_v8, %v3234_v15 }
0x2188   :  { %v3240_v0 = vsel %vm97_vm0, %v3236_v16, -inf }
0x2189   :  { %3241 = vmax.xlane.f32.xlu1 %v3240_v0 }
0x218b   :  { %v3381_v17 = vpop.f32.mrf.mxu0 }
0x218c   :  { %v3382_v53 = vadd.f32 %v5534_v52, %v3381_v17 }
0x2193   :  { %v3384_v18 = vpop.f32.mrf.mxu0 }
0x2194   :  { %v3385_v19 = vadd.f32 %v5534_v52, %v3384_v18 }
0x2196   :  { %5304 = vmatpush.xpose.msk.msrb.mxu2 %vm269_vm2, %v3385_v19 }
0x219a   :  { %5305 = vmatpush.xpose.msk.msrb.mxu2 %vm269_vm2, %v3382_v53 }
0x21f4   :  { %v3239_v35 = vpop.xlane.xlu0 %3238 }
0x21f5   :  { %v3243_v21 = vsub.f32 %v3235_v33, %v3239_v35 }
0x21f7   :  { %v3245_v24 = vmul.f32 1.442695, %v3243_v21 }
0x21f9   :  { %5672 = vpow2.f32 %v3245_v24 }
0x21fc   :  { %v3242_v25 = vpop.xlane.xlu1 %3241 }
0x21fd   :  { %v3244_v26 = vsub.f32 %v3236_v16, %v3242_v25 }
0x21ff   :  { %v5673_v38 = vpop.eup %5672  ;;  %v3247_v27 = vmul.f32 1.442695, %v3244_v26 }
0x2200   :  { %v3249_v59 = vsel %vm97_vm0, %v5673_v38, 0.0 }
0x2201   :  { %5674 = vpow2.f32 %v3247_v27  ;;  %3250 = vadd.xlane.f32.xlu2 %v3249_v59 }
0x2207   :  { %v5675_v14 = vpop.eup %5674 }
0x2208   :  { %v3252_v2 = vsel %vm97_vm0, %v5675_v14, 0.0 }
0x2209   :  { %3253 = vadd.xlane.f32.xlu0 %v3252_v2 }
0x2274   :  { %v3251_v41 = vpop.xlane.xlu2 %3250 }
0x2275   :  { %5676 = vrcp.f32 %v3251_v41 }
0x227b   :  { %v5677_v42 = vpop.eup %5676 }
0x227c   :  { %v3257_v43 = vmul.f32 %v5677_v42, %v5673_v38  ;;  %v3254_v46 = vpop.xlane.xlu0 %3253 }
0x227d   :  { %5678 = vrcp.f32 %v3254_v46 }
0x227e   :  { %5278 = vmatmul.msk.f32.vlgmr.msra.gmra.mxu1 %vm97_vm0, %v3257_v43 }
0x2283   :  { %v5679_v47 = vpop.eup %5678 }
0x2284   :  { %v3258_v50 = vmul.f32 %v5679_v47, %v5675_v14 }
0x2286   :  { %5279 = vmatmul.msk.f32.gmra.mxu1 %vm97_vm0, %v3258_v50 }
0x228e   :  { %5302 = vmatmul.msk.f32.vlgmr.msrb.gmra.mxu1 %vm137_vm1, %v6889_v23 }
0x2296   :  { %5303 = vmatmul.msk.f32.gmra.mxu1 %vm137_vm1, %v6902_v30 }
0x22fb   :  { %v3282_v51 = vpop.f32.mrf.mxu1 }
0x22fc   :  { %5281 = vmatmul.msk.f32.vlgmr.msra.gmra.mxu2 %vm269_vm2, %v3282_v51  ;;  %v5317_v51 = vld [vmem:[%s7697_s17 + $0x50] sm:$0xff] }
0x2303   :  { %v3285_v55 = vpop.f32.mrf.mxu1 }
0x2304   :  { %5282 = vmatmul.msk.f32.gmra.mxu2 %vm269_vm2, %v3285_v55 }
0x230b   :  { %v3414_v60 = vpop.f32.mrf.mxu1 }
0x230c   :  { %5306 = vmatmul.msk.f32.vlgmr.msrb.gmra.mxu2 %vm269_vm2, %v3349_v58  ;;  %v3415_v6 = vadd.f32 %v5535_v62, %v3414_v60 }
0x2313   :  { %v3417_v4 = vpop.f32.mrf.mxu1 }
0x2314   :  { %v3418_v5 = vadd.f32 %v5535_v62, %v3417_v4  ;;  %5307 = vmatmul.msk.f32.gmra.mxu2 %vm269_vm2, %v3352_v1 }
0x2316   :  { %3501 = vmatpush.msra.mxu3 %v3418_v5 }
0x2318   :  { %3502 = vmatpush.msra.mxu3 %v3415_v6  ;;  %v5325_v6 = vld [vmem:[%s7698_s19 + $0x58] sm:$0xff] }
0x2319   :  { %3676 = vmatpush.msra.mxu2 %v5325_v6  ;;  %v5341_v6 = vld [vmem:[%s7736_s29 + $0x190] sm:$0xff] }
0x237f   :  { %v3313_v7 = vpop.f32.mrf.mxu2 }
0x2380   :  { %v3319_v9 = vadd.f32 %v3313_v7, %v7109_v36 }
0x2387   :  { %v3316_v10 = vpop.f32.mrf.mxu2 }
0x2388   :  { %v3320_v11 = vadd.f32 %v3316_v10, %v7112_v12 }
0x238f   :  { %v3449_v32 = vpop.f32.mrf.mxu2 }
0x2390   :  { %v3455_v13 = vmul.f32 0.35355338, %v3449_v32 }
0x2392   :  { %v3457_v48 = vadd.f32 %v6949_v3, %v3455_v13 }
0x2394   :  { %v3459_v37 = vsel %vm97_vm0, %v3457_v48, -inf }
0x2395   :  { %3460 = vmax.xlane.f32.xlu1 %v3459_v37 }
0x2397   :  { %v3452_v33 = vpop.f32.mrf.mxu2 }
0x2398   :  { %v3456_v20 = vmul.f32 0.35355338, %v3452_v33 }
0x239a   :  { %v3458_v63 = vadd.f32 %v6956_v8, %v3456_v20  ;;  %v5310_v8 = vld [vmem:[%s7691_s13 + $0x58] sm:$0xff] }
0x239b   :  { %3533 = vmatpush.msra.mxu0 %v5310_v8 }
0x239c   :  { %v3462_v15 = vsel %vm97_vm0, %v3458_v63, -inf }
0x239d   :  { %3463 = vmax.xlane.f32.xlu2 %v3462_v15 }
0x2408   :  { %v3461_v16 = vpop.xlane.xlu1 %3460 }
0x2409   :  { %v3465_v0 = vsub.f32 %v3457_v48, %v3461_v16 }
0x240b   :  { %v3467_v36 = vmul.f32 1.442695, %v3465_v0 }
0x240d   :  { %5680 = vpow2.f32 %v3467_v36  ;;  %v5536_v36 = vld [vmem:[%s7694_s15 + $0x2] ss:$0 sm:$0xff] }
0x2410   :  { %v3464_v17 = vpop.xlane.xlu2 %3463 }
0x2411   :  { %v3466_v12 = vsub.f32 %v3458_v63, %v3464_v17 }
0x2413   :  { %v5681_v52 = vpop.eup %5680  ;;  %v3469_v18 = vmul.f32 1.442695, %v3466_v12 }
0x2414   :  { %v3471_v3 = vsel %vm97_vm0, %v5681_v52, 0.0 }
0x2415   :  { %5682 = vpow2.f32 %v3469_v18  ;;  %3472 = vadd.xlane.f32.xlu0 %v3471_v3 }
0x241b   :  { %v5683_v19 = vpop.eup %5682 }
0x241c   :  { %v3474_v53 = vsel %vm97_vm0, %v5683_v19, 0.0 }
0x241d   :  { %3475 = vadd.xlane.f32.xlu1 %v3474_v53 }
0x2488   :  { %v3473_v35 = vpop.xlane.xlu0 %3472 }
0x2489   :  { %5684 = vrcp.f32 %v3473_v35 }
0x248f   :  { %v5685_v21 = vpop.eup %5684 }
0x2490   :  { %v3479_v24 = vmul.f32 %v5685_v21, %v5681_v52  ;;  %v3476_v25 = vpop.xlane.xlu1 %3475  ;;  %v5537_v52 = vld [vmem:[%s7695_s16 + $0x2] ss:$0 sm:$0xff] }
0x2491   :  { %5686 = vrcp.f32 %v3476_v25 }
0x2492   :  { %5308 = vmatmul.msk.f32.vlgmr.msra.gmra.mxu3 %vm97_vm0, %v3479_v24 }
0x2497   :  { %v5687_v26 = vpop.eup %5686 }
0x2498   :  { %v3480_v38 = vmul.f32 %v5687_v26, %v5683_v19 }
0x249a   :  { %5309 = vmatmul.msk.f32.gmra.mxu3 %vm97_vm0, %v3480_v38 }
0x2515   :  { %v3504_v27 = vpop.f32.mrf.mxu3 }
0x2516   :  { %5311 = vmatmul.msk.f32.vlgmr.msra.gmra.mxu0 %vm269_vm2, %v3504_v27  ;;  %v5324_v27 = vld [vmem:[%s7698_s19 + $0x50] sm:$0xff] }
0x2517   :  { %3677 = vmatpush.msra.mxu2 %v5324_v27 }
0x251d   :  { %v3507_v59 = vpop.f32.mrf.mxu3 }
0x251e   :  { %5312 = vmatmul.msk.f32.gmra.mxu0 %vm269_vm2, %v3507_v59  ;;  %v5323_v59 = vld [vmem:[%s7698_s19 + $0x48] sm:$0xff] }
0x251f   :  { %3678 = vmatpush.msra.mxu2 %v5323_v59 }
0x2593   :  { %v3535_v14 = vpop.f32.mrf.mxu0 }
0x2594   :  { %v3541_v2 = vadd.f32 %v3535_v14, %v3319_v9  ;;  %v5322_v14 = vld [vmem:[%s7698_s19 + $0x40] sm:$0xff] }
0x2595   :  { %3679 = vmatpush.msra.mxu2 %v5322_v14 }
0x2596   :  { %v3543_v22 = vadd.f32 %v3541_v2, %v6889_v23  ;;  %v5318_v23 = vld [vmem:[%s7697_s17 + $0x58] sm:$0xff]  ;;  %v5538_v2 = vld [vmem:[%s7696_s18 + $0x2] ss:$0 sm:$0xff] }
0x2597   :  { %3635 = vmatpush.msra.mxu1 %v5318_v23 }
0x2598   :  { %v3549_v34 = vsel %vm137_vm1, %v3543_v22, 0.0  ;;  %v3557_v39 = vmul.f32 %v3543_v22, %v3543_v22 }
0x2599   :  { %3550 = vadd.xlane.f32.xlu2 %v3549_v34  ;;  %3636 = vmatpush.msra.mxu1 %v5317_v51 }
0x259a   :  { %v3559_v40 = vsel %vm137_vm1, %v3557_v39, 0.0 }
0x259b   :  { %3560 = vadd.xlane.f32.xlu0 %v3559_v40  ;;  %v3538_v41 = vpop.f32.mrf.mxu0 }
0x259c   :  { %v3542_v42 = vadd.f32 %v3538_v41, %v3320_v11 }
0x259e   :  { %v3544_v43 = vadd.f32 %v3542_v42, %v6902_v30  ;;  %v5316_v30 = vld [vmem:[%s7697_s17 + $0x48] sm:$0xff] }
0x259f   :  { %3637 = vmatpush.msra.mxu1 %v5316_v30 }
0x25a0   :  { %v3552_v46 = vsel %vm137_vm1, %v3544_v43, 0.0  ;;  %v3558_v47 = vmul.f32 %v3544_v43, %v3544_v43 }
0x25a1   :  { %3553 = vadd.xlane.f32.xlu1 %v3552_v46  ;;  %3638 = vmatpush.msra.mxu1 %v5315_v56 }
0x25a2   :  { %v3562_v50 = vsel %vm137_vm1, %v3558_v47, 0.0 }
0x25a3   :  { %3563 = vadd.xlane.f32.xlu2 %v3562_v50 }
0x260c   :  { %v3551_v55 = vpop.xlane.xlu2 %3550 }
0x260d   :  { %v3555_v57 = vmul.f32 %v3551_v55, %v6271_v28 }
0x260e   :  { %v3561_v58 = vpop.xlane.xlu0 %3560 }
0x260f   :  { %v3567_v60 = vmul.f32 %v3555_v57, %v3555_v57  ;;  %v3565_v61 = vmul.f32 %v3561_v58, %v6271_v28  ;;  %v3571_v0 = vsub.f32 %v3543_v22, %v3555_v57 }
0x2611   :  { %v3569_v1 = vsub.f32 %v3565_v61, %v3567_v60 }
0x2613   :  { %v3573_v62 = vadd.f32 1e-05, %v3569_v1  ;;  %v5335_v1 = vld [vmem:[%s7735_s28 + $0x198] sm:$0xff] }
0x2614   :  { %v3554_v4 = vpop.xlane.xlu1 %3553  ;;  %3781 = vmatpush.msrb.mxu3 %v5335_v1  ;;  %v5543_v1 = vld [vmem:[%s7741_s9 + $0xc] ss:$0 sm:$0xff] }
0x2615   :  { %5688 = vrsqrt.f32 %v3573_v62  ;;  %v3556_v5 = vmul.f32 %v3554_v4, %v6271_v28  ;;  %vm3581_vm15 = vweird.f32 %v3573_v62  ;;  %v5349_v4 = vld [vmem:[%s7737_s4 + $0x198] sm:$0xff] }
0x2616   :  { %v3564_v7 = vpop.xlane.xlu2 %3563  ;;  %3847 = vmatpush.msrb.mxu1 %v5349_v4 }
0x2617   :  { %v3568_v9 = vmul.f32 %v3556_v5, %v3556_v5  ;;  %v3566_v10 = vmul.f32 %v3564_v7, %v6271_v28  ;;  %v3572_v21 = vsub.f32 %v3544_v43, %v3556_v5  ;;  %v5539_v43 = vld [vmem:[%s7699_s20 + $0x2] ss:$0 sm:$0xff]  ;;  %v5334_v5 = vld [vmem:[%s7735_s28 + $0x190] sm:$0xff] }
0x2618   :  { %v5348_v7 = vld [vmem:[%s7737_s4 + $0x190] sm:$0xff]  ;;  %3782 = vmatpush.msrb.mxu3 %v5334_v5 }
0x2619   :  { %v3570_v11 = vsub.f32 %v3566_v10, %v3568_v9  ;;  %3848 = vmatpush.msrb.mxu1 %v5348_v7  ;;  %v5333_v9 = vld [vmem:[%s7735_s28 + $0x188] sm:$0xff] }
0x261a   :  { %v5340_v10 = vld [vmem:[%s7736_s29 + $0x188] sm:$0xff]  ;;  %3783 = vmatpush.msrb.mxu3 %v5333_v9 }
0x261b   :  { %v5689_v32 = vpop.eup %5688  ;;  %v3574_v13 = vadd.f32 1e-05, %v3570_v11  ;;  %v5347_v11 = vld [vmem:[%s7737_s4 + $0x188] sm:$0xff] }
0x261c   :  { %v3576_v48 = vmul.f32 %v5689_v32, %v3573_v62  ;;  %vm3582_vm14 = vweird.f32 %v5689_v32  ;;  %v5342_v62 = vld [vmem:[%s7736_s29 + $0x198] sm:$0xff]  ;;  %3849 = vmatpush.msrb.mxu1 %v5347_v11 }
0x261d   :  { %5690 = vrsqrt.f32 %v3574_v13  ;;  %vm3583_vm3 = vmor %vm3581_vm15, %vm3582_vm14  ;;  %vm3591_vm5 = vweird.f32 %v3574_v13  ;;  %3814 = vmatpush.msrb.mxu0 %v5342_v62 }
0x261e   :  { %v3577_v37 = vmul.f32 %v5689_v32, %v3576_v48  ;;  %v5339_v48 = vld [vmem:[%s7736_s29 + $0x180] sm:$0xff] }
0x261f   :  { %3815 = vmatpush.msrb.mxu0 %v5341_v6 }
0x2620   :  { %v3578_v33 = vmul.f32 0.5, %v3577_v37  ;;  %v5346_v37 = vld [vmem:[%s7737_s4 + $0x180] sm:$0xff] }
0x2621   :  { %3816 = vmatpush.msrb.mxu0 %v5340_v10  ;;  %3850 = vmatpush.msrb.mxu1 %v5346_v37  ;;  %v5544_v10 = vld [vmem:[%s7743_s7 + $0xc] ss:$0 sm:$0xff] }
0x2622   :  { %v3579_v20 = vsub.f32 1.5, %v3578_v33  ;;  %v5370_v37 = vld [vmem:[%s7736_s29 + $0x1a8] sm:$0xff] }
0x2623   :  { %v5691_v63 = vpop.eup %5690  ;;  %3817 = vmatpush.msrb.mxu0 %v5339_v48  ;;  %v5371_v48 = vld [vmem:[%s7736_s29 + $0x1b0] sm:$0xff] }
0x2624   :  { %v3580_v15 = vmul.f32 %v5689_v32, %v3579_v20  ;;  %v3586_v16 = vmul.f32 %v5691_v63, %v3574_v13  ;;  %vm3592_vm4 = vweird.f32 %v5691_v63  ;;  %v5332_v13 = vld [vmem:[%s7735_s28 + $0x180] sm:$0xff] }
0x2625   :  { %vm3593_vm6 = vmor %vm3591_vm5, %vm3592_vm4  ;;  %3784 = vmatpush.msrb.mxu3 %v5332_v13 }
0x2626   :  { %v3584_v17 = vsel %vm3583_vm3, %v5689_v32, %v3580_v15  ;;  %v3587_v12 = vmul.f32 %v5691_v63, %v3586_v16 }
0x2627   :  { %v3595_v18 = vmul.f32 %v3584_v17, %v3571_v0 }
0x2628   :  { %v3588_v3 = vmul.f32 0.5, %v3587_v12 }
0x2629   :  { %v3600_v19 = vmul.f32 %v5536_v36, %v3595_v18  ;;  %v5364_v18 = vld [vmem:[%s7735_s28 + $0x1b0] sm:$0xff] }
0x262a   :  { %v3589_v53 = vsub.f32 1.5, %v3588_v3 }
0x262b   :  { %v3605_v8 = vadd.f32 %v5537_v52, %v3600_v19 }
0x262c   :  { %v3590_v35 = vmul.f32 %v5691_v63, %v3589_v53  ;;  %v5363_v53 = vld [vmem:[%s7735_s28 + $0x1a8] sm:$0xff] }
0x262d   :  { %5320 = vmatmul.msk.f32.vlgmr.msra.gmra.mxu1 %vm137_vm1, %v3605_v8 }
0x262e   :  { %v3594_v24 = vsel %vm3593_vm6, %v5691_v63, %v3590_v35  ;;  %v5362_v35 = vld [vmem:[%s7735_s28 + $0x1a0] sm:$0xff] }
0x262f   :  { %v3596_v25 = vmul.f32 %v3594_v24, %v3572_v21 }
0x2631   :  { %v3601_v26 = vmul.f32 %v5536_v36, %v3596_v25 }
0x2633   :  { %v3606_v38 = vadd.f32 %v5537_v52, %v3601_v26  ;;  %v5365_v52 = vld [vmem:[%s7735_s28 + $0x1b8] sm:$0xff] }
0x2634   :  { %4006 = vmatpush.msra.mxu1 %v5365_v52 }
0x2635   :  { %5321 = vmatmul.msk.f32.gmra.mxu1 %vm137_vm1, %v3606_v38 }
0x2636   :  { %4007 = vmatpush.msra.mxu1 %v5364_v18 }
0x2638   :  { %4008 = vmatpush.msra.mxu1 %v5363_v53 }
0x263a   :  { %4009 = vmatpush.msra.mxu1 %v5362_v35  ;;  %v5546_v35 = vld [vmem:[%s7742_s12 + $0xd] ss:$0 sm:$0xff] }
0x26aa   :  { %v3640_v22 = vpop.f32.mrf.mxu1 }
0x26ab   :  { %v3641_v34 = vadd.f32 %v5538_v2, %v3640_v22 }
0x26ad   :  { %v3646_v39 = vmax.f32 %v3641_v34, 0.0  ;;  %v5540_v34 = vld [vmem:[%s7700_s21 + $0x2] ss:$0 sm:$0xff] }
0x26af   :  { %5327 = vmatmul.msk.f32.vlgmr.msra.gmra.mxu2 %vm137_vm1, %v3646_v39 }
0x26b2   :  { %v3643_v40 = vpop.f32.mrf.mxu1 }
0x26b3   :  { %v3644_v41 = vadd.f32 %v5538_v2, %v3643_v40 }
0x26b5   :  { %v3647_v42 = vmax.f32 %v3644_v41, 0.0  ;;  %v5541_v41 = vld [vmem:[%s7701_s22 + $0x2] ss:$0 sm:$0xff] }
0x26b7   :  { %5328 = vmatmul.msk.f32.gmra.mxu2 %vm137_vm1, %v3647_v42 }
0x2732   :  { %v3681_v46 = vpop.f32.mrf.mxu2 }
0x2733   :  { %v3682_v47 = vadd.f32 %v5539_v43, %v3681_v46 }
0x2735   :  { %v7221_v50 = vadd.f32 %v3682_v47, %v3605_v8 }
0x2737   :  { %v3693_v23 = vsel %vm137_vm1, %v7221_v50, 0.0  ;;  %v3701_v51 = vmul.f32 %v7221_v50, %v7221_v50 }
0x2738   :  { %3694 = vadd.xlane.f32.xlu0 %v3693_v23 }
0x2739   :  { %v3703_v30 = vsel %vm137_vm1, %v3701_v51, 0.0 }
0x273a   :  { %3704 = vadd.xlane.f32.xlu1 %v3703_v30  ;;  %v3684_v55 = vpop.f32.mrf.mxu2 }
0x273b   :  { %v3685_v56 = vadd.f32 %v5539_v43, %v3684_v55 }
0x273d   :  { %v7228_v57 = vadd.f32 %v3685_v56, %v3606_v38 }
0x273f   :  { %v3696_v58 = vsel %vm137_vm1, %v7228_v57, 0.0  ;;  %v3702_v60 = vmul.f32 %v7228_v57, %v7228_v57 }
0x2740   :  { %3697 = vadd.xlane.f32.xlu2 %v3696_v58 }
0x2741   :  { %v3706_v61 = vsel %vm137_vm1, %v3702_v60, 0.0 }
0x2742   :  { %3707 = vadd.xlane.f32.xlu0 %v3706_v61  ;;  %v5542_v61 = vld [vmem:[%s7742_s12 + $0xc] ss:$0 sm:$0xff] }
0x27ab   :  { %v3695_v32 = vpop.xlane.xlu0 %3694 }
0x27ac   :  { %v3699_v33 = vmul.f32 %v3695_v32, %v6271_v28  ;;  %v5372_v32 = vld [vmem:[%s7736_s29 + $0x1b8] sm:$0xff] }
0x27ad   :  { %v3705_v20 = vpop.xlane.xlu1 %3704 }
0x27ae   :  { %v3711_v63 = vmul.f32 %v3699_v33, %v3699_v33  ;;  %v3709_v15 = vmul.f32 %v3705_v20, %v6271_v28  ;;  %v3715_v22 = vsub.f32 %v7221_v50, %v3699_v33  ;;  %v5369_v33 = vld [vmem:[%s7736_s29 + $0x1a0] sm:$0xff] }
0x27b0   :  { %v3713_v16 = vsub.f32 %v3709_v15, %v3711_v63  ;;  %v5359_v15 = vld [vmem:[%s7691_s13 + $0x60] sm:$0xff] }
0x27b1   :  { %3971 = vmatpush.msra.mxu0 %v5359_v15 }
0x27b2   :  { %v3717_v0 = vadd.f32 1e-05, %v3713_v16 }
0x27b3   :  { %v3698_v36 = vpop.xlane.xlu2 %3697 }
0x27b4   :  { %5692 = vrsqrt.f32 %v3717_v0  ;;  %v3700_v17 = vmul.f32 %v3698_v36, %v6271_v28  ;;  %vm3725_vm8 = vweird.f32 %v3717_v0  ;;  %v7350_v36 = vld [vmem:[%s7692_s2] sm:$0xff] }
0x27b5   :  { %v3708_v12 = vpop.xlane.xlu0 %3707 }
0x27b6   :  { %v3712_v3 = vmul.f32 %v3700_v17, %v3700_v17  ;;  %v3710_v19 = vmul.f32 %v3708_v12, %v6271_v28  ;;  %v3716_v50 = vsub.f32 %v7228_v57, %v3700_v17 }
0x27b8   :  { %v3714_v8 = vsub.f32 %v3710_v19, %v3712_v3  ;;  %v7357_v3 = vld [vmem:[%s7692_s2 + $0x8] sm:$0xff] }
0x27ba   :  { %v5693_v21 = vpop.eup %5692  ;;  %v3718_v24 = vadd.f32 1e-05, %v3714_v8 }
0x27bb   :  { %v3720_v25 = vmul.f32 %v5693_v21, %v3717_v0  ;;  %vm3726_vm7 = vweird.f32 %v5693_v21 }
0x27bc   :  { %5694 = vrsqrt.f32 %v3718_v24  ;;  %vm3727_vm9 = vmor %vm3725_vm8, %vm3726_vm7  ;;  %vm3735_vm11 = vweird.f32 %v3718_v24 }
0x27bd   :  { %v3721_v26 = vmul.f32 %v5693_v21, %v3720_v25 }
0x27bf   :  { %v3722_v38 = vmul.f32 0.5, %v3721_v26 }
0x27c1   :  { %v3723_v27 = vsub.f32 1.5, %v3722_v38 }
0x27c2   :  { %v5695_v59 = vpop.eup %5694 }
0x27c3   :  { %v3724_v14 = vmul.f32 %v5693_v21, %v3723_v27  ;;  %v3730_v2 = vmul.f32 %v5695_v59, %v3718_v24  ;;  %vm3736_vm10 = vweird.f32 %v5695_v59 }
0x27c4   :  { %vm3737_vm12 = vmor %vm3735_vm11, %vm3736_vm10  ;;  %vm4915_vm11 = vcmask 392192  }
0x27c5   :  { %v3728_v39 = vsel %vm3727_vm9, %v5693_v21, %v3724_v14  ;;  %v3731_v40 = vmul.f32 %v5695_v59, %v3730_v2 }
0x27c6   :  { %v3739_v42 = vmul.f32 %v3728_v39, %v3715_v22 }
0x27c7   :  { %v3732_v43 = vmul.f32 0.5, %v3731_v40 }
0x27c8   :  { %v3744_v46 = vmul.f32 %v5540_v34, %v3739_v42  ;;  %v5378_v42 = vld [vmem:[%s7737_s4 + $0x1b0] sm:$0xff] }
0x27c9   :  { %v3733_v47 = vsub.f32 1.5, %v3732_v43  ;;  %v5377_v43 = vld [vmem:[%s7737_s4 + $0x1a8] sm:$0xff] }
0x27ca   :  { %v7294_v23 = vadd.f32 %v5541_v41, %v3744_v46  ;;  %v5376_v46 = vld [vmem:[%s7737_s4 + $0x1a0] sm:$0xff] }
0x27cb   :  { %v3734_v51 = vmul.f32 %v5695_v59, %v3733_v47 }
0x27cc   :  { %5337 = vmatmul.msk.f32.vlgmr.msrb.gmra.mxu3 %vm137_vm1, %v7294_v23  ;;  %5344 = vmatmul.msk.f32.vlgmr.msrb.gmra.mxu0 %vm137_vm1, %v7294_v23 }
0x27cd   :  { %v3738_v30 = vsel %vm3737_vm12, %v5695_v59, %v3734_v51  ;;  %5351 = vmatmul.msk.f32.vlgmr.msrb.gmra.mxu1 %vm137_vm1, %v7294_v23  ;;  %vm4918_vm12 = vcmask 654336  }
0x27ce   :  { %v3740_v55 = vmul.f32 %v3738_v30, %v3716_v50 }
0x27d0   :  { %v3745_v56 = vmul.f32 %v5540_v34, %v3740_v55  ;;  %v5395_v55 = vld [vmem:[%s7735_s28 + $0x1d8] sm:$0xff] }
0x27d2   :  { %v7303_v58 = vadd.f32 %v5541_v41, %v3745_v56  ;;  %v5379_v41 = vld [vmem:[%s7737_s4 + $0x1b8] sm:$0xff]  ;;  %v5394_v56 = vld [vmem:[%s7735_s28 + $0x1d0] sm:$0xff] }
0x27d4   :  { %5338 = vmatmul.msk.f32.gmra.mxu3 %vm137_vm1, %v7303_v58  ;;  %5345 = vmatmul.msk.f32.gmra.mxu0 %vm137_vm1, %v7303_v58 }
0x27d5   :  { %5352 = vmatmul.msk.f32.gmra.mxu1 %vm137_vm1, %v7303_v58 }
0x27dd   :  { %5367 = vmatmul.msk.f32.vlgmr.msra.gmra.mxu1 %vm137_vm1, %v7294_v23 }
0x27e5   :  { %5368 = vmatmul.msk.f32.gmra.mxu1 %vm137_vm1, %v7303_v58 }
0x2849   :  { %v3819_v57 = vpop.f32.mrf.mxu0 }
0x284a   :  { %v3852_v60 = vpop.f32.mrf.mxu1  ;;  %v3820_v11 = vadd.f32 %v5542_v61, %v3819_v57  ;;  %v5393_v57 = vld [vmem:[%s7735_s28 + $0x1c8] sm:$0xff] }
0x284b   :  { %v3853_v9 = vadd.f32 %v5543_v1, %v3852_v60  ;;  %v5392_v60 = vld [vmem:[%s7735_s28 + $0x1c0] sm:$0xff] }
0x284f   :  { %v3786_v7 = vpop.f32.mrf.mxu3 }
0x2850   :  { %v3787_v13 = vadd.f32 %v5544_v10, %v3786_v7  ;;  %v5399_v7 = vld [vmem:[%s7736_s29 + $0x1c0] sm:$0xff] }
0x2851   :  { %v3822_v62 = vpop.f32.mrf.mxu0 }
0x2852   :  { %v3823_v4 = vadd.f32 %v5542_v61, %v3822_v62  ;;  %v3855_v5 = vpop.f32.mrf.mxu1  ;;  %v5402_v62 = vld [vmem:[%s7736_s29 + $0x1d8] sm:$0xff] }
0x2853   :  { %v3856_v6 = vadd.f32 %v5543_v1, %v3855_v5  ;;  %v5401_v5 = vld [vmem:[%s7736_s29 + $0x1d0] sm:$0xff] }
0x2854   :  { %5353 = vmatpush.xpose.msk.msrb.mxu2 %vm269_vm2, %v3823_v4 }
0x2855   :  { %3939 = vmatpush.msra.mxu3 %v3856_v6  ;;  %v5400_v6 = vld [vmem:[%s7736_s29 + $0x1c8] sm:$0xff] }
0x2857   :  { %3940 = vmatpush.msra.mxu3 %v3853_v9  ;;  %v3789_v20 = vpop.f32.mrf.mxu3 }
0x2858   :  { %5354 = vmatpush.xpose.msk.msrb.mxu2 %vm269_vm2, %v3820_v11  ;;  %v3790_v63 = vadd.f32 %v5544_v10, %v3789_v20  ;;  %v5545_v11 = vld [vmem:[%s7743_s7 + $0xd] ss:$0 sm:$0xff] }
0x2859   :  { %4072 = vmatpush.msrb.mxu3 %v5379_v41 }
0x285a   :  { %v4011_v10 = vpop.f32.mrf.mxu1 }
0x285b   :  { %5355 = vmatmul.msk.f32.vlgmr.msrb.gmra.mxu2 %vm269_vm2, %v3787_v13  ;;  %4073 = vmatpush.msrb.mxu3 %v5378_v42 }
0x285c   :  { %4039 = vmatpush.msra.mxu2 %v5372_v32  ;;  %v4012_v32 = vadd.f32 %v5545_v11, %v4011_v10  ;;  %v5430_v10 = vld [vmem:[%s7736_s29 + $0x1e8] sm:$0xff] }
0x285d   :  { %4074 = vmatpush.msrb.mxu3 %v5377_v43 }
0x285e   :  { %4040 = vmatpush.msra.mxu2 %v5371_v48 }
0x285f   :  { %4075 = vmatpush.msrb.mxu3 %v5376_v46  ;;  %v5409_v46 = vld [vmem:[%s7737_s4 + $0x1d8] sm:$0xff] }
0x2860   :  { %4041 = vmatpush.msra.mxu2 %v5370_v37 }
0x2862   :  { %4042 = vmatpush.msra.mxu2 %v5369_v33  ;;  %v4014_v48 = vpop.f32.mrf.mxu1  ;;  %v5547_v33 = vld [vmem:[%s7741_s9 + $0xd] ss:$0 sm:$0xff] }
0x2863   :  { %5356 = vmatmul.msk.f32.gmra.mxu2 %vm269_vm2, %v3790_v63  ;;  %v4015_v37 = vadd.f32 %v5545_v11, %v4014_v48  ;;  %v5429_v11 = vld [vmem:[%s7736_s29 + $0x1e0] sm:$0xff]  ;;  %v5548_v48 = vld [vmem:[%s7743_s7 + $0xe] ss:$0 sm:$0xff] }
0x286b   :  { %5374 = vmatmul.msk.f32.vlgmr.msra.gmra.mxu2 %vm137_vm1, %v7294_v23 }
0x2873   :  { %5375 = vmatmul.msk.f32.gmra.mxu2 %vm137_vm1, %v7303_v58 }
0x28de   :  { %v3887_v16 = vpop.f32.mrf.mxu2 }
0x28df   :  { %v3893_v0 = vmul.f32 0.35355338, %v3887_v16 }
0x28e1   :  { %v3895_v17 = vadd.f32 %v7350_v36, %v3893_v0 }
0x28e3   :  { %v3897_v12 = vsel %vm97_vm0, %v3895_v17, -inf }
0x28e4   :  { %3898 = vmax.xlane.f32.xlu1 %v3897_v12 }
0x28e6   :  { %v3890_v52 = vpop.f32.mrf.mxu2 }
0x28e7   :  { %v3894_v18 = vmul.f32 0.35355338, %v3890_v52 }
0x28e9   :  { %v3896_v19 = vadd.f32 %v7357_v3, %v3894_v18 }
0x28eb   :  { %v3900_v53 = vsel %vm97_vm0, %v3896_v19, -inf }
0x28ec   :  { %3901 = vmax.xlane.f32.xlu2 %v3900_v53 }
0x28ee   :  { %v4044_v8 = vpop.f32.mrf.mxu2 }
0x28ef   :  { %v4045_v25 = vadd.f32 %v5546_v35, %v4044_v8 }
0x28f6   :  { %v4047_v21 = vpop.f32.mrf.mxu2 }
0x28f7   :  { %v4048_v24 = vadd.f32 %v5546_v35, %v4047_v21 }
0x28f9   :  { %5383 = vmatpush.xpose.msk.msrb.mxu0 %vm269_vm2, %v4048_v24 }
0x28fd   :  { %5384 = vmatpush.xpose.msk.msrb.mxu0 %vm269_vm2, %v4045_v25  ;;  %v5550_v25 = vld [vmem:[%s7742_s12 + $0xe] ss:$0 sm:$0xff] }
0x2957   :  { %v3899_v26 = vpop.xlane.xlu1 %3898 }
0x2958   :  { %v3903_v38 = vsub.f32 %v3895_v17, %v3899_v26  ;;  %v5389_v17 = vld [vmem:[%s7691_s13 + $0x68] sm:$0xff] }
0x2959   :  { %4196 = vmatpush.msrb.mxu2 %v5389_v17 }
0x295a   :  { %v3905_v27 = vmul.f32 1.442695, %v3903_v38 }
0x295c   :  { %5696 = vpow2.f32 %v3905_v27 }
0x295f   :  { %v3902_v59 = vpop.xlane.xlu2 %3901 }
0x2960   :  { %v3904_v14 = vsub.f32 %v3896_v19, %v3902_v59 }
0x2962   :  { %v5697_v2 = vpop.eup %5696  ;;  %v3907_v22 = vmul.f32 1.442695, %v3904_v14 }
0x2963   :  { %v3909_v34 = vsel %vm97_vm0, %v5697_v2, 0.0 }
0x2964   :  { %5698 = vpow2.f32 %v3907_v22  ;;  %3910 = vadd.xlane.f32.xlu0 %v3909_v34 }
0x296a   :  { %v5699_v39 = vpop.eup %5698 }
0x296b   :  { %v3912_v40 = vsel %vm97_vm0, %v5699_v39, 0.0 }
0x296c   :  { %3913 = vadd.xlane.f32.xlu1 %v3912_v40 }
0x29d7   :  { %v3911_v47 = vpop.xlane.xlu0 %3910 }
0x29d8   :  { %5700 = vrcp.f32 %v3911_v47  ;;  %v5408_v47 = vld [vmem:[%s7737_s4 + $0x1d0] sm:$0xff] }
0x29de   :  { %v5701_v51 = vpop.eup %5700 }
0x29df   :  { %v3917_v50 = vmul.f32 %v5701_v51, %v5697_v2  ;;  %v3914_v30 = vpop.xlane.xlu1 %3913  ;;  %v5407_v51 = vld [vmem:[%s7737_s4 + $0x1c8] sm:$0xff] }
0x29e0   :  { %5702 = vrcp.f32 %v3914_v30 }
0x29e1   :  { %5357 = vmatmul.msk.f32.vlgmr.msra.gmra.mxu3 %vm97_vm0, %v3917_v50  ;;  %v5406_v50 = vld [vmem:[%s7737_s4 + $0x1c0] sm:$0xff] }
0x29e2   :  { %4228 = vmatpush.msra.mxu3 %v5395_v55 }
0x29e4   :  { %4229 = vmatpush.msra.mxu3 %v5394_v56 }
0x29e6   :  { %v5703_v61 = vpop.eup %5702  ;;  %4230 = vmatpush.msra.mxu3 %v5393_v57 }
0x29e7   :  { %v3918_v1 = vmul.f32 %v5703_v61, %v5699_v39  ;;  %v5424_v61 = vld [vmem:[%s7735_s28 + $0x1f0] sm:$0xff] }
0x29e8   :  { %4231 = vmatpush.msra.mxu3 %v5392_v60  ;;  %v5425_v60 = vld [vmem:[%s7735_s28 + $0x1f8] sm:$0xff] }
0x29e9   :  { %5358 = vmatmul.msk.f32.gmra.mxu3 %vm97_vm0, %v3918_v1  ;;  %v5423_v1 = vld [vmem:[%s7735_s28 + $0x1e8] sm:$0xff] }
0x29f1   :  { %5381 = vmatmul.msk.f32.vlgmr.msrb.gmra.mxu3 %vm137_vm1, %v7294_v23 }
0x29f9   :  { %5382 = vmatmul.msk.f32.gmra.mxu3 %vm137_vm1, %v7303_v58 }
0x2a01   :  { %5397 = vmatmul.msk.f32.vlgmr.msra.gmra.mxu3 %vm137_vm1, %v7294_v23 }
0x2a09   :  { %5398 = vmatmul.msk.f32.gmra.mxu3 %vm137_vm1, %v7303_v58 }
0x2a64   :  { %v3942_v4 = vpop.f32.mrf.mxu3 }
0x2a65   :  { %5360 = vmatmul.msk.f32.vlgmr.msra.gmra.mxu0 %vm269_vm2, %v3942_v4 }
0x2a66   :  { %4261 = vmatpush.msra.mxu0 %v5402_v62  ;;  %v5422_v62 = vld [vmem:[%s7735_s28 + $0x1e0] sm:$0xff]  ;;  %s7744_s28 = sld [smem:[#allocation14_spill]] }
0x2a68   :  { %4262 = vmatpush.msra.mxu0 %v5401_v5 }
0x2a6a   :  { %4263 = vmatpush.msra.mxu0 %v5400_v6  ;;  %v5432_v6 = vld [vmem:[%s7736_s29 + $0x1f8] sm:$0xff] }
0x2a6c   :  { %v3945_v9 = vpop.f32.mrf.mxu3  ;;  %4264 = vmatpush.msra.mxu0 %v5399_v7 }
0x2a6d   :  { %5361 = vmatmul.msk.f32.gmra.mxu0 %vm269_vm2, %v3945_v9  ;;  %v5431_v9 = vld [vmem:[%s7736_s29 + $0x1f0] sm:$0xff] }
0x2a74   :  { %v4077_v13 = vpop.f32.mrf.mxu3 }
0x2a75   :  { %5385 = vmatmul.msk.f32.vlgmr.msrb.gmra.mxu0 %vm269_vm2, %v4012_v32  ;;  %v4078_v15 = vadd.f32 %v5547_v33, %v4077_v13 }
0x2a7c   :  { %v4080_v20 = vpop.f32.mrf.mxu3 }
0x2a7d   :  { %v4081_v63 = vadd.f32 %v5547_v33, %v4080_v20  ;;  %5386 = vmatmul.msk.f32.gmra.mxu0 %vm269_vm2, %v4015_v37 }
0x2a7f   :  { %4164 = vmatpush.msrb.mxu1 %v4081_v63 }
0x2a81   :  { %4165 = vmatpush.msrb.mxu1 %v4078_v15  ;;  %v5551_v15 = vld [vmem:[%s7741_s9 + $0xe] ss:$0 sm:$0xff] }
0x2a83   :  { %4294 = vmatpush.msra.mxu1 %v5409_v46 }
0x2a84   :  { %v4233_v13 = vpop.f32.mrf.mxu3 }
0x2a85   :  { %5404 = vmatmul.msk.f32.vlgmr.msra.gmra.mxu0 %vm137_vm1, %v7294_v23  ;;  %4295 = vmatpush.msra.mxu1 %v5408_v47  ;;  %v4234_v37 = vadd.f32 %v5548_v48, %v4233_v13 }
0x2a87   :  { %4296 = vmatpush.msra.mxu1 %v5407_v51 }
0x2a89   :  { %4297 = vmatpush.msra.mxu1 %v5406_v50 }
0x2a8c   :  { %v4236_v20 = vpop.f32.mrf.mxu3 }
0x2a8d   :  { %5405 = vmatmul.msk.f32.gmra.mxu0 %vm137_vm1, %v7303_v58  ;;  %v4237_v63 = vadd.f32 %v5548_v48, %v4236_v20  ;;  %v5552_v48 = vld [vmem:[%s7743_s7 + $0xf] ss:$0 sm:$0xff] }
0x2ae2   :  { %v7428_v16 = vpop.f32.mrf.mxu0 }
0x2aea   :  { %v7430_v0 = vpop.f32.mrf.mxu0 }
0x2af2   :  { %v4112_v12 = vpop.f32.mrf.mxu0 }
0x2af3   :  { %v4118_v52 = vmul.f32 0.35355338, %v4112_v12 }
0x2af5   :  { %v4120_v18 = vadd.f32 %v7350_v36, %v4118_v52 }
0x2af7   :  { %v4122_v19 = vsel %vm97_vm0, %v4120_v18, -inf }
0x2af8   :  { %4123 = vmax.xlane.f32.xlu2 %v4122_v19 }
0x2afa   :  { %v4115_v53 = vpop.f32.mrf.mxu0 }
0x2afb   :  { %v4119_v8 = vmul.f32 0.35355338, %v4115_v53 }
0x2afd   :  { %v4121_v35 = vadd.f32 %v7357_v3, %v4119_v8 }
0x2aff   :  { %v4125_v21 = vsel %vm97_vm0, %v4121_v35, -inf }
0x2b00   :  { %4126 = vmax.xlane.f32.xlu0 %v4125_v21 }
0x2b02   :  { %v4266_v24 = vpop.f32.mrf.mxu0 }
0x2b03   :  { %v4267_v27 = vadd.f32 %v5550_v25, %v4266_v24 }
0x2b0a   :  { %v4269_v26 = vpop.f32.mrf.mxu0 }
0x2b0b   :  { %v4270_v38 = vadd.f32 %v5550_v25, %v4269_v26  ;;  %v5419_v25 = vld [vmem:[%s7691_s13 + $0x70] sm:$0xff] }
0x2b0c   :  { %4418 = vmatpush.msrb.mxu0 %v5419_v25 }
0x2b0d   :  { %5413 = vmatpush.xpose.msk.msra.mxu2 %vm269_vm2, %v4270_v38 }
0x2b11   :  { %5414 = vmatpush.xpose.msk.msra.mxu2 %vm269_vm2, %v4267_v27 }
0x2b6b   :  { %v4124_v59 = vpop.xlane.xlu2 %4123 }
0x2b6c   :  { %v4128_v14 = vsub.f32 %v4120_v18, %v4124_v59  ;;  %v5549_v18 = vld [vmem:[%s7693_s14 + $0x3] ss:$0 sm:$0xff] }
0x2b6d   :  { %v3982_v19 = vadd.f32 %v5549_v18, %v7428_v16 }
0x2b6e   :  { %v4130_v2 = vmul.f32 1.442695, %v4128_v14 }
0x2b70   :  { %5704 = vpow2.f32 %v4130_v2 }
0x2b73   :  { %v4127_v22 = vpop.xlane.xlu0 %4126 }
0x2b74   :  { %v4129_v34 = vsub.f32 %v4121_v35, %v4127_v22  ;;  %v3983_v35 = vadd.f32 %v5549_v18, %v7430_v0 }
0x2b76   :  { %v5705_v39 = vpop.eup %5704  ;;  %v4132_v40 = vmul.f32 1.442695, %v4129_v34  ;;  %v5553_v34 = vld [vmem:[%s7742_s12 + $0xf] ss:$0 sm:$0xff] }
0x2b77   :  { %v4134_v41 = vsel %vm97_vm0, %v5705_v39, 0.0 }
0x2b78   :  { %5706 = vpow2.f32 %v4132_v40  ;;  %4135 = vadd.xlane.f32.xlu1 %v4134_v41 }
0x2b7e   :  { %v5707_v42 = vpop.eup %5706 }
0x2b7f   :  { %v4137_v43 = vsel %vm97_vm0, %v5707_v42, 0.0 }
0x2b80   :  { %4138 = vadd.xlane.f32.xlu2 %v4137_v43 }
0x2beb   :  { %v4136_v30 = vpop.xlane.xlu1 %4135 }
0x2bec   :  { %5708 = vrcp.f32 %v4136_v30 }
0x2bf2   :  { %v5709_v55 = vpop.eup %5708 }
0x2bf3   :  { %v4142_v56 = vmul.f32 %v5709_v55, %v5705_v39  ;;  %v4139_v57 = vpop.xlane.xlu2 %4138 }
0x2bf4   :  { %5710 = vrcp.f32 %v4139_v57 }
0x2bf5   :  { %5387 = vmatmul.msk.f32.vlgmr.msrb.gmra.mxu1 %vm97_vm0, %v4142_v56 }
0x2bf6   :  { %4450 = vmatpush.msrb.mxu1 %v5425_v60  ;;  %v5439_v60 = vld [vmem:[%s7737_s4 + $0x1f8] sm:$0xff] }
0x2bf8   :  { %4451 = vmatpush.msrb.mxu1 %v5424_v61  ;;  %v5438_v61 = vld [vmem:[%s7737_s4 + $0x1f0] sm:$0xff] }
0x2bfa   :  { %v5711_v4 = vpop.eup %5710  ;;  %4452 = vmatpush.msrb.mxu1 %v5423_v1  ;;  %v5437_v1 = vld [vmem:[%s7737_s4 + $0x1e8] sm:$0xff] }
0x2bfb   :  { %v4143_v5 = vmul.f32 %v5711_v4, %v5707_v42 }
0x2bfc   :  { %4453 = vmatpush.msrb.mxu1 %v5422_v62  ;;  %v5436_v62 = vld [vmem:[%s7737_s4 + $0x1e0] sm:$0xff] }
0x2bfd   :  { %5388 = vmatmul.msk.f32.gmra.mxu1 %vm97_vm0, %v4143_v5 }
0x2c05   :  { %5411 = vmatmul.msk.f32.vlgmr.msra.gmra.mxu1 %vm137_vm1, %v7294_v23 }
0x2c0d   :  { %5412 = vmatmul.msk.f32.gmra.mxu1 %vm137_vm1, %v7303_v58 }
0x2c15   :  { %5427 = vmatmul.msk.f32.vlgmr.msrb.gmra.mxu1 %vm137_vm1, %v7294_v23 }
0x2c1d   :  { %5428 = vmatmul.msk.f32.gmra.mxu1 %vm137_vm1, %v7303_v58 }
0x2c72   :  { %v4167_v7 = vpop.f32.mrf.mxu1 }
0x2c73   :  { %5390 = vmatmul.msk.f32.vlgmr.msrb.gmra.mxu2 %vm269_vm2, %v4167_v7 }
0x2c74   :  { %4483 = vmatpush.msrb.mxu2 %v5432_v6 }
0x2c76   :  { %4484 = vmatpush.msrb.mxu2 %v5431_v9 }
0x2c78   :  { %4485 = vmatpush.msrb.mxu2 %v5430_v10 }
0x2c7a   :  { %v4170_v32 = vpop.f32.mrf.mxu1  ;;  %4486 = vmatpush.msrb.mxu2 %v5429_v11 }
0x2c7b   :  { %5391 = vmatmul.msk.f32.gmra.mxu2 %vm269_vm2, %v4170_v32 }
0x2c82   :  { %v4299_v33 = vpop.f32.mrf.mxu1 }
0x2c83   :  { %5415 = vmatmul.msk.f32.vlgmr.msra.gmra.mxu2 %vm269_vm2, %v4234_v37  ;;  %v4300_v52 = vadd.f32 %v5551_v15, %v4299_v33 }
0x2c8a   :  { %v4302_v17 = vpop.f32.mrf.mxu1 }
0x2c8b   :  { %v4303_v12 = vadd.f32 %v5551_v15, %v4302_v17  ;;  %5416 = vmatmul.msk.f32.gmra.mxu2 %vm269_vm2, %v4237_v63  ;;  %v5554_v15 = vld [vmem:[%s7741_s9 + $0xf] ss:$0 sm:$0xff] }
0x2c8d   :  { %4386 = vmatpush.msrb.mxu3 %v4303_v12 }
0x2c8f   :  { %4387 = vmatpush.msrb.mxu3 %v4300_v52 }
0x2c91   :  { %4516 = vmatpush.msra.mxu3 %v5439_v60 }
0x2c92   :  { %v4455_v13 = vpop.f32.mrf.mxu1 }
0x2c93   :  { %5434 = vmatmul.msk.f32.vlgmr.msrb.gmra.mxu2 %vm137_vm1, %v7294_v23  ;;  %4517 = vmatpush.msra.mxu3 %v5438_v61  ;;  %v4456_v37 = vadd.f32 %v5552_v48, %v4455_v13  ;;  %v5454_v13 = vld [vmem:[%s7697_s17 + $0x60] sm:$0xff] }
0x2c95   :  { %4518 = vmatpush.msra.mxu3 %v5437_v1 }
0x2c97   :  { %4519 = vmatpush.msra.mxu3 %v5436_v62 }
0x2c9a   :  { %v4458_v20 = vpop.f32.mrf.mxu1 }
0x2c9b   :  { %5435 = vmatmul.msk.f32.gmra.mxu2 %vm137_vm1, %v7303_v58  ;;  %v4459_v63 = vadd.f32 %v5552_v48, %v4458_v20 }
0x2cf6   :  { %v4198_v53 = vpop.f32.mrf.mxu2 }
0x2cf7   :  { %v7510_v8 = vadd.f32 %v4198_v53, %v3982_v19 }
0x2cfe   :  { %v4201_v21 = vpop.f32.mrf.mxu2 }
0x2cff   :  { %v7513_v24 = vadd.f32 %v4201_v21, %v3983_v35 }
0x2d06   :  { %v4334_v26 = vpop.f32.mrf.mxu2 }
0x2d07   :  { %v4340_v38 = vmul.f32 0.35355338, %v4334_v26 }
0x2d09   :  { %v4342_v27 = vadd.f32 %v7350_v36, %v4340_v38 }
0x2d0b   :  { %v4344_v59 = vsel %vm97_vm0, %v4342_v27, -inf }
0x2d0c   :  { %4345 = vmax.xlane.f32.xlu0 %v4344_v59 }
0x2d0e   :  { %v4337_v16 = vpop.f32.mrf.mxu2 }
0x2d0f   :  { %v4341_v14 = vmul.f32 0.35355338, %v4337_v16 }
0x2d11   :  { %v4343_v2 = vadd.f32 %v7357_v3, %v4341_v14 }
0x2d13   :  { %v4347_v0 = vsel %vm97_vm0, %v4343_v2, -inf }
0x2d14   :  { %4348 = vmax.xlane.f32.xlu1 %v4347_v0 }
0x2d16   :  { %v4488_v22 = vpop.f32.mrf.mxu2 }
0x2d17   :  { %v4489_v41 = vadd.f32 %v5553_v34, %v4488_v22 }
0x2d1e   :  { %v4491_v39 = vpop.f32.mrf.mxu2 }
0x2d1f   :  { %v4492_v40 = vadd.f32 %v5553_v34, %v4491_v39 }
0x2d21   :  { %5443 = vmatpush.xpose.msk.msra.mxu0 %vm269_vm2, %v4492_v40 }
0x2d25   :  { %5444 = vmatpush.xpose.msk.msra.mxu0 %vm269_vm2, %v4489_v41 }
0x2d7f   :  { %v4346_v42 = vpop.xlane.xlu0 %4345 }
0x2d80   :  { %v4350_v43 = vsub.f32 %v4342_v27, %v4346_v42 }
0x2d82   :  { %v4352_v46 = vmul.f32 1.442695, %v4350_v43 }
0x2d84   :  { %5712 = vpow2.f32 %v4352_v46 }
0x2d87   :  { %v4349_v47 = vpop.xlane.xlu1 %4348 }
0x2d88   :  { %v4351_v51 = vsub.f32 %v4343_v2, %v4349_v47 }
0x2d8a   :  { %v5713_v50 = vpop.eup %5712  ;;  %v4354_v30 = vmul.f32 1.442695, %v4351_v51 }
0x2d8b   :  { %v4356_v55 = vsel %vm97_vm0, %v5713_v50, 0.0 }
0x2d8c   :  { %5714 = vpow2.f32 %v4354_v30  ;;  %4357 = vadd.xlane.f32.xlu2 %v4356_v55 }
0x2d92   :  { %v5715_v56 = vpop.eup %5714 }
0x2d93   :  { %v4359_v57 = vsel %vm97_vm0, %v5715_v56, 0.0 }
0x2d94   :  { %4360 = vadd.xlane.f32.xlu0 %v4359_v57 }
0x2dff   :  { %v4358_v4 = vpop.xlane.xlu2 %4357 }
0x2e00   :  { %5716 = vrcp.f32 %v4358_v4 }
0x2e06   :  { %v5717_v5 = vpop.eup %5716 }
0x2e07   :  { %v4364_v6 = vmul.f32 %v5717_v5, %v5713_v50  ;;  %v4361_v7 = vpop.xlane.xlu0 %4360 }
0x2e08   :  { %5718 = vrcp.f32 %v4361_v7 }
0x2e09   :  { %5417 = vmatmul.msk.f32.vlgmr.msrb.gmra.mxu3 %vm97_vm0, %v4364_v6 }
0x2e0e   :  { %v5719_v9 = vpop.eup %5718 }
0x2e0f   :  { %v4365_v10 = vmul.f32 %v5719_v9, %v5715_v56 }
0x2e11   :  { %5418 = vmatmul.msk.f32.gmra.mxu3 %vm97_vm0, %v4365_v10 }
0x2e19   :  { %5441 = vmatmul.msk.f32.vlgmr.msra.gmra.mxu3 %vm137_vm1, %v7294_v23 }
0x2e21   :  { %5442 = vmatmul.msk.f32.gmra.mxu3 %vm137_vm1, %v7303_v58 }
0x2e8c   :  { %v4389_v11 = vpop.f32.mrf.mxu3 }
0x2e8d   :  { %5420 = vmatmul.msk.f32.vlgmr.msrb.gmra.mxu0 %vm269_vm2, %v4389_v11  ;;  %v5456_v11 = vld [vmem:[%s7697_s17 + $0x70] sm:$0xff] }
0x2e94   :  { %v4392_v32 = vpop.f32.mrf.mxu3 }
0x2e95   :  { %5421 = vmatmul.msk.f32.gmra.mxu0 %vm269_vm2, %v4392_v32 }
0x2e9c   :  { %v4521_v33 = vpop.f32.mrf.mxu3 }
0x2e9d   :  { %5445 = vmatmul.msk.f32.vlgmr.msra.gmra.mxu0 %vm269_vm2, %v4456_v37  ;;  %v4522_v52 = vadd.f32 %v5554_v15, %v4521_v33 }
0x2ea4   :  { %v4524_v17 = vpop.f32.mrf.mxu3 }
0x2ea5   :  { %v4525_v12 = vadd.f32 %v5554_v15, %v4524_v17  ;;  %5446 = vmatmul.msk.f32.gmra.mxu0 %vm269_vm2, %v4459_v63 }
0x2ea7   :  { %4608 = vmatpush.msra.mxu1 %v4525_v12 }
0x2ea9   :  { %4609 = vmatpush.msra.mxu1 %v4522_v52  ;;  %v5464_v52 = vld [vmem:[%s7698_s19 + $0x78] sm:$0xff] }
0x2eaa   :  { %4783 = vmatpush.msrb.mxu0 %v5464_v52 }
0x2f0a   :  { %v4420_v18 = vpop.f32.mrf.mxu0 }
0x2f0b   :  { %v4426_v19 = vadd.f32 %v4420_v18, %v7510_v8 }
0x2f12   :  { %v4423_v53 = vpop.f32.mrf.mxu0 }
0x2f13   :  { %v4427_v35 = vadd.f32 %v4423_v53, %v7513_v24 }
0x2f1a   :  { %v4556_v21 = vpop.f32.mrf.mxu0 }
0x2f1b   :  { %v4562_v25 = vmul.f32 0.35355338, %v4556_v21 }
0x2f1d   :  { %v4564_v26 = vadd.f32 %v7350_v36, %v4562_v25 }
0x2f1f   :  { %v4566_v38 = vsel %vm97_vm0, %v4564_v26, -inf }
0x2f20   :  { %4567 = vmax.xlane.f32.xlu1 %v4566_v38 }
0x2f22   :  { %v4559_v27 = vpop.f32.mrf.mxu0 }
0x2f23   :  { %v4563_v59 = vmul.f32 0.35355338, %v4559_v27 }
0x2f25   :  { %v4565_v16 = vadd.f32 %v7357_v3, %v4563_v59  ;;  %v5449_v3 = vld [vmem:[%s7691_s13 + $0x78] sm:$0xff] }
0x2f26   :  { %4640 = vmatpush.msra.mxu2 %v5449_v3 }
0x2f27   :  { %v4569_v14 = vsel %vm97_vm0, %v4565_v16, -inf }
0x2f28   :  { %4570 = vmax.xlane.f32.xlu2 %v4569_v14 }
0x2f93   :  { %v4568_v2 = vpop.xlane.xlu1 %4567 }
0x2f94   :  { %v4572_v0 = vsub.f32 %v4564_v26, %v4568_v2 }
0x2f96   :  { %v4574_v8 = vmul.f32 1.442695, %v4572_v0 }
0x2f98   :  { %5720 = vpow2.f32 %v4574_v8  ;;  %v5555_v8 = vld [vmem:[%s7694_s15 + $0x3] ss:$0 sm:$0xff] }
0x2f9b   :  { %v4571_v22 = vpop.xlane.xlu2 %4570 }
0x2f9c   :  { %v4573_v24 = vsub.f32 %v4565_v16, %v4571_v22 }
0x2f9e   :  { %v5721_v34 = vpop.eup %5720  ;;  %v4576_v39 = vmul.f32 1.442695, %v4573_v24 }
0x2f9f   :  { %v4578_v36 = vsel %vm97_vm0, %v5721_v34, 0.0 }
0x2fa0   :  { %5722 = vpow2.f32 %v4576_v39  ;;  %4579 = vadd.xlane.f32.xlu0 %v4578_v36 }
0x2fa6   :  { %v5723_v40 = vpop.eup %5722 }
0x2fa7   :  { %v4581_v41 = vsel %vm97_vm0, %v5723_v40, 0.0 }
0x2fa8   :  { %4582 = vadd.xlane.f32.xlu1 %v4581_v41 }
0x3013   :  { %v4580_v42 = vpop.xlane.xlu0 %4579 }
0x3014   :  { %5724 = vrcp.f32 %v4580_v42 }
0x301a   :  { %v5725_v43 = vpop.eup %5724 }
0x301b   :  { %v4586_v46 = vmul.f32 %v5725_v43, %v5721_v34  ;;  %v4583_v47 = vpop.xlane.xlu1 %4582  ;;  %v5556_v34 = vld [vmem:[%s7695_s16 + $0x3] ss:$0 sm:$0xff] }
0x301c   :  { %5726 = vrcp.f32 %v4583_v47 }
0x301d   :  { %5447 = vmatmul.msk.f32.vlgmr.msra.gmra.mxu1 %vm97_vm0, %v4586_v46 }
0x3022   :  { %v5727_v51 = vpop.eup %5726 }
0x3023   :  { %v4587_v50 = vmul.f32 %v5727_v51, %v5723_v40 }
0x3025   :  { %5448 = vmatmul.msk.f32.gmra.mxu1 %vm97_vm0, %v4587_v50 }
0x309a   :  { %v4611_v30 = vpop.f32.mrf.mxu1 }
0x309b   :  { %5450 = vmatmul.msk.f32.vlgmr.msra.gmra.mxu2 %vm269_vm2, %v4611_v30  ;;  %v5463_v30 = vld [vmem:[%s7698_s19 + $0x70] sm:$0xff] }
0x309c   :  { %4784 = vmatpush.msrb.mxu0 %v5463_v30 }
0x30a2   :  { %v4614_v55 = vpop.f32.mrf.mxu1 }
0x30a3   :  { %5451 = vmatmul.msk.f32.gmra.mxu2 %vm269_vm2, %v4614_v55  ;;  %v5462_v55 = vld [vmem:[%s7698_s19 + $0x68] sm:$0xff] }
0x30a4   :  { %4785 = vmatpush.msrb.mxu0 %v5462_v55 }
0x311e   :  { %v4642_v56 = vpop.f32.mrf.mxu2 }
0x311f   :  { %v4648_v57 = vadd.f32 %v4642_v56, %v4426_v19  ;;  %v5461_v56 = vld [vmem:[%s7698_s19 + $0x60] sm:$0xff]  ;;  %s5746_s19 = smov 48  }
0x3120   :  { %4786 = vmatpush.msrb.mxu0 %v5461_v56 }
0x3121   :  { %v4650_v60 = vadd.f32 %v4648_v57, %v7294_v23  ;;  %v5457_v23 = vld [vmem:[%s7697_s17 + $0x78] sm:$0xff]  ;;  %v5557_v57 = vld [vmem:[%s7696_s18 + $0x3] ss:$0 sm:$0xff]  ;;  %s5745_s18 = smov 16  }
0x3122   :  { %4742 = vmatpush.msrb.mxu3 %v5457_v23 }
0x3123   :  { %v4656_v61 = vsel %vm137_vm1, %v4650_v60, 0.0  ;;  %v4664_v1 = vmul.f32 %v4650_v60, %v4650_v60 }
0x3124   :  { %4657 = vadd.xlane.f32.xlu2 %v4656_v61  ;;  %4743 = vmatpush.msrb.mxu3 %v5456_v11 }
0x3125   :  { %v4666_v62 = vsel %vm137_vm1, %v4664_v1, 0.0 }
0x3126   :  { %4667 = vadd.xlane.f32.xlu0 %v4666_v62  ;;  %v4645_v4 = vpop.f32.mrf.mxu2 }
0x3127   :  { %v4649_v5 = vadd.f32 %v4645_v4, %v4427_v35 }
0x3129   :  { %v4651_v6 = vadd.f32 %v4649_v5, %v7303_v58  ;;  %v5455_v58 = vld [vmem:[%s7697_s17 + $0x68] sm:$0xff] }
0x312a   :  { %4744 = vmatpush.msrb.mxu3 %v5455_v58 }
0x312b   :  { %v4659_v7 = vsel %vm137_vm1, %v4651_v6, 0.0  ;;  %v4665_v9 = vmul.f32 %v4651_v6, %v4651_v6 }
0x312c   :  { %4660 = vadd.xlane.f32.xlu1 %v4659_v7  ;;  %4745 = vmatpush.msrb.mxu3 %v5454_v13 }
0x312d   :  { %v4669_v10 = vsel %vm137_vm1, %v4665_v9, 0.0 }
0x312e   :  { %4670 = vadd.xlane.f32.xlu2 %v4669_v10 }
0x3197   :  { %v4658_v32 = vpop.xlane.xlu2 %4657 }
0x3198   :  { %v4662_v48 = vmul.f32 %v4658_v32, %v6271_v28 }
0x3199   :  { %v4668_v37 = vpop.xlane.xlu0 %4667 }
0x319a   :  { %v4674_v33 = vmul.f32 %v4662_v48, %v4662_v48  ;;  %v4672_v20 = vmul.f32 %v4668_v37, %v6271_v28  ;;  %v4678_v0 = vsub.f32 %v4650_v60, %v4662_v48 }
0x319c   :  { %v4676_v63 = vsub.f32 %v4672_v20, %v4674_v33 }
0x319e   :  { %v4680_v15 = vadd.f32 1e-05, %v4676_v63  ;;  %v4861_v63 = vld [vmem:[%s7705_s25 + $0x18] sm:$0xff] }
0x319f   :  { %v4661_v17 = vpop.xlane.xlu1 %4660  ;;  %4884 = vmatpush.msrb.mxu1 %v4861_v63 }
0x31a0   :  { %5728 = vrsqrt.f32 %v4680_v15  ;;  %v4663_v12 = vmul.f32 %v4661_v17, %v6271_v28  ;;  %vm4688_vm13 = vweird.f32 %v4680_v15 }
0x31a1   :  { %v4671_v18 = vpop.xlane.xlu2 %4670 }
0x31a2   :  { %v4675_v19 = vmul.f32 %v4663_v12, %v4663_v12  ;;  %v4673_v53 = vmul.f32 %v4671_v18, %v6271_v28  ;;  %v4679_v43 = vsub.f32 %v4651_v6, %v4663_v12  ;;  %v5558_v6 = vld [vmem:[%s7699_s20 + $0x3] ss:$0 sm:$0xff] }
0x31a4   :  { %v4677_v35 = vsub.f32 %v4673_v53, %v4675_v19 }
0x31a6   :  { %v5729_v21 = vpop.eup %5728  ;;  %v4681_v25 = vadd.f32 1e-05, %v4677_v35 }
0x31a7   :  { %v4683_v26 = vmul.f32 %v5729_v21, %v4680_v15  ;;  %vm4689_vm2 = vweird.f32 %v5729_v21  ;;  %v4860_v15 = vld [vmem:[%s7705_s25 + $0x10] sm:$0xff] }
0x31a8   :  { %5730 = vrsqrt.f32 %v4681_v25  ;;  %vm4690_vm14 = vmor %vm4688_vm13, %vm4689_vm2  ;;  %vm4698_vm3 = vweird.f32 %v4681_v25  ;;  %4885 = vmatpush.msrb.mxu1 %v4860_v15 }
0x31a9   :  { %v4684_v38 = vmul.f32 %v5729_v21, %v4683_v26 }
0x31ab   :  { %v4685_v27 = vmul.f32 0.5, %v4684_v38 }
0x31ad   :  { %v4686_v59 = vsub.f32 1.5, %v4685_v27 }
0x31ae   :  { %v5731_v16 = vpop.eup %5730 }
0x31af   :  { %v4687_v14 = vmul.f32 %v5729_v21, %v4686_v59  ;;  %v4693_v2 = vmul.f32 %v5731_v16, %v4681_v25  ;;  %vm4699_vm15 = vweird.f32 %v5731_v16 }
0x31b0   :  { %vm4700_vm4 = vmor %vm4698_vm3, %vm4699_vm15 }
0x31b1   :  { %v4691_v22 = vsel %vm4690_vm14, %v5729_v21, %v4687_v14  ;;  %v4694_v24 = vmul.f32 %v5731_v16, %v4693_v2 }
0x31b2   :  { %v4702_v39 = vmul.f32 %v4691_v22, %v4678_v0 }
0x31b3   :  { %v4695_v36 = vmul.f32 0.5, %v4694_v24 }
0x31b4   :  { %v4707_v40 = vmul.f32 %v5555_v8, %v4702_v39  ;;  %v5559_v39 = vld [vmem:[%s7700_s21 + $0x3] ss:$0 sm:$0xff] }
0x31b5   :  { %v4696_v41 = vsub.f32 1.5, %v4695_v36 }
0x31b6   :  { %v4712_v3 = vadd.f32 %v5556_v34, %v4707_v40  ;;  %v5560_v40 = vld [vmem:[%s7701_s22 + $0x3] ss:$0 sm:$0xff] }
0x31b7   :  { %v4697_v42 = vmul.f32 %v5731_v16, %v4696_v41 }
0x31b8   :  { %5459 = vmatmul.msk.f32.vlgmr.msrb.gmra.mxu3 %vm137_vm1, %v4712_v3 }
0x31b9   :  { %v4701_v46 = vsel %vm4700_vm4, %v5731_v16, %v4697_v42 }
0x31ba   :  { %v4703_v47 = vmul.f32 %v4701_v46, %v4679_v43 }
0x31bc   :  { %v4708_v51 = vmul.f32 %v5555_v8, %v4703_v47 }
0x31be   :  { %v4713_v50 = vadd.f32 %v5556_v34, %v4708_v51 }
0x31c0   :  { %5460 = vmatmul.msk.f32.gmra.mxu3 %vm137_vm1, %v4713_v50 }
0x323b   :  { %v4747_v60 = vpop.f32.mrf.mxu3 }
0x323c   :  { %v4748_v61 = vadd.f32 %v5557_v57, %v4747_v60 }
0x323e   :  { %v4753_v1 = vmax.f32 %v4748_v61, 0.0 }
0x3240   :  { %5466 = vmatmul.msk.f32.vlgmr.msrb.gmra.mxu0 %vm137_vm1, %v4753_v1 }
0x3243   :  { %v4750_v62 = vpop.f32.mrf.mxu3 }
0x3244   :  { %v4751_v4 = vadd.f32 %v5557_v57, %v4750_v62  ;;  %v5561_v57 = vld [vmem:[%s7744_s28] ss:$0 sm:$0xff] }
0x3246   :  { %v4754_v5 = vmax.f32 %v4751_v4, 0.0  ;;  %v4895_v4 = vcvt.s32.f32 %v6793_v31 }
0x3248   :  { %5467 = vmatmul.msk.f32.gmra.mxu0 %vm137_vm1, %v4754_v5 }
0x32bd   :  { %v4788_v7 = vpop.f32.mrf.mxu0 }
0x32be   :  { %v4789_v9 = vadd.f32 %v5558_v6, %v4788_v7 }
0x32c0   :  { %v7622_v10 = vadd.f32 %v4789_v9, %v4712_v3 }
0x32c2   :  { %v4800_v23 = vsel %vm137_vm1, %v7622_v10, 0.0  ;;  %v4808_v11 = vmul.f32 %v7622_v10, %v7622_v10 }
0x32c3   :  { %4801 = vadd.xlane.f32.xlu0 %v4800_v23 }
0x32c4   :  { %v4810_v58 = vsel %vm137_vm1, %v4808_v11, 0.0  ;;  %v4896_v11 = vcvt.s32.f32 %v6797_v44 }
0x32c5   :  { %4811 = vadd.xlane.f32.xlu1 %v4810_v58  ;;  %v4791_v32 = vpop.f32.mrf.mxu0 }
0x32c6   :  { %v4792_v13 = vadd.f32 %v5558_v6, %v4791_v32 }
0x32c8   :  { %v7629_v48 = vadd.f32 %v4792_v13, %v4713_v50 }
0x32ca   :  { %v4803_v37 = vsel %vm137_vm1, %v7629_v48, 0.0  ;;  %v4809_v33 = vmul.f32 %v7629_v48, %v7629_v48 }
0x32cb   :  { %4804 = vadd.xlane.f32.xlu2 %v4803_v37 }
0x32cc   :  { %v4813_v20 = vsel %vm137_vm1, %v4809_v33, 0.0 }
0x32cd   :  { %4814 = vadd.xlane.f32.xlu0 %v4813_v20 }
0x32de   :  { %4899 = vrot.lane.b32.xlu1 %v6883_v49, %s5745_s18  ;;  %v4859_v49 = vld [vmem:[%s7705_s25 + $0x8] sm:$0xff] }
0x32df   :  { %4886 = vmatpush.msrb.mxu1 %v4859_v49 }
0x32e1   :  { %4907 = vrot.lane.b32.xlu0 %v6801_v45, %s5746_s19 }
0x32e3   :  { %4901 = vrot.lane.b32.xlu2 %v6899_v29, %s5745_s18 }
0x32eb   :  { %4909 = vrot.lane.b32.xlu2 %v6806_v54, %s5746_s19  ;;  %v4858_v54 = vld [vmem:[%s7705_s25] sm:$0xff] }
0x32ec   :  { %4887 = vmatpush.msrb.mxu1 %v4858_v54 }
0x3336   :  { %v4802_v45 = vpop.xlane.xlu0 %4801 }
0x3337   :  { %v4806_v29 = vmul.f32 %v4802_v45, %v6271_v28 }
0x3338   :  { %v4812_v17 = vpop.xlane.xlu1 %4811 }
0x3339   :  { %v4818_v12 = vmul.f32 %v4806_v29, %v4806_v29  ;;  %v4816_v52 = vmul.f32 %v4812_v17, %v6271_v28  ;;  %v4822_v34 = vsub.f32 %v7622_v10, %v4806_v29 }
0x333b   :  { %v4820_v18 = vsub.f32 %v4816_v52, %v4818_v12 }
0x333d   :  { %v4824_v19 = vadd.f32 1e-05, %v4820_v18 }
0x333e   :  { %v4805_v53 = vpop.xlane.xlu2 %4804 }
0x333f   :  { %5732 = vrsqrt.f32 %v4824_v19  ;;  %v4807_v35 = vmul.f32 %v4805_v53, %v6271_v28  ;;  %vm4832_vm6 = vweird.f32 %v4824_v19 }
0x3340   :  { %v4815_v21 = vpop.xlane.xlu0 %4814 }
0x3341   :  { %v4819_v25 = vmul.f32 %v4807_v35, %v4807_v35  ;;  %v4817_v26 = vmul.f32 %v4815_v21, %v6271_v28  ;;  %v4823_v51 = vsub.f32 %v7629_v48, %v4807_v35 }
0x3343   :  { %v4821_v38 = vsub.f32 %v4817_v26, %v4819_v25 }
0x3345   :  { %v5733_v27 = vpop.eup %5732  ;;  %v4825_v59 = vadd.f32 1e-05, %v4821_v38 }
0x3346   :  { %v4827_v16 = vmul.f32 %v5733_v27, %v4824_v19  ;;  %vm4833_vm5 = vweird.f32 %v5733_v27  ;;  %v4902_v61 = vpop.permute.xlu2 %4901 }
0x3347   :  { %5734 = vrsqrt.f32 %v4825_v59  ;;  %vm4834_vm7 = vmor %vm4832_vm6, %vm4833_vm5  ;;  %vm4842_vm9 = vweird.f32 %v4825_v59 }
0x3348   :  { %v4828_v14 = vmul.f32 %v5733_v27, %v4827_v16 }
0x334a   :  { %v4829_v2 = vmul.f32 0.5, %v4828_v14 }
0x334c   :  { %v4830_v0 = vsub.f32 1.5, %v4829_v2 }
0x334d   :  { %v5735_v8 = vpop.eup %5734 }
0x334e   :  { %v4831_v22 = vmul.f32 %v5733_v27, %v4830_v0  ;;  %v4837_v24 = vmul.f32 %v5735_v8, %v4825_v59  ;;  %vm4843_vm8 = vweird.f32 %v5735_v8  ;;  %v4910_v58 = vpop.permute.xlu2 %4909 }
0x334f   :  { %vm4844_vm10 = vmor %vm4842_vm9, %vm4843_vm8 }
0x3350   :  { %v4835_v28 = vsel %vm4834_vm7, %v5733_v27, %v4831_v22  ;;  %v4838_v36 = vmul.f32 %v5735_v8, %v4837_v24  ;;  %v4900_v62 = vpop.permute.xlu1 %4899 }
0x3351   :  { %v4846_v41 = vmul.f32 %v4835_v28, %v4822_v34 }
0x3352   :  { %v4839_v3 = vmul.f32 0.5, %v4838_v36 }
0x3353   :  { %v4851_v42 = vmul.f32 %v5559_v39, %v4846_v41  ;;  %v4908_v5 = vpop.permute.xlu0 %4907 }
0x3354   :  { %v4840_v43 = vsub.f32 1.5, %v4839_v3 }
0x3355   :  { %v4856_v46 = vadd.f32 %v5560_v40, %v4851_v42 }
0x3356   :  { %v4841_v47 = vmul.f32 %v5735_v8, %v4840_v43 }
0x3357   :  { %5470 = vmatmul.msk.f32.vlgmr.msrb.gmra.mxu1 %vm137_vm1, %v4856_v46 }
0x3358   :  { %v4845_v50 = vsel %vm4844_vm10, %v5735_v8, %v4841_v47 }
0x3359   :  { %v4847_v30 = vmul.f32 %v4845_v50, %v4823_v51 }
0x335b   :  { %v4852_v55 = vmul.f32 %v5559_v39, %v4847_v30 }
0x335d   :  { %v4857_v56 = vadd.f32 %v5560_v40, %v4852_v55 }
0x335f   :  { %5471 = vmatmul.msk.f32.gmra.mxu1 %vm137_vm1, %v4857_v56 }
0x33d4   :  { %v4889_v60 = vpop.f32.mrf.mxu1 }
0x33d5   :  { %v4890_v1 = vadd.f32 %v5561_v57, %v4889_v60 }
0x33d7   :  { %v4913_v6 = vsel %vm97_vm0, %v4890_v1, %v4900_v62 }
0x33d8   :  { %v4916_v7 = vsel %vm4915_vm11, %v4913_v6, %v4908_v5 }
0x33d9   :  { %v4919_v9 = vsel %vm4918_vm12, %v4916_v7, %v4895_v4 }
0x33da   :  { %4921 = vst [vmem:[%s7745_s23] sm:$0xff] %v4919_v9 }
0x33dc   :  { %v4892_v10 = vpop.f32.mrf.mxu1 }
0x33dd   :  { %v4893_v23 = vadd.f32 %v5561_v57, %v4892_v10 }
0x33df   :  { %v4914_v32 = vsel %vm97_vm0, %v4893_v23, %v4902_v61 }
0x33e0   :  { %v4917_v13 = vsel %vm4915_vm11, %v4914_v32, %v4910_v58 }
0x33e1   :  { %v4920_v48 = vsel %vm4918_vm12, %v4917_v13, %v4896_v11 }
0x33e2   :  { %4922 = vst [vmem:[%s7745_s23 + $0x8] sm:$0xff] %v4920_v48 }

</bundles_post_ra>
